<compile_context>
chip_gen: v7x
topology: tpu7x:2x2x1
jax: 0.10.0
libtpu: 0.0.40
codegen_flags: <defaults>
</compile_context>

<pallas_src>
import functools

import jax
import jax.numpy as jnp
from jax.experimental import pallas as pl
from jax.experimental.pallas import tpu as pltpu

Z_DIM = 16  # z_dim argument of MovMNISTNet.__init__

_VMEM = pl.BlockSpec(memory_space=pltpu.MemorySpace.VMEM)


# ---------------------------------------------------------------------------
# Kernel A: conv1 = im2col matmul + bias + ReLU + 2x2 max-pool, fused.
# ---------------------------------------------------------------------------
def _conv_relu_pool_kernel(c_ref, w_ref, b_ref, o_ref, *, n_taps, m_rows):
    # c_ref: (n_taps*m_rows, K) bf16 -- im2col rows, tap-major (one slab per
    #        2x2 pool position); K padded to a multiple of 128.
    # w_ref: (K, 128) bf16, b_ref: (1, 128) f32, o_ref: (m_rows, 128) bf16.
    # One fused matmul over all taps, then max over the tap row-slabs
    # (= 2x2 max-pool), then bias + ReLU once.
    y = jnp.dot(c_ref[...], w_ref[...], preferred_element_type=jnp.float32)
    m = y[0:m_rows]
    for t in range(1, n_taps):
        m = jnp.maximum(m, y[t * m_rows:(t + 1) * m_rows])
    o_ref[...] = jnp.maximum(m + b_ref[...], 0.0).astype(o_ref.dtype)


def conv_relu_pool(cols, w, b, *, n_taps, m_rows):
    return pl.pallas_call(
        functools.partial(_conv_relu_pool_kernel, n_taps=n_taps, m_rows=m_rows),
        out_shape=jax.ShapeDtypeStruct((m_rows, w.shape[1]), jnp.bfloat16),
        in_specs=[_VMEM, _VMEM, _VMEM],
        out_specs=_VMEM,
    )(cols, w, b)


# ---------------------------------------------------------------------------
# Kernel B: conv2 (matmul + bias + ReLU + pool) fused with the entire FC chain
#           (fc1 -> fc2 -> g1 -> g2); the conv2 activation never leaves VMEM.
# ---------------------------------------------------------------------------
def _conv2_fc_kernel(c_ref, w2_ref, b2_ref, fc1w_ref, fc1b_ref,
                     fc2w_ref, fc2b_ref, g1w_ref, g1b_ref, g2w_ref, g2b_ref,
                     o_ref, pool_ref, flat_ref, *, n_taps, m_rows, batch):
    bf16 = jnp.bfloat16

    # conv2: single fused matmul over all 4 pool taps, pool-max, bias+ReLU once.
    y = jnp.dot(c_ref[...], w2_ref[...], preferred_element_type=jnp.float32)
    m = y[0:m_rows]
    for t in range(1, n_taps):
        m = jnp.maximum(m, y[t * m_rows:(t + 1) * m_rows])
    pool_ref[...] = jnp.maximum(m + b2_ref[...], 0.0)        # (m_rows, 128) f32

    # Re-layout (pos, batch, chan) rows into a lane-dense (batch, 16*128) slab.
    # fc1's weight (prepared outside) already absorbs PyTorch's channel-major
    # x.view(-1, 800) flatten, remapped to this (pos, chan-padded) layout.
    n_pos = m_rows // batch
    for p in range(n_pos):
        flat_ref[:, pl.ds(p * 128, 128)] = (
            pool_ref[pl.ds(p * batch, batch), :].astype(bf16))

    # FC chain: fc1+ReLU, fc2+ReLU, g1+ReLU, g2 (+bias); all VMEM-resident.
    h = jnp.dot(flat_ref[...], fc1w_ref[...], preferred_element_type=jnp.float32)
    h = jnp.maximum(h + fc1b_ref[...], 0.0).astype(bf16)
    h = jnp.dot(h, fc2w_ref[...], preferred_element_type=jnp.float32)
    h = jnp.maximum(h + fc2b_ref[...], 0.0).astype(bf16)
    h = jnp.dot(h, g1w_ref[...], preferred_element_type=jnp.float32)
    h = jnp.maximum(h + g1b_ref[...], 0.0).astype(bf16)
    h = jnp.dot(h, g2w_ref[...], preferred_element_type=jnp.float32)
    o_ref[...] = h + g2b_ref[...]


def conv2_fc_chain(cols, prep, *, batch, n_taps, m_rows):
    n_pos = m_rows // batch
    return pl.pallas_call(
        functools.partial(_conv2_fc_kernel, n_taps=n_taps, m_rows=m_rows,
                          batch=batch),
        out_shape=jax.ShapeDtypeStruct((batch, prep["g2_w"].shape[1]),
                                       jnp.float32),
        in_specs=[_VMEM] * 11,
        out_specs=_VMEM,
        scratch_shapes=[
            pltpu.VMEM((m_rows, 128), jnp.float32),          # pooled conv2 out
            pltpu.VMEM((batch, n_pos * 128), jnp.bfloat16),  # lane-dense flatten
        ],
    )(cols, prep["w2"], prep["b2"], prep["fc1_w"], prep["fc1_b"],
      prep["fc2_w"], prep["fc2_b"], prep["g1_w"], prep["g1_b"],
      prep["g2_w"], prep["g2_b"])


# ---------------------------------------------------------------------------
# XLA glue: pool-tap-major im2col (pure layout shuffle, no compute)
# ---------------------------------------------------------------------------
def pool_tap_cols(x, k, stride, pool, *, pos_major, k_pad=None):
    # x: (B, H, W, C) -> (pool*pool*B*Hq*Wq, k*k*C), rows tap-major, then
    # (b, hq, wq) if pos_major=False else (hq, wq, b).
    B, H, W, C = x.shape
    Ho = (H - k) // stride + 1
    Wo = (W - k) // stride + 1
    assert Ho % pool == 0 and Wo % pool == 0, (
        "pool_tap_cols requires even conv output dims", Ho, Wo)
    Hq, Wq = Ho // pool, Wo // pool
    taps = []
    for i in range(k):
        for j in range(k):
            taps.append(x[:, i:i + stride * (Ho - 1) + 1:stride,
                          j:j + stride * (Wo - 1) + 1:stride, :])
    K = k * k * C
    p = jnp.stack(taps, axis=3)                        # (B, Ho, Wo, k*k, C)
    p = p.reshape(B, Hq, pool, Wq, pool, K)
    if pos_major:
        p = jnp.transpose(p, (2, 4, 1, 3, 0, 5))       # (pi, pj, Hq, Wq, B, K)
    else:
        p = jnp.transpose(p, (2, 4, 0, 1, 3, 5))       # (pi, pj, B, Hq, Wq, K)
    cols = p.reshape(pool * pool * B * Hq * Wq, K)
    if k_pad is not None and k_pad > K:
        cols = jnp.pad(cols, ((0, 0), (0, k_pad - K)))
    return cols, Hq, Wq


# ---------------------------------------------------------------------------
# Parameters: PyTorch shapes + one-time kernel-ready layout prep
# ---------------------------------------------------------------------------
def init_params(key, z_dim):
    ks = jax.random.split(key, 12)

    def w(k, shape, scale=0.05):
        return (scale * jax.random.normal(k, shape)).astype(jnp.float32)

    return {
        "conv1_w": w(ks[0], (20, 3, 5, 5)),    # Conv2d(3, 20, 5, stride=2)
        "conv1_b": w(ks[1], (20,)),
        "conv2_w": w(ks[2], (50, 20, 5, 5)),   # Conv2d(20, 50, 5, stride=2)
        "conv2_b": w(ks[3], (50,)),
        "fc1_w": w(ks[4], (500, 800)),         # Linear(800, 500)
        "fc1_b": w(ks[5], (500,)),
        "fc2_w": w(ks[6], (30, 500)),          # Linear(500, 30)
        "fc2_b": w(ks[7], (30,)),
        "g1_w": w(ks[8], (10, 30)),            # g: Linear(30, 10)
        "g1_b": w(ks[9], (10,)),
        "g2_w": w(ks[10], (z_dim, 10)),        # g: Linear(10, z_dim)
        "g2_b": w(ks[11], (z_dim,)),
    }


def prepare_params(params):
    """One-time weight re-layout / zero-padding (outside the jitted forward)."""
    bf16, f32 = jnp.bfloat16, jnp.float32

    def conv_w(w, cin_pad, cout_pad, k_pad):
        # (Cout, Cin, kh, kw) -> (k_pad, cout_pad) bf16, rows = (kh, kw, cin_pad)
        cout, cin, kh, kw = w.shape
        t = jnp.transpose(w, (2, 3, 1, 0))                      # (kh, kw, cin, cout)
        t = jnp.pad(t, ((0, 0), (0, 0), (0, cin_pad - cin), (0, cout_pad - cout)))
        t = t.reshape(kh * kw * cin_pad, cout_pad)
        return jnp.pad(t, ((0, k_pad - t.shape[0]), (0, 0))).astype(bf16)

    def vec(b, n_pad):
        return jnp.pad(b, (0, n_pad - b.shape[0])).reshape(1, n_pad).astype(f32)

    def lin_w(w, in_pad, out_pad):                              # torch (out, in)
        wt = w.T
        return jnp.pad(wt, ((0, in_pad - wt.shape[0]),
                            (0, out_pad - wt.shape[1]))).astype(bf16)

    # fc1: absorb PyTorch's x.view(-1, 800) channel-major flatten, remapped to
    # the kernel's (spatial position, channel padded to 128) layout; outputs
    # padded 500 -> 512 (fc2_w gets matching zero rows).
    t = params["fc1_w"].reshape(500, 50, 4, 4)                  # (f, c, hq, wq)
    t = jnp.transpose(t, (2, 3, 1, 0))                          # (hq, wq, c, f)
    t = jnp.pad(t, ((0, 0), (0, 0), (0, 128 - 50), (0, 512 - 500)))
    fc1_w = t.reshape(4 * 4 * 128, 512).astype(bf16)            # (2048, 512)

    return {
        "w1": conv_w(params["conv1_w"], 3, 128, 128),           # (128, 128)
        "b1": vec(params["conv1_b"], 128),
        "w2": conv_w(params["conv2_w"], 128, 128, 5 * 5 * 128), # (3200, 128)
        "b2": vec(params["conv2_b"], 128),
        "fc1_w": fc1_w,
        "fc1_b": vec(params["fc1_b"], 512),
        "fc2_w": lin_w(params["fc2_w"], 512, 128),
        "fc2_b": vec(params["fc2_b"], 128),
        "g1_w": lin_w(params["g1_w"], 128, 128),
        "g1_b": vec(params["g1_b"], 128),
        "g2_w": lin_w(params["g2_w"], 128, 128),
        "g2_b": vec(params["g2_b"], 128),
    }


# ---------------------------------------------------------------------------
# Forward pass
# ---------------------------------------------------------------------------
def mov_mnist_net_forward(prep, x_nchw, z_dim=Z_DIM):
    B = x_nchw.shape[0]
    x = jnp.transpose(x_nchw, (0, 2, 3, 1)).astype(jnp.bfloat16)   # NHWC bf16

    # conv1(3->20, k5, s2) + ReLU + maxpool2x2; K padded 75->128, C_out -> 128.
    cols1, hq1, wq1 = pool_tap_cols(x, 5, 2, 2, pos_major=False, k_pad=128)
    m1 = B * hq1 * wq1
    h = conv_relu_pool(cols1, prep["w1"], prep["b1"], n_taps=4, m_rows=m1)
    # Keep all 128 zero-padded channels so the conv2 glue stays lane-dense
    # (padded channels multiply zero rows of w2, so results are unchanged).
    h = h.reshape(B, hq1, wq1, 128)

    # conv2(20->50, k5, s2) + ReLU + maxpool2x2 + flatten + fc1/fc2/g: ONE kernel.
    cols2, hq2, wq2 = pool_tap_cols(h, 5, 2, 2, pos_major=True)
    out = conv2_fc_chain(cols2, prep, batch=B, n_taps=4,
                         m_rows=B * hq2 * wq2)
    return out[:, :z_dim]


if __name__ == "__main__":
    key = jax.random.PRNGKey(0)
    pk, xk = jax.random.split(key)
    params = init_params(pk, Z_DIM)
    prep = prepare_params(params)          # one-time kernel-ready weight layout
    # batch=2, channels=3, spatial=84 (fc1_in_features = 50*4*4 forces 84x84)
    x = jax.random.normal(xk, (2, 3, 84, 84), dtype=jnp.float32)
    fwd = jax.jit(mov_mnist_net_forward)
    y = jax.block_until_ready(fwd(prep, x))
    assert y.shape == (2, Z_DIM), y.shape
    print("KERNEL_OK")
</pallas_src>

<mosaic_0001>
module attributes {stable_mosaic.version = 11 : i64} {
  func.func @_conv_relu_pool_kernel(%arg0: memref<3200x128xbf16, #tpu.memory_space<vmem>>, %arg1: memref<128x128xbf16, #tpu.memory_space<vmem>>, %arg2: memref<1x128xf32, #tpu.memory_space<vmem>>, %arg3: memref<800x128xbf16, #tpu.memory_space<vmem>>) attributes {dimension_semantics = [], scalar_prefetch = 0 : i64, scratch_operands = 0 : i64, tpu.core_type = #tpu.core_type<tc>} {
    %c0 = arith.constant 0 : index
    %c0_0 = arith.constant 0 : index
    %0 = vector.load %arg0[%c0, %c0_0] : memref<3200x128xbf16, #tpu.memory_space<vmem>>, vector<3200x128xbf16>
    %c0_1 = arith.constant 0 : index
    %c0_2 = arith.constant 0 : index
    %1 = vector.load %arg1[%c0_1, %c0_2] : memref<128x128xbf16, #tpu.memory_space<vmem>>, vector<128x128xbf16>
    %cst = arith.constant dense<0.000000e+00> : vector<3200x128xf32>
    %2 = tpu.matmul %0, %1, %cst {dimension_numbers = #tpu.dot_dimension_numbers<[1], [0], [0], [1], [0, 0, 1, 1], [], []>} : vector<3200x128xbf16>, vector<128x128xbf16>, vector<3200x128xf32> -> vector<3200x128xf32>
    %3 = vector.extract_strided_slice %2 {offsets = [0, 0], sizes = [800, 128], strides = [1, 1]} : vector<3200x128xf32> to vector<800x128xf32>
    %4 = vector.extract_strided_slice %2 {offsets = [800, 0], sizes = [800, 128], strides = [1, 1]} : vector<3200x128xf32> to vector<800x128xf32>
    %5 = arith.maximumf %3, %4 : vector<800x128xf32>
    %6 = vector.extract_strided_slice %2 {offsets = [1600, 0], sizes = [800, 128], strides = [1, 1]} : vector<3200x128xf32> to vector<800x128xf32>
    %7 = arith.maximumf %5, %6 : vector<800x128xf32>
    %8 = vector.extract_strided_slice %2 {offsets = [2400, 0], sizes = [800, 128], strides = [1, 1]} : vector<3200x128xf32> to vector<800x128xf32>
    %9 = arith.maximumf %7, %8 : vector<800x128xf32>
    %c0_3 = arith.constant 0 : index
    %c0_4 = arith.constant 0 : index
    %10 = vector.load %arg2[%c0_3, %c0_4] : memref<1x128xf32, #tpu.memory_space<vmem>>, vector<1x128xf32>
    %11 = vector.broadcast %10 : vector<1x128xf32> to vector<800x128xf32>
    %12 = arith.addf %9, %11 : vector<800x128xf32>
    %cst_5 = arith.constant 0.000000e+00 : f32
    %13 = vector.broadcast %cst_5 : f32 to vector<800x128xf32>
    %14 = arith.maximumf %12, %13 : vector<800x128xf32>
    %15 = arith.truncf %14 : vector<800x128xf32> to vector<800x128xbf16>
    %c0_6 = arith.constant 0 : index
    %c0_7 = arith.constant 0 : index
    %16 = vector.load %arg3[%c0_6, %c0_7] : memref<800x128xbf16, #tpu.memory_space<vmem>>, vector<800x128xbf16>
    tpu.vector_store %arg3[%c0_6, %c0_7], %15 {strides = array<i32>} : memref<800x128xbf16, #tpu.memory_space<vmem>>, vector<800x128xbf16>,
    return
  }
}

module attributes {stable_mosaic.version = 11 : i64} {
  func.func @_conv2_fc_kernel(%arg0: memref<128x3200xbf16, #tpu.memory_space<vmem>>, %arg1: memref<3200x128xbf16, #tpu.memory_space<vmem>>, %arg2: memref<1x128xf32, #tpu.memory_space<vmem>>, %arg3: memref<2048x512xbf16, #tpu.memory_space<vmem>>, %arg4: memref<1x512xf32, #tpu.memory_space<vmem>>, %arg5: memref<512x128xbf16, #tpu.memory_space<vmem>>, %arg6: memref<1x128xf32, #tpu.memory_space<vmem>>, %arg7: memref<128x128xbf16, #tpu.memory_space<vmem>>, %arg8: memref<1x128xf32, #tpu.memory_space<vmem>>, %arg9: memref<128x128xbf16, #tpu.memory_space<vmem>>, %arg10: memref<1x128xf32, #tpu.memory_space<vmem>>, %arg11: memref<2x128xf32, #tpu.memory_space<vmem>>, %arg12: memref<32x128xf32, #tpu.memory_space<vmem>>, %arg13: memref<2x2048xbf16, #tpu.memory_space<vmem>>) attributes {dimension_semantics = [], scalar_prefetch = 0 : i64, scratch_operands = 2 : i64, tpu.core_type = #tpu.core_type<tc>} {
    %c0 = arith.constant 0 : index
    %c0_0 = arith.constant 0 : index
    %0 = vector.load %arg0[%c0, %c0_0] : memref<128x3200xbf16, #tpu.memory_space<vmem>>, vector<128x3200xbf16>
    %c0_1 = arith.constant 0 : index
    %c0_2 = arith.constant 0 : index
    %1 = vector.load %arg1[%c0_1, %c0_2] : memref<3200x128xbf16, #tpu.memory_space<vmem>>, vector<3200x128xbf16>
    %cst = arith.constant dense<0.000000e+00> : vector<128x128xf32>
    %2 = tpu.matmul %0, %1, %cst {dimension_numbers = #tpu.dot_dimension_numbers<[1], [0], [0], [1], [0, 0, 1, 1], [], []>} : vector<128x3200xbf16>, vector<3200x128xbf16>, vector<128x128xf32> -> vector<128x128xf32>
    %3 = vector.extract_strided_slice %2 {offsets = [0, 0], sizes = [32, 128], strides = [1, 1]} : vector<128x128xf32> to vector<32x128xf32>
    %4 = vector.extract_strided_slice %2 {offsets = [32, 0], sizes = [32, 128], strides = [1, 1]} : vector<128x128xf32> to vector<32x128xf32>
    %5 = arith.maximumf %3, %4 : vector<32x128xf32>
    %6 = vector.extract_strided_slice %2 {offsets = [64, 0], sizes = [32, 128], strides = [1, 1]} : vector<128x128xf32> to vector<32x128xf32>
    %7 = arith.maximumf %5, %6 : vector<32x128xf32>
    %8 = vector.extract_strided_slice %2 {offsets = [96, 0], sizes = [32, 128], strides = [1, 1]} : vector<128x128xf32> to vector<32x128xf32>
    %9 = arith.maximumf %7, %8 : vector<32x128xf32>
    %c0_3 = arith.constant 0 : index
    %c0_4 = arith.constant 0 : index
    %10 = vector.load %arg2[%c0_3, %c0_4] : memref<1x128xf32, #tpu.memory_space<vmem>>, vector<1x128xf32>
    %11 = vector.broadcast %10 : vector<1x128xf32> to vector<32x128xf32>
    %12 = arith.addf %9, %11 : vector<32x128xf32>
    %cst_5 = arith.constant 0.000000e+00 : f32
    %13 = vector.broadcast %cst_5 : f32 to vector<32x128xf32>
    %14 = arith.maximumf %12, %13 : vector<32x128xf32>
    %c0_6 = arith.constant 0 : index
    %c0_7 = arith.constant 0 : index
    %15 = vector.load %arg12[%c0_6, %c0_7] : memref<32x128xf32, #tpu.memory_space<vmem>>, vector<32x128xf32>
    tpu.vector_store %arg12[%c0_6, %c0_7], %14 {strides = array<i32>} : memref<32x128xf32, #tpu.memory_space<vmem>>, vector<32x128xf32>,
    %c0_8 = arith.constant 0 : index
    %c0_9 = arith.constant 0 : index
    %16 = vector.load %arg12[%c0_8, %c0_9] : memref<32x128xf32, #tpu.memory_space<vmem>>, vector<2x128xf32>
    %17 = arith.truncf %16 : vector<2x128xf32> to vector<2x128xbf16>
    %c0_10 = arith.constant 0 : index
    %c0_11 = arith.constant 0 : index
    %18 = vector.load %arg13[%c0_10, %c0_11] : memref<2x2048xbf16, #tpu.memory_space<vmem>>, vector<2x128xbf16>
    tpu.vector_store %arg13[%c0_10, %c0_11], %17 {strides = array<i32>} : memref<2x2048xbf16, #tpu.memory_space<vmem>>, vector<2x128xbf16>,
    %c2 = arith.constant 2 : index
    %c0_12 = arith.constant 0 : index
    %19 = vector.load %arg12[%c2, %c0_12] : memref<32x128xf32, #tpu.memory_space<vmem>>, vector<2x128xf32>
    %20 = arith.truncf %19 : vector<2x128xf32> to vector<2x128xbf16>
    %c0_13 = arith.constant 0 : index
    %c128 = arith.constant 128 : index
    %21 = vector.load %arg13[%c0_13, %c128] : memref<2x2048xbf16, #tpu.memory_space<vmem>>, vector<2x128xbf16>
    tpu.vector_store %arg13[%c0_13, %c128], %20 {strides = array<i32>} : memref<2x2048xbf16, #tpu.memory_space<vmem>>, vector<2x128xbf16>,
    %c4 = arith.constant 4 : index
    %c0_14 = arith.constant 0 : index
    %22 = vector.load %arg12[%c4, %c0_14] : memref<32x128xf32, #tpu.memory_space<vmem>>, vector<2x128xf32>
    %23 = arith.truncf %22 : vector<2x128xf32> to vector<2x128xbf16>
    %c0_15 = arith.constant 0 : index
    %c256 = arith.constant 256 : index
    %24 = vector.load %arg13[%c0_15, %c256] : memref<2x2048xbf16, #tpu.memory_space<vmem>>, vector<2x128xbf16>
    tpu.vector_store %arg13[%c0_15, %c256], %23 {strides = array<i32>} : memref<2x2048xbf16, #tpu.memory_space<vmem>>, vector<2x128xbf16>,
    %c6 = arith.constant 6 : index
    %c0_16 = arith.constant 0 : index
    %25 = vector.load %arg12[%c6, %c0_16] : memref<32x128xf32, #tpu.memory_space<vmem>>, vector<2x128xf32>
    %26 = arith.truncf %25 : vector<2x128xf32> to vector<2x128xbf16>
    %c0_17 = arith.constant 0 : index
    %c384 = arith.constant 384 : index
    %27 = vector.load %arg13[%c0_17, %c384] : memref<2x2048xbf16, #tpu.memory_space<vmem>>, vector<2x128xbf16>
    tpu.vector_store %arg13[%c0_17, %c384], %26 {strides = array<i32>} : memref<2x2048xbf16, #tpu.memory_space<vmem>>, vector<2x128xbf16>,
    %c8 = arith.constant 8 : index
    %c0_18 = arith.constant 0 : index
    %28 = vector.load %arg12[%c8, %c0_18] : memref<32x128xf32, #tpu.memory_space<vmem>>, vector<2x128xf32>
    %29 = arith.truncf %28 : vector<2x128xf32> to vector<2x128xbf16>
    %c0_19 = arith.constant 0 : index
    %c512 = arith.constant 512 : index
    %30 = vector.load %arg13[%c0_19, %c512] : memref<2x2048xbf16, #tpu.memory_space<vmem>>, vector<2x128xbf16>
    tpu.vector_store %arg13[%c0_19, %c512], %29 {strides = array<i32>} : memref<2x2048xbf16, #tpu.memory_space<vmem>>, vector<2x128xbf16>,
    %c10 = arith.constant 10 : index
    %c0_20 = arith.constant 0 : index
    %31 = vector.load %arg12[%c10, %c0_20] : memref<32x128xf32, #tpu.memory_space<vmem>>, vector<2x128xf32>
    %32 = arith.truncf %31 : vector<2x128xf32> to vector<2x128xbf16>
    %c0_21 = arith.constant 0 : index
    %c640 = arith.constant 640 : index
    %33 = vector.load %arg13[%c0_21, %c640] : memref<2x2048xbf16, #tpu.memory_space<vmem>>, vector<2x128xbf16>
    tpu.vector_store %arg13[%c0_21, %c640], %32 {strides = array<i32>} : memref<2x2048xbf16, #tpu.memory_space<vmem>>, vector<2x128xbf16>,
    %c12 = arith.constant 12 : index
    %c0_22 = arith.constant 0 : index
    %34 = vector.load %arg12[%c12, %c0_22] : memref<32x128xf32, #tpu.memory_space<vmem>>, vector<2x128xf32>
    %35 = arith.truncf %34 : vector<2x128xf32> to vector<2x128xbf16>
    %c0_23 = arith.constant 0 : index
    %c768 = arith.constant 768 : index
    %36 = vector.load %arg13[%c0_23, %c768] : memref<2x2048xbf16, #tpu.memory_space<vmem>>, vector<2x128xbf16>
    tpu.vector_store %arg13[%c0_23, %c768], %35 {strides = array<i32>} : memref<2x2048xbf16, #tpu.memory_space<vmem>>, vector<2x128xbf16>,
    %c14 = arith.constant 14 : index
    %c0_24 = arith.constant 0 : index
    %37 = vector.load %arg12[%c14, %c0_24] : memref<32x128xf32, #tpu.memory_space<vmem>>, vector<2x128xf32>
    %38 = arith.truncf %37 : vector<2x128xf32> to vector<2x128xbf16>
    %c0_25 = arith.constant 0 : index
    %c896 = arith.constant 896 : index
    %39 = vector.load %arg13[%c0_25, %c896] : memref<2x2048xbf16, #tpu.memory_space<vmem>>, vector<2x128xbf16>
    tpu.vector_store %arg13[%c0_25, %c896], %38 {strides = array<i32>} : memref<2x2048xbf16, #tpu.memory_space<vmem>>, vector<2x128xbf16>,
    %c16 = arith.constant 16 : index
    %c0_26 = arith.constant 0 : index
    %40 = vector.load %arg12[%c16, %c0_26] : memref<32x128xf32, #tpu.memory_space<vmem>>, vector<2x128xf32>
    %41 = arith.truncf %40 : vector<2x128xf32> to vector<2x128xbf16>
    %c0_27 = arith.constant 0 : index
    %c1024 = arith.constant 1024 : index
    %42 = vector.load %arg13[%c0_27, %c1024] : memref<2x2048xbf16, #tpu.memory_space<vmem>>, vector<2x128xbf16>
    tpu.vector_store %arg13[%c0_27, %c1024], %41 {strides = array<i32>} : memref<2x2048xbf16, #tpu.memory_space<vmem>>, vector<2x128xbf16>,
    %c18 = arith.constant 18 : index
    %c0_28 = arith.constant 0 : index
    %43 = vector.load %arg12[%c18, %c0_28] : memref<32x128xf32, #tpu.memory_space<vmem>>, vector<2x128xf32>
    %44 = arith.truncf %43 : vector<2x128xf32> to vector<2x128xbf16>
    %c0_29 = arith.constant 0 : index
    %c1152 = arith.constant 1152 : index
    %45 = vector.load %arg13[%c0_29, %c1152] : memref<2x2048xbf16, #tpu.memory_space<vmem>>, vector<2x128xbf16>
    tpu.vector_store %arg13[%c0_29, %c1152], %44 {strides = array<i32>} : memref<2x2048xbf16, #tpu.memory_space<vmem>>, vector<2x128xbf16>,
    %c20 = arith.constant 20 : index
    %c0_30 = arith.constant 0 : index
    %46 = vector.load %arg12[%c20, %c0_30] : memref<32x128xf32, #tpu.memory_space<vmem>>, vector<2x128xf32>
    %47 = arith.truncf %46 : vector<2x128xf32> to vector<2x128xbf16>
    %c0_31 = arith.constant 0 : index
    %c1280 = arith.constant 1280 : index
    %48 = vector.load %arg13[%c0_31, %c1280] : memref<2x2048xbf16, #tpu.memory_space<vmem>>, vector<2x128xbf16>
    tpu.vector_store %arg13[%c0_31, %c1280], %47 {strides = array<i32>} : memref<2x2048xbf16, #tpu.memory_space<vmem>>, vector<2x128xbf16>,
    %c22 = arith.constant 22 : index
    %c0_32 = arith.constant 0 : index
    %49 = vector.load %arg12[%c22, %c0_32] : memref<32x128xf32, #tpu.memory_space<vmem>>, vector<2x128xf32>
    %50 = arith.truncf %49 : vector<2x128xf32> to vector<2x128xbf16>
    %c0_33 = arith.constant 0 : index
    %c1408 = arith.constant 1408 : index
    %51 = vector.load %arg13[%c0_33, %c1408] : memref<2x2048xbf16, #tpu.memory_space<vmem>>, vector<2x128xbf16>
    tpu.vector_store %arg13[%c0_33, %c1408], %50 {strides = array<i32>} : memref<2x2048xbf16, #tpu.memory_space<vmem>>, vector<2x128xbf16>,
    %c24 = arith.constant 24 : index
    %c0_34 = arith.constant 0 : index
    %52 = vector.load %arg12[%c24, %c0_34] : memref<32x128xf32, #tpu.memory_space<vmem>>, vector<2x128xf32>
    %53 = arith.truncf %52 : vector<2x128xf32> to vector<2x128xbf16>
    %c0_35 = arith.constant 0 : index
    %c1536 = arith.constant 1536 : index
    %54 = vector.load %arg13[%c0_35, %c1536] : memref<2x2048xbf16, #tpu.memory_space<vmem>>, vector<2x128xbf16>
    tpu.vector_store %arg13[%c0_35, %c1536], %53 {strides = array<i32>} : memref<2x2048xbf16, #tpu.memory_space<vmem>>, vector<2x128xbf16>,
    %c26 = arith.constant 26 : index
    %c0_36 = arith.constant 0 : index
    %55 = vector.load %arg12[%c26, %c0_36] : memref<32x128xf32, #tpu.memory_space<vmem>>, vector<2x128xf32>
    %56 = arith.truncf %55 : vector<2x128xf32> to vector<2x128xbf16>
    %c0_37 = arith.constant 0 : index
    %c1664 = arith.constant 1664 : index
    %57 = vector.load %arg13[%c0_37, %c1664] : memref<2x2048xbf16, #tpu.memory_space<vmem>>, vector<2x128xbf16>
    tpu.vector_store %arg13[%c0_37, %c1664], %56 {strides = array<i32>} : memref<2x2048xbf16, #tpu.memory_space<vmem>>, vector<2x128xbf16>,
    %c28 = arith.constant 28 : index
    %c0_38 = arith.constant 0 : index
    %58 = vector.load %arg12[%c28, %c0_38] : memref<32x128xf32, #tpu.memory_space<vmem>>, vector<2x128xf32>
    %59 = arith.truncf %58 : vector<2x128xf32> to vector<2x128xbf16>
    %c0_39 = arith.constant 0 : index
    %c1792 = arith.constant 1792 : index
    %60 = vector.load %arg13[%c0_39, %c1792] : memref<2x2048xbf16, #tpu.memory_space<vmem>>, vector<2x128xbf16>
    tpu.vector_store %arg13[%c0_39, %c1792], %59 {strides = array<i32>} : memref<2x2048xbf16, #tpu.memory_space<vmem>>, vector<2x128xbf16>,
    %c30 = arith.constant 30 : index
    %c0_40 = arith.constant 0 : index
    %61 = vector.load %arg12[%c30, %c0_40] : memref<32x128xf32, #tpu.memory_space<vmem>>, vector<2x128xf32>
    %62 = arith.truncf %61 : vector<2x128xf32> to vector<2x128xbf16>
    %c0_41 = arith.constant 0 : index
    %c1920 = arith.constant 1920 : index
    %63 = vector.load %arg13[%c0_41, %c1920] : memref<2x2048xbf16, #tpu.memory_space<vmem>>, vector<2x128xbf16>
    tpu.vector_store %arg13[%c0_41, %c1920], %62 {strides = array<i32>} : memref<2x2048xbf16, #tpu.memory_space<vmem>>, vector<2x128xbf16>,
    %c0_42 = arith.constant 0 : index
    %c0_43 = arith.constant 0 : index
    %64 = vector.load %arg13[%c0_42, %c0_43] : memref<2x2048xbf16, #tpu.memory_space<vmem>>, vector<2x2048xbf16>
    %c0_44 = arith.constant 0 : index
    %c0_45 = arith.constant 0 : index
    %65 = vector.load %arg3[%c0_44, %c0_45] : memref<2048x512xbf16, #tpu.memory_space<vmem>>, vector<2048x512xbf16>
    %cst_46 = arith.constant dense<0.000000e+00> : vector<2x512xf32>
    %66 = tpu.matmul %64, %65, %cst_46 {dimension_numbers = #tpu.dot_dimension_numbers<[1], [0], [0], [1], [0, 0, 1, 1], [], []>} : vector<2x2048xbf16>, vector<2048x512xbf16>, vector<2x512xf32> -> vector<2x512xf32>
    %c0_47 = arith.constant 0 : index
    %c0_48 = arith.constant 0 : index
    %67 = vector.load %arg4[%c0_47, %c0_48] : memref<1x512xf32, #tpu.memory_space<vmem>>, vector<1x512xf32>
    %68 = vector.broadcast %67 : vector<1x512xf32> to vector<2x512xf32>
    %69 = arith.addf %66, %68 : vector<2x512xf32>
    %cst_49 = arith.constant 0.000000e+00 : f32
    %70 = vector.broadcast %cst_49 : f32 to vector<2x512xf32>
    %71 = arith.maximumf %69, %70 : vector<2x512xf32>
    %72 = arith.truncf %71 : vector<2x512xf32> to vector<2x512xbf16>
    %c0_50 = arith.constant 0 : index
    %c0_51 = arith.constant 0 : index
    %73 = vector.load %arg5[%c0_50, %c0_51] : memref<512x128xbf16, #tpu.memory_space<vmem>>, vector<512x128xbf16>
    %cst_52 = arith.constant dense<0.000000e+00> : vector<2x128xf32>
    %74 = tpu.matmul %72, %73, %cst_52 {dimension_numbers = #tpu.dot_dimension_numbers<[1], [0], [0], [1], [0, 0, 1, 1], [], []>} : vector<2x512xbf16>, vector<512x128xbf16>, vector<2x128xf32> -> vector<2x128xf32>
    %c0_53 = arith.constant 0 : index
    %c0_54 = arith.constant 0 : index
    %75 = vector.load %arg6[%c0_53, %c0_54] : memref<1x128xf32, #tpu.memory_space<vmem>>, vector<1x128xf32>
    %76 = vector.broadcast %75 : vector<1x128xf32> to vector<2x128xf32>
    %77 = arith.addf %74, %76 : vector<2x128xf32>
    %cst_55 = arith.constant 0.000000e+00 : f32
    %78 = vector.broadcast %cst_55 : f32 to vector<2x128xf32>
    %79 = arith.maximumf %77, %78 : vector<2x128xf32>
    %80 = arith.truncf %79 : vector<2x128xf32> to vector<2x128xbf16>
    %c0_56 = arith.constant 0 : index
    %c0_57 = arith.constant 0 : index
    %81 = vector.load %arg7[%c0_56, %c0_57] : memref<128x128xbf16, #tpu.memory_space<vmem>>, vector<128x128xbf16>
    %cst_58 = arith.constant dense<0.000000e+00> : vector<2x128xf32>
    %82 = tpu.matmul %80, %81, %cst_58 {dimension_numbers = #tpu.dot_dimension_numbers<[1], [0], [0], [1], [0, 0, 1, 1], [], []>} : vector<2x128xbf16>, vector<128x128xbf16>, vector<2x128xf32> -> vector<2x128xf32>
    %c0_59 = arith.constant 0 : index
    %c0_60 = arith.constant 0 : index
    %83 = vector.load %arg8[%c0_59, %c0_60] : memref<1x128xf32, #tpu.memory_space<vmem>>, vector<1x128xf32>
    %84 = vector.broadcast %83 : vector<1x128xf32> to vector<2x128xf32>
    %85 = arith.addf %82, %84 : vector<2x128xf32>
    %cst_61 = arith.constant 0.000000e+00 : f32
    %86 = vector.broadcast %cst_61 : f32 to vector<2x128xf32>
    %87 = arith.maximumf %85, %86 : vector<2x128xf32>
    %88 = arith.truncf %87 : vector<2x128xf32> to vector<2x128xbf16>
    %c0_62 = arith.constant 0 : index
    %c0_63 = arith.constant 0 : index
    %89 = vector.load %arg9[%c0_62, %c0_63] : memref<128x128xbf16, #tpu.memory_space<vmem>>, vector<128x128xbf16>
    %cst_64 = arith.constant dense<0.000000e+00> : vector<2x128xf32>
    %90 = tpu.matmul %88, %89, %cst_64 {dimension_numbers = #tpu.dot_dimension_numbers<[1], [0], [0], [1], [0, 0, 1, 1], [], []>} : vector<2x128xbf16>, vector<128x128xbf16>, vector<2x128xf32> -> vector<2x128xf32>
    %c0_65 = arith.constant 0 : index
    %c0_66 = arith.constant 0 : index
    %91 = vector.load %arg10[%c0_65, %c0_66] : memref<1x128xf32, #tpu.memory_space<vmem>>, vector<1x128xf32>
    %92 = vector.broadcast %91 : vector<1x128xf32> to vector<2x128xf32>
    %93 = arith.addf %90, %92 : vector<2x128xf32>
    %c0_67 = arith.constant 0 : index
    %c0_68 = arith.constant 0 : index
    %94 = vector.load %arg11[%c0_67, %c0_68] : memref<2x128xf32, #tpu.memory_space<vmem>>, vector<2x128xf32>
    tpu.vector_store %arg11[%c0_67, %c0_68], %93 {strides = array<i32>} : memref<2x128xf32, #tpu.memory_space<vmem>>, vector<2x128xf32>,
    return
  }
}

</mosaic_0001>

<bundles_post_ra>
// kernel: mov_mnist_net_forward.2
= control target key start
LH: loop header
LB: loop body
LE: loop exit
PB: predicated region body
PF: predicated region fallthrough
CT: control target
= control target key end

     0   :  { %s7384_s1 = inlined_call_operand.vmem [shape: bf16[128,128], index: 1, kind: input, shape index: {}]   ;;  %s7385_s0 = inlined_call_operand.vmem [shape: bf16[3200,128], index: 0, kind: input, shape index: {}]   ;;  %s7386_s2 = inlined_call_operand.vmem [shape: f32[1,128], index: 2, kind: input, shape index: {}]   ;;  %s7387_s3 = inlined_call_operand.vmem [shape: bf16[800,128], index: 3, kind: output, shape index: {}]  }
   0x1   :  { %v5671_v0 = vld [vmem:[%s7384_s1] sm:$0xff]   ;;  %v5672_v1 = vld [vmem:[%s7384_s1 + $0x8] sm:$0xff]   ;;  %v5673_v2 = vld [vmem:[%s7384_s1 + $0x10] sm:$0xff]  }
   0x2   :  { %5239 = vmatprep.subr.bf16.mxu0 %v5671_v0  ;;  %5655 = vmatprep.subr.bf16.mxu1 %v5671_v0  ;;  %v5674_v3 = vld [vmem:[%s7384_s1 + $0x18] sm:$0xff]   ;;  %v5679_v4 = vld [vmem:[%s7385_s0] sm:$0xff]   ;;  %v5676_v7 = vld [vmem:[%s7384_s1 + $0x28] sm:$0xff]  }
   0x3   :  { %5240 = vmatpush3.bf16.msra.mxu0 %v5671_v0  ;;  %5663 = vmatpush3.bf16.msra.mxu1 %v5671_v0  ;;  %v5681_v5 = vld [vmem:[%s7385_s0 + $0x320] sm:$0xff]   ;;  %v5677_v8 = vld [vmem:[%s7384_s1 + $0x30] sm:$0xff]   ;;  %v5678_v9 = vld [vmem:[%s7384_s1 + $0x38] sm:$0xff]  }
   0x4   :  { %5241 = vmatprep.subr.bf16.mxu0 %v5672_v1  ;;  %5656 = vmatprep.subr.bf16.mxu1 %v5672_v1  ;;  %v5675_v6 = vld [vmem:[%s7384_s1 + $0x20] sm:$0xff]   ;;  %v5680_v10 = vld [vmem:[%s7385_s0 + $0x8] sm:$0xff]   ;;  %v5683_v12 = vld [vmem:[%s7385_s0 + $0x10] sm:$0xff]  }
   0x5   :  { %5255 = vmatprep.mubr.bf16.mxu0 %v5679_v4  ;;  %5455 = vmatprep.mubr.bf16.mxu1 %v5681_v5  ;;  %v5682_v11 = vld [vmem:[%s7385_s0 + $0x328] sm:$0xff]   ;;  %v5685_v13 = vld [vmem:[%s7385_s0 + $0x330] sm:$0xff]   ;;  %v5684_v14 = vld [vmem:[%s7385_s0 + $0x18] sm:$0xff]  }
   0x6   :  { %v5686_v15 = vld [vmem:[%s7385_s0 + $0x338] sm:$0xff]   ;;  %v5687_v16 = vld [vmem:[%s7385_s0 + $0x20] sm:$0xff]   ;;  %v5688_v18 = vld [vmem:[%s7385_s0 + $0x28] sm:$0xff]  }
   0x7   :  { %5242 = vmatpush3.bf16.msra.mxu0 %v5672_v1  ;;  %5664 = vmatpush3.bf16.msra.mxu1 %v5672_v1  ;;  %v5689_v17 = vld [vmem:[%s7385_s0 + $0x340] sm:$0xff]   ;;  %v5690_v19 = vld [vmem:[%s7385_s0 + $0x348] sm:$0xff]   ;;  %v5691_v20 = vld [vmem:[%s7385_s0 + $0x30] sm:$0xff]  }
   0x8   :  { %5243 = vmatprep.subr.bf16.mxu0 %v5673_v2  ;;  %5657 = vmatprep.subr.bf16.mxu1 %v5673_v2  ;;  %v5693_v21 = vld [vmem:[%s7385_s0 + $0x350] sm:$0xff]   ;;  %v5692_v22 = vld [vmem:[%s7385_s0 + $0x38] sm:$0xff]   ;;  %v5695_v24 = vld [vmem:[%s7385_s0 + $0x40] sm:$0xff]  }
   0x9   :  { %v5694_v23 = vld [vmem:[%s7385_s0 + $0x358] sm:$0xff]   ;;  %v5697_v25 = vld [vmem:[%s7385_s0 + $0x360] sm:$0xff]   ;;  %v5696_v26 = vld [vmem:[%s7385_s0 + $0x48] sm:$0xff]  }
   0xa   :  { %v5698_v27 = vld [vmem:[%s7385_s0 + $0x368] sm:$0xff]   ;;  %v5699_v28 = vld [vmem:[%s7385_s0 + $0x50] sm:$0xff]   ;;  %v5700_v30 = vld [vmem:[%s7385_s0 + $0x58] sm:$0xff]  }
   0xb   :  { %5244 = vmatpush3.bf16.msra.mxu0 %v5673_v2  ;;  %5665 = vmatpush3.bf16.msra.mxu1 %v5673_v2  ;;  %v5701_v29 = vld [vmem:[%s7385_s0 + $0x370] sm:$0xff]   ;;  %v5702_v31 = vld [vmem:[%s7385_s0 + $0x378] sm:$0xff]   ;;  %v5703_v32 = vld [vmem:[%s7385_s0 + $0x60] sm:$0xff]  }
   0xc   :  { %5245 = vmatprep.subr.bf16.mxu0 %v5674_v3  ;;  %5658 = vmatprep.subr.bf16.mxu1 %v5674_v3  ;;  %v5705_v33 = vld [vmem:[%s7385_s0 + $0x380] sm:$0xff]   ;;  %v5704_v34 = vld [vmem:[%s7385_s0 + $0x68] sm:$0xff]   ;;  %v5707_v36 = vld [vmem:[%s7385_s0 + $0x70] sm:$0xff]  }
   0xd   :  { %v5706_v35 = vld [vmem:[%s7385_s0 + $0x388] sm:$0xff]   ;;  %v5709_v37 = vld [vmem:[%s7385_s0 + $0x390] sm:$0xff]   ;;  %v5708_v38 = vld [vmem:[%s7385_s0 + $0x78] sm:$0xff]  }
   0xe   :  { %v5710_v39 = vld [vmem:[%s7385_s0 + $0x398] sm:$0xff]   ;;  %v5711_v40 = vld [vmem:[%s7385_s0 + $0x80] sm:$0xff]   ;;  %v5712_v42 = vld [vmem:[%s7385_s0 + $0x88] sm:$0xff]  }
   0xf   :  { %5246 = vmatpush3.bf16.msra.mxu0 %v5674_v3  ;;  %5666 = vmatpush3.bf16.msra.mxu1 %v5674_v3  ;;  %v5713_v41 = vld [vmem:[%s7385_s0 + $0x3a0] sm:$0xff]   ;;  %v5714_v43 = vld [vmem:[%s7385_s0 + $0x3a8] sm:$0xff]   ;;  %v5715_v44 = vld [vmem:[%s7385_s0 + $0x90] sm:$0xff]  }
  0x10   :  { %5247 = vmatprep.subr.bf16.mxu0 %v5675_v6  ;;  %5659 = vmatprep.subr.bf16.mxu1 %v5675_v6  ;;  %v5717_v45 = vld [vmem:[%s7385_s0 + $0x3b0] sm:$0xff]   ;;  %v5716_v46 = vld [vmem:[%s7385_s0 + $0x98] sm:$0xff]   ;;  %v5719_v48 = vld [vmem:[%s7385_s0 + $0xa0] sm:$0xff]  }
  0x11   :  { %v5718_v47 = vld [vmem:[%s7385_s0 + $0x3b8] sm:$0xff]   ;;  %v5721_v49 = vld [vmem:[%s7385_s0 + $0x3c0] sm:$0xff]   ;;  %v5720_v50 = vld [vmem:[%s7385_s0 + $0xa8] sm:$0xff]  }
  0x12   :  { %v5722_v51 = vld [vmem:[%s7385_s0 + $0x3c8] sm:$0xff]   ;;  %v5723_v52 = vld [vmem:[%s7385_s0 + $0xb0] sm:$0xff]   ;;  %v5724_v54 = vld [vmem:[%s7385_s0 + $0xb8] sm:$0xff]  }
  0x13   :  { %5248 = vmatpush3.bf16.msra.mxu0 %v5675_v6  ;;  %5667 = vmatpush3.bf16.msra.mxu1 %v5675_v6  ;;  %v5725_v53 = vld [vmem:[%s7385_s0 + $0x3d0] sm:$0xff]   ;;  %v5726_v55 = vld [vmem:[%s7385_s0 + $0x3d8] sm:$0xff]   ;;  %v5727_v56 = vld [vmem:[%s7385_s0 + $0xc0] sm:$0xff]  }
  0x14   :  { %5249 = vmatprep.subr.bf16.mxu0 %v5676_v7  ;;  %5660 = vmatprep.subr.bf16.mxu1 %v5676_v7  ;;  %v5729_v57 = vld [vmem:[%s7385_s0 + $0x3e0] sm:$0xff]   ;;  %v5728_v58 = vld [vmem:[%s7385_s0 + $0xc8] sm:$0xff]   ;;  %v5731_v60 = vld [vmem:[%s7385_s0 + $0xd0] sm:$0xff]  }
  0x15   :  { %v5730_v59 = vld [vmem:[%s7385_s0 + $0x3e8] sm:$0xff]   ;;  %v5733_v61 = vld [vmem:[%s7385_s0 + $0x3f0] sm:$0xff]   ;;  %v5732_v62 = vld [vmem:[%s7385_s0 + $0xd8] sm:$0xff]  }
  0x16   :  { %v5734_v63 = vld [vmem:[%s7385_s0 + $0x3f8] sm:$0xff]   ;;  %v5735_v0 = vld [vmem:[%s7385_s0 + $0xe0] sm:$0xff]   ;;  %v5736_v2 = vld [vmem:[%s7385_s0 + $0xe8] sm:$0xff]  }
  0x17   :  { %5250 = vmatpush3.bf16.msra.mxu0 %v5676_v7  ;;  %5668 = vmatpush3.bf16.msra.mxu1 %v5676_v7  ;;  %v5737_v1 = vld [vmem:[%s7385_s0 + $0x400] sm:$0xff]   ;;  %v5738_v3 = vld [vmem:[%s7385_s0 + $0x408] sm:$0xff]   ;;  %v5739_v4 = vld [vmem:[%s7385_s0 + $0xf0] sm:$0xff]  }
  0x18   :  { %5251 = vmatprep.subr.bf16.mxu0 %v5677_v8  ;;  %5661 = vmatprep.subr.bf16.mxu1 %v5677_v8  ;;  %v5741_v5 = vld [vmem:[%s7385_s0 + $0x410] sm:$0xff]   ;;  %v5740_v6 = vld [vmem:[%s7385_s0 + $0xf8] sm:$0xff]  }
  0x19   :  { %v5742_v7 = vld [vmem:[%s7385_s0 + $0x418] sm:$0xff]  }
  0x1b   :  { %5252 = vmatpush3.bf16.msra.mxu0 %v5677_v8  ;;  %5669 = vmatpush3.bf16.msra.mxu1 %v5677_v8  ;;  %v5743_v8 = vld [vmem:[%s7385_s0 + $0x100] sm:$0xff]  }
  0x1c   :  { %5253 = vmatprep.subr.bf16.mxu0 %v5678_v9  ;;  %5662 = vmatprep.subr.bf16.mxu1 %v5678_v9 }
  0x1f   :  { %5254 = vmatpush3.bf16.msra.mxu0 %v5678_v9  ;;  %5670 = vmatpush3.bf16.msra.mxu1 %v5678_v9  ;;  %v5745_v9 = vld [vmem:[%s7385_s0 + $0x420] sm:$0xff]  }
  0x22   :  { %5256 = vmatmul.mubr.bf16.vlgmr.msra.gmra.mrb[0].mxu0 %v5680_v10  ;;  %5456 = vmatmul.mubr.bf16.vlgmr.msra.gmra.mrb[0].mxu1 %v5682_v11  ;;  %v5744_v10 = vld [vmem:[%s7385_s0 + $0x108] sm:$0xff]  }
  0x23   :  { %5259 = vmatprep.mubr.bf16.mxu0 %v5683_v12  ;;  %5459 = vmatprep.mubr.bf16.mxu1 %v5685_v13  ;;  %v5746_v11 = vld [vmem:[%s7385_s0 + $0x428] sm:$0xff]   ;;  %v5747_v12 = vld [vmem:[%s7385_s0 + $0x110] sm:$0xff]  }
  0x24   :  { %v5749_v13 = vld [vmem:[%s7385_s0 + $0x430] sm:$0xff]  }
  0x2a   :  { %5260 = vmatmul.mubr.bf16.gmra.mrb[4].mxu0 %v5684_v14  ;;  %5460 = vmatmul.mubr.bf16.gmra.mrb[4].mxu1 %v5686_v15  ;;  %v5748_v14 = vld [vmem:[%s7385_s0 + $0x118] sm:$0xff]  }
  0x2b   :  { %5263 = vmatprep.mubr.bf16.mxu0 %v5687_v16  ;;  %5463 = vmatprep.mubr.bf16.mxu1 %v5689_v17  ;;  %v5750_v15 = vld [vmem:[%s7385_s0 + $0x438] sm:$0xff]   ;;  %v5751_v16 = vld [vmem:[%s7385_s0 + $0x120] sm:$0xff]  }
  0x2c   :  { %v5753_v17 = vld [vmem:[%s7385_s0 + $0x440] sm:$0xff]  }
  0x32   :  { %5264 = vmatmul.mubr.bf16.gmra.mrb[8].mxu0 %v5688_v18  ;;  %5464 = vmatmul.mubr.bf16.gmra.mrb[8].mxu1 %v5690_v19  ;;  %v5752_v18 = vld [vmem:[%s7385_s0 + $0x128] sm:$0xff]  }
  0x33   :  { %5267 = vmatprep.mubr.bf16.mxu0 %v5691_v20  ;;  %5467 = vmatprep.mubr.bf16.mxu1 %v5693_v21  ;;  %v5754_v19 = vld [vmem:[%s7385_s0 + $0x448] sm:$0xff]   ;;  %v5755_v20 = vld [vmem:[%s7385_s0 + $0x130] sm:$0xff]  }
  0x34   :  { %v5757_v21 = vld [vmem:[%s7385_s0 + $0x450] sm:$0xff]  }
  0x3a   :  { %5268 = vmatmul.mubr.bf16.gmra.mrb[12].mxu0 %v5692_v22  ;;  %5468 = vmatmul.mubr.bf16.gmra.mrb[12].mxu1 %v5694_v23  ;;  %v5756_v22 = vld [vmem:[%s7385_s0 + $0x138] sm:$0xff]  }
  0x3b   :  { %5271 = vmatprep.mubr.bf16.mxu0 %v5695_v24  ;;  %5471 = vmatprep.mubr.bf16.mxu1 %v5697_v25  ;;  %v5758_v23 = vld [vmem:[%s7385_s0 + $0x458] sm:$0xff]   ;;  %v5759_v24 = vld [vmem:[%s7385_s0 + $0x140] sm:$0xff]  }
  0x3c   :  { %v5761_v25 = vld [vmem:[%s7385_s0 + $0x460] sm:$0xff]  }
  0x42   :  { %5272 = vmatmul.mubr.bf16.gmra.mrb[16].mxu0 %v5696_v26  ;;  %5472 = vmatmul.mubr.bf16.gmra.mrb[16].mxu1 %v5698_v27  ;;  %v5760_v26 = vld [vmem:[%s7385_s0 + $0x148] sm:$0xff]  }
  0x43   :  { %5275 = vmatprep.mubr.bf16.mxu0 %v5699_v28  ;;  %5475 = vmatprep.mubr.bf16.mxu1 %v5701_v29  ;;  %v5762_v27 = vld [vmem:[%s7385_s0 + $0x468] sm:$0xff]   ;;  %v5763_v28 = vld [vmem:[%s7385_s0 + $0x150] sm:$0xff]  }
  0x44   :  { %v5765_v29 = vld [vmem:[%s7385_s0 + $0x470] sm:$0xff]  }
  0x4a   :  { %5276 = vmatmul.mubr.bf16.gmra.mrb[20].mxu0 %v5700_v30  ;;  %5476 = vmatmul.mubr.bf16.gmra.mrb[20].mxu1 %v5702_v31  ;;  %v5764_v30 = vld [vmem:[%s7385_s0 + $0x158] sm:$0xff]  }
  0x4b   :  { %5279 = vmatprep.mubr.bf16.mxu0 %v5703_v32  ;;  %5479 = vmatprep.mubr.bf16.mxu1 %v5705_v33  ;;  %v5766_v31 = vld [vmem:[%s7385_s0 + $0x478] sm:$0xff]   ;;  %v5767_v32 = vld [vmem:[%s7385_s0 + $0x160] sm:$0xff]  }
  0x4c   :  { %v5769_v33 = vld [vmem:[%s7385_s0 + $0x480] sm:$0xff]  }
  0x52   :  { %5280 = vmatmul.mubr.bf16.gmra.mrb[24].mxu0 %v5704_v34  ;;  %5480 = vmatmul.mubr.bf16.gmra.mrb[24].mxu1 %v5706_v35  ;;  %v5768_v34 = vld [vmem:[%s7385_s0 + $0x168] sm:$0xff]  }
  0x53   :  { %5283 = vmatprep.mubr.bf16.mxu0 %v5707_v36  ;;  %5483 = vmatprep.mubr.bf16.mxu1 %v5709_v37  ;;  %v5770_v35 = vld [vmem:[%s7385_s0 + $0x488] sm:$0xff]   ;;  %v5771_v36 = vld [vmem:[%s7385_s0 + $0x170] sm:$0xff]  }
  0x54   :  { %v5773_v37 = vld [vmem:[%s7385_s0 + $0x490] sm:$0xff]  }
  0x5a   :  { %5284 = vmatmul.mubr.bf16.gmra.mrb[28].mxu0 %v5708_v38  ;;  %5484 = vmatmul.mubr.bf16.gmra.mrb[28].mxu1 %v5710_v39  ;;  %v5772_v38 = vld [vmem:[%s7385_s0 + $0x178] sm:$0xff]  }
  0x5b   :  { %5287 = vmatprep.mubr.bf16.mxu0 %v5711_v40  ;;  %5487 = vmatprep.mubr.bf16.mxu1 %v5713_v41  ;;  %v5774_v39 = vld [vmem:[%s7385_s0 + $0x498] sm:$0xff]   ;;  %v5775_v40 = vld [vmem:[%s7385_s0 + $0x180] sm:$0xff]  }
  0x5c   :  { %v5777_v41 = vld [vmem:[%s7385_s0 + $0x4a0] sm:$0xff]  }
  0x62   :  { %5288 = vmatmul.mubr.bf16.gmra.mrb[32].mxu0 %v5712_v42  ;;  %5488 = vmatmul.mubr.bf16.gmra.mrb[32].mxu1 %v5714_v43  ;;  %v5776_v42 = vld [vmem:[%s7385_s0 + $0x188] sm:$0xff]  }
  0x63   :  { %5291 = vmatprep.mubr.bf16.mxu0 %v5715_v44  ;;  %5491 = vmatprep.mubr.bf16.mxu1 %v5717_v45  ;;  %v5778_v43 = vld [vmem:[%s7385_s0 + $0x4a8] sm:$0xff]   ;;  %v5779_v44 = vld [vmem:[%s7385_s0 + $0x190] sm:$0xff]  }
  0x64   :  { %v5781_v45 = vld [vmem:[%s7385_s0 + $0x4b0] sm:$0xff]  }
  0x6a   :  { %5292 = vmatmul.mubr.bf16.gmra.mrb[36].mxu0 %v5716_v46  ;;  %5492 = vmatmul.mubr.bf16.gmra.mrb[36].mxu1 %v5718_v47  ;;  %v5780_v46 = vld [vmem:[%s7385_s0 + $0x198] sm:$0xff]  }
  0x6b   :  { %5295 = vmatprep.mubr.bf16.mxu0 %v5719_v48  ;;  %5495 = vmatprep.mubr.bf16.mxu1 %v5721_v49  ;;  %v5782_v47 = vld [vmem:[%s7385_s0 + $0x4b8] sm:$0xff]   ;;  %v5783_v48 = vld [vmem:[%s7385_s0 + $0x1a0] sm:$0xff]  }
  0x6c   :  { %v5785_v49 = vld [vmem:[%s7385_s0 + $0x4c0] sm:$0xff]  }
  0x72   :  { %5296 = vmatmul.mubr.bf16.gmra.mrb[40].mxu0 %v5720_v50  ;;  %5496 = vmatmul.mubr.bf16.gmra.mrb[40].mxu1 %v5722_v51  ;;  %v5784_v50 = vld [vmem:[%s7385_s0 + $0x1a8] sm:$0xff]  }
  0x73   :  { %5299 = vmatprep.mubr.bf16.mxu0 %v5723_v52  ;;  %5499 = vmatprep.mubr.bf16.mxu1 %v5725_v53  ;;  %v5786_v51 = vld [vmem:[%s7385_s0 + $0x4c8] sm:$0xff]   ;;  %v5787_v52 = vld [vmem:[%s7385_s0 + $0x1b0] sm:$0xff]  }
  0x74   :  { %v5789_v53 = vld [vmem:[%s7385_s0 + $0x4d0] sm:$0xff]  }
  0x7a   :  { %5300 = vmatmul.mubr.bf16.gmra.mrb[44].mxu0 %v5724_v54  ;;  %5500 = vmatmul.mubr.bf16.gmra.mrb[44].mxu1 %v5726_v55 }
  0x7b   :  { %5303 = vmatprep.mubr.bf16.mxu0 %v5727_v56  ;;  %5503 = vmatprep.mubr.bf16.mxu1 %v5729_v57 }
  0x82   :  { %5304 = vmatmul.mubr.bf16.gmra.mrb[48].mxu0 %v5728_v58  ;;  %5504 = vmatmul.mubr.bf16.gmra.mrb[48].mxu1 %v5730_v59  ;;  %v5788_v58 = vld [vmem:[%s7385_s0 + $0x1b8] sm:$0xff]  }
  0x83   :  { %5307 = vmatprep.mubr.bf16.mxu0 %v5731_v60  ;;  %5507 = vmatprep.mubr.bf16.mxu1 %v5733_v61  ;;  %v5790_v59 = vld [vmem:[%s7385_s0 + $0x4d8] sm:$0xff]  }
  0x8a   :  { %5308 = vmatmul.mubr.bf16.gmra.mrb[52].mxu0 %v5732_v62  ;;  %5508 = vmatmul.mubr.bf16.gmra.mrb[52].mxu1 %v5734_v63  ;;  %v5791_v62 = vld [vmem:[%s7385_s0 + $0x1c0] sm:$0xff]  }
  0x8b   :  { %5311 = vmatprep.mubr.bf16.mxu0 %v5735_v0  ;;  %5511 = vmatprep.mubr.bf16.mxu1 %v5737_v1  ;;  %v5793_v63 = vld [vmem:[%s7385_s0 + $0x4e0] sm:$0xff]  }
  0x92   :  { %5312 = vmatmul.mubr.bf16.gmra.mrb[56].mxu0 %v5736_v2  ;;  %5512 = vmatmul.mubr.bf16.gmra.mrb[56].mxu1 %v5738_v3 }
  0x93   :  { %5315 = vmatprep.mubr.bf16.mxu0 %v5739_v4  ;;  %5515 = vmatprep.mubr.bf16.mxu1 %v5741_v5 }
  0x9a   :  { %5316 = vmatmul.mubr.bf16.gmra.mrb[60].mxu0 %v5740_v6  ;;  %5516 = vmatmul.mubr.bf16.gmra.mrb[60].mxu1 %v5742_v7  ;;  %v5792_v6 = vld [vmem:[%s7385_s0 + $0x1c8] sm:$0xff]  }
  0x9b   :  { %5319 = vmatprep.mubr.bf16.mxu0 %v5743_v8  ;;  %5519 = vmatprep.mubr.bf16.mxu1 %v5745_v9  ;;  %v5794_v7 = vld [vmem:[%s7385_s0 + $0x4e8] sm:$0xff]  }
  0xa2   :  { %5320 = vmatmul.mubr.bf16.gmra.mrb[64].mxu0 %v5744_v10  ;;  %5520 = vmatmul.mubr.bf16.gmra.mrb[64].mxu1 %v5746_v11  ;;  %v5795_v10 = vld [vmem:[%s7385_s0 + $0x1d0] sm:$0xff]  }
  0xa3   :  { %5323 = vmatprep.mubr.bf16.mxu0 %v5747_v12  ;;  %5523 = vmatprep.mubr.bf16.mxu1 %v5749_v13  ;;  %v5797_v11 = vld [vmem:[%s7385_s0 + $0x4f0] sm:$0xff]  }
  0xaa   :  { %5324 = vmatmul.mubr.bf16.gmra.mrb[68].mxu0 %v5748_v14  ;;  %5524 = vmatmul.mubr.bf16.gmra.mrb[68].mxu1 %v5750_v15 }
  0xab   :  { %5327 = vmatprep.mubr.bf16.mxu0 %v5751_v16  ;;  %5527 = vmatprep.mubr.bf16.mxu1 %v5753_v17 }
  0xb2   :  { %5328 = vmatmul.mubr.bf16.gmra.mrb[72].mxu0 %v5752_v18  ;;  %5528 = vmatmul.mubr.bf16.gmra.mrb[72].mxu1 %v5754_v19  ;;  %v5796_v18 = vld [vmem:[%s7385_s0 + $0x1d8] sm:$0xff]  }
  0xb3   :  { %5331 = vmatprep.mubr.bf16.mxu0 %v5755_v20  ;;  %5531 = vmatprep.mubr.bf16.mxu1 %v5757_v21  ;;  %v5798_v19 = vld [vmem:[%s7385_s0 + $0x4f8] sm:$0xff]  }
  0xba   :  { %5332 = vmatmul.mubr.bf16.gmra.mrb[76].mxu0 %v5756_v22  ;;  %5532 = vmatmul.mubr.bf16.gmra.mrb[76].mxu1 %v5758_v23  ;;  %v5799_v22 = vld [vmem:[%s7385_s0 + $0x1e0] sm:$0xff]  }
  0xbb   :  { %5335 = vmatprep.mubr.bf16.mxu0 %v5759_v24  ;;  %5535 = vmatprep.mubr.bf16.mxu1 %v5761_v25  ;;  %v5801_v23 = vld [vmem:[%s7385_s0 + $0x500] sm:$0xff]  }
  0xc2   :  { %5336 = vmatmul.mubr.bf16.gmra.mrb[80].mxu0 %v5760_v26  ;;  %5536 = vmatmul.mubr.bf16.gmra.mrb[80].mxu1 %v5762_v27 }
  0xc3   :  { %5339 = vmatprep.mubr.bf16.mxu0 %v5763_v28  ;;  %5539 = vmatprep.mubr.bf16.mxu1 %v5765_v29 }
  0xca   :  { %5340 = vmatmul.mubr.bf16.gmra.mrb[84].mxu0 %v5764_v30  ;;  %5540 = vmatmul.mubr.bf16.gmra.mrb[84].mxu1 %v5766_v31  ;;  %v5800_v30 = vld [vmem:[%s7385_s0 + $0x1e8] sm:$0xff]  }
  0xcb   :  { %5343 = vmatprep.mubr.bf16.mxu0 %v5767_v32  ;;  %5543 = vmatprep.mubr.bf16.mxu1 %v5769_v33  ;;  %v5802_v31 = vld [vmem:[%s7385_s0 + $0x508] sm:$0xff]  }
  0xd2   :  { %5344 = vmatmul.mubr.bf16.gmra.mrb[88].mxu0 %v5768_v34  ;;  %5544 = vmatmul.mubr.bf16.gmra.mrb[88].mxu1 %v5770_v35  ;;  %v5803_v34 = vld [vmem:[%s7385_s0 + $0x1f0] sm:$0xff]  }
  0xd3   :  { %5347 = vmatprep.mubr.bf16.mxu0 %v5771_v36  ;;  %5547 = vmatprep.mubr.bf16.mxu1 %v5773_v37  ;;  %v5805_v35 = vld [vmem:[%s7385_s0 + $0x510] sm:$0xff]  }
  0xda   :  { %5348 = vmatmul.mubr.bf16.gmra.mrb[92].mxu0 %v5772_v38  ;;  %5548 = vmatmul.mubr.bf16.gmra.mrb[92].mxu1 %v5774_v39 }
  0xdb   :  { %5351 = vmatprep.mubr.bf16.mxu0 %v5775_v40  ;;  %5551 = vmatprep.mubr.bf16.mxu1 %v5777_v41 }
  0xe2   :  { %5352 = vmatmul.mubr.bf16.gmra.mrb[96].mxu0 %v5776_v42  ;;  %5552 = vmatmul.mubr.bf16.gmra.mrb[96].mxu1 %v5778_v43  ;;  %v5804_v42 = vld [vmem:[%s7385_s0 + $0x1f8] sm:$0xff]  }
  0xe3   :  { %5355 = vmatprep.mubr.bf16.mxu0 %v5779_v44  ;;  %5555 = vmatprep.mubr.bf16.mxu1 %v5781_v45  ;;  %v5806_v43 = vld [vmem:[%s7385_s0 + $0x518] sm:$0xff]  }
  0xea   :  { %5356 = vmatmul.mubr.bf16.gmra.mrb[100].mxu0 %v5780_v46  ;;  %5556 = vmatmul.mubr.bf16.gmra.mrb[100].mxu1 %v5782_v47  ;;  %v5807_v46 = vld [vmem:[%s7385_s0 + $0x200] sm:$0xff]  }
  0xeb   :  { %5359 = vmatprep.mubr.bf16.mxu0 %v5783_v48  ;;  %5559 = vmatprep.mubr.bf16.mxu1 %v5785_v49  ;;  %v5809_v47 = vld [vmem:[%s7385_s0 + $0x520] sm:$0xff]  }
  0xf2   :  { %5360 = vmatmul.mubr.bf16.gmra.mrb[104].mxu0 %v5784_v50  ;;  %5560 = vmatmul.mubr.bf16.gmra.mrb[104].mxu1 %v5786_v51 }
  0xf3   :  { %5363 = vmatprep.mubr.bf16.mxu0 %v5787_v52  ;;  %5563 = vmatprep.mubr.bf16.mxu1 %v5789_v53 }
  0xf5   :  { %v6254_v54 = vpop.f32.mrb[0].mxu0  ;;  %v6256_v55 = vpop.f32.mrb[0].mxu1 }
  0xf6   :  { %v6258_v56 = vpop.f32.mrb[1].mxu0  ;;  %v6260_v57 = vpop.f32.mrb[1].mxu1 }
  0xf7   :  { %v6268_v60 = vpop.f32.mrb[2].mxu0  ;;  %v6270_v61 = vpop.f32.mrb[2].mxu1 }
  0xf8   :  { %v6278_v0 = vpop.f32.mrb[3].mxu0  ;;  %v6280_v1 = vpop.f32.mrb[3].mxu1 }
  0xfa   :  { %5364 = vmatmul.mubr.bf16.gmra.mrb[108].mxu0 %v5788_v58  ;;  %5564 = vmatmul.mubr.bf16.gmra.mrb[108].mxu1 %v5790_v59  ;;  %v5808_v58 = vld [vmem:[%s7385_s0 + $0x208] sm:$0xff]  }
  0xfb   :  { %5367 = vmatprep.mubr.bf16.mxu0 %v5791_v62  ;;  %5567 = vmatprep.mubr.bf16.mxu1 %v5793_v63  ;;  %v5810_v59 = vld [vmem:[%s7385_s0 + $0x528] sm:$0xff]  }
  0xfd   :  { %v6282_v2 = vpop.f32.mrb[4].mxu0  ;;  %v6284_v3 = vpop.f32.mrb[4].mxu1 }
  0xfe   :  { %v6286_v4 = vpop.f32.mrb[5].mxu0  ;;  %v6288_v5 = vpop.f32.mrb[5].mxu1 }
  0xff   :  { %v6296_v8 = vpop.f32.mrb[6].mxu0  ;;  %v6298_v9 = vpop.f32.mrb[6].mxu1 }
 0x100   :  { %v6306_v12 = vpop.f32.mrb[7].mxu0  ;;  %v6308_v13 = vpop.f32.mrb[7].mxu1 }
 0x102   :  { %5368 = vmatmul.mubr.bf16.gmra.mrb[112].mxu0 %v5792_v6  ;;  %5568 = vmatmul.mubr.bf16.gmra.mrb[112].mxu1 %v5794_v7  ;;  %v5811_v6 = vld [vmem:[%s7385_s0 + $0x210] sm:$0xff]  }
 0x103   :  { %5371 = vmatprep.mubr.bf16.mxu0 %v5795_v10  ;;  %5571 = vmatprep.mubr.bf16.mxu1 %v5797_v11  ;;  %v5813_v7 = vld [vmem:[%s7385_s0 + $0x530] sm:$0xff]  }
 0x105   :  { %v6310_v14 = vpop.f32.mrb[8].mxu0  ;;  %v6312_v15 = vpop.f32.mrb[8].mxu1 }
 0x106   :  { %v6314_v16 = vpop.f32.mrb[9].mxu0  ;;  %v6316_v17 = vpop.f32.mrb[9].mxu1 }
 0x107   :  { %v6324_v20 = vpop.f32.mrb[10].mxu0  ;;  %v6326_v21 = vpop.f32.mrb[10].mxu1 }
 0x108   :  { %v6334_v24 = vpop.f32.mrb[11].mxu0  ;;  %v6336_v25 = vpop.f32.mrb[11].mxu1 }
 0x10a   :  { %5372 = vmatmul.mubr.bf16.gmra.mrb[116].mxu0 %v5796_v18  ;;  %5572 = vmatmul.mubr.bf16.gmra.mrb[116].mxu1 %v5798_v19 }
 0x10b   :  { %5375 = vmatprep.mubr.bf16.mxu0 %v5799_v22  ;;  %5575 = vmatprep.mubr.bf16.mxu1 %v5801_v23 }
 0x10d   :  { %v6338_v26 = vpop.f32.mrb[12].mxu0  ;;  %v6340_v27 = vpop.f32.mrb[12].mxu1 }
 0x10e   :  { %v6342_v28 = vpop.f32.mrb[13].mxu0  ;;  %v6344_v29 = vpop.f32.mrb[13].mxu1 }
 0x10f   :  { %v6352_v32 = vpop.f32.mrb[14].mxu0  ;;  %v6354_v33 = vpop.f32.mrb[14].mxu1 }
 0x110   :  { %v6362_v36 = vpop.f32.mrb[15].mxu0  ;;  %v6364_v37 = vpop.f32.mrb[15].mxu1 }
 0x112   :  { %5376 = vmatmul.mubr.bf16.gmra.mrb[120].mxu0 %v5800_v30  ;;  %5576 = vmatmul.mubr.bf16.gmra.mrb[120].mxu1 %v5802_v31  ;;  %v5812_v30 = vld [vmem:[%s7385_s0 + $0x218] sm:$0xff]  }
 0x113   :  { %5379 = vmatprep.mubr.bf16.mxu0 %v5803_v34  ;;  %5579 = vmatprep.mubr.bf16.mxu1 %v5805_v35  ;;  %v5814_v31 = vld [vmem:[%s7385_s0 + $0x538] sm:$0xff]  }
 0x115   :  { %v6366_v38 = vpop.f32.mrb[16].mxu0  ;;  %v6368_v39 = vpop.f32.mrb[16].mxu1 }
 0x116   :  { %v6370_v40 = vpop.f32.mrb[17].mxu0  ;;  %v6372_v41 = vpop.f32.mrb[17].mxu1 }
 0x117   :  { %v6380_v44 = vpop.f32.mrb[18].mxu0  ;;  %v6382_v45 = vpop.f32.mrb[18].mxu1 }
 0x118   :  { %v6390_v48 = vpop.f32.mrb[19].mxu0  ;;  %v6392_v49 = vpop.f32.mrb[19].mxu1 }
 0x11a   :  { %5380 = vmatmul.mubr.bf16.gmra.mrb[124].mxu0 %v5804_v42  ;;  %5580 = vmatmul.mubr.bf16.gmra.mrb[124].mxu1 %v5806_v43  ;;  %v5815_v42 = vld [vmem:[%s7385_s0 + $0x220] sm:$0xff]  }
 0x11b   :  { %5383 = vmatprep.mubr.bf16.mxu0 %v5807_v46  ;;  %5583 = vmatprep.mubr.bf16.mxu1 %v5809_v47  ;;  %v5817_v43 = vld [vmem:[%s7385_s0 + $0x540] sm:$0xff]  }
 0x11d   :  { %v6394_v50 = vpop.f32.mrb[20].mxu0  ;;  %v6396_v51 = vpop.f32.mrb[20].mxu1 }
 0x11e   :  { %v6398_v52 = vpop.f32.mrb[21].mxu0  ;;  %v6400_v53 = vpop.f32.mrb[21].mxu1 }
 0x11f   :  { %v6408_v62 = vpop.f32.mrb[22].mxu0  ;;  %v6410_v63 = vpop.f32.mrb[22].mxu1 }
 0x120   :  { %7388 = vst [vmem:[#allocation2_spill] sm:$0xff] %v6410_v63  ;;  %v6418_v10 = vpop.f32.mrb[23].mxu0  ;;  %v6420_v11 = vpop.f32.mrb[23].mxu1 }
 0x121   :  { %7389 = vst [vmem:[#allocation3_spill] sm:$0xff] %v6420_v11 }
 0x122   :  { %5384 = vmatmul.mubr.bf16.gmra.mrb[128].mxu0 %v5808_v58  ;;  %5584 = vmatmul.mubr.bf16.gmra.mrb[128].mxu1 %v5810_v59 }
 0x123   :  { %5387 = vmatprep.mubr.bf16.mxu0 %v5811_v6  ;;  %5587 = vmatprep.mubr.bf16.mxu1 %v5813_v7 }
 0x125   :  { %v6422_v18 = vpop.f32.mrb[24].mxu0  ;;  %v6424_v19 = vpop.f32.mrb[24].mxu1 }
 0x126   :  { %7390 = vst [vmem:[#allocation4_spill] sm:$0xff] %v6422_v18  ;;  %7391 = vst [vmem:[#allocation5_spill] sm:$0xff] %v6424_v19  ;;  %v6426_v22 = vpop.f32.mrb[25].mxu0  ;;  %v6428_v23 = vpop.f32.mrb[25].mxu1 }
 0x127   :  { %7392 = vst [vmem:[#allocation6_spill] sm:$0xff] %v6426_v22  ;;  %7393 = vst [vmem:[#allocation7_spill] sm:$0xff] %v6428_v23  ;;  %v6436_v34 = vpop.f32.mrb[26].mxu0  ;;  %v6438_v35 = vpop.f32.mrb[26].mxu1 }
 0x128   :  { %7394 = vst [vmem:[#allocation8_spill] sm:$0xff] %v6436_v34  ;;  %7395 = vst [vmem:[#allocation9_spill] sm:$0xff] %v6438_v35  ;;  %v6446_v46 = vpop.f32.mrb[27].mxu0  ;;  %v6448_v47 = vpop.f32.mrb[27].mxu1  ;;  %v5816_v35 = vld [vmem:[%s7385_s0 + $0x228] sm:$0xff]  }
 0x129   :  { %7396 = vst [vmem:[#allocation10_spill] sm:$0xff] %v6446_v46  ;;  %7397 = vst [vmem:[#allocation11_spill] sm:$0xff] %v6448_v47  ;;  %v5818_v47 = vld [vmem:[%s7385_s0 + $0x548] sm:$0xff]   ;;  %v5820_v46 = vld [vmem:[%s7385_s0 + $0x238] sm:$0xff]  }
 0x12a   :  { %5388 = vmatmul.mubr.bf16.gmra.mrb[132].mxu0 %v5812_v30  ;;  %5588 = vmatmul.mubr.bf16.gmra.mrb[132].mxu1 %v5814_v31 }
 0x12b   :  { %5391 = vmatprep.mubr.bf16.mxu0 %v5815_v42  ;;  %5591 = vmatprep.mubr.bf16.mxu1 %v5817_v43  ;;  %v5819_v42 = vld [vmem:[%s7385_s0 + $0x230] sm:$0xff]  }
 0x12c   :  { %v5821_v43 = vld [vmem:[%s7385_s0 + $0x550] sm:$0xff]  }
 0x12d   :  { %v6450_v58 = vpop.f32.mrb[28].mxu0  ;;  %v6452_v59 = vpop.f32.mrb[28].mxu1 }
 0x12e   :  { %7398 = vst [vmem:[#allocation12_spill] sm:$0xff] %v6450_v58  ;;  %7399 = vst [vmem:[#allocation13_spill] sm:$0xff] %v6452_v59  ;;  %v6454_v6 = vpop.f32.mrb[29].mxu0  ;;  %v6456_v7 = vpop.f32.mrb[29].mxu1 }
 0x12f   :  { %7400 = vst [vmem:[#allocation14_spill] sm:$0xff] %v6454_v6  ;;  %7401 = vst [vmem:[#allocation15_spill] sm:$0xff] %v6456_v7  ;;  %v6464_v30 = vpop.f32.mrb[30].mxu0  ;;  %v6466_v31 = vpop.f32.mrb[30].mxu1 }
 0x130   :  { %7402 = vst [vmem:[#allocation16_spill] sm:$0xff] %v6464_v30  ;;  %7403 = vst [vmem:[#allocation17_spill] sm:$0xff] %v6466_v31  ;;  %v6474_v7 = vpop.f32.mrb[31].mxu0  ;;  %v6476_v59 = vpop.f32.mrb[31].mxu1 }
 0x131   :  { %7404 = vst [vmem:[#allocation18_spill] sm:$0xff] %v6474_v7  ;;  %7405 = vst [vmem:[#allocation19_spill] sm:$0xff] %v6476_v59  ;;  %v5822_v59 = vld [vmem:[%s7385_s0 + $0x558] sm:$0xff]   ;;  %v5824_v7 = vld [vmem:[%s7385_s0 + $0x248] sm:$0xff]  }
 0x132   :  { %5392 = vmatmul.mubr.bf16.gmra.mrb[136].mxu0 %v5816_v35  ;;  %5592 = vmatmul.mubr.bf16.gmra.mrb[136].mxu1 %v5818_v47 }
 0x133   :  { %5395 = vmatprep.mubr.bf16.mxu0 %v5819_v42  ;;  %5595 = vmatprep.mubr.bf16.mxu1 %v5821_v43  ;;  %v5823_v42 = vld [vmem:[%s7385_s0 + $0x240] sm:$0xff]  }
 0x134   :  { %v5825_v43 = vld [vmem:[%s7385_s0 + $0x560] sm:$0xff]  }
 0x135   :  { %v6478_v6 = vpop.f32.mrb[32].mxu0  ;;  %v6480_v30 = vpop.f32.mrb[32].mxu1 }
 0x136   :  { %7406 = vst [vmem:[#allocation20_spill] sm:$0xff] %v6478_v6  ;;  %7407 = vst [vmem:[#allocation21_spill] sm:$0xff] %v6480_v30  ;;  %v6482_v31 = vpop.f32.mrb[33].mxu0  ;;  %v6484_v58 = vpop.f32.mrb[33].mxu1 }
 0x137   :  { %7408 = vst [vmem:[#allocation22_spill] sm:$0xff] %v6482_v31  ;;  %7409 = vst [vmem:[#allocation23_spill] sm:$0xff] %v6484_v58  ;;  %v6492_v35 = vpop.f32.mrb[34].mxu0  ;;  %v6494_v47 = vpop.f32.mrb[34].mxu1 }
 0x138   :  { %7410 = vst [vmem:[#allocation24_spill] sm:$0xff] %v6492_v35  ;;  %7411 = vst [vmem:[#allocation25_spill] sm:$0xff] %v6494_v47  ;;  %v6502_v58 = vpop.f32.mrb[35].mxu0  ;;  %v6504_v30 = vpop.f32.mrb[35].mxu1 }
 0x139   :  { %7412 = vst [vmem:[#allocation26_spill] sm:$0xff] %v6502_v58  ;;  %7413 = vst [vmem:[#allocation27_spill] sm:$0xff] %v6504_v30  ;;  %v5826_v30 = vld [vmem:[%s7385_s0 + $0x568] sm:$0xff]   ;;  %v5828_v58 = vld [vmem:[%s7385_s0 + $0x258] sm:$0xff]  }
 0x13a   :  { %5396 = vmatmul.mubr.bf16.gmra.mrb[140].mxu0 %v5820_v46  ;;  %5596 = vmatmul.mubr.bf16.gmra.mrb[140].mxu1 %v5822_v59 }
 0x13b   :  { %5399 = vmatprep.mubr.bf16.mxu0 %v5823_v42  ;;  %5599 = vmatprep.mubr.bf16.mxu1 %v5825_v43  ;;  %v5827_v42 = vld [vmem:[%s7385_s0 + $0x250] sm:$0xff]  }
 0x13c   :  { %v5829_v43 = vld [vmem:[%s7385_s0 + $0x570] sm:$0xff]  }
 0x13d   :  { %v6506_v31 = vpop.f32.mrb[36].mxu0  ;;  %v6508_v35 = vpop.f32.mrb[36].mxu1 }
 0x13e   :  { %7414 = vst [vmem:[#allocation28_spill] sm:$0xff] %v6506_v31  ;;  %7415 = vst [vmem:[#allocation29_spill] sm:$0xff] %v6508_v35  ;;  %v6510_v47 = vpop.f32.mrb[37].mxu0  ;;  %v6512_v6 = vpop.f32.mrb[37].mxu1 }
 0x13f   :  { %7416 = vst [vmem:[#allocation30_spill] sm:$0xff] %v6510_v47  ;;  %7417 = vst [vmem:[#allocation31_spill] sm:$0xff] %v6512_v6  ;;  %v6520_v46 = vpop.f32.mrb[38].mxu0  ;;  %v6522_v59 = vpop.f32.mrb[38].mxu1 }
 0x140   :  { %7418 = vst [vmem:[#allocation32_spill] sm:$0xff] %v6520_v46  ;;  %7419 = vst [vmem:[#allocation33_spill] sm:$0xff] %v6522_v59  ;;  %v6530_v6 = vpop.f32.mrb[39].mxu0  ;;  %v6532_v35 = vpop.f32.mrb[39].mxu1 }
 0x141   :  { %7420 = vst [vmem:[#allocation34_spill] sm:$0xff] %v6530_v6  ;;  %7421 = vst [vmem:[#allocation35_spill] sm:$0xff] %v6532_v35  ;;  %v5830_v35 = vld [vmem:[%s7385_s0 + $0x578] sm:$0xff]   ;;  %v5832_v6 = vld [vmem:[%s7385_s0 + $0x268] sm:$0xff]  }
 0x142   :  { %5400 = vmatmul.mubr.bf16.gmra.mrb[144].mxu0 %v5824_v7  ;;  %5600 = vmatmul.mubr.bf16.gmra.mrb[144].mxu1 %v5826_v30 }
 0x143   :  { %5403 = vmatprep.mubr.bf16.mxu0 %v5827_v42  ;;  %5603 = vmatprep.mubr.bf16.mxu1 %v5829_v43  ;;  %v5831_v42 = vld [vmem:[%s7385_s0 + $0x260] sm:$0xff]  }
 0x144   :  { %v5833_v43 = vld [vmem:[%s7385_s0 + $0x580] sm:$0xff]  }
 0x145   :  { %v6534_v47 = vpop.f32.mrb[40].mxu0  ;;  %v6536_v46 = vpop.f32.mrb[40].mxu1 }
 0x146   :  { %7422 = vst [vmem:[#allocation36_spill] sm:$0xff] %v6534_v47  ;;  %7423 = vst [vmem:[#allocation37_spill] sm:$0xff] %v6536_v46  ;;  %v6538_v59 = vpop.f32.mrb[41].mxu0  ;;  %v6540_v31 = vpop.f32.mrb[41].mxu1 }
 0x147   :  { %7424 = vst [vmem:[#allocation38_spill] sm:$0xff] %v6538_v59  ;;  %7425 = vst [vmem:[#allocation39_spill] sm:$0xff] %v6540_v31  ;;  %v6548_v7 = vpop.f32.mrb[42].mxu0  ;;  %v6550_v30 = vpop.f32.mrb[42].mxu1 }
 0x148   :  { %7426 = vst [vmem:[#allocation40_spill] sm:$0xff] %v6548_v7  ;;  %7427 = vst [vmem:[#allocation41_spill] sm:$0xff] %v6550_v30  ;;  %v6558_v31 = vpop.f32.mrb[43].mxu0  ;;  %v6560_v46 = vpop.f32.mrb[43].mxu1 }
 0x149   :  { %7428 = vst [vmem:[#allocation42_spill] sm:$0xff] %v6558_v31  ;;  %7429 = vst [vmem:[#allocation43_spill] sm:$0xff] %v6560_v46  ;;  %v5834_v46 = vld [vmem:[%s7385_s0 + $0x588] sm:$0xff]   ;;  %v5836_v31 = vld [vmem:[%s7385_s0 + $0x278] sm:$0xff]  }
 0x14a   :  { %5404 = vmatmul.mubr.bf16.gmra.mrb[148].mxu0 %v5828_v58  ;;  %5604 = vmatmul.mubr.bf16.gmra.mrb[148].mxu1 %v5830_v35 }
 0x14b   :  { %5407 = vmatprep.mubr.bf16.mxu0 %v5831_v42  ;;  %5607 = vmatprep.mubr.bf16.mxu1 %v5833_v43  ;;  %v5835_v42 = vld [vmem:[%s7385_s0 + $0x270] sm:$0xff]  }
 0x14c   :  { %v5837_v43 = vld [vmem:[%s7385_s0 + $0x590] sm:$0xff]  }
 0x14d   :  { %v6562_v59 = vpop.f32.mrb[44].mxu0  ;;  %v6564_v7 = vpop.f32.mrb[44].mxu1 }
 0x14e   :  { %7430 = vst [vmem:[#allocation44_spill] sm:$0xff] %v6562_v59  ;;  %7431 = vst [vmem:[#allocation45_spill] sm:$0xff] %v6564_v7  ;;  %v6566_v30 = vpop.f32.mrb[45].mxu0  ;;  %v6568_v47 = vpop.f32.mrb[45].mxu1 }
 0x14f   :  { %7432 = vst [vmem:[#allocation46_spill] sm:$0xff] %v6566_v30  ;;  %7433 = vst [vmem:[#allocation47_spill] sm:$0xff] %v6568_v47  ;;  %v6576_v58 = vpop.f32.mrb[46].mxu0  ;;  %v6578_v35 = vpop.f32.mrb[46].mxu1 }
 0x150   :  { %7434 = vst [vmem:[#allocation48_spill] sm:$0xff] %v6576_v58  ;;  %7435 = vst [vmem:[#allocation49_spill] sm:$0xff] %v6578_v35  ;;  %v6586_v47 = vpop.f32.mrb[47].mxu0  ;;  %v6588_v7 = vpop.f32.mrb[47].mxu1 }
 0x151   :  { %7436 = vst [vmem:[#allocation50_spill] sm:$0xff] %v6586_v47  ;;  %7437 = vst [vmem:[#allocation51_spill] sm:$0xff] %v6588_v7  ;;  %v5838_v7 = vld [vmem:[%s7385_s0 + $0x598] sm:$0xff]   ;;  %v5840_v47 = vld [vmem:[%s7385_s0 + $0x288] sm:$0xff]  }
 0x152   :  { %5408 = vmatmul.mubr.bf16.gmra.mrb[152].mxu0 %v5832_v6  ;;  %5608 = vmatmul.mubr.bf16.gmra.mrb[152].mxu1 %v5834_v46 }
 0x153   :  { %5411 = vmatprep.mubr.bf16.mxu0 %v5835_v42  ;;  %5611 = vmatprep.mubr.bf16.mxu1 %v5837_v43  ;;  %v5839_v42 = vld [vmem:[%s7385_s0 + $0x280] sm:$0xff]  }
 0x154   :  { %v5841_v43 = vld [vmem:[%s7385_s0 + $0x5a0] sm:$0xff]  }
 0x155   :  { %v6590_v30 = vpop.f32.mrb[48].mxu0  ;;  %v6592_v58 = vpop.f32.mrb[48].mxu1 }
 0x156   :  { %7438 = vst [vmem:[#allocation52_spill] sm:$0xff] %v6590_v30  ;;  %7439 = vst [vmem:[#allocation53_spill] sm:$0xff] %v6592_v58  ;;  %v6594_v35 = vpop.f32.mrb[49].mxu0  ;;  %v6596_v59 = vpop.f32.mrb[49].mxu1 }
 0x157   :  { %7440 = vst [vmem:[#allocation54_spill] sm:$0xff] %v6594_v35  ;;  %7441 = vst [vmem:[#allocation55_spill] sm:$0xff] %v6596_v59  ;;  %v6604_v6 = vpop.f32.mrb[50].mxu0  ;;  %v6606_v46 = vpop.f32.mrb[50].mxu1 }
 0x158   :  { %7442 = vst [vmem:[#allocation56_spill] sm:$0xff] %v6604_v6  ;;  %7443 = vst [vmem:[#allocation57_spill] sm:$0xff] %v6606_v46  ;;  %v6614_v59 = vpop.f32.mrb[51].mxu0  ;;  %v6616_v58 = vpop.f32.mrb[51].mxu1 }
 0x159   :  { %7444 = vst [vmem:[#allocation58_spill] sm:$0xff] %v6614_v59  ;;  %7445 = vst [vmem:[#allocation59_spill] sm:$0xff] %v6616_v58  ;;  %v5842_v58 = vld [vmem:[%s7385_s0 + $0x5a8] sm:$0xff]   ;;  %v5844_v59 = vld [vmem:[%s7385_s0 + $0x298] sm:$0xff]  }
 0x15a   :  { %5412 = vmatmul.mubr.bf16.gmra.mrb[156].mxu0 %v5836_v31  ;;  %5612 = vmatmul.mubr.bf16.gmra.mrb[156].mxu1 %v5838_v7 }
 0x15b   :  { %5415 = vmatprep.mubr.bf16.mxu0 %v5839_v42  ;;  %5615 = vmatprep.mubr.bf16.mxu1 %v5841_v43  ;;  %v5843_v42 = vld [vmem:[%s7385_s0 + $0x290] sm:$0xff]  }
 0x15c   :  { %v5845_v43 = vld [vmem:[%s7385_s0 + $0x5b0] sm:$0xff]  }
 0x15d   :  { %v6618_v35 = vpop.f32.mrb[52].mxu0  ;;  %v6620_v6 = vpop.f32.mrb[52].mxu1 }
 0x15e   :  { %7446 = vst [vmem:[#allocation60_spill] sm:$0xff] %v6618_v35  ;;  %7447 = vst [vmem:[#allocation61_spill] sm:$0xff] %v6620_v6  ;;  %v6622_v46 = vpop.f32.mrb[53].mxu0  ;;  %v6624_v30 = vpop.f32.mrb[53].mxu1 }
 0x15f   :  { %7448 = vst [vmem:[#allocation62_spill] sm:$0xff] %v6622_v46  ;;  %7449 = vst [vmem:[#allocation63_spill] sm:$0xff] %v6624_v30  ;;  %v6632_v31 = vpop.f32.mrb[54].mxu0  ;;  %v6634_v7 = vpop.f32.mrb[54].mxu1 }
 0x160   :  { %7450 = vst [vmem:[#allocation64_spill] sm:$0xff] %v6632_v31  ;;  %7451 = vst [vmem:[#allocation65_spill] sm:$0xff] %v6634_v7  ;;  %v6642_v30 = vpop.f32.mrb[55].mxu0  ;;  %v6644_v6 = vpop.f32.mrb[55].mxu1 }
 0x161   :  { %7452 = vst [vmem:[#allocation66_spill] sm:$0xff] %v6642_v30  ;;  %7453 = vst [vmem:[#allocation67_spill] sm:$0xff] %v6644_v6  ;;  %v5846_v6 = vld [vmem:[%s7385_s0 + $0x5b8] sm:$0xff]   ;;  %v5848_v30 = vld [vmem:[%s7385_s0 + $0x2a8] sm:$0xff]  }
 0x162   :  { %5416 = vmatmul.mubr.bf16.gmra.mrb[160].mxu0 %v5840_v47  ;;  %5616 = vmatmul.mubr.bf16.gmra.mrb[160].mxu1 %v5842_v58 }
 0x163   :  { %5419 = vmatprep.mubr.bf16.mxu0 %v5843_v42  ;;  %5619 = vmatprep.mubr.bf16.mxu1 %v5845_v43  ;;  %v5847_v42 = vld [vmem:[%s7385_s0 + $0x2a0] sm:$0xff]  }
 0x164   :  { %v5849_v43 = vld [vmem:[%s7385_s0 + $0x5c0] sm:$0xff]  }
 0x165   :  { %v6646_v46 = vpop.f32.mrb[56].mxu0  ;;  %v6648_v31 = vpop.f32.mrb[56].mxu1 }
 0x166   :  { %7454 = vst [vmem:[#allocation68_spill] sm:$0xff] %v6646_v46  ;;  %7455 = vst [vmem:[#allocation69_spill] sm:$0xff] %v6648_v31  ;;  %v6650_v7 = vpop.f32.mrb[57].mxu0  ;;  %v6652_v35 = vpop.f32.mrb[57].mxu1 }
 0x167   :  { %7456 = vst [vmem:[#allocation70_spill] sm:$0xff] %v6650_v7  ;;  %7457 = vst [vmem:[#allocation71_spill] sm:$0xff] %v6652_v35  ;;  %v6660_v47 = vpop.f32.mrb[58].mxu0  ;;  %v6662_v58 = vpop.f32.mrb[58].mxu1 }
 0x168   :  { %7458 = vst [vmem:[#allocation72_spill] sm:$0xff] %v6660_v47  ;;  %7459 = vst [vmem:[#allocation73_spill] sm:$0xff] %v6662_v58  ;;  %v6670_v35 = vpop.f32.mrb[59].mxu0  ;;  %v6672_v31 = vpop.f32.mrb[59].mxu1 }
 0x169   :  { %7460 = vst [vmem:[#allocation74_spill] sm:$0xff] %v6670_v35  ;;  %7461 = vst [vmem:[#allocation75_spill] sm:$0xff] %v6672_v31  ;;  %v5850_v31 = vld [vmem:[%s7385_s0 + $0x5c8] sm:$0xff]   ;;  %v5852_v35 = vld [vmem:[%s7385_s0 + $0x2b8] sm:$0xff]  }
 0x16a   :  { %5420 = vmatmul.mubr.bf16.gmra.mrb[164].mxu0 %v5844_v59  ;;  %5620 = vmatmul.mubr.bf16.gmra.mrb[164].mxu1 %v5846_v6 }
 0x16b   :  { %5423 = vmatprep.mubr.bf16.mxu0 %v5847_v42  ;;  %5623 = vmatprep.mubr.bf16.mxu1 %v5849_v43  ;;  %v5851_v42 = vld [vmem:[%s7385_s0 + $0x2b0] sm:$0xff]  }
 0x16c   :  { %v5853_v43 = vld [vmem:[%s7385_s0 + $0x5d0] sm:$0xff]  }
 0x16d   :  { %v6674_v7 = vpop.f32.mrb[60].mxu0  ;;  %v6676_v47 = vpop.f32.mrb[60].mxu1 }
 0x16e   :  { %7462 = vst [vmem:[#allocation76_spill] sm:$0xff] %v6674_v7  ;;  %7463 = vst [vmem:[#allocation77_spill] sm:$0xff] %v6676_v47  ;;  %v6678_v58 = vpop.f32.mrb[61].mxu0  ;;  %v6680_v46 = vpop.f32.mrb[61].mxu1 }
 0x16f   :  { %7464 = vst [vmem:[#allocation78_spill] sm:$0xff] %v6678_v58  ;;  %7465 = vst [vmem:[#allocation79_spill] sm:$0xff] %v6680_v46  ;;  %v6688_v59 = vpop.f32.mrb[62].mxu0  ;;  %v6690_v6 = vpop.f32.mrb[62].mxu1 }
 0x170   :  { %7466 = vst [vmem:[#allocation80_spill] sm:$0xff] %v6688_v59  ;;  %7467 = vst [vmem:[#allocation81_spill] sm:$0xff] %v6690_v6  ;;  %v6698_v46 = vpop.f32.mrb[63].mxu0  ;;  %v6700_v47 = vpop.f32.mrb[63].mxu1 }
 0x171   :  { %7468 = vst [vmem:[#allocation82_spill] sm:$0xff] %v6698_v46  ;;  %7469 = vst [vmem:[#allocation83_spill] sm:$0xff] %v6700_v47  ;;  %v5854_v47 = vld [vmem:[%s7385_s0 + $0x5d8] sm:$0xff]   ;;  %v5856_v46 = vld [vmem:[%s7385_s0 + $0x2c8] sm:$0xff]  }
 0x172   :  { %5424 = vmatmul.mubr.bf16.gmra.mrb[168].mxu0 %v5848_v30  ;;  %5624 = vmatmul.mubr.bf16.gmra.mrb[168].mxu1 %v5850_v31 }
 0x173   :  { %5427 = vmatprep.mubr.bf16.mxu0 %v5851_v42  ;;  %5627 = vmatprep.mubr.bf16.mxu1 %v5853_v43  ;;  %v5855_v42 = vld [vmem:[%s7385_s0 + $0x2c0] sm:$0xff]  }
 0x174   :  { %v5857_v43 = vld [vmem:[%s7385_s0 + $0x5e0] sm:$0xff]  }
 0x175   :  { %v6702_v58 = vpop.f32.mrb[64].mxu0  ;;  %v6704_v59 = vpop.f32.mrb[64].mxu1 }
 0x176   :  { %7470 = vst [vmem:[#allocation84_spill] sm:$0xff] %v6702_v58  ;;  %7471 = vst [vmem:[#allocation85_spill] sm:$0xff] %v6704_v59  ;;  %v6706_v6 = vpop.f32.mrb[65].mxu0  ;;  %v6708_v7 = vpop.f32.mrb[65].mxu1 }
 0x177   :  { %7472 = vst [vmem:[#allocation86_spill] sm:$0xff] %v6706_v6  ;;  %7473 = vst [vmem:[#allocation87_spill] sm:$0xff] %v6708_v7  ;;  %v6716_v30 = vpop.f32.mrb[66].mxu0  ;;  %v6718_v31 = vpop.f32.mrb[66].mxu1 }
 0x178   :  { %7474 = vst [vmem:[#allocation88_spill] sm:$0xff] %v6716_v30  ;;  %7475 = vst [vmem:[#allocation89_spill] sm:$0xff] %v6718_v31  ;;  %v6726_v7 = vpop.f32.mrb[67].mxu0  ;;  %v6728_v59 = vpop.f32.mrb[67].mxu1 }
 0x179   :  { %7476 = vst [vmem:[#allocation90_spill] sm:$0xff] %v6726_v7  ;;  %7477 = vst [vmem:[#allocation91_spill] sm:$0xff] %v6728_v59  ;;  %v5858_v59 = vld [vmem:[%s7385_s0 + $0x5e8] sm:$0xff]   ;;  %v5860_v7 = vld [vmem:[%s7385_s0 + $0x2d8] sm:$0xff]  }
 0x17a   :  { %5428 = vmatmul.mubr.bf16.gmra.mrb[172].mxu0 %v5852_v35  ;;  %5628 = vmatmul.mubr.bf16.gmra.mrb[172].mxu1 %v5854_v47 }
 0x17b   :  { %5431 = vmatprep.mubr.bf16.mxu0 %v5855_v42  ;;  %5631 = vmatprep.mubr.bf16.mxu1 %v5857_v43  ;;  %v5859_v42 = vld [vmem:[%s7385_s0 + $0x2d0] sm:$0xff]  }
 0x17c   :  { %v5861_v43 = vld [vmem:[%s7385_s0 + $0x5f0] sm:$0xff]  }
 0x17d   :  { %v6730_v6 = vpop.f32.mrb[68].mxu0  ;;  %v6732_v30 = vpop.f32.mrb[68].mxu1 }
 0x17e   :  { %7478 = vst [vmem:[#allocation92_spill] sm:$0xff] %v6730_v6  ;;  %7479 = vst [vmem:[#allocation93_spill] sm:$0xff] %v6732_v30  ;;  %v6734_v31 = vpop.f32.mrb[69].mxu0  ;;  %v6736_v58 = vpop.f32.mrb[69].mxu1 }
 0x17f   :  { %7480 = vst [vmem:[#allocation94_spill] sm:$0xff] %v6734_v31  ;;  %7481 = vst [vmem:[#allocation95_spill] sm:$0xff] %v6736_v58  ;;  %v6744_v35 = vpop.f32.mrb[70].mxu0  ;;  %v6746_v47 = vpop.f32.mrb[70].mxu1 }
 0x180   :  { %7482 = vst [vmem:[#allocation96_spill] sm:$0xff] %v6744_v35  ;;  %7483 = vst [vmem:[#allocation97_spill] sm:$0xff] %v6746_v47  ;;  %v6754_v58 = vpop.f32.mrb[71].mxu0  ;;  %v6756_v30 = vpop.f32.mrb[71].mxu1 }
 0x181   :  { %7484 = vst [vmem:[#allocation98_spill] sm:$0xff] %v6754_v58  ;;  %7485 = vst [vmem:[#allocation99_spill] sm:$0xff] %v6756_v30  ;;  %v5862_v30 = vld [vmem:[%s7385_s0 + $0x5f8] sm:$0xff]   ;;  %v5864_v58 = vld [vmem:[%s7385_s0 + $0x2e8] sm:$0xff]  }
 0x182   :  { %5432 = vmatmul.mubr.bf16.gmra.mrb[176].mxu0 %v5856_v46  ;;  %5632 = vmatmul.mubr.bf16.gmra.mrb[176].mxu1 %v5858_v59 }
 0x183   :  { %5435 = vmatprep.mubr.bf16.mxu0 %v5859_v42  ;;  %5635 = vmatprep.mubr.bf16.mxu1 %v5861_v43  ;;  %v5863_v42 = vld [vmem:[%s7385_s0 + $0x2e0] sm:$0xff]  }
 0x184   :  { %v5865_v43 = vld [vmem:[%s7385_s0 + $0x600] sm:$0xff]  }
 0x185   :  { %v6758_v31 = vpop.f32.mrb[72].mxu0  ;;  %v6760_v35 = vpop.f32.mrb[72].mxu1 }
 0x186   :  { %7486 = vst [vmem:[#allocation100_spill] sm:$0xff] %v6758_v31  ;;  %7487 = vst [vmem:[#allocation101_spill] sm:$0xff] %v6760_v35  ;;  %v6762_v47 = vpop.f32.mrb[73].mxu0  ;;  %v6764_v6 = vpop.f32.mrb[73].mxu1 }
 0x187   :  { %7488 = vst [vmem:[#allocation102_spill] sm:$0xff] %v6762_v47  ;;  %7489 = vst [vmem:[#allocation103_spill] sm:$0xff] %v6764_v6  ;;  %v6772_v46 = vpop.f32.mrb[74].mxu0  ;;  %v6774_v59 = vpop.f32.mrb[74].mxu1 }
 0x188   :  { %7490 = vst [vmem:[#allocation104_spill] sm:$0xff] %v6772_v46  ;;  %7491 = vst [vmem:[#allocation105_spill] sm:$0xff] %v6774_v59  ;;  %v6782_v6 = vpop.f32.mrb[75].mxu0  ;;  %v6784_v35 = vpop.f32.mrb[75].mxu1 }
 0x189   :  { %7492 = vst [vmem:[#allocation106_spill] sm:$0xff] %v6782_v6  ;;  %7493 = vst [vmem:[#allocation107_spill] sm:$0xff] %v6784_v35  ;;  %v5866_v35 = vld [vmem:[%s7385_s0 + $0x608] sm:$0xff]   ;;  %v5868_v6 = vld [vmem:[%s7385_s0 + $0x2f8] sm:$0xff]  }
 0x18a   :  { %5436 = vmatmul.mubr.bf16.gmra.mrb[180].mxu0 %v5860_v7  ;;  %5636 = vmatmul.mubr.bf16.gmra.mrb[180].mxu1 %v5862_v30 }
 0x18b   :  { %5439 = vmatprep.mubr.bf16.mxu0 %v5863_v42  ;;  %5639 = vmatprep.mubr.bf16.mxu1 %v5865_v43  ;;  %v5867_v42 = vld [vmem:[%s7385_s0 + $0x2f0] sm:$0xff]  }
 0x18c   :  { %v5869_v43 = vld [vmem:[%s7385_s0 + $0x610] sm:$0xff]  }
 0x18d   :  { %v6786_v47 = vpop.f32.mrb[76].mxu0  ;;  %v6788_v46 = vpop.f32.mrb[76].mxu1 }
 0x18e   :  { %7494 = vst [vmem:[#allocation108_spill] sm:$0xff] %v6786_v47  ;;  %7495 = vst [vmem:[#allocation109_spill] sm:$0xff] %v6788_v46  ;;  %v6790_v59 = vpop.f32.mrb[77].mxu0  ;;  %v6792_v31 = vpop.f32.mrb[77].mxu1 }
 0x18f   :  { %7496 = vst [vmem:[#allocation110_spill] sm:$0xff] %v6790_v59  ;;  %7497 = vst [vmem:[#allocation111_spill] sm:$0xff] %v6792_v31  ;;  %v6800_v7 = vpop.f32.mrb[78].mxu0  ;;  %v6802_v30 = vpop.f32.mrb[78].mxu1 }
 0x190   :  { %7498 = vst [vmem:[#allocation112_spill] sm:$0xff] %v6800_v7  ;;  %7499 = vst [vmem:[#allocation113_spill] sm:$0xff] %v6802_v30  ;;  %v6810_v31 = vpop.f32.mrb[79].mxu0  ;;  %v6812_v46 = vpop.f32.mrb[79].mxu1 }
 0x191   :  { %7500 = vst [vmem:[#allocation114_spill] sm:$0xff] %v6810_v31  ;;  %7501 = vst [vmem:[#allocation115_spill] sm:$0xff] %v6812_v46  ;;  %v5870_v46 = vld [vmem:[%s7385_s0 + $0x618] sm:$0xff]   ;;  %v5872_v31 = vld [vmem:[%s7385_s0 + $0x308] sm:$0xff]  }
 0x192   :  { %5440 = vmatmul.mubr.bf16.gmra.mrb[184].mxu0 %v5864_v58  ;;  %5640 = vmatmul.mubr.bf16.gmra.mrb[184].mxu1 %v5866_v35 }
 0x193   :  { %5443 = vmatprep.mubr.bf16.mxu0 %v5867_v42  ;;  %5643 = vmatprep.mubr.bf16.mxu1 %v5869_v43  ;;  %v5871_v42 = vld [vmem:[%s7385_s0 + $0x300] sm:$0xff]  }
 0x194   :  { %v5873_v43 = vld [vmem:[%s7385_s0 + $0x620] sm:$0xff]  }
 0x195   :  { %v6814_v59 = vpop.f32.mrb[80].mxu0  ;;  %v6816_v7 = vpop.f32.mrb[80].mxu1 }
 0x196   :  { %7502 = vst [vmem:[#allocation116_spill] sm:$0xff] %v6814_v59  ;;  %7503 = vst [vmem:[#allocation117_spill] sm:$0xff] %v6816_v7  ;;  %v6818_v30 = vpop.f32.mrb[81].mxu0  ;;  %v6820_v47 = vpop.f32.mrb[81].mxu1 }
 0x197   :  { %7504 = vst [vmem:[#allocation118_spill] sm:$0xff] %v6818_v30  ;;  %7505 = vst [vmem:[#allocation119_spill] sm:$0xff] %v6820_v47  ;;  %v6828_v58 = vpop.f32.mrb[82].mxu0  ;;  %v6830_v35 = vpop.f32.mrb[82].mxu1 }
 0x198   :  { %7506 = vst [vmem:[#allocation120_spill] sm:$0xff] %v6828_v58  ;;  %7507 = vst [vmem:[#allocation121_spill] sm:$0xff] %v6830_v35  ;;  %v6838_v47 = vpop.f32.mrb[83].mxu0  ;;  %v6840_v7 = vpop.f32.mrb[83].mxu1 }
 0x199   :  { %7508 = vst [vmem:[#allocation122_spill] sm:$0xff] %v6838_v47  ;;  %7509 = vst [vmem:[#allocation123_spill] sm:$0xff] %v6840_v7  ;;  %v5874_v7 = vld [vmem:[%s7385_s0 + $0x628] sm:$0xff]   ;;  %v5876_v47 = vld [vmem:[%s7385_s0 + $0x318] sm:$0xff]  }
 0x19a   :  { %5444 = vmatmul.mubr.bf16.gmra.mrb[188].mxu0 %v5868_v6  ;;  %5644 = vmatmul.mubr.bf16.gmra.mrb[188].mxu1 %v5870_v46 }
 0x19b   :  { %5447 = vmatprep.mubr.bf16.mxu0 %v5871_v42  ;;  %5647 = vmatprep.mubr.bf16.mxu1 %v5873_v43  ;;  %v5875_v42 = vld [vmem:[%s7385_s0 + $0x310] sm:$0xff]  }
 0x19c   :  { %v5877_v43 = vld [vmem:[%s7385_s0 + $0x630] sm:$0xff]  }
 0x19d   :  { %v6842_v30 = vpop.f32.mrb[84].mxu0  ;;  %v6844_v58 = vpop.f32.mrb[84].mxu1 }
 0x19e   :  { %7510 = vst [vmem:[#allocation124_spill] sm:$0xff] %v6842_v30  ;;  %7511 = vst [vmem:[#allocation125_spill] sm:$0xff] %v6844_v58  ;;  %v6846_v35 = vpop.f32.mrb[85].mxu0  ;;  %v6848_v59 = vpop.f32.mrb[85].mxu1 }
 0x19f   :  { %7512 = vst [vmem:[#allocation126_spill] sm:$0xff] %v6846_v35  ;;  %7513 = vst [vmem:[#allocation127_spill] sm:$0xff] %v6848_v59  ;;  %v6856_v6 = vpop.f32.mrb[86].mxu0  ;;  %v6858_v46 = vpop.f32.mrb[86].mxu1 }
 0x1a0   :  { %7514 = vst [vmem:[#allocation128_spill] sm:$0xff] %v6856_v6  ;;  %7515 = vst [vmem:[#allocation129_spill] sm:$0xff] %v6858_v46  ;;  %v6866_v59 = vpop.f32.mrb[87].mxu0  ;;  %v6868_v58 = vpop.f32.mrb[87].mxu1 }
 0x1a1   :  { %7516 = vst [vmem:[#allocation130_spill] sm:$0xff] %v6866_v59  ;;  %7517 = vst [vmem:[#allocation131_spill] sm:$0xff] %v6868_v58  ;;  %v5878_v58 = vld [vmem:[%s7385_s0 + $0x638] sm:$0xff]  }
 0x1a2   :  { %5448 = vmatmul.mubr.bf16.gmra.mrb[192].mxu0 %v5872_v31  ;;  %5648 = vmatmul.mubr.bf16.gmra.mrb[192].mxu1 %v5874_v7 }
 0x1a3   :  { %5451 = vmatprep.mubr.bf16.mxu0 %v5875_v42  ;;  %5651 = vmatprep.mubr.bf16.mxu1 %v5877_v43 }
 0x1a5   :  { %v6870_v35 = vpop.f32.mrb[88].mxu0  ;;  %v6872_v6 = vpop.f32.mrb[88].mxu1 }
 0x1a6   :  { %7518 = vst [vmem:[#allocation132_spill] sm:$0xff] %v6870_v35  ;;  %7519 = vst [vmem:[#allocation133_spill] sm:$0xff] %v6872_v6  ;;  %v6874_v46 = vpop.f32.mrb[89].mxu0  ;;  %v6876_v30 = vpop.f32.mrb[89].mxu1 }
 0x1a7   :  { %7520 = vst [vmem:[#allocation134_spill] sm:$0xff] %v6874_v46  ;;  %7521 = vst [vmem:[#allocation135_spill] sm:$0xff] %v6876_v30  ;;  %v6884_v31 = vpop.f32.mrb[90].mxu0  ;;  %v6886_v7 = vpop.f32.mrb[90].mxu1 }
 0x1a8   :  { %7522 = vst [vmem:[#allocation136_spill] sm:$0xff] %v6884_v31  ;;  %7523 = vst [vmem:[#allocation137_spill] sm:$0xff] %v6886_v7  ;;  %v6888_v42 = vpop.f32.mrb[91].mxu0  ;;  %v6890_v43 = vpop.f32.mrb[91].mxu1 }
 0x1a9   :  { %7524 = vst [vmem:[#allocation138_spill] sm:$0xff] %v6888_v42  ;;  %7525 = vst [vmem:[#allocation139_spill] sm:$0xff] %v6890_v43 }
 0x1aa   :  { %5452 = vmatmul.mubr.bf16.gmra.mrb[196].mxu0 %v5876_v47  ;;  %5652 = vmatmul.mubr.bf16.gmra.mrb[196].mxu1 %v5878_v58 }
 0x1ad   :  { %v6892_v6 = vpop.f32.mrb[92].mxu0  ;;  %v6894_v30 = vpop.f32.mrb[92].mxu1 }
 0x1ae   :  { %7526 = vst [vmem:[#allocation140_spill] sm:$0xff] %v6892_v6  ;;  %7527 = vst [vmem:[#allocation141_spill] sm:$0xff] %v6894_v30  ;;  %v6896_v46 = vpop.f32.mrb[93].mxu0  ;;  %v6898_v35 = vpop.f32.mrb[93].mxu1 }
 0x1af   :  { %7528 = vst [vmem:[#allocation142_spill] sm:$0xff] %v6896_v46  ;;  %7529 = vst [vmem:[#allocation143_spill] sm:$0xff] %v6898_v35  ;;  %v6900_v59 = vpop.f32.mrb[94].mxu0  ;;  %v6902_v23 = vpop.f32.mrb[94].mxu1 }
 0x1b0   :  { %7530 = vst [vmem:[#allocation144_spill] sm:$0xff] %v6900_v59  ;;  %7531 = vst [vmem:[#allocation145_spill] sm:$0xff] %v6902_v23  ;;  %v6904_v31 = vpop.f32.mrb[95].mxu0  ;;  %v6906_v7 = vpop.f32.mrb[95].mxu1 }
 0x1b1   :  { %7532 = vst [vmem:[#allocation146_spill] sm:$0xff] %v6904_v31  ;;  %7533 = vst [vmem:[#allocation147_spill] sm:$0xff] %v6906_v7 }
 0x1b5   :  { %v6908_v42 = vpop.f32.mrb[96].mxu0  ;;  %v6910_v47 = vpop.f32.mrb[96].mxu1 }
 0x1b6   :  { %7534 = vst [vmem:[#allocation148_spill] sm:$0xff] %v6908_v42  ;;  %7535 = vst [vmem:[#allocation149_spill] sm:$0xff] %v6910_v47  ;;  %v6912_v58 = vpop.f32.mrb[97].mxu0  ;;  %v6914_v6 = vpop.f32.mrb[97].mxu1 }
 0x1b7   :  { %7536 = vst [vmem:[#allocation150_spill] sm:$0xff] %v6912_v58  ;;  %7537 = vst [vmem:[#allocation151_spill] sm:$0xff] %v6914_v6  ;;  %v6916_v30 = vpop.f32.mrb[98].mxu0  ;;  %v6918_v46 = vpop.f32.mrb[98].mxu1 }
 0x1b8   :  { %7538 = vst [vmem:[#allocation152_spill] sm:$0xff] %v6916_v30  ;;  %7539 = vst [vmem:[#allocation153_spill] sm:$0xff] %v6918_v46  ;;  %v6920_v35 = vpop.f32.mrb[99].mxu0  ;;  %v6922_v59 = vpop.f32.mrb[99].mxu1 }
 0x1b9   :  { %7540 = vst [vmem:[#allocation154_spill] sm:$0xff] %v6920_v35  ;;  %7541 = vst [vmem:[#allocation155_spill] sm:$0xff] %v6922_v59  ;;  %v6931_v59 = vld [vmem:[%s7386_s2] ss:$0 sm:$0xff] }
 0x1bd   :  { %v5357_v23 = vpop.f32.mrb[100].mxu0  ;;  %v5557_v31 = vpop.f32.mrb[100].mxu1 }
 0x1be   :  { %v3314_v7 = vmax.f32 %v6254_v54, %v5357_v23  ;;  %v2113_v43 = vpop.f32.mrb[101].mxu0  ;;  %v2913_v42 = vpop.f32.mrb[101].mxu1 }
 0x1bf   :  { %v3312_v47 = vmax.f32 %v6258_v56, %v2113_v43  ;;  %v5358_v34 = vpop.f32.mrb[102].mxu0  ;;  %v5558_v58 = vpop.f32.mrb[102].mxu1 }
 0x1c0   :  { %v3414_v6 = vmax.f32 %v3314_v7, %v6256_v55  ;;  %v3315_v30 = vmax.f32 %v6268_v60, %v5358_v34  ;;  %v2116_v19 = vpop.f32.mrb[103].mxu0  ;;  %v2916_v46 = vpop.f32.mrb[103].mxu1 }
 0x1c1   :  { %v3412_v35 = vmax.f32 %v3312_v47, %v6260_v57  ;;  %v3313_v54 = vmax.f32 %v6278_v0, %v2116_v19 }
 0x1c2   :  { %v3514_v23 = vmax.f32 %v3414_v6, %v5557_v31  ;;  %v3415_v56 = vmax.f32 %v3315_v30, %v6270_v61 }
 0x1c3   :  { %v3512_v43 = vmax.f32 %v3412_v35, %v2913_v42  ;;  %v3413_v22 = vmax.f32 %v3313_v54, %v6280_v1 }
 0x1c4   :  { %v3621_v55 = vadd.f32 %v6931_v59, %v3514_v23  ;;  %v3515_v60 = vmax.f32 %v3415_v56, %v5558_v58 }
 0x1c5   :  { %v3619_v34 = vadd.f32 %v6931_v59, %v3512_v43  ;;  %v3513_v7 = vmax.f32 %v3413_v22, %v2916_v46  ;;  %v5361_v18 = vpop.f32.mrb[104].mxu0  ;;  %v5561_v11 = vpop.f32.mrb[104].mxu1 }
 0x1c6   :  { %v3622_v63 = vadd.f32 %v6931_v59, %v3515_v60  ;;  %v3318_v57 = vmax.f32 %v6282_v2, %v5361_v18  ;;  %v2129_v47 = vpop.f32.mrb[105].mxu0  ;;  %v2929_v0 = vpop.f32.mrb[105].mxu1  ;;  %v3721_v35 = vmax.f32 %v3621_v55, 0.0 }
 0x1c7   :  { %v3620_v19 = vadd.f32 %v6931_v59, %v3513_v7  ;;  %v3316_v61 = vmax.f32 %v6286_v4, %v2129_v47  ;;  %v5362_v30 = vpop.f32.mrb[106].mxu0  ;;  %v5562_v1 = vpop.f32.mrb[106].mxu1  ;;  %v3719_v58 = vmax.f32 %v3619_v34, 0.0 }
 0x1c8   :  { %v3722_v6 = vmax.f32 %v3622_v63, 0.0  ;;  %v3418_v31 = vmax.f32 %v3318_v57, %v6284_v3  ;;  %v3319_v22 = vmax.f32 %v6296_v8, %v5362_v30  ;;  %v2132_v46 = vpop.f32.mrb[107].mxu0  ;;  %v2932_v42 = vpop.f32.mrb[107].mxu1 }
 0x1c9   :  { %v3720_v54 = vmax.f32 %v3620_v19, 0.0  ;;  %v3416_v2 = vmax.f32 %v3316_v61, %v6288_v5  ;;  %v3317_v18 = vmax.f32 %v6306_v12, %v2132_v46 }
 0x1ca   :  { %v4740_v23 = vpack.c.bf16 %v3722_v6, %v3721_v35  ;;  %v3518_v56 = vmax.f32 %v3418_v31, %v5561_v11  ;;  %v3419_v4 = vmax.f32 %v3319_v22, %v6298_v9 }
 0x1cb   :  { %v4735_v43 = vpack.c.bf16 %v3720_v54, %v3719_v58  ;;  %v3516_v60 = vmax.f32 %v3416_v2, %v2929_v0  ;;  %v3417_v63 = vmax.f32 %v3317_v18, %v6308_v13 }
 0x1cc   :  { %4982 = vst [vmem:[%s7387_s3 + $0x8] sm:$0xff] %v4740_v23   ;;  %v3625_v3 = vadd.f32 %v6931_v59, %v3518_v56  ;;  %v3519_v8 = vmax.f32 %v3419_v4, %v5562_v1 }
 0x1cd   :  { %4736 = vst [vmem:[%s7387_s3] sm:$0xff] %v4735_v43   ;;  %v3623_v5 = vadd.f32 %v6931_v59, %v3516_v60  ;;  %v3517_v12 = vmax.f32 %v3417_v63, %v2932_v42  ;;  %v5365_v11 = vpop.f32.mrb[108].mxu0  ;;  %v5565_v9 = vpop.f32.mrb[108].mxu1 }
 0x1ce   :  { %v3626_v55 = vadd.f32 %v6931_v59, %v3519_v8  ;;  %v3322_v13 = vmax.f32 %v6310_v14, %v5365_v11  ;;  %v2145_v34 = vpop.f32.mrb[109].mxu0  ;;  %v2945_v7 = vpop.f32.mrb[109].mxu1  ;;  %v3725_v61 = vmax.f32 %v3625_v3, 0.0 }
 0x1cf   :  { %v3624_v57 = vadd.f32 %v6931_v59, %v3517_v12  ;;  %v3320_v47 = vmax.f32 %v6314_v16, %v2145_v34  ;;  %v5366_v0 = vpop.f32.mrb[110].mxu0  ;;  %v5566_v19 = vpop.f32.mrb[110].mxu1  ;;  %v3723_v22 = vmax.f32 %v3623_v5, 0.0 }
 0x1d0   :  { %v3726_v30 = vmax.f32 %v3626_v55, 0.0  ;;  %v3422_v1 = vmax.f32 %v3322_v13, %v6312_v15  ;;  %v3323_v35 = vmax.f32 %v6324_v20, %v5366_v0  ;;  %v2148_v6 = vpop.f32.mrb[111].mxu0  ;;  %v2948_v31 = vpop.f32.mrb[111].mxu1 }
 0x1d1   :  { %v3724_v46 = vmax.f32 %v3624_v57, 0.0  ;;  %v3420_v14 = vmax.f32 %v3320_v47, %v6316_v17  ;;  %v3321_v42 = vmax.f32 %v6334_v24, %v2148_v6 }
 0x1d2   :  { %v4750_v58 = vpack.c.bf16 %v3726_v30, %v3725_v61  ;;  %v3522_v54 = vmax.f32 %v3422_v1, %v5565_v9  ;;  %v3423_v16 = vmax.f32 %v3323_v35, %v6326_v21 }
 0x1d3   :  { %v4745_v2 = vpack.c.bf16 %v3724_v46, %v3723_v22  ;;  %v3520_v18 = vmax.f32 %v3420_v14, %v2945_v7  ;;  %v3421_v23 = vmax.f32 %v3321_v42, %v6336_v25 }
 0x1d4   :  { %4984 = vst [vmem:[%s7387_s3 + $0x18] sm:$0xff] %v4750_v58   ;;  %v3629_v15 = vadd.f32 %v6931_v59, %v3522_v54  ;;  %v3523_v20 = vmax.f32 %v3423_v16, %v5566_v19 }
 0x1d5   :  { %4983 = vst [vmem:[%s7387_s3 + $0x10] sm:$0xff] %v4745_v2   ;;  %v3627_v17 = vadd.f32 %v6931_v59, %v3520_v18  ;;  %v3521_v24 = vmax.f32 %v3421_v23, %v2948_v31  ;;  %v5369_v56 = vpop.f32.mrb[112].mxu0  ;;  %v5569_v21 = vpop.f32.mrb[112].mxu1 }
 0x1d6   :  { %v3630_v4 = vadd.f32 %v6931_v59, %v3523_v20  ;;  %v3326_v25 = vmax.f32 %v6338_v26, %v5369_v56  ;;  %v2161_v43 = vpop.f32.mrb[113].mxu0  ;;  %v2961_v60 = vpop.f32.mrb[113].mxu1  ;;  %v3729_v12 = vmax.f32 %v3629_v15, 0.0 }
 0x1d7   :  { %v3628_v63 = vadd.f32 %v6931_v59, %v3521_v24  ;;  %v3324_v3 = vmax.f32 %v6342_v28, %v2161_v43  ;;  %v5370_v8 = vpop.f32.mrb[114].mxu0  ;;  %v5570_v5 = vpop.f32.mrb[114].mxu1  ;;  %v3727_v7 = vmax.f32 %v3627_v17, 0.0 }
 0x1d8   :  { %v3730_v11 = vmax.f32 %v3630_v4, 0.0  ;;  %v3426_v9 = vmax.f32 %v3326_v25, %v6340_v27  ;;  %v3327_v55 = vmax.f32 %v6352_v32, %v5370_v8  ;;  %v2164_v13 = vpop.f32.mrb[115].mxu0  ;;  %v2964_v34 = vpop.f32.mrb[115].mxu1 }
 0x1d9   :  { %v3728_v57 = vmax.f32 %v3628_v63, 0.0  ;;  %v3424_v26 = vmax.f32 %v3324_v3, %v6344_v29  ;;  %v3325_v47 = vmax.f32 %v6362_v36, %v2164_v13 }
 0x1da   :  { %v4760_v0 = vpack.c.bf16 %v3730_v11, %v3729_v12  ;;  %v3526_v19 = vmax.f32 %v3426_v9, %v5569_v21  ;;  %v3427_v28 = vmax.f32 %v3327_v55, %v6354_v33 }
 0x1db   :  { %v4755_v61 = vpack.c.bf16 %v3728_v57, %v3727_v7  ;;  %v3524_v30 = vmax.f32 %v3424_v26, %v2961_v60  ;;  %v3425_v1 = vmax.f32 %v3325_v47, %v6364_v37 }
 0x1dc   :  { %4986 = vst [vmem:[%s7387_s3 + $0x28] sm:$0xff] %v4760_v0   ;;  %v3633_v27 = vadd.f32 %v6931_v59, %v3526_v19  ;;  %v3527_v32 = vmax.f32 %v3427_v28, %v5570_v5 }
 0x1dd   :  { %4985 = vst [vmem:[%s7387_s3 + $0x20] sm:$0xff] %v4755_v61   ;;  %v3631_v29 = vadd.f32 %v6931_v59, %v3524_v30  ;;  %v3525_v36 = vmax.f32 %v3425_v1, %v2964_v34  ;;  %v5373_v35 = vpop.f32.mrb[116].mxu0  ;;  %v5573_v33 = vpop.f32.mrb[116].mxu1  ;;  %v7542_v30 = vld [vmem:[#allocation2_spill] sm:$0xff] }
 0x1de   :  { %v3634_v6 = vadd.f32 %v6931_v59, %v3527_v32  ;;  %v3330_v37 = vmax.f32 %v6366_v38, %v5373_v35  ;;  %v2177_v31 = vpop.f32.mrb[117].mxu0  ;;  %v2977_v22 = vpop.f32.mrb[117].mxu1  ;;  %v3733_v54 = vmax.f32 %v3633_v27, 0.0  ;;  %v7543_v32 = vld [vmem:[#allocation3_spill] sm:$0xff] }
 0x1df   :  { %v3632_v46 = vadd.f32 %v6931_v59, %v3525_v36  ;;  %v3328_v14 = vmax.f32 %v6370_v40, %v2177_v31  ;;  %v5374_v42 = vpop.f32.mrb[118].mxu0  ;;  %v5574_v58 = vpop.f32.mrb[118].mxu1  ;;  %v3731_v20 = vmax.f32 %v3631_v29, 0.0 }
 0x1e0   :  { %v3734_v16 = vmax.f32 %v3634_v6, 0.0  ;;  %v3430_v2 = vmax.f32 %v3330_v37, %v6368_v39  ;;  %v3331_v18 = vmax.f32 %v6380_v44, %v5374_v42  ;;  %v2180_v23 = vpop.f32.mrb[119].mxu0  ;;  %v2980_v15 = vpop.f32.mrb[119].mxu1  ;;  %v7544_v6 = vld [vmem:[#allocation4_spill] sm:$0xff] }
 0x1e1   :  { %v3732_v17 = vmax.f32 %v3632_v46, 0.0  ;;  %v3428_v38 = vmax.f32 %v3328_v14, %v6372_v41  ;;  %v3329_v24 = vmax.f32 %v6390_v48, %v2180_v23  ;;  %v7545_v14 = vld [vmem:[#allocation6_spill] sm:$0xff] }
 0x1e2   :  { %v4770_v56 = vpack.c.bf16 %v3734_v16, %v3733_v54  ;;  %v3530_v21 = vmax.f32 %v3430_v2, %v5573_v33  ;;  %v3431_v40 = vmax.f32 %v3331_v18, %v6382_v45  ;;  %v7546_v18 = vld [vmem:[#allocation5_spill] sm:$0xff] }
 0x1e3   :  { %v4765_v4 = vpack.c.bf16 %v3732_v17, %v3731_v20  ;;  %v3528_v25 = vmax.f32 %v3428_v38, %v2977_v22  ;;  %v3429_v43 = vmax.f32 %v3329_v24, %v6392_v49 }
 0x1e4   :  { %4988 = vst [vmem:[%s7387_s3 + $0x38] sm:$0xff] %v4770_v56   ;;  %v3637_v39 = vadd.f32 %v6931_v59, %v3530_v21  ;;  %v3531_v44 = vmax.f32 %v3431_v40, %v5574_v58  ;;  %v7548_v21 = vld [vmem:[#allocation7_spill] sm:$0xff] }
 0x1e5   :  { %4987 = vst [vmem:[%s7387_s3 + $0x30] sm:$0xff] %v4765_v4   ;;  %v3635_v41 = vadd.f32 %v6931_v59, %v3528_v25  ;;  %v3529_v48 = vmax.f32 %v3429_v43, %v2980_v15  ;;  %v5377_v60 = vpop.f32.mrb[120].mxu0  ;;  %v5577_v45 = vpop.f32.mrb[120].mxu1  ;;  %v7547_v15 = vld [vmem:[#allocation8_spill] sm:$0xff]  ;;  %v7549_v4 = vld [vmem:[#allocation10_spill] sm:$0xff] }
 0x1e6   :  { %v3638_v63 = vadd.f32 %v6931_v59, %v3531_v44  ;;  %v3334_v49 = vmax.f32 %v6394_v50, %v5377_v60  ;;  %v2193_v3 = vpop.f32.mrb[121].mxu0  ;;  %v2993_v8 = vpop.f32.mrb[121].mxu1  ;;  %v3737_v55 = vmax.f32 %v3637_v39, 0.0  ;;  %v7550_v44 = vld [vmem:[#allocation9_spill] sm:$0xff] }
 0x1e7   :  { %v3636_v5 = vadd.f32 %v6931_v59, %v3529_v48  ;;  %v3332_v12 = vmax.f32 %v6398_v52, %v2193_v3  ;;  %v5378_v11 = vpop.f32.mrb[122].mxu0  ;;  %v5578_v9 = vpop.f32.mrb[122].mxu1  ;;  %v3735_v47 = vmax.f32 %v3635_v41, 0.0 }
 0x1e8   :  { %v3738_v13 = vmax.f32 %v3638_v63, 0.0  ;;  %v3434_v34 = vmax.f32 %v3334_v49, %v6396_v51  ;;  %v3335_v7 = vmax.f32 %v6408_v62, %v5378_v11  ;;  %v2196_v57 = vpop.f32.mrb[123].mxu0  ;;  %v2996_v26 = vpop.f32.mrb[123].mxu1 }
 0x1e9   :  { %v3736_v0 = vmax.f32 %v3636_v5, 0.0  ;;  %v3432_v50 = vmax.f32 %v3332_v12, %v6400_v53  ;;  %v3333_v19 = vmax.f32 %v6418_v10, %v2196_v57 }
 0x1ea   :  { %v4780_v28 = vpack.c.bf16 %v3738_v13, %v3737_v55  ;;  %v3534_v61 = vmax.f32 %v3434_v34, %v5577_v45  ;;  %v3435_v52 = vmax.f32 %v3335_v7, %v7542_v30  ;;  %v7551_v45 = vld [vmem:[#allocation11_spill] sm:$0xff]  ;;  %v7552_v55 = vld [vmem:[#allocation12_spill] sm:$0xff] }
 0x1eb   :  { %v4775_v1 = vpack.c.bf16 %v3736_v0, %v3735_v47  ;;  %v3532_v27 = vmax.f32 %v3432_v50, %v2993_v8  ;;  %v3433_v29 = vmax.f32 %v3333_v19, %v7543_v32 }
 0x1ec   :  { %4990 = vst [vmem:[%s7387_s3 + $0x48] sm:$0xff] %v4780_v28   ;;  %v3641_v51 = vadd.f32 %v6931_v59, %v3534_v61  ;;  %v3535_v62 = vmax.f32 %v3435_v52, %v5578_v9  ;;  %v7554_v61 = vld [vmem:[#allocation13_spill] sm:$0xff]  ;;  %v7555_v52 = vld [vmem:[#allocation16_spill] sm:$0xff] }
 0x1ed   :  { %4989 = vst [vmem:[%s7387_s3 + $0x40] sm:$0xff] %v4775_v1   ;;  %v3639_v53 = vadd.f32 %v6931_v59, %v3532_v27  ;;  %v3533_v10 = vmax.f32 %v3433_v29, %v2996_v26  ;;  %v5381_v36 = vpop.f32.mrb[124].mxu0  ;;  %v5581_v35 = vpop.f32.mrb[124].mxu1  ;;  %v7553_v26 = vld [vmem:[#allocation14_spill] sm:$0xff] }
 0x1ee   :  { %v3642_v33 = vadd.f32 %v6931_v59, %v3535_v62  ;;  %v3338_v37 = vmax.f32 %v7544_v6, %v5381_v36  ;;  %v2209_v31 = vpop.f32.mrb[125].mxu0  ;;  %v3009_v22 = vpop.f32.mrb[125].mxu1  ;;  %v3741_v16 = vmax.f32 %v3641_v51, 0.0  ;;  %v7556_v62 = vld [vmem:[#allocation15_spill] sm:$0xff]  ;;  %v7558_v6 = vld [vmem:[#allocation17_spill] sm:$0xff] }
 0x1ef   :  { %v3640_v46 = vadd.f32 %v6931_v59, %v3533_v10  ;;  %v3336_v42 = vmax.f32 %v7545_v14, %v2209_v31  ;;  %v5382_v58 = vpop.f32.mrb[126].mxu0  ;;  %v5582_v54 = vpop.f32.mrb[126].mxu1  ;;  %v3739_v24 = vmax.f32 %v3639_v53, 0.0  ;;  %v7557_v10 = vld [vmem:[#allocation18_spill] sm:$0xff] }
 0x1f0   :  { %v3742_v2 = vmax.f32 %v3642_v33, 0.0  ;;  %v3438_v23 = vmax.f32 %v3338_v37, %v7546_v18  ;;  %v3339_v20 = vmax.f32 %v7547_v15, %v5382_v58  ;;  %v2212_v17 = vpop.f32.mrb[127].mxu0  ;;  %v3012_v38 = vpop.f32.mrb[127].mxu1  ;;  %v7560_v15 = vld [vmem:[#allocation20_spill] sm:$0xff] }
 0x1f1   :  { %v3740_v56 = vmax.f32 %v3640_v46, 0.0  ;;  %v3436_v40 = vmax.f32 %v3336_v42, %v7548_v21  ;;  %v3337_v25 = vmax.f32 %v7549_v4, %v2212_v17  ;;  %v7559_v46 = vld [vmem:[#allocation19_spill] sm:$0xff] }
 0x1f2   :  { %v4790_v43 = vpack.c.bf16 %v3742_v2, %v3741_v16  ;;  %v3538_v39 = vmax.f32 %v3438_v23, %v5581_v35  ;;  %v3439_v41 = vmax.f32 %v3339_v20, %v7550_v44 }
 0x1f3   :  { %v4785_v48 = vpack.c.bf16 %v3740_v56, %v3739_v24  ;;  %v3536_v60 = vmax.f32 %v3436_v40, %v3009_v22  ;;  %v3437_v63 = vmax.f32 %v3337_v25, %v7551_v45  ;;  %v7561_v56 = vld [vmem:[#allocation22_spill] sm:$0xff] }
 0x1f4   :  { %4992 = vst [vmem:[%s7387_s3 + $0x58] sm:$0xff] %v4790_v43   ;;  %v3645_v49 = vadd.f32 %v6931_v59, %v3538_v39  ;;  %v3539_v3 = vmax.f32 %v3439_v41, %v5582_v54  ;;  %v7562_v39 = vld [vmem:[#allocation21_spill] sm:$0xff]  ;;  %v7563_v41 = vld [vmem:[#allocation24_spill] sm:$0xff] }
 0x1f5   :  { %4991 = vst [vmem:[%s7387_s3 + $0x50] sm:$0xff] %v4785_v48   ;;  %v3643_v8 = vadd.f32 %v6931_v59, %v3536_v60  ;;  %v3537_v5 = vmax.f32 %v3437_v63, %v3012_v38  ;;  %v5385_v12 = vpop.f32.mrb[128].mxu0  ;;  %v5585_v11 = vpop.f32.mrb[128].mxu1 }
 0x1f6   :  { %v3646_v9 = vadd.f32 %v6931_v59, %v3539_v3  ;;  %v3342_v13 = vmax.f32 %v7552_v55, %v5385_v12  ;;  %v2225_v34 = vpop.f32.mrb[129].mxu0  ;;  %v3025_v7 = vpop.f32.mrb[129].mxu1  ;;  %v3745_v19 = vmax.f32 %v3645_v49, 0.0  ;;  %v7564_v3 = vld [vmem:[#allocation23_spill] sm:$0xff]  ;;  %v7566_v55 = vld [vmem:[#allocation25_spill] sm:$0xff] }
 0x1f7   :  { %v3644_v57 = vadd.f32 %v6931_v59, %v3537_v5  ;;  %v3340_v47 = vmax.f32 %v7553_v26, %v2225_v34  ;;  %v5386_v0 = vpop.f32.mrb[130].mxu0  ;;  %v5586_v50 = vpop.f32.mrb[130].mxu1  ;;  %v3743_v29 = vmax.f32 %v3643_v8, 0.0  ;;  %v7565_v5 = vld [vmem:[#allocation26_spill] sm:$0xff] }
 0x1f8   :  { %v3746_v28 = vmax.f32 %v3646_v9, 0.0  ;;  %v3442_v30 = vmax.f32 %v3342_v13, %v7554_v61  ;;  %v3343_v1 = vmax.f32 %v7555_v52, %v5386_v0  ;;  %v2228_v27 = vpop.f32.mrb[131].mxu0  ;;  %v3028_v32 = vpop.f32.mrb[131].mxu1  ;;  %v7568_v52 = vld [vmem:[#allocation28_spill] sm:$0xff] }
 0x1f9   :  { %v3744_v51 = vmax.f32 %v3644_v57, 0.0  ;;  %v3440_v53 = vmax.f32 %v3340_v47, %v7556_v62  ;;  %v3341_v36 = vmax.f32 %v7557_v10, %v2228_v27  ;;  %v7567_v57 = vld [vmem:[#allocation27_spill] sm:$0xff] }
 0x1fa   :  { %v4800_v35 = vpack.c.bf16 %v3746_v28, %v3745_v19  ;;  %v3542_v33 = vmax.f32 %v3442_v30, %v5585_v11  ;;  %v3443_v37 = vmax.f32 %v3343_v1, %v7558_v6 }
 0x1fb   :  { %v4795_v31 = vpack.c.bf16 %v3744_v51, %v3743_v29  ;;  %v3540_v22 = vmax.f32 %v3440_v53, %v3025_v7  ;;  %v3441_v14 = vmax.f32 %v3341_v36, %v7559_v46  ;;  %v7569_v51 = vld [vmem:[#allocation30_spill] sm:$0xff] }
 0x1fc   :  { %4994 = vst [vmem:[%s7387_s3 + $0x68] sm:$0xff] %v4800_v35   ;;  %v3649_v42 = vadd.f32 %v6931_v59, %v3542_v33  ;;  %v3543_v58 = vmax.f32 %v3443_v37, %v5586_v50  ;;  %v7570_v33 = vld [vmem:[#allocation29_spill] sm:$0xff]  ;;  %v7571_v37 = vld [vmem:[#allocation32_spill] sm:$0xff] }
 0x1fd   :  { %4993 = vst [vmem:[%s7387_s3 + $0x60] sm:$0xff] %v4795_v31   ;;  %v3647_v54 = vadd.f32 %v6931_v59, %v3540_v22  ;;  %v3541_v16 = vmax.f32 %v3441_v14, %v3028_v32  ;;  %v5389_v2 = vpop.f32.mrb[132].mxu0  ;;  %v5589_v18 = vpop.f32.mrb[132].mxu1 }
 0x1fe   :  { %v3650_v23 = vadd.f32 %v6931_v59, %v3543_v58  ;;  %v3346_v20 = vmax.f32 %v7560_v15, %v5389_v2  ;;  %v2241_v17 = vpop.f32.mrb[133].mxu0  ;;  %v3041_v38 = vpop.f32.mrb[133].mxu1  ;;  %v3749_v25 = vmax.f32 %v3649_v42, 0.0  ;;  %v7572_v58 = vld [vmem:[#allocation31_spill] sm:$0xff]  ;;  %v7574_v15 = vld [vmem:[#allocation33_spill] sm:$0xff] }
 0x1ff   :  { %v3648_v24 = vadd.f32 %v6931_v59, %v3541_v16  ;;  %v3344_v21 = vmax.f32 %v7561_v56, %v2241_v17  ;;  %v5390_v40 = vpop.f32.mrb[134].mxu0  ;;  %v5590_v4 = vpop.f32.mrb[134].mxu1  ;;  %v3747_v63 = vmax.f32 %v3647_v54, 0.0  ;;  %v7573_v16 = vld [vmem:[#allocation34_spill] sm:$0xff] }
 0x200   :  { %v3750_v43 = vmax.f32 %v3650_v23, 0.0  ;;  %v3446_v44 = vmax.f32 %v3346_v20, %v7562_v39  ;;  %v3347_v48 = vmax.f32 %v7563_v41, %v5390_v40  ;;  %v2244_v60 = vpop.f32.mrb[135].mxu0  ;;  %v3044_v45 = vpop.f32.mrb[135].mxu1  ;;  %v7576_v41 = vld [vmem:[#allocation36_spill] sm:$0xff] }
 0x201   :  { %v3748_v49 = vmax.f32 %v3648_v24, 0.0  ;;  %v3444_v8 = vmax.f32 %v3344_v21, %v7564_v3  ;;  %v3345_v12 = vmax.f32 %v7565_v5, %v2244_v60  ;;  %v7575_v24 = vld [vmem:[#allocation35_spill] sm:$0xff] }
 0x202   :  { %v4810_v11 = vpack.c.bf16 %v3750_v43, %v3749_v25  ;;  %v3546_v9 = vmax.f32 %v3446_v44, %v5589_v18  ;;  %v3447_v13 = vmax.f32 %v3347_v48, %v7566_v55 }
 0x203   :  { %v4805_v34 = vpack.c.bf16 %v3748_v49, %v3747_v63  ;;  %v3544_v7 = vmax.f32 %v3444_v8, %v3041_v38  ;;  %v3445_v26 = vmax.f32 %v3345_v12, %v7567_v57  ;;  %v7577_v49 = vld [vmem:[#allocation38_spill] sm:$0xff] }
 0x204   :  { %4996 = vst [vmem:[%s7387_s3 + $0x78] sm:$0xff] %v4810_v11   ;;  %v3653_v47 = vadd.f32 %v6931_v59, %v3546_v9  ;;  %v3547_v0 = vmax.f32 %v3447_v13, %v5590_v4  ;;  %v7578_v9 = vld [vmem:[#allocation37_spill] sm:$0xff]  ;;  %v7579_v13 = vld [vmem:[#allocation40_spill] sm:$0xff] }
 0x205   :  { %4995 = vst [vmem:[%s7387_s3 + $0x70] sm:$0xff] %v4805_v34   ;;  %v3651_v50 = vadd.f32 %v6931_v59, %v3544_v7  ;;  %v3545_v19 = vmax.f32 %v3445_v26, %v3044_v45  ;;  %v5393_v28 = vpop.f32.mrb[136].mxu0  ;;  %v5593_v61 = vpop.f32.mrb[136].mxu1 }
 0x206   :  { %v3654_v30 = vadd.f32 %v6931_v59, %v3547_v0  ;;  %v3350_v1 = vmax.f32 %v7568_v52, %v5393_v28  ;;  %v2257_v27 = vpop.f32.mrb[137].mxu0  ;;  %v3057_v32 = vpop.f32.mrb[137].mxu1  ;;  %v3753_v36 = vmax.f32 %v3653_v47, 0.0  ;;  %v7580_v0 = vld [vmem:[#allocation39_spill] sm:$0xff]  ;;  %v7582_v52 = vld [vmem:[#allocation41_spill] sm:$0xff] }
 0x207   :  { %v3652_v29 = vadd.f32 %v6931_v59, %v3545_v19  ;;  %v3348_v62 = vmax.f32 %v7569_v51, %v2257_v27  ;;  %v5394_v53 = vpop.f32.mrb[138].mxu0  ;;  %v5594_v10 = vpop.f32.mrb[138].mxu1  ;;  %v3751_v14 = vmax.f32 %v3651_v50, 0.0  ;;  %v7581_v19 = vld [vmem:[#allocation42_spill] sm:$0xff] }
 0x208   :  { %v3754_v35 = vmax.f32 %v3654_v30, 0.0  ;;  %v3450_v6 = vmax.f32 %v3350_v1, %v7570_v33  ;;  %v3351_v31 = vmax.f32 %v7571_v37, %v5394_v53  ;;  %v2260_v22 = vpop.f32.mrb[139].mxu0  ;;  %v3060_v46 = vpop.f32.mrb[139].mxu1  ;;  %v7584_v37 = vld [vmem:[#allocation44_spill] sm:$0xff] }
 0x209   :  { %v3752_v42 = vmax.f32 %v3652_v29, 0.0  ;;  %v3448_v54 = vmax.f32 %v3348_v62, %v7572_v58  ;;  %v3349_v2 = vmax.f32 %v7573_v16, %v2260_v22  ;;  %v7583_v29 = vld [vmem:[#allocation43_spill] sm:$0xff] }
 0x20a   :  { %v4820_v18 = vpack.c.bf16 %v3754_v35, %v3753_v36  ;;  %v3550_v23 = vmax.f32 %v3450_v6, %v5593_v61  ;;  %v3451_v20 = vmax.f32 %v3351_v31, %v7574_v15 }
 0x20b   :  { %v4815_v17 = vpack.c.bf16 %v3752_v42, %v3751_v14  ;;  %v3548_v38 = vmax.f32 %v3448_v54, %v3057_v32  ;;  %v3449_v56 = vmax.f32 %v3349_v2, %v7575_v24  ;;  %v7585_v42 = vld [vmem:[#allocation46_spill] sm:$0xff] }
 0x20c   :  { %4998 = vst [vmem:[%s7387_s3 + $0x88] sm:$0xff] %v4820_v18   ;;  %v3657_v21 = vadd.f32 %v6931_v59, %v3550_v23  ;;  %v3551_v40 = vmax.f32 %v3451_v20, %v5594_v10  ;;  %v7586_v23 = vld [vmem:[#allocation45_spill] sm:$0xff]  ;;  %v7587_v20 = vld [vmem:[#allocation48_spill] sm:$0xff] }
 0x20d   :  { %4997 = vst [vmem:[%s7387_s3 + $0x80] sm:$0xff] %v4815_v17   ;;  %v3655_v4 = vadd.f32 %v6931_v59, %v3548_v38  ;;  %v3549_v25 = vmax.f32 %v3449_v56, %v3060_v46  ;;  %v5397_v43 = vpop.f32.mrb[140].mxu0  ;;  %v5597_v39 = vpop.f32.mrb[140].mxu1 }
 0x20e   :  { %v3658_v44 = vadd.f32 %v6931_v59, %v3551_v40  ;;  %v3354_v48 = vmax.f32 %v7576_v41, %v5397_v43  ;;  %v2273_v60 = vpop.f32.mrb[141].mxu0  ;;  %v3073_v45 = vpop.f32.mrb[141].mxu1  ;;  %v3757_v12 = vmax.f32 %v3657_v21, 0.0  ;;  %v7588_v40 = vld [vmem:[#allocation47_spill] sm:$0xff]  ;;  %v7590_v41 = vld [vmem:[#allocation49_spill] sm:$0xff] }
 0x20f   :  { %v3656_v63 = vadd.f32 %v6931_v59, %v3549_v25  ;;  %v3352_v3 = vmax.f32 %v7577_v49, %v2273_v60  ;;  %v5398_v8 = vpop.f32.mrb[142].mxu0  ;;  %v5598_v5 = vpop.f32.mrb[142].mxu1  ;;  %v3755_v26 = vmax.f32 %v3655_v4, 0.0  ;;  %v7589_v25 = vld [vmem:[#allocation50_spill] sm:$0xff] }
 0x210   :  { %v3758_v11 = vmax.f32 %v3658_v44, 0.0  ;;  %v3454_v55 = vmax.f32 %v3354_v48, %v7578_v9  ;;  %v3355_v34 = vmax.f32 %v7579_v13, %v5398_v8  ;;  %v2276_v7 = vpop.f32.mrb[143].mxu0  ;;  %v3076_v57 = vpop.f32.mrb[143].mxu1  ;;  %v7592_v13 = vld [vmem:[#allocation52_spill] sm:$0xff] }
 0x211   :  { %v3756_v47 = vmax.f32 %v3656_v63, 0.0  ;;  %v3452_v50 = vmax.f32 %v3352_v3, %v7580_v0  ;;  %v3353_v28 = vmax.f32 %v7581_v19, %v2276_v7  ;;  %v7591_v63 = vld [vmem:[#allocation51_spill] sm:$0xff] }
 0x212   :  { %v4830_v61 = vpack.c.bf16 %v3758_v11, %v3757_v12  ;;  %v3554_v30 = vmax.f32 %v3454_v55, %v5597_v39  ;;  %v3455_v1 = vmax.f32 %v3355_v34, %v7582_v52 }
 0x213   :  { %v4825_v27 = vpack.c.bf16 %v3756_v47, %v3755_v26  ;;  %v3552_v32 = vmax.f32 %v3452_v50, %v3073_v45  ;;  %v3453_v51 = vmax.f32 %v3353_v28, %v7583_v29  ;;  %v7593_v47 = vld [vmem:[#allocation54_spill] sm:$0xff] }
 0x214   :  { %5000 = vst [vmem:[%s7387_s3 + $0x98] sm:$0xff] %v4830_v61   ;;  %v3661_v62 = vadd.f32 %v6931_v59, %v3554_v30  ;;  %v3555_v53 = vmax.f32 %v3455_v1, %v5598_v5  ;;  %v7594_v30 = vld [vmem:[#allocation53_spill] sm:$0xff]  ;;  %v7595_v1 = vld [vmem:[#allocation56_spill] sm:$0xff] }
 0x215   :  { %4999 = vst [vmem:[%s7387_s3 + $0x90] sm:$0xff] %v4825_v27   ;;  %v3659_v10 = vadd.f32 %v6931_v59, %v3552_v32  ;;  %v3553_v36 = vmax.f32 %v3453_v51, %v3076_v57  ;;  %v5401_v35 = vpop.f32.mrb[144].mxu0  ;;  %v5601_v33 = vpop.f32.mrb[144].mxu1 }
 0x216   :  { %v3662_v6 = vadd.f32 %v6931_v59, %v3555_v53  ;;  %v3358_v31 = vmax.f32 %v7584_v37, %v5401_v35  ;;  %v2289_v22 = vpop.f32.mrb[145].mxu0  ;;  %v3089_v46 = vpop.f32.mrb[145].mxu1  ;;  %v3761_v2 = vmax.f32 %v3661_v62, 0.0  ;;  %v7596_v53 = vld [vmem:[#allocation55_spill] sm:$0xff]  ;;  %v7598_v37 = vld [vmem:[#allocation57_spill] sm:$0xff] }
 0x217   :  { %v3660_v14 = vadd.f32 %v6931_v59, %v3553_v36  ;;  %v3356_v58 = vmax.f32 %v7585_v42, %v2289_v22  ;;  %v5402_v54 = vpop.f32.mrb[146].mxu0  ;;  %v5602_v16 = vpop.f32.mrb[146].mxu1  ;;  %v3759_v56 = vmax.f32 %v3659_v10, 0.0  ;;  %v7597_v36 = vld [vmem:[#allocation58_spill] sm:$0xff] }
 0x218   :  { %v3762_v18 = vmax.f32 %v3662_v6, 0.0  ;;  %v3458_v15 = vmax.f32 %v3358_v31, %v7586_v23  ;;  %v3359_v17 = vmax.f32 %v7587_v20, %v5402_v54  ;;  %v2292_v38 = vpop.f32.mrb[147].mxu0  ;;  %v3092_v24 = vpop.f32.mrb[147].mxu1  ;;  %v7600_v20 = vld [vmem:[#allocation60_spill] sm:$0xff] }
 0x219   :  { %v3760_v21 = vmax.f32 %v3660_v14, 0.0  ;;  %v3456_v4 = vmax.f32 %v3356_v58, %v7588_v40  ;;  %v3357_v43 = vmax.f32 %v7589_v25, %v2292_v38  ;;  %v7599_v14 = vld [vmem:[#allocation59_spill] sm:$0xff] }
 0x21a   :  { %v4840_v39 = vpack.c.bf16 %v3762_v18, %v3761_v2  ;;  %v3558_v44 = vmax.f32 %v3458_v15, %v5601_v33  ;;  %v3459_v48 = vmax.f32 %v3359_v17, %v7590_v41 }
 0x21b   :  { %v4835_v60 = vpack.c.bf16 %v3760_v21, %v3759_v56  ;;  %v3556_v45 = vmax.f32 %v3456_v4, %v3089_v46  ;;  %v3457_v49 = vmax.f32 %v3357_v43, %v7591_v63  ;;  %v7601_v21 = vld [vmem:[#allocation62_spill] sm:$0xff] }
 0x21c   :  { %5002 = vst [vmem:[%s7387_s3 + $0xa8] sm:$0xff] %v4840_v39   ;;  %v3665_v3 = vadd.f32 %v6931_v59, %v3558_v44  ;;  %v3559_v8 = vmax.f32 %v3459_v48, %v5602_v16  ;;  %v7602_v44 = vld [vmem:[#allocation61_spill] sm:$0xff]  ;;  %v7603_v48 = vld [vmem:[#allocation64_spill] sm:$0xff] }
 0x21d   :  { %5001 = vst [vmem:[%s7387_s3 + $0xa0] sm:$0xff] %v4835_v60   ;;  %v3663_v5 = vadd.f32 %v6931_v59, %v3556_v45  ;;  %v3557_v12 = vmax.f32 %v3457_v49, %v3092_v24  ;;  %v5405_v11 = vpop.f32.mrb[148].mxu0  ;;  %v5605_v9 = vpop.f32.mrb[148].mxu1 }
 0x21e   :  { %v3666_v55 = vadd.f32 %v6931_v59, %v3559_v8  ;;  %v3362_v34 = vmax.f32 %v7592_v13, %v5405_v11  ;;  %v2305_v7 = vpop.f32.mrb[149].mxu0  ;;  %v3105_v57 = vpop.f32.mrb[149].mxu1  ;;  %v3765_v28 = vmax.f32 %v3665_v3, 0.0  ;;  %v7604_v8 = vld [vmem:[#allocation63_spill] sm:$0xff]  ;;  %v7606_v13 = vld [vmem:[#allocation65_spill] sm:$0xff] }
 0x21f   :  { %v3664_v26 = vadd.f32 %v6931_v59, %v3557_v12  ;;  %v3360_v0 = vmax.f32 %v7593_v47, %v2305_v7  ;;  %v5406_v50 = vpop.f32.mrb[150].mxu0  ;;  %v5606_v19 = vpop.f32.mrb[150].mxu1  ;;  %v3763_v51 = vmax.f32 %v3663_v5, 0.0  ;;  %v7605_v12 = vld [vmem:[#allocation66_spill] sm:$0xff] }
 0x220   :  { %v3766_v61 = vmax.f32 %v3666_v55, 0.0  ;;  %v3462_v52 = vmax.f32 %v3362_v34, %v7594_v30  ;;  %v3363_v27 = vmax.f32 %v7595_v1, %v5406_v50  ;;  %v2308_v32 = vpop.f32.mrb[151].mxu0  ;;  %v3108_v29 = vpop.f32.mrb[151].mxu1  ;;  %v7608_v1 = vld [vmem:[#allocation68_spill] sm:$0xff] }
 0x221   :  { %v3764_v62 = vmax.f32 %v3664_v26, 0.0  ;;  %v3460_v10 = vmax.f32 %v3360_v0, %v7596_v53  ;;  %v3361_v35 = vmax.f32 %v7597_v36, %v2308_v32  ;;  %v7607_v26 = vld [vmem:[#allocation67_spill] sm:$0xff] }
 0x222   :  { %v4850_v33 = vpack.c.bf16 %v3766_v61, %v3765_v28  ;;  %v3562_v6 = vmax.f32 %v3462_v52, %v5605_v9  ;;  %v3463_v31 = vmax.f32 %v3363_v27, %v7598_v37 }
 0x223   :  { %v4845_v22 = vpack.c.bf16 %v3764_v62, %v3763_v51  ;;  %v3560_v46 = vmax.f32 %v3460_v10, %v3105_v57  ;;  %v3461_v42 = vmax.f32 %v3361_v35, %v7599_v14  ;;  %v7609_v62 = vld [vmem:[#allocation70_spill] sm:$0xff] }
 0x224   :  { %5004 = vst [vmem:[%s7387_s3 + $0xb8] sm:$0xff] %v4850_v33   ;;  %v3669_v58 = vadd.f32 %v6931_v59, %v3562_v6  ;;  %v3563_v54 = vmax.f32 %v3463_v31, %v5606_v19  ;;  %v7610_v6 = vld [vmem:[#allocation69_spill] sm:$0xff]  ;;  %v7611_v31 = vld [vmem:[#allocation72_spill] sm:$0xff] }
 0x225   :  { %5003 = vst [vmem:[%s7387_s3 + $0xb0] sm:$0xff] %v4845_v22   ;;  %v3667_v16 = vadd.f32 %v6931_v59, %v3560_v46  ;;  %v3561_v2 = vmax.f32 %v3461_v42, %v3108_v29  ;;  %v5409_v18 = vpop.f32.mrb[152].mxu0  ;;  %v5609_v23 = vpop.f32.mrb[152].mxu1 }
 0x226   :  { %v3670_v15 = vadd.f32 %v6931_v59, %v3563_v54  ;;  %v3366_v17 = vmax.f32 %v7600_v20, %v5409_v18  ;;  %v2321_v38 = vpop.f32.mrb[153].mxu0  ;;  %v3121_v24 = vpop.f32.mrb[153].mxu1  ;;  %v3769_v43 = vmax.f32 %v3669_v58, 0.0  ;;  %v7612_v54 = vld [vmem:[#allocation71_spill] sm:$0xff]  ;;  %v7614_v20 = vld [vmem:[#allocation73_spill] sm:$0xff] }
 0x227   :  { %v3668_v56 = vadd.f32 %v6931_v59, %v3561_v2  ;;  %v3364_v40 = vmax.f32 %v7601_v21, %v2321_v38  ;;  %v5410_v4 = vpop.f32.mrb[154].mxu0  ;;  %v5610_v25 = vpop.f32.mrb[154].mxu1  ;;  %v3767_v49 = vmax.f32 %v3667_v16, 0.0  ;;  %v7613_v2 = vld [vmem:[#allocation74_spill] sm:$0xff] }
 0x228   :  { %v3770_v39 = vmax.f32 %v3670_v15, 0.0  ;;  %v3466_v41 = vmax.f32 %v3366_v17, %v7602_v44  ;;  %v3367_v60 = vmax.f32 %v7603_v48, %v5410_v4  ;;  %v2324_v45 = vpop.f32.mrb[155].mxu0  ;;  %v3124_v63 = vpop.f32.mrb[155].mxu1  ;;  %v7616_v48 = vld [vmem:[#allocation76_spill] sm:$0xff] }
 0x229   :  { %v3768_v3 = vmax.f32 %v3668_v56, 0.0  ;;  %v3464_v5 = vmax.f32 %v3364_v40, %v7604_v8  ;;  %v3365_v11 = vmax.f32 %v7605_v12, %v2324_v45  ;;  %v7615_v56 = vld [vmem:[#allocation75_spill] sm:$0xff] }
 0x22a   :  { %v4860_v9 = vpack.c.bf16 %v3770_v39, %v3769_v43  ;;  %v3566_v55 = vmax.f32 %v3466_v41, %v5609_v23  ;;  %v3467_v34 = vmax.f32 %v3367_v60, %v7606_v13 }
 0x22b   :  { %v4855_v7 = vpack.c.bf16 %v3768_v3, %v3767_v49  ;;  %v3564_v57 = vmax.f32 %v3464_v5, %v3121_v24  ;;  %v3465_v47 = vmax.f32 %v3365_v11, %v7607_v26  ;;  %v7617_v3 = vld [vmem:[#allocation78_spill] sm:$0xff] }
 0x22c   :  { %5006 = vst [vmem:[%s7387_s3 + $0xc8] sm:$0xff] %v4860_v9   ;;  %v3673_v0 = vadd.f32 %v6931_v59, %v3566_v55  ;;  %v3567_v50 = vmax.f32 %v3467_v34, %v5610_v25  ;;  %v7618_v55 = vld [vmem:[#allocation77_spill] sm:$0xff]  ;;  %v7619_v34 = vld [vmem:[#allocation80_spill] sm:$0xff] }
 0x22d   :  { %5005 = vst [vmem:[%s7387_s3 + $0xc0] sm:$0xff] %v4855_v7   ;;  %v3671_v19 = vadd.f32 %v6931_v59, %v3564_v57  ;;  %v3565_v28 = vmax.f32 %v3465_v47, %v3124_v63  ;;  %v5413_v61 = vpop.f32.mrb[156].mxu0  ;;  %v5613_v30 = vpop.f32.mrb[156].mxu1 }
 0x22e   :  { %v3674_v52 = vadd.f32 %v6931_v59, %v3567_v50  ;;  %v3370_v27 = vmax.f32 %v7608_v1, %v5413_v61  ;;  %v2337_v32 = vpop.f32.mrb[157].mxu0  ;;  %v3137_v29 = vpop.f32.mrb[157].mxu1  ;;  %v3773_v35 = vmax.f32 %v3673_v0, 0.0  ;;  %v7620_v50 = vld [vmem:[#allocation79_spill] sm:$0xff]  ;;  %v7622_v1 = vld [vmem:[#allocation81_spill] sm:$0xff] }
 0x22f   :  { %v3672_v51 = vadd.f32 %v6931_v59, %v3565_v28  ;;  %v3368_v53 = vmax.f32 %v7609_v62, %v2337_v32  ;;  %v5414_v10 = vpop.f32.mrb[158].mxu0  ;;  %v5614_v36 = vpop.f32.mrb[158].mxu1  ;;  %v3771_v42 = vmax.f32 %v3671_v19, 0.0  ;;  %v7621_v28 = vld [vmem:[#allocation82_spill] sm:$0xff] }
 0x230   :  { %v3774_v33 = vmax.f32 %v3674_v52, 0.0  ;;  %v3470_v37 = vmax.f32 %v3370_v27, %v7610_v6  ;;  %v3371_v22 = vmax.f32 %v7611_v31, %v5414_v10  ;;  %v2340_v46 = vpop.f32.mrb[159].mxu0  ;;  %v3140_v14 = vpop.f32.mrb[159].mxu1  ;;  %v7624_v31 = vld [vmem:[#allocation84_spill] sm:$0xff] }
 0x231   :  { %v3772_v58 = vmax.f32 %v3672_v51, 0.0  ;;  %v3468_v16 = vmax.f32 %v3368_v53, %v7612_v54  ;;  %v3369_v18 = vmax.f32 %v7613_v2, %v2340_v46  ;;  %v7623_v51 = vld [vmem:[#allocation83_spill] sm:$0xff] }
 0x232   :  { %v4870_v23 = vpack.c.bf16 %v3774_v33, %v3773_v35  ;;  %v3570_v15 = vmax.f32 %v3470_v37, %v5613_v30  ;;  %v3471_v17 = vmax.f32 %v3371_v22, %v7614_v20 }
 0x233   :  { %v4865_v38 = vpack.c.bf16 %v3772_v58, %v3771_v42  ;;  %v3568_v24 = vmax.f32 %v3468_v16, %v3137_v29  ;;  %v3469_v21 = vmax.f32 %v3369_v18, %v7615_v56  ;;  %v7625_v58 = vld [vmem:[#allocation86_spill] sm:$0xff] }
 0x234   :  { %5008 = vst [vmem:[%s7387_s3 + $0xd8] sm:$0xff] %v4870_v23   ;;  %v3677_v40 = vadd.f32 %v6931_v59, %v3570_v15  ;;  %v3571_v4 = vmax.f32 %v3471_v17, %v5614_v36  ;;  %v7626_v15 = vld [vmem:[#allocation85_spill] sm:$0xff]  ;;  %v7627_v17 = vld [vmem:[#allocation88_spill] sm:$0xff] }
 0x235   :  { %5007 = vst [vmem:[%s7387_s3 + $0xd0] sm:$0xff] %v4865_v38   ;;  %v3675_v25 = vadd.f32 %v6931_v59, %v3568_v24  ;;  %v3569_v43 = vmax.f32 %v3469_v21, %v3140_v14  ;;  %v5417_v39 = vpop.f32.mrb[160].mxu0  ;;  %v5617_v44 = vpop.f32.mrb[160].mxu1 }
 0x236   :  { %v3678_v41 = vadd.f32 %v6931_v59, %v3571_v4  ;;  %v3374_v60 = vmax.f32 %v7616_v48, %v5417_v39  ;;  %v2353_v45 = vpop.f32.mrb[161].mxu0  ;;  %v3153_v63 = vpop.f32.mrb[161].mxu1  ;;  %v3777_v11 = vmax.f32 %v3677_v40, 0.0  ;;  %v7628_v4 = vld [vmem:[#allocation87_spill] sm:$0xff] }
 0x237   :  { %v3676_v49 = vadd.f32 %v6931_v59, %v3569_v43  ;;  %v3372_v8 = vmax.f32 %v7617_v3, %v2353_v45  ;;  %v5418_v5 = vpop.f32.mrb[162].mxu0  ;;  %v5618_v12 = vpop.f32.mrb[162].mxu1  ;;  %v3775_v47 = vmax.f32 %v3675_v25, 0.0  ;;  %v7629_v43 = vld [vmem:[#allocation90_spill] sm:$0xff] }
 0x238   :  { %v3778_v9 = vmax.f32 %v3678_v41, 0.0  ;;  %v3474_v13 = vmax.f32 %v3374_v60, %v7618_v55  ;;  %v3375_v7 = vmax.f32 %v7619_v34, %v5418_v5  ;;  %v2356_v57 = vpop.f32.mrb[163].mxu0  ;;  %v3156_v26 = vpop.f32.mrb[163].mxu1  ;;  %v7630_v41 = vld [vmem:[#allocation89_spill] sm:$0xff]  ;;  %v7225_v3 = vld [vmem:[%s7386_s2] ss:$0 sm:$0xff] }
 0x239   :  { %v3776_v0 = vmax.f32 %v3676_v49, 0.0  ;;  %v3472_v19 = vmax.f32 %v3372_v8, %v7620_v50  ;;  %v3373_v61 = vmax.f32 %v7621_v28, %v2356_v57  ;;  %v7632_v34 = vld [vmem:[#allocation92_spill] sm:$0xff] }
 0x23a   :  { %v4880_v30 = vpack.c.bf16 %v3778_v9, %v3777_v11  ;;  %v3574_v52 = vmax.f32 %v3474_v13, %v5617_v44  ;;  %v3475_v27 = vmax.f32 %v3375_v7, %v7622_v1 }
 0x23b   :  { %v4875_v32 = vpack.c.bf16 %v3776_v0, %v3775_v47  ;;  %v3572_v29 = vmax.f32 %v3472_v19, %v3153_v63  ;;  %v3473_v62 = vmax.f32 %v3373_v61, %v7623_v51  ;;  %v7631_v63 = vld [vmem:[#allocation91_spill] sm:$0xff]  ;;  %v7633_v0 = vld [vmem:[#allocation94_spill] sm:$0xff] }
 0x23c   :  { %5010 = vst [vmem:[%s7387_s3 + $0xe8] sm:$0xff] %v4880_v30   ;;  %v3681_v53 = vadd.f32 %v6931_v59, %v3574_v52  ;;  %v3575_v10 = vmax.f32 %v3475_v27, %v5618_v12  ;;  %v7634_v52 = vld [vmem:[#allocation93_spill] sm:$0xff]  ;;  %v7635_v27 = vld [vmem:[#allocation96_spill] sm:$0xff] }
 0x23d   :  { %5009 = vst [vmem:[%s7387_s3 + $0xe0] sm:$0xff] %v4875_v32   ;;  %v3679_v36 = vadd.f32 %v6931_v59, %v3572_v29  ;;  %v3573_v35 = vmax.f32 %v3473_v62, %v3156_v26  ;;  %v5421_v33 = vpop.f32.mrb[164].mxu0  ;;  %v5621_v6 = vpop.f32.mrb[164].mxu1 }
 0x23e   :  { %v3682_v37 = vadd.f32 %v6931_v59, %v3575_v10  ;;  %v3378_v22 = vmax.f32 %v7624_v31, %v5421_v33  ;;  %v2369_v46 = vpop.f32.mrb[165].mxu0  ;;  %v3169_v14 = vpop.f32.mrb[165].mxu1  ;;  %v3781_v18 = vmax.f32 %v3681_v53, 0.0  ;;  %v7636_v10 = vld [vmem:[#allocation95_spill] sm:$0xff]  ;;  %v7638_v31 = vld [vmem:[#allocation97_spill] sm:$0xff] }
 0x23f   :  { %v3680_v42 = vadd.f32 %v6931_v59, %v3573_v35  ;;  %v3376_v54 = vmax.f32 %v7625_v58, %v2369_v46  ;;  %v5422_v16 = vpop.f32.mrb[166].mxu0  ;;  %v5622_v2 = vpop.f32.mrb[166].mxu1  ;;  %v3779_v21 = vmax.f32 %v3679_v36, 0.0  ;;  %v7637_v35 = vld [vmem:[#allocation98_spill] sm:$0xff] }
 0x240   :  { %v3782_v23 = vmax.f32 %v3682_v37, 0.0  ;;  %v3478_v20 = vmax.f32 %v3378_v22, %v7626_v15  ;;  %v3379_v38 = vmax.f32 %v7627_v17, %v5422_v16  ;;  %v2372_v24 = vpop.f32.mrb[167].mxu0  ;;  %v3172_v56 = vpop.f32.mrb[167].mxu1  ;;  %v7640_v17 = vld [vmem:[#allocation100_spill] sm:$0xff] }
 0x241   :  { %v3780_v40 = vmax.f32 %v3680_v42, 0.0  ;;  %v3476_v25 = vmax.f32 %v3376_v54, %v7628_v4  ;;  %v3377_v39 = vmax.f32 %v7629_v43, %v2372_v24  ;;  %v7639_v42 = vld [vmem:[#allocation99_spill] sm:$0xff] }
 0x242   :  { %v4890_v44 = vpack.c.bf16 %v3782_v23, %v3781_v18  ;;  %v3578_v59 = vmax.f32 %v3478_v20, %v5621_v6  ;;  %v3479_v48 = vmax.f32 %v3379_v38, %v7630_v41 }
 0x243   :  { %v4885_v60 = vpack.c.bf16 %v3780_v40, %v3779_v21  ;;  %v3576_v45 = vmax.f32 %v3476_v25, %v3169_v14  ;;  %v3477_v49 = vmax.f32 %v3377_v39, %v7631_v63  ;;  %v7641_v40 = vld [vmem:[#allocation102_spill] sm:$0xff] }
 0x244   :  { %5012 = vst [vmem:[%s7387_s3 + $0xf8] sm:$0xff] %v4890_v44   ;;  %v3685_v8 = vadd.f32 %v7225_v3, %v3578_v59  ;;  %v3579_v5 = vmax.f32 %v3479_v48, %v5622_v2  ;;  %v7642_v59 = vld [vmem:[#allocation101_spill] sm:$0xff]  ;;  %v7643_v48 = vld [vmem:[#allocation104_spill] sm:$0xff] }
 0x245   :  { %5011 = vst [vmem:[%s7387_s3 + $0xf0] sm:$0xff] %v4885_v60   ;;  %v3683_v12 = vadd.f32 %v7225_v3, %v3576_v45  ;;  %v3577_v11 = vmax.f32 %v3477_v49, %v3172_v56  ;;  %v5425_v9 = vpop.f32.mrb[168].mxu0  ;;  %v5625_v55 = vpop.f32.mrb[168].mxu1 }
 0x246   :  { %v3686_v13 = vadd.f32 %v7225_v3, %v3579_v5  ;;  %v3382_v7 = vmax.f32 %v7632_v34, %v5425_v9  ;;  %v2385_v57 = vpop.f32.mrb[169].mxu0  ;;  %v3185_v26 = vpop.f32.mrb[169].mxu1  ;;  %v3785_v61 = vmax.f32 %v3685_v8, 0.0  ;;  %v7644_v5 = vld [vmem:[#allocation103_spill] sm:$0xff]  ;;  %v7646_v34 = vld [vmem:[#allocation105_spill] sm:$0xff] }
 0x247   :  { %v3684_v47 = vadd.f32 %v7225_v3, %v3577_v11  ;;  %v3380_v50 = vmax.f32 %v7633_v0, %v2385_v57  ;;  %v5426_v19 = vpop.f32.mrb[170].mxu0  ;;  %v5626_v28 = vpop.f32.mrb[170].mxu1  ;;  %v3783_v62 = vmax.f32 %v3683_v12, 0.0  ;;  %v7645_v11 = vld [vmem:[#allocation106_spill] sm:$0xff] }
 0x248   :  { %v3786_v30 = vmax.f32 %v3686_v13, 0.0  ;;  %v3482_v1 = vmax.f32 %v3382_v7, %v7634_v52  ;;  %v3383_v32 = vmax.f32 %v7635_v27, %v5426_v19  ;;  %v2388_v29 = vpop.f32.mrb[171].mxu0  ;;  %v3188_v51 = vpop.f32.mrb[171].mxu1  ;;  %v7648_v27 = vld [vmem:[#allocation108_spill] sm:$0xff] }
 0x249   :  { %v3784_v53 = vmax.f32 %v3684_v47, 0.0  ;;  %v3480_v36 = vmax.f32 %v3380_v50, %v7636_v10  ;;  %v3381_v33 = vmax.f32 %v7637_v35, %v2388_v29  ;;  %v7647_v47 = vld [vmem:[#allocation107_spill] sm:$0xff] }
 0x24a   :  { %v4900_v6 = vpack.c.bf16 %v3786_v30, %v3785_v61  ;;  %v3582_v37 = vmax.f32 %v3482_v1, %v5625_v55  ;;  %v3483_v22 = vmax.f32 %v3383_v32, %v7638_v31 }
 0x24b   :  { %v4895_v46 = vpack.c.bf16 %v3784_v53, %v3783_v62  ;;  %v3580_v14 = vmax.f32 %v3480_v36, %v3185_v26  ;;  %v3481_v58 = vmax.f32 %v3381_v33, %v7639_v42  ;;  %v7649_v53 = vld [vmem:[#allocation110_spill] sm:$0xff] }
 0x24c   :  { %5014 = vst [vmem:[%s7387_s3 + $0x108] sm:$0xff] %v4900_v6   ;;  %v3689_v54 = vadd.f32 %v7225_v3, %v3582_v37  ;;  %v3583_v16 = vmax.f32 %v3483_v22, %v5626_v28  ;;  %v7650_v37 = vld [vmem:[#allocation109_spill] sm:$0xff]  ;;  %v7651_v22 = vld [vmem:[#allocation112_spill] sm:$0xff] }
 0x24d   :  { %5013 = vst [vmem:[%s7387_s3 + $0x100] sm:$0xff] %v4895_v46   ;;  %v3687_v2 = vadd.f32 %v7225_v3, %v3580_v14  ;;  %v3581_v18 = vmax.f32 %v3481_v58, %v3188_v51  ;;  %v5429_v23 = vpop.f32.mrb[172].mxu0  ;;  %v5629_v15 = vpop.f32.mrb[172].mxu1 }
 0x24e   :  { %v3690_v20 = vadd.f32 %v7225_v3, %v3583_v16  ;;  %v3386_v38 = vmax.f32 %v7640_v17, %v5429_v23  ;;  %v2401_v24 = vpop.f32.mrb[173].mxu0  ;;  %v3201_v56 = vpop.f32.mrb[173].mxu1  ;;  %v3789_v39 = vmax.f32 %v3689_v54, 0.0  ;;  %v7652_v16 = vld [vmem:[#allocation111_spill] sm:$0xff]  ;;  %v7654_v17 = vld [vmem:[#allocation113_spill] sm:$0xff] }
 0x24f   :  { %v3688_v21 = vadd.f32 %v7225_v3, %v3581_v18  ;;  %v3384_v4 = vmax.f32 %v7641_v40, %v2401_v24  ;;  %v5430_v25 = vpop.f32.mrb[174].mxu0  ;;  %v5630_v43 = vpop.f32.mrb[174].mxu1  ;;  %v3787_v49 = vmax.f32 %v3687_v2, 0.0  ;;  %v7653_v18 = vld [vmem:[#allocation114_spill] sm:$0xff] }
 0x250   :  { %v3790_v44 = vmax.f32 %v3690_v20, 0.0  ;;  %v3486_v41 = vmax.f32 %v3386_v38, %v7642_v59  ;;  %v3387_v60 = vmax.f32 %v7643_v48, %v5430_v25  ;;  %v2404_v45 = vpop.f32.mrb[175].mxu0  ;;  %v3204_v63 = vpop.f32.mrb[175].mxu1  ;;  %v7656_v48 = vld [vmem:[#allocation116_spill] sm:$0xff] }
 0x251   :  { %v3788_v8 = vmax.f32 %v3688_v21, 0.0  ;;  %v3484_v12 = vmax.f32 %v3384_v4, %v7644_v5  ;;  %v3385_v9 = vmax.f32 %v7645_v11, %v2404_v45  ;;  %v7655_v21 = vld [vmem:[#allocation115_spill] sm:$0xff] }
 0x252   :  { %v4910_v55 = vpack.c.bf16 %v3790_v44, %v3789_v39  ;;  %v3586_v13 = vmax.f32 %v3486_v41, %v5629_v15  ;;  %v3487_v7 = vmax.f32 %v3387_v60, %v7646_v34 }
 0x253   :  { %v4905_v57 = vpack.c.bf16 %v3788_v8, %v3787_v49  ;;  %v3584_v26 = vmax.f32 %v3484_v12, %v3201_v56  ;;  %v3485_v0 = vmax.f32 %v3385_v9, %v7647_v47  ;;  %v7657_v8 = vld [vmem:[#allocation118_spill] sm:$0xff] }
 0x254   :  { %5016 = vst [vmem:[%s7387_s3 + $0x118] sm:$0xff] %v4910_v55   ;;  %v3693_v50 = vadd.f32 %v7225_v3, %v3586_v13  ;;  %v3587_v19 = vmax.f32 %v3487_v7, %v5630_v43  ;;  %v7658_v13 = vld [vmem:[#allocation117_spill] sm:$0xff]  ;;  %v7659_v7 = vld [vmem:[#allocation120_spill] sm:$0xff] }
 0x255   :  { %5015 = vst [vmem:[%s7387_s3 + $0x110] sm:$0xff] %v4905_v57   ;;  %v3691_v28 = vadd.f32 %v7225_v3, %v3584_v26  ;;  %v3585_v61 = vmax.f32 %v3485_v0, %v3204_v63  ;;  %v5433_v30 = vpop.f32.mrb[176].mxu0  ;;  %v5633_v52 = vpop.f32.mrb[176].mxu1 }
 0x256   :  { %v3694_v1 = vadd.f32 %v7225_v3, %v3587_v19  ;;  %v3390_v32 = vmax.f32 %v7648_v27, %v5433_v30  ;;  %v2417_v29 = vpop.f32.mrb[177].mxu0  ;;  %v3217_v51 = vpop.f32.mrb[177].mxu1  ;;  %v3793_v33 = vmax.f32 %v3693_v50, 0.0  ;;  %v7660_v19 = vld [vmem:[#allocation119_spill] sm:$0xff]  ;;  %v7662_v27 = vld [vmem:[#allocation121_spill] sm:$0xff] }
 0x257   :  { %v3692_v62 = vadd.f32 %v7225_v3, %v3585_v61  ;;  %v3388_v10 = vmax.f32 %v7649_v53, %v2417_v29  ;;  %v5434_v36 = vpop.f32.mrb[178].mxu0  ;;  %v5634_v35 = vpop.f32.mrb[178].mxu1  ;;  %v3791_v58 = vmax.f32 %v3691_v28, 0.0  ;;  %v7661_v61 = vld [vmem:[#allocation122_spill] sm:$0xff] }
 0x258   :  { %v3794_v6 = vmax.f32 %v3694_v1, 0.0  ;;  %v3490_v31 = vmax.f32 %v3390_v32, %v7650_v37  ;;  %v3391_v46 = vmax.f32 %v7651_v22, %v5434_v36  ;;  %v2420_v14 = vpop.f32.mrb[179].mxu0  ;;  %v3220_v42 = vpop.f32.mrb[179].mxu1  ;;  %v7664_v22 = vld [vmem:[#allocation124_spill] sm:$0xff] }
 0x259   :  { %v3792_v54 = vmax.f32 %v3692_v62, 0.0  ;;  %v3488_v2 = vmax.f32 %v3388_v10, %v7652_v16  ;;  %v3389_v23 = vmax.f32 %v7653_v18, %v2420_v14  ;;  %v7663_v62 = vld [vmem:[#allocation123_spill] sm:$0xff] }
 0x25a   :  { %v4920_v15 = vpack.c.bf16 %v3794_v6, %v3793_v33  ;;  %v3590_v20 = vmax.f32 %v3490_v31, %v5633_v52  ;;  %v3491_v38 = vmax.f32 %v3391_v46, %v7654_v17 }
 0x25b   :  { %v4915_v24 = vpack.c.bf16 %v3792_v54, %v3791_v58  ;;  %v3588_v56 = vmax.f32 %v3488_v2, %v3217_v51  ;;  %v3489_v40 = vmax.f32 %v3389_v23, %v7655_v21  ;;  %v7665_v54 = vld [vmem:[#allocation126_spill] sm:$0xff] }
 0x25c   :  { %5018 = vst [vmem:[%s7387_s3 + $0x128] sm:$0xff] %v4920_v15   ;;  %v3697_v4 = vadd.f32 %v7225_v3, %v3590_v20  ;;  %v3591_v25 = vmax.f32 %v3491_v38, %v5634_v35  ;;  %v7666_v20 = vld [vmem:[#allocation125_spill] sm:$0xff]  ;;  %v7667_v38 = vld [vmem:[#allocation128_spill] sm:$0xff] }
 0x25d   :  { %5017 = vst [vmem:[%s7387_s3 + $0x120] sm:$0xff] %v4915_v24   ;;  %v3695_v43 = vadd.f32 %v7225_v3, %v3588_v56  ;;  %v3589_v39 = vmax.f32 %v3489_v40, %v3220_v42  ;;  %v5437_v44 = vpop.f32.mrb[180].mxu0  ;;  %v5637_v59 = vpop.f32.mrb[180].mxu1 }
 0x25e   :  { %v3698_v41 = vadd.f32 %v7225_v3, %v3591_v25  ;;  %v3394_v60 = vmax.f32 %v7656_v48, %v5437_v44  ;;  %v2433_v45 = vpop.f32.mrb[181].mxu0  ;;  %v3233_v63 = vpop.f32.mrb[181].mxu1  ;;  %v3797_v9 = vmax.f32 %v3697_v4, 0.0  ;;  %v7668_v25 = vld [vmem:[#allocation127_spill] sm:$0xff]  ;;  %v7670_v48 = vld [vmem:[#allocation129_spill] sm:$0xff] }
 0x25f   :  { %v3696_v49 = vadd.f32 %v7225_v3, %v3589_v39  ;;  %v3392_v5 = vmax.f32 %v7657_v8, %v2433_v45  ;;  %v5438_v12 = vpop.f32.mrb[182].mxu0  ;;  %v5638_v11 = vpop.f32.mrb[182].mxu1  ;;  %v3795_v0 = vmax.f32 %v3695_v43, 0.0  ;;  %v7669_v39 = vld [vmem:[#allocation130_spill] sm:$0xff] }
 0x260   :  { %v3798_v55 = vmax.f32 %v3698_v41, 0.0  ;;  %v3494_v34 = vmax.f32 %v3394_v60, %v7658_v13  ;;  %v3395_v57 = vmax.f32 %v7659_v7, %v5438_v12  ;;  %v2436_v26 = vpop.f32.mrb[183].mxu0  ;;  %v3236_v47 = vpop.f32.mrb[183].mxu1  ;;  %v7672_v7 = vld [vmem:[#allocation132_spill] sm:$0xff] }
 0x261   :  { %v3796_v50 = vmax.f32 %v3696_v49, 0.0  ;;  %v3492_v28 = vmax.f32 %v3392_v5, %v7660_v19  ;;  %v3393_v30 = vmax.f32 %v7661_v61, %v2436_v26  ;;  %v7671_v49 = vld [vmem:[#allocation131_spill] sm:$0xff] }
 0x262   :  { %v4930_v52 = vpack.c.bf16 %v3798_v55, %v3797_v9  ;;  %v3594_v1 = vmax.f32 %v3494_v34, %v5637_v59  ;;  %v3495_v32 = vmax.f32 %v3395_v57, %v7662_v27 }
 0x263   :  { %v4925_v29 = vpack.c.bf16 %v3796_v50, %v3795_v0  ;;  %v3592_v51 = vmax.f32 %v3492_v28, %v3233_v63  ;;  %v3493_v53 = vmax.f32 %v3393_v30, %v7663_v62  ;;  %v7673_v50 = vld [vmem:[#allocation134_spill] sm:$0xff] }
 0x264   :  { %5020 = vst [vmem:[%s7387_s3 + $0x138] sm:$0xff] %v4930_v52   ;;  %v3701_v10 = vadd.f32 %v7225_v3, %v3594_v1  ;;  %v3595_v36 = vmax.f32 %v3495_v32, %v5638_v11  ;;  %v7674_v1 = vld [vmem:[#allocation133_spill] sm:$0xff]  ;;  %v7675_v32 = vld [vmem:[#allocation136_spill] sm:$0xff] }
 0x265   :  { %5019 = vst [vmem:[%s7387_s3 + $0x130] sm:$0xff] %v4925_v29   ;;  %v3699_v35 = vadd.f32 %v7225_v3, %v3592_v51  ;;  %v3593_v33 = vmax.f32 %v3493_v53, %v3236_v47  ;;  %v5441_v6 = vpop.f32.mrb[184].mxu0  ;;  %v5641_v37 = vpop.f32.mrb[184].mxu1 }
 0x266   :  { %v3702_v31 = vadd.f32 %v7225_v3, %v3595_v36  ;;  %v3398_v46 = vmax.f32 %v7664_v22, %v5441_v6  ;;  %v2449_v14 = vpop.f32.mrb[185].mxu0  ;;  %v3249_v42 = vpop.f32.mrb[185].mxu1  ;;  %v3801_v23 = vmax.f32 %v3701_v10, 0.0  ;;  %v7676_v36 = vld [vmem:[#allocation135_spill] sm:$0xff]  ;;  %v7678_v22 = vld [vmem:[#allocation137_spill] sm:$0xff] }
 0x267   :  { %v3700_v58 = vadd.f32 %v7225_v3, %v3593_v33  ;;  %v3396_v16 = vmax.f32 %v7665_v54, %v2449_v14  ;;  %v5442_v2 = vpop.f32.mrb[186].mxu0  ;;  %v5642_v18 = vpop.f32.mrb[186].mxu1  ;;  %v3799_v40 = vmax.f32 %v3699_v35, 0.0  ;;  %v7677_v33 = vld [vmem:[#allocation138_spill] sm:$0xff] }
 0x268   :  { %v3802_v15 = vmax.f32 %v3702_v31, 0.0  ;;  %v3498_v17 = vmax.f32 %v3398_v46, %v7666_v20  ;;  %v3399_v24 = vmax.f32 %v7667_v38, %v5442_v2  ;;  %v2452_v56 = vpop.f32.mrb[187].mxu0  ;;  %v3252_v21 = vpop.f32.mrb[187].mxu1  ;;  %v7680_v38 = vld [vmem:[#allocation140_spill] sm:$0xff] }
 0x269   :  { %v3800_v4 = vmax.f32 %v3700_v58, 0.0  ;;  %v3496_v43 = vmax.f32 %v3396_v16, %v7668_v25  ;;  %v3397_v44 = vmax.f32 %v7669_v39, %v2452_v56  ;;  %v7679_v58 = vld [vmem:[#allocation139_spill] sm:$0xff] }
 0x26a   :  { %v4940_v59 = vpack.c.bf16 %v3802_v15, %v3801_v23  ;;  %v3598_v41 = vmax.f32 %v3498_v17, %v5641_v37  ;;  %v3499_v60 = vmax.f32 %v3399_v24, %v7670_v48 }
 0x26b   :  { %v4935_v45 = vpack.c.bf16 %v3800_v4, %v3799_v40  ;;  %v3596_v63 = vmax.f32 %v3496_v43, %v3249_v42  ;;  %v3497_v8 = vmax.f32 %v3397_v44, %v7671_v49  ;;  %v7681_v4 = vld [vmem:[#allocation142_spill] sm:$0xff] }
 0x26c   :  { %5022 = vst [vmem:[%s7387_s3 + $0x148] sm:$0xff] %v4940_v59   ;;  %v3705_v5 = vadd.f32 %v7225_v3, %v3598_v41  ;;  %v3599_v12 = vmax.f32 %v3499_v60, %v5642_v18  ;;  %v7682_v41 = vld [vmem:[#allocation141_spill] sm:$0xff]  ;;  %v7683_v60 = vld [vmem:[#allocation144_spill] sm:$0xff] }
 0x26d   :  { %5021 = vst [vmem:[%s7387_s3 + $0x140] sm:$0xff] %v4935_v45   ;;  %v3703_v11 = vadd.f32 %v7225_v3, %v3596_v63  ;;  %v3597_v9 = vmax.f32 %v3497_v8, %v3252_v21  ;;  %v5445_v55 = vpop.f32.mrb[188].mxu0  ;;  %v5645_v13 = vpop.f32.mrb[188].mxu1 }
 0x26e   :  { %v3706_v34 = vadd.f32 %v7225_v3, %v3599_v12  ;;  %v3402_v57 = vmax.f32 %v7672_v7, %v5445_v55  ;;  %v2465_v26 = vpop.f32.mrb[189].mxu0  ;;  %v3265_v47 = vpop.f32.mrb[189].mxu1  ;;  %v3805_v30 = vmax.f32 %v3705_v5, 0.0  ;;  %v7684_v12 = vld [vmem:[#allocation143_spill] sm:$0xff]  ;;  %v7686_v7 = vld [vmem:[#allocation145_spill] sm:$0xff] }
 0x26f   :  { %v3704_v0 = vadd.f32 %v7225_v3, %v3597_v9  ;;  %v3400_v19 = vmax.f32 %v7673_v50, %v2465_v26  ;;  %v5446_v28 = vpop.f32.mrb[190].mxu0  ;;  %v5646_v61 = vpop.f32.mrb[190].mxu1  ;;  %v3803_v53 = vmax.f32 %v3703_v11, 0.0  ;;  %v7685_v9 = vld [vmem:[#allocation146_spill] sm:$0xff] }
 0x270   :  { %v3806_v52 = vmax.f32 %v3706_v34, 0.0  ;;  %v3502_v27 = vmax.f32 %v3402_v57, %v7674_v1  ;;  %v3403_v29 = vmax.f32 %v7675_v32, %v5446_v28  ;;  %v2468_v51 = vpop.f32.mrb[191].mxu0  ;;  %v3268_v62 = vpop.f32.mrb[191].mxu1  ;;  %v7688_v32 = vld [vmem:[#allocation148_spill] sm:$0xff] }
 0x271   :  { %v3804_v10 = vmax.f32 %v3704_v0, 0.0  ;;  %v3500_v35 = vmax.f32 %v3400_v19, %v7676_v36  ;;  %v3401_v6 = vmax.f32 %v7677_v33, %v2468_v51  ;;  %v7687_v0 = vld [vmem:[#allocation147_spill] sm:$0xff] }
 0x272   :  { %v4950_v37 = vpack.c.bf16 %v3806_v52, %v3805_v30  ;;  %v3602_v31 = vmax.f32 %v3502_v27, %v5645_v13  ;;  %v3503_v46 = vmax.f32 %v3403_v29, %v7678_v22 }
 0x273   :  { %v4945_v14 = vpack.c.bf16 %v3804_v10, %v3803_v53  ;;  %v3600_v42 = vmax.f32 %v3500_v35, %v3265_v47  ;;  %v3501_v54 = vmax.f32 %v3401_v6, %v7679_v58  ;;  %v7689_v10 = vld [vmem:[#allocation150_spill] sm:$0xff] }
 0x274   :  { %5024 = vst [vmem:[%s7387_s3 + $0x158] sm:$0xff] %v4950_v37   ;;  %v3709_v16 = vadd.f32 %v7225_v3, %v3602_v31  ;;  %v3603_v2 = vmax.f32 %v3503_v46, %v5646_v61  ;;  %v7690_v31 = vld [vmem:[#allocation149_spill] sm:$0xff]  ;;  %v7691_v46 = vld [vmem:[#allocation152_spill] sm:$0xff] }
 0x275   :  { %5023 = vst [vmem:[%s7387_s3 + $0x150] sm:$0xff] %v4945_v14   ;;  %v3707_v18 = vadd.f32 %v7225_v3, %v3600_v42  ;;  %v3601_v23 = vmax.f32 %v3501_v54, %v3268_v62  ;;  %v5449_v15 = vpop.f32.mrb[192].mxu0  ;;  %v5649_v20 = vpop.f32.mrb[192].mxu1 }
 0x276   :  { %v3710_v17 = vadd.f32 %v7225_v3, %v3603_v2  ;;  %v3406_v24 = vmax.f32 %v7680_v38, %v5449_v15  ;;  %v2481_v56 = vpop.f32.mrb[193].mxu0  ;;  %v3281_v21 = vpop.f32.mrb[193].mxu1  ;;  %v3809_v44 = vmax.f32 %v3709_v16, 0.0  ;;  %v7692_v2 = vld [vmem:[#allocation151_spill] sm:$0xff]  ;;  %v7694_v38 = vld [vmem:[#allocation153_spill] sm:$0xff] }
 0x277   :  { %v3708_v40 = vadd.f32 %v7225_v3, %v3601_v23  ;;  %v3404_v25 = vmax.f32 %v7681_v4, %v2481_v56  ;;  %v5450_v43 = vpop.f32.mrb[194].mxu0  ;;  %v5650_v39 = vpop.f32.mrb[194].mxu1  ;;  %v3807_v8 = vmax.f32 %v3707_v18, 0.0  ;;  %v7693_v23 = vld [vmem:[#allocation154_spill] sm:$0xff] }
 0x278   :  { %v3810_v59 = vmax.f32 %v3710_v17, 0.0  ;;  %v3506_v48 = vmax.f32 %v3406_v24, %v7682_v41  ;;  %v3407_v45 = vmax.f32 %v7683_v60, %v5450_v43  ;;  %v2484_v63 = vpop.f32.mrb[195].mxu0  ;;  %v3284_v49 = vpop.f32.mrb[195].mxu1 }
 0x279   :  { %v3808_v5 = vmax.f32 %v3708_v40, 0.0  ;;  %v3504_v11 = vmax.f32 %v3404_v25, %v7684_v12  ;;  %v3405_v55 = vmax.f32 %v7685_v9, %v2484_v63  ;;  %v7695_v40 = vld [vmem:[#allocation155_spill] sm:$0xff] }
 0x27a   :  { %v4960_v13 = vpack.c.bf16 %v3810_v59, %v3809_v44  ;;  %v3606_v34 = vmax.f32 %v3506_v48, %v5649_v20  ;;  %v3507_v57 = vmax.f32 %v3407_v45, %v7686_v7 }
 0x27b   :  { %v4955_v26 = vpack.c.bf16 %v3808_v5, %v3807_v8  ;;  %v3604_v47 = vmax.f32 %v3504_v11, %v3281_v21  ;;  %v3505_v50 = vmax.f32 %v3405_v55, %v7687_v0 }
 0x27c   :  { %5026 = vst [vmem:[%s7387_s3 + $0x168] sm:$0xff] %v4960_v13   ;;  %v3713_v19 = vadd.f32 %v7225_v3, %v3606_v34  ;;  %v3607_v28 = vmax.f32 %v3507_v57, %v5650_v39 }
 0x27d   :  { %5025 = vst [vmem:[%s7387_s3 + $0x160] sm:$0xff] %v4955_v26   ;;  %v3711_v61 = vadd.f32 %v7225_v3, %v3604_v47  ;;  %v3605_v30 = vmax.f32 %v3505_v50, %v3284_v49  ;;  %v5453_v52 = vpop.f32.mrb[196].mxu0  ;;  %v5653_v1 = vpop.f32.mrb[196].mxu1 }
 0x27e   :  { %v3714_v27 = vadd.f32 %v7225_v3, %v3607_v28  ;;  %v3410_v29 = vmax.f32 %v7688_v32, %v5453_v52  ;;  %v2497_v51 = vpop.f32.mrb[197].mxu0  ;;  %v3297_v62 = vpop.f32.mrb[197].mxu1  ;;  %v3813_v6 = vmax.f32 %v3713_v19, 0.0 }
 0x27f   :  { %v3712_v53 = vadd.f32 %v7225_v3, %v3605_v30  ;;  %v3408_v36 = vmax.f32 %v7689_v10, %v2497_v51  ;;  %v5454_v35 = vpop.f32.mrb[198].mxu0  ;;  %v5654_v33 = vpop.f32.mrb[198].mxu1  ;;  %v3811_v54 = vmax.f32 %v3711_v61, 0.0 }
 0x280   :  { %v3814_v37 = vmax.f32 %v3714_v27, 0.0  ;;  %v3510_v22 = vmax.f32 %v3410_v29, %v7690_v31  ;;  %v3411_v14 = vmax.f32 %v7691_v46, %v5454_v35  ;;  %v2500_v42 = vpop.f32.mrb[199].mxu0  ;;  %v3300_v58 = vpop.f32.mrb[199].mxu1 }
 0x281   :  { %v3812_v16 = vmax.f32 %v3712_v53, 0.0  ;;  %v3508_v18 = vmax.f32 %v3408_v36, %v7692_v2  ;;  %v3409_v15 = vmax.f32 %v7693_v23, %v2500_v42 }
 0x282   :  { %v4970_v20 = vpack.c.bf16 %v3814_v37, %v3813_v6  ;;  %v3610_v17 = vmax.f32 %v3510_v22, %v5653_v1  ;;  %v3511_v24 = vmax.f32 %v3411_v14, %v7694_v38 }
 0x283   :  { %v4965_v56 = vpack.c.bf16 %v3812_v16, %v3811_v54  ;;  %v3608_v21 = vmax.f32 %v3508_v18, %v3297_v62  ;;  %v3509_v4 = vmax.f32 %v3409_v15, %v7695_v40 }
 0x284   :  { %5028 = vst [vmem:[%s7387_s3 + $0x178] sm:$0xff] %v4970_v20   ;;  %v3717_v25 = vadd.f32 %v7225_v3, %v3610_v17  ;;  %v3611_v43 = vmax.f32 %v3511_v24, %v5654_v33 }
 0x285   :  { %5027 = vst [vmem:[%s7387_s3 + $0x170] sm:$0xff] %v4965_v56   ;;  %v3715_v39 = vadd.f32 %v7225_v3, %v3608_v21  ;;  %v3609_v44 = vmax.f32 %v3509_v4, %v3300_v58 }
 0x286   :  { %v3718_v59 = vadd.f32 %v7225_v3, %v3611_v43  ;;  %v3817_v48 = vmax.f32 %v3717_v25, 0.0 }
 0x287   :  { %v3716_v41 = vadd.f32 %v7225_v3, %v3609_v44  ;;  %v3815_v45 = vmax.f32 %v3715_v39, 0.0 }
 0x288   :  { %v3818_v60 = vmax.f32 %v3718_v59, 0.0 }
 0x289   :  { %v3816_v63 = vmax.f32 %v3716_v41, 0.0 }
 0x28a   :  { %v4980_v49 = vpack.c.bf16 %v3818_v60, %v3817_v48 }
 0x28b   :  { %v4975_v8 = vpack.c.bf16 %v3816_v63, %v3815_v45 }
 0x28c   :  { %5030 = vst [vmem:[%s7387_s3 + $0x188] sm:$0xff] %v4980_v49  }
 0x28d   :  { %5029 = vst [vmem:[%s7387_s3 + $0x180] sm:$0xff] %v4975_v8  }

// kernel: mov_mnist_net_forward.3
= control target key start
LH: loop header
LB: loop body
LE: loop exit
PB: predicated region body
PF: predicated region fallthrough
CT: control target
= control target key end

     0   :  { %s15271_s0 = inlined_call_operand.vmem [shape: bf16[128,3200], index: 0, kind: input, shape index: {}]   ;;  %s15272_s1 = inlined_call_operand.vmem [shape: bf16[3200,128], index: 1, kind: input, shape index: {}]   ;;  %s15273_s2 = inlined_call_operand.vmem [shape: f32[1,128], index: 2, kind: input, shape index: {}]   ;;  %s15274_s3 = inlined_call_operand.vmem [shape: bf16[2048,512], index: 3, kind: input, shape index: {}]   ;;  %s15275_s4 = inlined_call_operand.vmem [shape: f32[1,512], index: 4, kind: input, shape index: {}]   ;;  %s15276_s5 = inlined_call_operand.vmem [shape: bf16[512,128], index: 5, kind: input, shape index: {}]   ;;  %s15277_s6 = inlined_call_operand.vmem [shape: f32[1,128], index: 6, kind: input, shape index: {}]   ;;  %s15278_s7 = inlined_call_operand.vmem [shape: bf16[128,128], index: 7, kind: input, shape index: {}]   ;;  %s15279_s8 = inlined_call_operand.vmem [shape: f32[1,128], index: 8, kind: input, shape index: {}]   ;;  %s15280_s9 = inlined_call_operand.vmem [shape: bf16[128,128], index: 9, kind: input, shape index: {}]   ;;  %s15281_s10 = inlined_call_operand.vmem [shape: f32[1,128], index: 10, kind: input, shape index: {}]   ;;  %s15282_s11 = inlined_call_operand.hbm [shape: f32[2,128], index: 11, kind: output, shape index: {}]  }
   0x1   :  { %v10602_v0 = vld [vmem:[%s15272_s1 + $0x40] sm:$0xff]   ;;  %v10606_v4 = vld [vmem:[%s15272_s1 + $0x48] sm:$0xff]   ;;  %v10610_v8 = vld [vmem:[%s15272_s1 + $0x50] sm:$0xff]  }
   0x2   :  { %v10603_v1 = vld [vmem:[%s15272_s1 + $0xc0] sm:$0xff]   ;;  %9620 = vmatprep.subr.bf16.mxu0 %v10602_v0  ;;  %v10607_v5 = vld [vmem:[%s15272_s1 + $0xc8] sm:$0xff]   ;;  %v10611_v9 = vld [vmem:[%s15272_s1 + $0xd0] sm:$0xff]  }
   0x3   :  { %v10604_v2 = vld [vmem:[%s15272_s1] sm:$0xff]   ;;  %9684 = vmatprep.subr.bf16.mxu1 %v10603_v1  ;;  %v10608_v6 = vld [vmem:[%s15272_s1 + $0x8] sm:$0xff]   ;;  %v10612_v10 = vld [vmem:[%s15272_s1 + $0x10] sm:$0xff]  }
   0x4   :  { %v10605_v3 = vld [vmem:[%s15272_s1 + $0x80] sm:$0xff]   ;;  %9621 = vmatpush3.bf16.msra.mxu0 %v10604_v2  ;;  %v10609_v7 = vld [vmem:[%s15272_s1 + $0x88] sm:$0xff]   ;;  %v10613_v11 = vld [vmem:[%s15272_s1 + $0x90] sm:$0xff]  }
   0x5   :  { %9685 = vmatpush3.bf16.msra.mxu1 %v10605_v3  ;;  %9622 = vmatprep.subr.bf16.mxu0 %v10606_v4  ;;  %v10614_v12 = vld [vmem:[%s15272_s1 + $0x58] sm:$0xff]   ;;  %v10618_v16 = vld [vmem:[%s15272_s1 + $0x60] sm:$0xff]   ;;  %v10622_v20 = vld [vmem:[%s15272_s1 + $0x68] sm:$0xff]  }
   0x6   :  { %9686 = vmatprep.subr.bf16.mxu1 %v10607_v5  ;;  %v10615_v13 = vld [vmem:[%s15272_s1 + $0xd8] sm:$0xff]   ;;  %v10619_v17 = vld [vmem:[%s15272_s1 + $0xe0] sm:$0xff]   ;;  %v10623_v21 = vld [vmem:[%s15272_s1 + $0xe8] sm:$0xff]  }
   0x7   :  { %v10616_v14 = vld [vmem:[%s15272_s1 + $0x18] sm:$0xff]   ;;  %v10620_v18 = vld [vmem:[%s15272_s1 + $0x20] sm:$0xff]   ;;  %v10624_v22 = vld [vmem:[%s15272_s1 + $0x28] sm:$0xff]  }
   0x8   :  { %9623 = vmatpush3.bf16.msra.mxu0 %v10608_v6  ;;  %v10617_v15 = vld [vmem:[%s15272_s1 + $0x98] sm:$0xff]   ;;  %v10621_v19 = vld [vmem:[%s15272_s1 + $0xa0] sm:$0xff]   ;;  %v10625_v23 = vld [vmem:[%s15272_s1 + $0xa8] sm:$0xff]  }
   0x9   :  { %9687 = vmatpush3.bf16.msra.mxu1 %v10609_v7  ;;  %9624 = vmatprep.subr.bf16.mxu0 %v10610_v8  ;;  %v10626_v24 = vld [vmem:[%s15272_s1 + $0x70] sm:$0xff]   ;;  %v10630_v28 = vld [vmem:[%s15272_s1 + $0x78] sm:$0xff]   ;;  %v10634_v32 = vld [vmem:[%s15271_s0] ss:$100 sps:$4 sm:$0xff]  }
   0xa   :  { %9688 = vmatprep.subr.bf16.mxu1 %v10611_v9  ;;  %v10627_v25 = vld [vmem:[%s15272_s1 + $0xf0] sm:$0xff]   ;;  %v10631_v29 = vld [vmem:[%s15272_s1 + $0xf8] sm:$0xff]   ;;  %v10636_v33 = vld [vmem:[%s15271_s0 + $0x4] ss:$100 sps:$4 sm:$0xff]  }
   0xb   :  { %v10628_v26 = vld [vmem:[%s15272_s1 + $0x30] sm:$0xff]   ;;  %v10632_v30 = vld [vmem:[%s15272_s1 + $0x38] sm:$0xff]   ;;  %v10637_v34 = vld [vmem:[%s15271_s0 + $0x8] ss:$100 sps:$4 sm:$0xff]   ;;  %2888 = vmatprep.mubr.bf16.mxu0 %v10636_v33 }
   0xc   :  { %9625 = vmatpush3.bf16.msra.mxu0 %v10612_v10  ;;  %v10629_v27 = vld [vmem:[%s15272_s1 + $0xb0] sm:$0xff]   ;;  %v10633_v31 = vld [vmem:[%s15272_s1 + $0xb8] sm:$0xff]   ;;  %v10640_v36 = vld [vmem:[%s15272_s1 + $0x140] sm:$0xff]  }
   0xd   :  { %9689 = vmatpush3.bf16.msra.mxu1 %v10613_v11  ;;  %9626 = vmatprep.subr.bf16.mxu0 %v10614_v12  ;;  %v10639_v35 = vld [vmem:[%s15271_s0 + $0xc] ss:$100 sps:$4 sm:$0xff]   ;;  %v10641_v37 = vld [vmem:[%s15272_s1 + $0x100] sm:$0xff]   ;;  %v10644_v39 = vld [vmem:[%s15271_s0 + $0xd4] ss:$100 sps:$4 sm:$0xff]  }
   0xe   :  { %9690 = vmatprep.subr.bf16.mxu1 %v10615_v13  ;;  %2985 = vmatprep.mubr.bf16.mxu1 %v10639_v35  ;;  %v10642_v38 = vld [vmem:[%s15271_s0 + $0xcc] ss:$100 sps:$4 sm:$0xff]   ;;  %v10650_v44 = vld [vmem:[%s15271_s0 + $0x194] ss:$100 sps:$4 sm:$0xff]   ;;  %v10652_v45 = vld [vmem:[%s15271_s0 + $0x19c] ss:$100 sps:$4 sm:$0xff]  }
   0xf   :  { %v10646_v40 = vld [vmem:[%s15271_s0 + $0xc8] ss:$100 sps:$4 sm:$0xff]   ;;  %v10647_v41 = vld [vmem:[%s15271_s0 + $0xd0] ss:$100 sps:$4 sm:$0xff]   ;;  %v10655_v49 = vld [vmem:[%s15271_s0 + $0x198] ss:$100 sps:$4 sm:$0xff]  }
  0x10   :  { %9627 = vmatpush3.bf16.msra.mxu0 %v10616_v14  ;;  %v10648_v42 = vld [vmem:[%s15272_s1 + $0x148] sm:$0xff]   ;;  %v10656_v46 = vld [vmem:[%s15272_s1 + $0x150] sm:$0xff]   ;;  %v10658_v50 = vld [vmem:[%s15271_s0 + $0x25c] ss:$100 sps:$4 sm:$0xff]  }
  0x11   :  { %9691 = vmatpush3.bf16.msra.mxu1 %v10617_v15  ;;  %9628 = vmatprep.subr.bf16.mxu0 %v10618_v16  ;;  %v10649_v43 = vld [vmem:[%s15272_s1 + $0x108] sm:$0xff]   ;;  %v10657_v47 = vld [vmem:[%s15272_s1 + $0x110] sm:$0xff]   ;;  %v10664_v52 = vld [vmem:[%s15272_s1 + $0x158] sm:$0xff]  }
  0x12   :  { %9692 = vmatprep.subr.bf16.mxu1 %v10619_v17  ;;  %v10654_v48 = vld [vmem:[%s15271_s0 + $0x190] ss:$100 sps:$4 sm:$0xff]   ;;  %v10660_v51 = vld [vmem:[%s15271_s0 + $0x264] ss:$100 sps:$4 sm:$0xff]   ;;  %v10665_v53 = vld [vmem:[%s15272_s1 + $0x118] sm:$0xff]  }
  0x13   :  { %v10662_v54 = vld [vmem:[%s15271_s0 + $0x258] ss:$100 sps:$4 sm:$0xff]   ;;  %v10672_v55 = vld [vmem:[%s15272_s1 + $0x160] sm:$0xff]   ;;  %v10668_v59 = vld [vmem:[%s15271_s0 + $0x32c] ss:$100 sps:$4 sm:$0xff]  }
  0x14   :  { %9629 = vmatpush3.bf16.msra.mxu0 %v10620_v18  ;;  %v10663_v56 = vld [vmem:[%s15271_s0 + $0x260] ss:$100 sps:$4 sm:$0xff]   ;;  %v10676_v62 = vld [vmem:[%s15272_s1 + $0x1c8] sm:$0xff]   ;;  %v10679_v5 = vld [vmem:[%s15271_s0 + $0x3f4] ss:$100 sps:$4 sm:$0xff]  }
  0x15   :  { %9693 = vmatpush3.bf16.msra.mxu1 %v10621_v19  ;;  %9630 = vmatprep.subr.bf16.mxu0 %v10622_v20  ;;  %v10666_v57 = vld [vmem:[%s15271_s0 + $0x324] ss:$100 sps:$4 sm:$0xff]   ;;  %v10677_v3 = vld [vmem:[%s15271_s0 + $0x3ec] ss:$100 sps:$4 sm:$0xff]   ;;  %v10688_v8 = vld [vmem:[%s15272_s1 + $0x1d8] sm:$0xff]  }
  0x16   :  { %9694 = vmatprep.subr.bf16.mxu1 %v10623_v21  ;;  %v10673_v58 = vld [vmem:[%s15272_s1 + $0x120] sm:$0xff]   ;;  %v10681_v63 = vld [vmem:[%s15272_s1 + $0x188] sm:$0xff]   ;;  %v10686_v6 = vld [vmem:[%s15272_s1 + $0x1d0] sm:$0xff]  }
  0x17   :  { %v10674_v60 = vld [vmem:[%s15272_s1 + $0x1c0] sm:$0xff]   ;;  %v10684_v1 = vld [vmem:[%s15272_s1 + $0x168] sm:$0xff]   ;;  %v10687_v7 = vld [vmem:[%s15272_s1 + $0x190] sm:$0xff]  }
  0x18   :  { %9631 = vmatpush3.bf16.msra.mxu0 %v10624_v22  ;;  %v10675_v61 = vld [vmem:[%s15272_s1 + $0x180] sm:$0xff]   ;;  %v10671_v2 = vld [vmem:[%s15271_s0 + $0x328] ss:$100 sps:$4 sm:$0xff]   ;;  %v10693_v9 = vld [vmem:[%s15272_s1 + $0x198] sm:$0xff]  }
  0x19   :  { %9695 = vmatpush3.bf16.msra.mxu1 %v10625_v23  ;;  %9632 = vmatprep.subr.bf16.mxu0 %v10626_v24  ;;  %v10670_v0 = vld [vmem:[%s15271_s0 + $0x320] ss:$100 sps:$4 sm:$0xff]   ;;  %v10685_v4 = vld [vmem:[%s15272_s1 + $0x128] sm:$0xff]   ;;  %v10683_v11 = vld [vmem:[%s15271_s0 + $0x3f0] ss:$100 sps:$4 sm:$0xff]  }
  0x1a   :  { %9696 = vmatprep.subr.bf16.mxu1 %v10627_v25  ;;  %v10682_v10 = vld [vmem:[%s15271_s0 + $0x3e8] ss:$100 sps:$4 sm:$0xff]   ;;  %v10689_v12 = vld [vmem:[%s15271_s0 + $0x4b4] ss:$100 sps:$4 sm:$0xff]   ;;  %v10691_v14 = vld [vmem:[%s15271_s0 + $0x4bc] ss:$100 sps:$4 sm:$0xff]  }
  0x1b   :  { %v10696_v13 = vld [vmem:[%s15272_s1 + $0x170] sm:$0xff]   ;;  %v10698_v16 = vld [vmem:[%s15272_s1 + $0x1e0] sm:$0xff]   ;;  %v10700_v18 = vld [vmem:[%s15272_s1 + $0x1e8] sm:$0xff]  }
  0x1c   :  { %9633 = vmatpush3.bf16.msra.mxu0 %v10628_v26  ;;  %v10697_v15 = vld [vmem:[%s15272_s1 + $0x130] sm:$0xff]   ;;  %v10699_v17 = vld [vmem:[%s15272_s1 + $0x1a0] sm:$0xff]   ;;  %v10705_v20 = vld [vmem:[%s15272_s1 + $0x1a8] sm:$0xff]  }
  0x1d   :  { %9697 = vmatpush3.bf16.msra.mxu1 %v10629_v27  ;;  %9634 = vmatprep.subr.bf16.mxu0 %v10630_v28  ;;  %v10694_v19 = vld [vmem:[%s15271_s0 + $0x4b0] ss:$100 sps:$4 sm:$0xff]   ;;  %v10695_v21 = vld [vmem:[%s15271_s0 + $0x4b8] ss:$100 sps:$4 sm:$0xff]   ;;  %v10703_v23 = vld [vmem:[%s15271_s0 + $0x584] ss:$100 sps:$4 sm:$0xff]  }
  0x1e   :  { %9698 = vmatprep.subr.bf16.mxu1 %v10631_v29  ;;  %v10701_v22 = vld [vmem:[%s15271_s0 + $0x57c] ss:$100 sps:$4 sm:$0xff]   ;;  %v10710_v26 = vld [vmem:[%s15272_s1 + $0x1f0] sm:$0xff]  }
  0x1f   :  { %v10708_v24 = vld [vmem:[%s15272_s1 + $0x178] sm:$0xff]   ;;  %v10711_v27 = vld [vmem:[%s15272_s1 + $0x1b0] sm:$0xff]  }
  0x20   :  { %9635 = vmatpush3.bf16.msra.mxu0 %v10632_v30  ;;  %v10709_v25 = vld [vmem:[%s15272_s1 + $0x138] sm:$0xff]   ;;  %v10717_v30 = vld [vmem:[%s15272_s1 + $0x240] sm:$0xff]   ;;  %v10713_v35 = vld [vmem:[%s15271_s0 + $0x10] ss:$100 sps:$4 sm:$0xff]  }
  0x21   :  { %9699 = vmatpush3.bf16.msra.mxu1 %v10633_v31  ;;  %9748 = vmatprep.subr.bf16.mxu0 %v10640_v36  ;;  %v10712_v28 = vld [vmem:[%s15272_s1 + $0x1f8] sm:$0xff]  }
  0x22   :  { %9812 = vmatprep.subr.bf16.mxu1 %v10674_v60  ;;  %v10716_v29 = vld [vmem:[%s15272_s1 + $0x1b8] sm:$0xff]   ;;  %v10761_v60 = vld [vmem:[%s15272_s1 + $0x268] sm:$0xff]  }
  0x23   :  { %2889 = vmatmul.mubr.bf16.vlgmr.msra.gmra.mrb[0].mxu0 %v10634_v32  ;;  %v10706_v31 = vld [vmem:[%s15271_s0 + $0x578] ss:$100 sps:$4 sm:$0xff]   ;;  %v10707_v32 = vld [vmem:[%s15271_s0 + $0x580] ss:$100 sps:$4 sm:$0xff]  }
  0x24   :  { %2986 = vmatmul.mubr.bf16.vlgmr.msra.gmra.mrb[0].mxu1 %v10637_v34  ;;  %9749 = vmatpush3.bf16.msra.mxu0 %v10641_v37  ;;  %v10715_v33 = vld [vmem:[%s15271_s0 + $0x14] ss:$100 sps:$4 sm:$0xff]   ;;  %v10720_v34 = vld [vmem:[%s15271_s0 + $0x1c] ss:$100 sps:$4 sm:$0xff]  }
  0x25   :  { %2896 = vmatprep.mubr.bf16.mxu0 %v10642_v38  ;;  %2993 = vmatprep.mubr.bf16.mxu1 %v10644_v39  ;;  %v10718_v36 = vld [vmem:[%s15271_s0 + $0x18] ss:$100 sps:$4 sm:$0xff]   ;;  %v10721_v37 = vld [vmem:[%s15272_s1 + $0x200] sm:$0xff]   ;;  %v10725_v39 = vld [vmem:[%s15272_s1 + $0x248] sm:$0xff]  }
  0x26   :  { %9750 = vmatprep.subr.bf16.mxu0 %v10648_v42  ;;  %9813 = vmatpush3.bf16.msra.mxu1 %v10675_v61  ;;  %v10722_v38 = vld [vmem:[%s15271_s0 + $0xdc] ss:$100 sps:$4 sm:$0xff]   ;;  %v10733_v42 = vld [vmem:[%s15272_s1 + $0x250] sm:$0xff]   ;;  %v10764_v61 = vld [vmem:[%s15272_s1 + $0x228] sm:$0xff]  }
  0x27   :  { %9814 = vmatprep.subr.bf16.mxu1 %v10676_v62  ;;  %v10740_v62 = vld [vmem:[%s15271_s0 + $0x268] ss:$100 sps:$4 sm:$0xff]  }
  0x28   :  { %9751 = vmatpush3.bf16.msra.mxu0 %v10649_v43  ;;  %v10724_v43 = vld [vmem:[%s15271_s0 + $0xd8] ss:$100 sps:$4 sm:$0xff]  }
  0x29   :  { %9752 = vmatprep.subr.bf16.mxu0 %v10656_v46  ;;  %v10734_v46 = vld [vmem:[%s15271_s0 + $0x1ac] ss:$100 sps:$4 sm:$0xff]  }
  0x2a   :  { %9815 = vmatpush3.bf16.msra.mxu1 %v10681_v63  ;;  %v10766_v63 = vld [vmem:[%s15272_s1 + $0x2d0] sm:$0xff]  }
  0x2b   :  { %2897 = vmatmul.mubr.bf16.gmra.mrb[4].mxu0 %v10646_v40  ;;  %9816 = vmatprep.subr.bf16.mxu1 %v10686_v6  ;;  %v10726_v40 = vld [vmem:[%s15271_s0 + $0xe4] ss:$100 sps:$4 sm:$0xff]   ;;  %v10773_v6 = vld [vmem:[%s15272_s1 + $0x270] sm:$0xff]  }
  0x2c   :  { %2994 = vmatmul.mubr.bf16.gmra.mrb[4].mxu1 %v10647_v41  ;;  %2904 = vmatprep.mubr.bf16.mxu0 %v10650_v44  ;;  %v10728_v41 = vld [vmem:[%s15272_s1 + $0x208] sm:$0xff]   ;;  %v10729_v44 = vld [vmem:[%s15271_s0 + $0xe0] ss:$100 sps:$4 sm:$0xff]  }
  0x2d   :  { %3001 = vmatprep.mubr.bf16.mxu1 %v10652_v45  ;;  %9753 = vmatpush3.bf16.msra.mxu0 %v10657_v47  ;;  %v10730_v45 = vld [vmem:[%s15271_s0 + $0x1a4] ss:$100 sps:$4 sm:$0xff]   ;;  %v10736_v47 = vld [vmem:[%s15272_s1 + $0x210] sm:$0xff]  }
  0x2e   :  { %9754 = vmatprep.subr.bf16.mxu0 %v10664_v52  ;;  %9817 = vmatpush3.bf16.msra.mxu1 %v10687_v7  ;;  %v10732_v52 = vld [vmem:[%s15271_s0 + $0x1a0] ss:$100 sps:$4 sm:$0xff]   ;;  %v10776_v7 = vld [vmem:[%s15272_s1 + $0x230] sm:$0xff]  }
  0x2f   :  { %9818 = vmatprep.subr.bf16.mxu1 %v10688_v8  ;;  %v10748_v8 = vld [vmem:[%s15271_s0 + $0x330] ss:$100 sps:$4 sm:$0xff]  }
  0x31   :  { %9755 = vmatpush3.bf16.msra.mxu0 %v10665_v53  ;;  %v10755_v53 = vld [vmem:[%s15272_s1 + $0x280] sm:$0xff]  }
  0x32   :  { %9756 = vmatprep.subr.bf16.mxu0 %v10672_v55  ;;  %9819 = vmatpush3.bf16.msra.mxu1 %v10693_v9  ;;  %v10756_v55 = vld [vmem:[%s15272_s1 + $0x2c8] sm:$0xff]   ;;  %v10778_v9 = vld [vmem:[%s15272_s1 + $0x2e0] sm:$0xff]  }
  0x33   :  { %2905 = vmatmul.mubr.bf16.gmra.mrb[8].mxu0 %v10654_v48  ;;  %9820 = vmatprep.subr.bf16.mxu1 %v10698_v16  ;;  %v10741_v48 = vld [vmem:[%s15272_s1 + $0x258] sm:$0xff]  }
  0x34   :  { %3002 = vmatmul.mubr.bf16.gmra.mrb[8].mxu1 %v10655_v49  ;;  %2912 = vmatprep.mubr.bf16.mxu0 %v10658_v50  ;;  %v10744_v49 = vld [vmem:[%s15272_s1 + $0x218] sm:$0xff]   ;;  %v10749_v50 = vld [vmem:[%s15272_s1 + $0x260] sm:$0xff]  }
  0x35   :  { %3009 = vmatprep.mubr.bf16.mxu1 %v10660_v51  ;;  %9757 = vmatpush3.bf16.msra.mxu0 %v10673_v58  ;;  %v10754_v51 = vld [vmem:[%s15272_s1 + $0x2c0] sm:$0xff]   ;;  %v10759_v58 = vld [vmem:[%s15272_s1 + $0x288] sm:$0xff]   ;;  %v10785_v16 = vld [vmem:[%s15272_s1 + $0x278] sm:$0xff]  }
  0x36   :  { %9758 = vmatprep.subr.bf16.mxu0 %v10684_v1  ;;  %9821 = vmatpush3.bf16.msra.mxu1 %v10699_v17  ;;  %v10767_v1 = vld [vmem:[%s15272_s1 + $0x290] sm:$0xff]   ;;  %v10760_v17 = vld [vmem:[%s15271_s0 + $0x3f8] ss:$100 sps:$4 sm:$0xff]  }
  0x37   :  { %9822 = vmatprep.subr.bf16.mxu1 %v10700_v18  ;;  %v10788_v18 = vld [vmem:[%s15272_s1 + $0x238] sm:$0xff]  }
  0x39   :  { %9759 = vmatpush3.bf16.msra.mxu0 %v10685_v4  ;;  %v10750_v4 = vld [vmem:[%s15271_s0 + $0x33c] ss:$100 sps:$4 sm:$0xff]  }
  0x3a   :  { %9760 = vmatprep.subr.bf16.mxu0 %v10696_v13  ;;  %9823 = vmatpush3.bf16.msra.mxu1 %v10705_v20  ;;  %v10780_v13 = vld [vmem:[%s15272_s1 + $0x2e8] sm:$0xff]  }
  0x3b   :  { %2913 = vmatmul.mubr.bf16.gmra.mrb[12].mxu0 %v10662_v54  ;;  %9824 = vmatprep.subr.bf16.mxu1 %v10710_v26  ;;  %v10737_v54 = vld [vmem:[%s15271_s0 + $0x1a8] ss:$100 sps:$4 sm:$0xff]   ;;  %v10797_v26 = vld [vmem:[%s15272_s1 + $0x340] sm:$0xff]  }
  0x3c   :  { %3010 = vmatmul.mubr.bf16.gmra.mrb[12].mxu1 %v10663_v56  ;;  %2920 = vmatprep.mubr.bf16.mxu0 %v10666_v57  ;;  %v10738_v56 = vld [vmem:[%s15271_s0 + $0x26c] ss:$100 sps:$4 sm:$0xff]   ;;  %v10742_v57 = vld [vmem:[%s15271_s0 + $0x274] ss:$100 sps:$4 sm:$0xff]   ;;  %v10769_v20 = vld [vmem:[%s15271_s0 + $0x4c4] ss:$100 sps:$4 sm:$0xff]  }
  0x3d   :  { %3017 = vmatprep.mubr.bf16.mxu1 %v10668_v59  ;;  %9761 = vmatpush3.bf16.msra.mxu0 %v10697_v15  ;;  %v10752_v59 = vld [vmem:[%s15272_s1 + $0x220] sm:$0xff]   ;;  %v10783_v15 = vld [vmem:[%s15272_s1 + $0x2a8] sm:$0xff]  }
  0x3e   :  { %9762 = vmatprep.subr.bf16.mxu0 %v10708_v24  ;;  %9825 = vmatpush3.bf16.msra.mxu1 %v10711_v27  ;;  %v10774_v24 = vld [vmem:[%s15271_s0 + $0x4cc] ss:$100 sps:$4 sm:$0xff]   ;;  %v10772_v27 = vld [vmem:[%s15271_s0 + $0x4c0] ss:$100 sps:$4 sm:$0xff]  }
  0x3f   :  { %9826 = vmatprep.subr.bf16.mxu1 %v10712_v28  ;;  %v10777_v28 = vld [vmem:[%s15271_s0 + $0x4c8] ss:$100 sps:$4 sm:$0xff]  }
  0x41   :  { %9763 = vmatpush3.bf16.msra.mxu0 %v10709_v25  ;;  %v10796_v25 = vld [vmem:[%s15272_s1 + $0x2b8] sm:$0xff]  }
  0x42   :  { %9876 = vmatprep.subr.bf16.mxu0 %v10717_v30  ;;  %9827 = vmatpush3.bf16.msra.mxu1 %v10716_v29  ;;  %v10781_v29 = vld [vmem:[%s15271_s0 + $0x58c] ss:$100 sps:$4 sm:$0xff]   ;;  %v10786_v30 = vld [vmem:[%s15271_s0 + $0x594] ss:$100 sps:$4 sm:$0xff]  }
  0x43   :  { %2921 = vmatmul.mubr.bf16.gmra.mrb[16].mxu0 %v10670_v0  ;;  %9940 = vmatprep.subr.bf16.mxu1 %v10754_v51  ;;  %v10745_v0 = vld [vmem:[%s15271_s0 + $0x270] ss:$100 sps:$4 sm:$0xff]  }
  0x44   :  { %3018 = vmatmul.mubr.bf16.gmra.mrb[16].mxu1 %v10671_v2  ;;  %2928 = vmatprep.mubr.bf16.mxu0 %v10677_v3  ;;  %v10768_v2 = vld [vmem:[%s15272_s1 + $0x2d8] sm:$0xff]   ;;  %v10816_v51 = vld [vmem:[%s15272_s1 + $0x310] sm:$0xff]  }
  0x45   :  { %3025 = vmatprep.mubr.bf16.mxu1 %v10679_v5  ;;  %v10746_v3 = vld [vmem:[%s15271_s0 + $0x334] ss:$100 sps:$4 sm:$0xff]  }
  0x46   :  { %v10771_v5 = vld [vmem:[%s15272_s1 + $0x298] sm:$0xff]  }
  0x4b   :  { %2929 = vmatmul.mubr.bf16.gmra.mrb[20].mxu0 %v10682_v10  ;;  %v10753_v10 = vld [vmem:[%s15271_s0 + $0x338] ss:$100 sps:$4 sm:$0xff]  }
  0x4c   :  { %3026 = vmatmul.mubr.bf16.gmra.mrb[20].mxu1 %v10683_v11  ;;  %2936 = vmatprep.mubr.bf16.mxu0 %v10689_v12  ;;  %v10757_v11 = vld [vmem:[%s15271_s0 + $0x3fc] ss:$100 sps:$4 sm:$0xff]  }
  0x4d   :  { %3033 = vmatprep.mubr.bf16.mxu1 %v10691_v14  ;;  %v10779_v12 = vld [vmem:[%s15272_s1 + $0x2a0] sm:$0xff]  }
  0x4e   :  { %v10762_v14 = vld [vmem:[%s15271_s0 + $0x404] ss:$100 sps:$4 sm:$0xff]  }
  0x53   :  { %2937 = vmatmul.mubr.bf16.gmra.mrb[24].mxu0 %v10694_v19  ;;  %v10765_v19 = vld [vmem:[%s15271_s0 + $0x400] ss:$100 sps:$4 sm:$0xff]  }
  0x54   :  { %3034 = vmatmul.mubr.bf16.gmra.mrb[24].mxu1 %v10695_v21  ;;  %2944 = vmatprep.mubr.bf16.mxu0 %v10701_v22  ;;  %v10790_v21 = vld [vmem:[%s15272_s1 + $0x2f0] sm:$0xff]  }
  0x55   :  { %3041 = vmatprep.mubr.bf16.mxu1 %v10703_v23  ;;  %v10791_v22 = vld [vmem:[%s15272_s1 + $0x2b0] sm:$0xff]   ;;  %v10792_v23 = vld [vmem:[%s15272_s1 + $0x2f8] sm:$0xff]  }
  0x5b   :  { %2945 = vmatmul.mubr.bf16.gmra.mrb[28].mxu0 %v10706_v31  ;;  %v10784_v31 = vld [vmem:[%s15271_s0 + $0x588] ss:$100 sps:$4 sm:$0xff]  }
  0x5c   :  { %3042 = vmatmul.mubr.bf16.gmra.mrb[28].mxu1 %v10707_v32  ;;  %3082 = vmatprep.mubr.bf16.mxu0 %v10715_v33  ;;  %v10789_v32 = vld [vmem:[%s15271_s0 + $0x590] ss:$100 sps:$4 sm:$0xff]   ;;  %v10795_v33 = vld [vmem:[%s15271_s0 + $0x24] ss:$100 sps:$4 sm:$0xff]  }
  0x5d   :  { %3179 = vmatprep.mubr.bf16.mxu1 %v10720_v34  ;;  %v10800_v34 = vld [vmem:[%s15271_s0 + $0x2c] ss:$100 sps:$4 sm:$0xff]  }
  0x63   :  { %3083 = vmatmul.mubr.bf16.vlgmr.msra.gmra.mrb[32].mxu0 %v10713_v35  ;;  %v10793_v35 = vld [vmem:[%s15271_s0 + $0x20] ss:$100 sps:$4 sm:$0xff]  }
  0x64   :  { %9877 = vmatpush3.bf16.msra.mxu0 %v10721_v37  ;;  %3180 = vmatmul.mubr.bf16.vlgmr.msra.gmra.mrb[32].mxu1 %v10718_v36  ;;  %v10798_v36 = vld [vmem:[%s15271_s0 + $0x28] ss:$100 sps:$4 sm:$0xff]   ;;  %v10801_v37 = vld [vmem:[%s15272_s1 + $0x300] sm:$0xff]  }
  0x65   :  { %3090 = vmatprep.mubr.bf16.mxu0 %v10722_v38  ;;  %9878 = vmatprep.subr.bf16.mxu0 %v10725_v39  ;;  %v10802_v38 = vld [vmem:[%s15271_s0 + $0xec] ss:$100 sps:$4 sm:$0xff]  }
  0x66   :  { %3187 = vmatprep.mubr.bf16.mxu1 %v10726_v40  ;;  %9941 = vmatpush3.bf16.msra.mxu1 %v10755_v53  ;;  %v10805_v39 = vld [vmem:[%s15272_s1 + $0x348] sm:$0xff]   ;;  %v10806_v40 = vld [vmem:[%s15271_s0 + $0xf4] ss:$100 sps:$4 sm:$0xff]  }
  0x67   :  { %9942 = vmatprep.subr.bf16.mxu1 %v10756_v55  ;;  %v10846_v53 = vld [vmem:[%s15272_s1 + $0x3d0] sm:$0xff]   ;;  %v10848_v55 = vld [vmem:[%s15272_s1 + $0x3d8] sm:$0xff]  }
  0x68   :  { %9879 = vmatpush3.bf16.msra.mxu0 %v10728_v41  ;;  %v10834_v41 = vld [vmem:[%s15272_s1 + $0x3c0] sm:$0xff]  }
  0x69   :  { %9880 = vmatprep.subr.bf16.mxu0 %v10733_v42  ;;  %v10835_v42 = vld [vmem:[%s15272_s1 + $0x380] sm:$0xff]  }
  0x6a   :  { %9943 = vmatpush3.bf16.msra.mxu1 %v10759_v58  ;;  %v10817_v58 = vld [vmem:[%s15271_s0 + $0x1b8] ss:$100 sps:$4 sm:$0xff]  }
  0x6b   :  { %3091 = vmatmul.mubr.bf16.gmra.mrb[36].mxu0 %v10724_v43  ;;  %9944 = vmatprep.subr.bf16.mxu1 %v10766_v63  ;;  %v10836_v43 = vld [vmem:[%s15272_s1 + $0x3c8] sm:$0xff]   ;;  %v10832_v63 = vld [vmem:[%s15272_s1 + $0x320] sm:$0xff]  }
  0x6c   :  { %3188 = vmatmul.mubr.bf16.gmra.mrb[36].mxu1 %v10729_v44  ;;  %3098 = vmatprep.mubr.bf16.mxu0 %v10730_v45  ;;  %v10808_v44 = vld [vmem:[%s15272_s1 + $0x308] sm:$0xff]  }
  0x6d   :  { %3195 = vmatprep.mubr.bf16.mxu1 %v10734_v46  ;;  %9881 = vmatpush3.bf16.msra.mxu0 %v10736_v47  ;;  %v10804_v45 = vld [vmem:[%s15271_s0 + $0xe8] ss:$100 sps:$4 sm:$0xff]   ;;  %v10813_v46 = vld [vmem:[%s15272_s1 + $0x350] sm:$0xff]  }
  0x6e   :  { %9882 = vmatprep.subr.bf16.mxu0 %v10741_v48  ;;  %9945 = vmatpush3.bf16.msra.mxu1 %v10767_v1  ;;  %v10809_v47 = vld [vmem:[%s15271_s0 + $0xf0] ss:$100 sps:$4 sm:$0xff]   ;;  %v10839_v48 = vld [vmem:[%s15272_s1 + $0x388] sm:$0xff]  }
  0x6f   :  { %9946 = vmatprep.subr.bf16.mxu1 %v10768_v2  ;;  %v10844_v1 = vld [vmem:[%s15272_s1 + $0x328] sm:$0xff]   ;;  %v10858_v2 = vld [vmem:[%s15272_s1 + $0x3e0] sm:$0xff]  }
  0x71   :  { %9883 = vmatpush3.bf16.msra.mxu0 %v10744_v49  ;;  %v10810_v49 = vld [vmem:[%s15271_s0 + $0x1b4] ss:$100 sps:$4 sm:$0xff]  }
  0x72   :  { %9884 = vmatprep.subr.bf16.mxu0 %v10749_v50  ;;  %9947 = vmatpush3.bf16.msra.mxu1 %v10771_v5  ;;  %v10814_v50 = vld [vmem:[%s15271_s0 + $0x1bc] ss:$100 sps:$4 sm:$0xff]   ;;  %v10860_v5 = vld [vmem:[%s15272_s1 + $0x3e8] sm:$0xff]  }
  0x73   :  { %3099 = vmatmul.mubr.bf16.gmra.mrb[40].mxu0 %v10732_v52  ;;  %9948 = vmatprep.subr.bf16.mxu1 %v10778_v9  ;;  %v10821_v52 = vld [vmem:[%s15272_s1 + $0x358] sm:$0xff]   ;;  %v10863_v9 = vld [vmem:[%s15272_s1 + $0x3a8] sm:$0xff]  }
  0x74   :  { %3196 = vmatmul.mubr.bf16.gmra.mrb[40].mxu1 %v10737_v54  ;;  %3106 = vmatprep.mubr.bf16.mxu0 %v10738_v56  ;;  %v10847_v54 = vld [vmem:[%s15272_s1 + $0x390] sm:$0xff]  }
  0x75   :  { %3203 = vmatprep.mubr.bf16.mxu1 %v10742_v57  ;;  %9885 = vmatpush3.bf16.msra.mxu0 %v10752_v59  ;;  %v10812_v56 = vld [vmem:[%s15271_s0 + $0x1b0] ss:$100 sps:$4 sm:$0xff]   ;;  %v10824_v57 = vld [vmem:[%s15272_s1 + $0x318] sm:$0xff]  }
  0x76   :  { %9886 = vmatprep.subr.bf16.mxu0 %v10761_v60  ;;  %9949 = vmatpush3.bf16.msra.mxu1 %v10779_v12  ;;  %v10818_v59 = vld [vmem:[%s15271_s0 + $0x27c] ss:$100 sps:$4 sm:$0xff]  }
  0x77   :  { %9950 = vmatprep.subr.bf16.mxu1 %v10780_v13  ;;  %v10829_v60 = vld [vmem:[%s15272_s1 + $0x360] sm:$0xff]   ;;  %v10865_v12 = vld [vmem:[%s15272_s1 + $0x378] sm:$0xff]  }
  0x78   :  { %v10868_v13 = vld [vmem:[%s15272_s1 + $0x338] sm:$0xff]  }
  0x79   :  { %9887 = vmatpush3.bf16.msra.mxu0 %v10764_v61  ;;  %v10851_v61 = vld [vmem:[%s15272_s1 + $0x398] sm:$0xff]  }
  0x7a   :  { %9888 = vmatprep.subr.bf16.mxu0 %v10773_v6  ;;  %9951 = vmatpush3.bf16.msra.mxu1 %v10783_v15  ;;  %v10825_v6 = vld [vmem:[%s15271_s0 + $0x280] ss:$100 sps:$4 sm:$0xff]   ;;  %v10871_v15 = vld [vmem:[%s15272_s1 + $0x3b0] sm:$0xff]  }
  0x7b   :  { %3107 = vmatmul.mubr.bf16.gmra.mrb[44].mxu0 %v10740_v62  ;;  %9952 = vmatprep.subr.bf16.mxu1 %v10790_v21  ;;  %v10822_v62 = vld [vmem:[%s15271_s0 + $0x284] ss:$100 sps:$4 sm:$0xff]   ;;  %v10876_v21 = vld [vmem:[%s15272_s1 + $0x3b8] sm:$0xff]  }
  0x7c   :  { %3204 = vmatmul.mubr.bf16.gmra.mrb[44].mxu1 %v10745_v0  ;;  %3114 = vmatprep.mubr.bf16.mxu0 %v10746_v3  ;;  %v10841_v0 = vld [vmem:[%s15272_s1 + $0x368] sm:$0xff]   ;;  %v10859_v3 = vld [vmem:[%s15272_s1 + $0x3a0] sm:$0xff]  }
  0x7d   :  { %3211 = vmatprep.mubr.bf16.mxu1 %v10750_v4  ;;  %9889 = vmatpush3.bf16.msra.mxu0 %v10776_v7  ;;  %v10820_v4 = vld [vmem:[%s15271_s0 + $0x278] ss:$100 sps:$4 sm:$0xff]   ;;  %v10853_v7 = vld [vmem:[%s15272_s1 + $0x370] sm:$0xff]  }
  0x7e   :  { %9890 = vmatprep.subr.bf16.mxu0 %v10785_v16  ;;  %9953 = vmatpush3.bf16.msra.mxu1 %v10791_v22  ;;  %v10828_v16 = vld [vmem:[%s15271_s0 + $0x340] ss:$100 sps:$4 sm:$0xff]  }
  0x7f   :  { %9954 = vmatprep.subr.bf16.mxu1 %v10792_v23  ;;  %v10877_v22 = vld [vmem:[%s15272_s1 + $0x440] sm:$0xff]   ;;  %v10840_v23 = vld [vmem:[%s15271_s0 + $0x408] ss:$100 sps:$4 sm:$0xff]  }
  0x81   :  { %9891 = vmatpush3.bf16.msra.mxu0 %v10788_v18  ;;  %v10833_v18 = vld [vmem:[%s15271_s0 + $0x348] ss:$100 sps:$4 sm:$0xff]  }
  0x82   :  { %9955 = vmatpush3.bf16.msra.mxu1 %v10796_v25  ;;  %10004 = vmatprep.subr.bf16.mxu0 %v10797_v26  ;;  %v10849_v25 = vld [vmem:[%s15271_s0 + $0x4d4] ss:$100 sps:$4 sm:$0xff]   ;;  %v10854_v26 = vld [vmem:[%s15271_s0 + $0x4dc] ss:$100 sps:$4 sm:$0xff]  }
  0x83   :  { %3115 = vmatmul.mubr.bf16.gmra.mrb[48].mxu0 %v10748_v8  ;;  %10068 = vmatprep.subr.bf16.mxu1 %v10834_v41  ;;  %v10826_v8 = vld [vmem:[%s15271_s0 + $0x344] ss:$100 sps:$4 sm:$0xff]  }
  0x84   :  { %3212 = vmatmul.mubr.bf16.gmra.mrb[48].mxu1 %v10753_v10  ;;  %3122 = vmatprep.mubr.bf16.mxu0 %v10757_v11  ;;  %v10830_v10 = vld [vmem:[%s15271_s0 + $0x34c] ss:$100 sps:$4 sm:$0xff]   ;;  %v10886_v41 = vld [vmem:[%s15271_s0 + $0x104] ss:$100 sps:$4 sm:$0xff]  }
  0x85   :  { %3219 = vmatprep.mubr.bf16.mxu1 %v10762_v14  ;;  %v10856_v11 = vld [vmem:[%s15272_s1 + $0x330] sm:$0xff]  }
  0x86   :  { %v10870_v14 = vld [vmem:[%s15272_s1 + $0x3f0] sm:$0xff]  }
  0x8b   :  { %3123 = vmatmul.mubr.bf16.gmra.mrb[52].mxu0 %v10760_v17  ;;  %v10872_v17 = vld [vmem:[%s15272_s1 + $0x3f8] sm:$0xff]  }
  0x8c   :  { %3220 = vmatmul.mubr.bf16.gmra.mrb[52].mxu1 %v10765_v19  ;;  %3130 = vmatprep.mubr.bf16.mxu0 %v10769_v20  ;;  %v10837_v19 = vld [vmem:[%s15271_s0 + $0x40c] ss:$100 sps:$4 sm:$0xff]   ;;  %v10842_v20 = vld [vmem:[%s15271_s0 + $0x414] ss:$100 sps:$4 sm:$0xff]  }
  0x8d   :  { %3227 = vmatprep.mubr.bf16.mxu1 %v10774_v24  ;;  %v10845_v24 = vld [vmem:[%s15271_s0 + $0x410] ss:$100 sps:$4 sm:$0xff]  }
  0x93   :  { %3131 = vmatmul.mubr.bf16.gmra.mrb[56].mxu0 %v10772_v27  ;;  %v10852_v27 = vld [vmem:[%s15271_s0 + $0x4d0] ss:$100 sps:$4 sm:$0xff]  }
  0x94   :  { %3228 = vmatmul.mubr.bf16.gmra.mrb[56].mxu1 %v10777_v28  ;;  %3138 = vmatprep.mubr.bf16.mxu0 %v10781_v29  ;;  %v10857_v28 = vld [vmem:[%s15271_s0 + $0x4d8] ss:$100 sps:$4 sm:$0xff]  }
  0x95   :  { %3235 = vmatprep.mubr.bf16.mxu1 %v10786_v30  ;;  %v10861_v29 = vld [vmem:[%s15271_s0 + $0x59c] ss:$100 sps:$4 sm:$0xff]   ;;  %v10866_v30 = vld [vmem:[%s15271_s0 + $0x5a4] ss:$100 sps:$4 sm:$0xff]  }
  0x9b   :  { %3139 = vmatmul.mubr.bf16.gmra.mrb[60].mxu0 %v10784_v31  ;;  %v10864_v31 = vld [vmem:[%s15271_s0 + $0x598] ss:$100 sps:$4 sm:$0xff]  }
  0x9c   :  { %3236 = vmatmul.mubr.bf16.gmra.mrb[60].mxu1 %v10789_v32  ;;  %3276 = vmatprep.mubr.bf16.mxu0 %v10795_v33  ;;  %v10869_v32 = vld [vmem:[%s15271_s0 + $0x5a0] ss:$100 sps:$4 sm:$0xff]  }
  0x9d   :  { %3373 = vmatprep.mubr.bf16.mxu1 %v10800_v34  ;;  %v10914_v33 = vld [vmem:[%s15272_s1 + $0x4c0] sm:$0xff]   ;;  %v10875_v34 = vld [vmem:[%s15271_s0 + $0x34] ss:$100 sps:$4 sm:$0xff]  }
  0xa3   :  { %3277 = vmatmul.mubr.bf16.vlgmr.msra.gmra.mrb[64].mxu0 %v10793_v35  ;;  %v10880_v35 = vld [vmem:[%s15271_s0 + $0x3c] ss:$100 sps:$4 sm:$0xff]  }
  0xa4   :  { %10005 = vmatpush3.bf16.msra.mxu0 %v10801_v37  ;;  %3374 = vmatmul.mubr.bf16.vlgmr.msra.gmra.mrb[64].mxu1 %v10798_v36  ;;  %v10873_v36 = vld [vmem:[%s15271_s0 + $0x30] ss:$100 sps:$4 sm:$0xff]   ;;  %v10878_v37 = vld [vmem:[%s15271_s0 + $0x38] ss:$100 sps:$4 sm:$0xff]  }
  0xa5   :  { %3284 = vmatprep.mubr.bf16.mxu0 %v10802_v38  ;;  %10006 = vmatprep.subr.bf16.mxu0 %v10805_v39  ;;  %v10881_v38 = vld [vmem:[%s15272_s1 + $0x400] sm:$0xff]  }
  0xa6   :  { %3381 = vmatprep.mubr.bf16.mxu1 %v10806_v40  ;;  %10069 = vmatpush3.bf16.msra.mxu1 %v10835_v42  ;;  %v10882_v39 = vld [vmem:[%s15271_s0 + $0xfc] ss:$100 sps:$4 sm:$0xff]   ;;  %v10885_v40 = vld [vmem:[%s15272_s1 + $0x448] sm:$0xff]  }
  0xa7   :  { %10070 = vmatprep.subr.bf16.mxu1 %v10836_v43  ;;  %v10915_v42 = vld [vmem:[%s15272_s1 + $0x480] sm:$0xff]   ;;  %v10916_v43 = vld [vmem:[%s15272_s1 + $0x4c8] sm:$0xff]  }
  0xa8   :  { %10007 = vmatpush3.bf16.msra.mxu0 %v10808_v44  ;;  %v10888_v44 = vld [vmem:[%s15272_s1 + $0x408] sm:$0xff]  }
  0xa9   :  { %10008 = vmatprep.subr.bf16.mxu0 %v10813_v46  ;;  %v10893_v46 = vld [vmem:[%s15272_s1 + $0x450] sm:$0xff]  }
  0xaa   :  { %10071 = vmatpush3.bf16.msra.mxu1 %v10839_v48  ;;  %v10890_v48 = vld [vmem:[%s15271_s0 + $0x1c4] ss:$100 sps:$4 sm:$0xff]  }
  0xab   :  { %3285 = vmatmul.mubr.bf16.gmra.mrb[68].mxu0 %v10804_v45  ;;  %10072 = vmatprep.subr.bf16.mxu1 %v10846_v53  ;;  %v10884_v45 = vld [vmem:[%s15271_s0 + $0xf8] ss:$100 sps:$4 sm:$0xff]  }
  0xac   :  { %3382 = vmatmul.mubr.bf16.gmra.mrb[68].mxu1 %v10809_v47  ;;  %3292 = vmatprep.mubr.bf16.mxu0 %v10810_v49  ;;  %v10889_v47 = vld [vmem:[%s15271_s0 + $0x100] ss:$100 sps:$4 sm:$0xff]   ;;  %v10919_v49 = vld [vmem:[%s15272_s1 + $0x488] sm:$0xff]   ;;  %v10901_v53 = vld [vmem:[%s15272_s1 + $0x458] sm:$0xff]  }
  0xad   :  { %3389 = vmatprep.mubr.bf16.mxu1 %v10814_v50  ;;  %10009 = vmatpush3.bf16.msra.mxu0 %v10816_v51  ;;  %v10894_v50 = vld [vmem:[%s15271_s0 + $0x1cc] ss:$100 sps:$4 sm:$0xff]  }
  0xae   :  { %10010 = vmatprep.subr.bf16.mxu0 %v10821_v52  ;;  %10073 = vmatpush3.bf16.msra.mxu1 %v10847_v54  ;;  %v10926_v51 = vld [vmem:[%s15272_s1 + $0x4d0] sm:$0xff]  }
  0xaf   :  { %10074 = vmatprep.subr.bf16.mxu1 %v10848_v55  ;;  %v10896_v52 = vld [vmem:[%s15272_s1 + $0x410] sm:$0xff]   ;;  %v10928_v55 = vld [vmem:[%s15272_s1 + $0x4d8] sm:$0xff]  }
  0xb0   :  { %v10927_v54 = vld [vmem:[%s15272_s1 + $0x490] sm:$0xff]  }
  0xb1   :  { %10011 = vmatpush3.bf16.msra.mxu0 %v10824_v57  ;;  %v10892_v57 = vld [vmem:[%s15271_s0 + $0x1c0] ss:$100 sps:$4 sm:$0xff]  }
  0xb2   :  { %10012 = vmatprep.subr.bf16.mxu0 %v10829_v60  ;;  %10075 = vmatpush3.bf16.msra.mxu1 %v10851_v61  ;;  %v10898_v60 = vld [vmem:[%s15271_s0 + $0x28c] ss:$100 sps:$4 sm:$0xff]   ;;  %v10931_v61 = vld [vmem:[%s15272_s1 + $0x498] sm:$0xff]  }
  0xb3   :  { %3293 = vmatmul.mubr.bf16.gmra.mrb[72].mxu0 %v10812_v56  ;;  %10076 = vmatprep.subr.bf16.mxu1 %v10858_v2  ;;  %v10904_v56 = vld [vmem:[%s15272_s1 + $0x418] sm:$0xff]   ;;  %v10939_v2 = vld [vmem:[%s15272_s1 + $0x4a0] sm:$0xff]  }
  0xb4   :  { %3390 = vmatmul.mubr.bf16.gmra.mrb[72].mxu1 %v10817_v58  ;;  %3300 = vmatprep.mubr.bf16.mxu0 %v10818_v59  ;;  %v10909_v58 = vld [vmem:[%s15272_s1 + $0x460] sm:$0xff]   ;;  %v10897_v59 = vld [vmem:[%s15271_s0 + $0x1c8] ss:$100 sps:$4 sm:$0xff]  }
  0xb5   :  { %3397 = vmatprep.mubr.bf16.mxu1 %v10822_v62  ;;  %10013 = vmatpush3.bf16.msra.mxu0 %v10832_v63  ;;  %v10902_v62 = vld [vmem:[%s15271_s0 + $0x294] ss:$100 sps:$4 sm:$0xff]   ;;  %v10938_v63 = vld [vmem:[%s15272_s1 + $0x4e0] sm:$0xff]  }
  0xb6   :  { %10014 = vmatprep.subr.bf16.mxu0 %v10841_v0  ;;  %10077 = vmatpush3.bf16.msra.mxu1 %v10859_v3  ;;  %v10912_v0 = vld [vmem:[%s15272_s1 + $0x420] sm:$0xff]   ;;  %v10940_v3 = vld [vmem:[%s15272_s1 + $0x4e8] sm:$0xff]  }
  0xb7   :  { %10078 = vmatprep.subr.bf16.mxu1 %v10860_v5  ;;  %v10900_v5 = vld [vmem:[%s15271_s0 + $0x288] ss:$100 sps:$4 sm:$0xff]  }
  0xb9   :  { %10015 = vmatpush3.bf16.msra.mxu0 %v10844_v1  ;;  %v10921_v1 = vld [vmem:[%s15272_s1 + $0x468] sm:$0xff]  }
  0xba   :  { %10016 = vmatprep.subr.bf16.mxu0 %v10853_v7  ;;  %10079 = vmatpush3.bf16.msra.mxu1 %v10863_v9  ;;  %v10906_v9 = vld [vmem:[%s15271_s0 + $0x354] ss:$100 sps:$4 sm:$0xff]  }
  0xbb   :  { %3301 = vmatmul.mubr.bf16.gmra.mrb[76].mxu0 %v10820_v4  ;;  %10080 = vmatprep.subr.bf16.mxu1 %v10870_v14  ;;  %v10924_v4 = vld [vmem:[%s15272_s1 + $0x428] sm:$0xff]   ;;  %v10950_v14 = vld [vmem:[%s15272_s1 + $0x4f0] sm:$0xff]  }
  0xbc   :  { %3398 = vmatmul.mubr.bf16.gmra.mrb[76].mxu1 %v10825_v6  ;;  %3308 = vmatprep.mubr.bf16.mxu0 %v10826_v8  ;;  %v10933_v6 = vld [vmem:[%s15272_s1 + $0x470] sm:$0xff]  }
  0xbd   :  { %3405 = vmatprep.mubr.bf16.mxu1 %v10830_v10  ;;  %10017 = vmatpush3.bf16.msra.mxu0 %v10856_v11  ;;  %v10905_v8 = vld [vmem:[%s15271_s0 + $0x290] ss:$100 sps:$4 sm:$0xff]   ;;  %v10943_v10 = vld [vmem:[%s15272_s1 + $0x4a8] sm:$0xff]  }
  0xbe   :  { %10018 = vmatprep.subr.bf16.mxu0 %v10865_v12  ;;  %10081 = vmatpush3.bf16.msra.mxu1 %v10871_v15 }
  0xbf   :  { %10082 = vmatprep.subr.bf16.mxu1 %v10872_v17 }
  0xc1   :  { %10019 = vmatpush3.bf16.msra.mxu0 %v10868_v13  ;;  %v10910_v13 = vld [vmem:[%s15271_s0 + $0x35c] ss:$100 sps:$4 sm:$0xff]  }
  0xc2   :  { %10083 = vmatpush3.bf16.msra.mxu1 %v10876_v21  ;;  %10132 = vmatprep.subr.bf16.mxu0 %v10877_v22 }
  0xc3   :  { %3309 = vmatmul.mubr.bf16.gmra.mrb[80].mxu0 %v10828_v16  ;;  %10196 = vmatprep.subr.bf16.mxu1 %v10914_v33 }
  0xc4   :  { %3406 = vmatmul.mubr.bf16.gmra.mrb[80].mxu1 %v10833_v18  ;;  %3316 = vmatprep.mubr.bf16.mxu0 %v10837_v19  ;;  %v10936_v18 = vld [vmem:[%s15272_s1 + $0x430] sm:$0xff]  }
  0xc5   :  { %3413 = vmatprep.mubr.bf16.mxu1 %v10842_v20 }
  0xcb   :  { %3317 = vmatmul.mubr.bf16.gmra.mrb[84].mxu0 %v10840_v23 }
  0xcc   :  { %3414 = vmatmul.mubr.bf16.gmra.mrb[84].mxu1 %v10845_v24  ;;  %3324 = vmatprep.mubr.bf16.mxu0 %v10849_v25  ;;  %v10945_v24 = vld [vmem:[%s15272_s1 + $0x478] sm:$0xff]   ;;  %v10951_v25 = vld [vmem:[%s15272_s1 + $0x4b0] sm:$0xff]  }
  0xcd   :  { %3421 = vmatprep.mubr.bf16.mxu1 %v10854_v26  ;;  %v10952_v26 = vld [vmem:[%s15272_s1 + $0x4f8] sm:$0xff]  }
  0xd3   :  { %3325 = vmatmul.mubr.bf16.gmra.mrb[88].mxu0 %v10852_v27 }
  0xd4   :  { %3422 = vmatmul.mubr.bf16.gmra.mrb[88].mxu1 %v10857_v28  ;;  %3332 = vmatprep.mubr.bf16.mxu0 %v10861_v29 }
  0xd5   :  { %3429 = vmatprep.mubr.bf16.mxu1 %v10866_v30  ;;  %v10908_v30 = vld [vmem:[%s15271_s0 + $0x350] ss:$100 sps:$4 sm:$0xff]  }
  0xdb   :  { %3333 = vmatmul.mubr.bf16.gmra.mrb[92].mxu0 %v10864_v31  ;;  %v10948_v31 = vld [vmem:[%s15272_s1 + $0x438] sm:$0xff]  }
  0xdc   :  { %3430 = vmatmul.mubr.bf16.gmra.mrb[92].mxu1 %v10869_v32  ;;  %3470 = vmatprep.mubr.bf16.mxu0 %v10875_v34  ;;  %v10956_v32 = vld [vmem:[%s15272_s1 + $0x4b8] sm:$0xff]  }
  0xdd   :  { %3567 = vmatprep.mubr.bf16.mxu1 %v10880_v35  ;;  %v10913_v34 = vld [vmem:[%s15271_s0 + $0x358] ss:$100 sps:$4 sm:$0xff]   ;;  %v10957_v35 = vld [vmem:[%s15272_s1 + $0x540] sm:$0xff]  }
  0xe3   :  { %3471 = vmatmul.mubr.bf16.vlgmr.msra.gmra.mrb[96].mxu0 %v10873_v36 }
  0xe4   :  { %10133 = vmatpush3.bf16.msra.mxu0 %v10881_v38  ;;  %3568 = vmatmul.mubr.bf16.vlgmr.msra.gmra.mrb[96].mxu1 %v10878_v37  ;;  %v10917_v38 = vld [vmem:[%s15271_s0 + $0x41c] ss:$100 sps:$4 sm:$0xff]  }
  0xe5   :  { %3478 = vmatprep.mubr.bf16.mxu0 %v10882_v39  ;;  %10134 = vmatprep.subr.bf16.mxu0 %v10885_v40 }
  0xe6   :  { %3575 = vmatprep.mubr.bf16.mxu1 %v10886_v41  ;;  %10197 = vmatpush3.bf16.msra.mxu1 %v10915_v42 }
  0xe7   :  { %10198 = vmatprep.subr.bf16.mxu1 %v10916_v43 }
  0xe8   :  { %10135 = vmatpush3.bf16.msra.mxu0 %v10888_v44 }
  0xe9   :  { %10136 = vmatprep.subr.bf16.mxu0 %v10893_v46 }
  0xea   :  { %10199 = vmatpush3.bf16.msra.mxu1 %v10919_v49 }
  0xeb   :  { %3479 = vmatmul.mubr.bf16.gmra.mrb[100].mxu0 %v10884_v45  ;;  %10200 = vmatprep.subr.bf16.mxu1 %v10926_v51  ;;  %v10922_v45 = vld [vmem:[%s15271_s0 + $0x424] ss:$100 sps:$4 sm:$0xff]  }
  0xec   :  { %3576 = vmatmul.mubr.bf16.gmra.mrb[100].mxu1 %v10889_v47  ;;  %3486 = vmatprep.mubr.bf16.mxu0 %v10890_v48 }
  0xed   :  { %3583 = vmatprep.mubr.bf16.mxu1 %v10894_v50  ;;  %10137 = vmatpush3.bf16.msra.mxu0 %v10896_v52  ;;  %v10920_v52 = vld [vmem:[%s15271_s0 + $0x418] ss:$100 sps:$4 sm:$0xff]  }
  0xee   :  { %10138 = vmatprep.subr.bf16.mxu0 %v10901_v53  ;;  %10201 = vmatpush3.bf16.msra.mxu1 %v10927_v54 }
  0xef   :  { %10202 = vmatprep.subr.bf16.mxu1 %v10928_v55  ;;  %v10925_v55 = vld [vmem:[%s15271_s0 + $0x420] ss:$100 sps:$4 sm:$0xff]  }
  0xf1   :  { %10139 = vmatpush3.bf16.msra.mxu0 %v10904_v56 }
  0xf2   :  { %10140 = vmatprep.subr.bf16.mxu0 %v10909_v58  ;;  %10203 = vmatpush3.bf16.msra.mxu1 %v10931_v61 }
  0xf3   :  { %3487 = vmatmul.mubr.bf16.gmra.mrb[104].mxu0 %v10892_v57  ;;  %10204 = vmatprep.subr.bf16.mxu1 %v10938_v63  ;;  %v10934_v63 = vld [vmem:[%s15271_s0 + $0x4ec] ss:$100 sps:$4 sm:$0xff]  }
  0xf4   :  { %3584 = vmatmul.mubr.bf16.gmra.mrb[104].mxu1 %v10897_v59  ;;  %3494 = vmatprep.mubr.bf16.mxu0 %v10898_v60  ;;  %v10929_v59 = vld [vmem:[%s15271_s0 + $0x4e4] ss:$100 sps:$4 sm:$0xff]  }
  0xf5   :  { %3591 = vmatprep.mubr.bf16.mxu1 %v10902_v62  ;;  %10141 = vmatpush3.bf16.msra.mxu0 %v10912_v0 }
  0xf6   :  { %v9636_v7 = vpop.f32.mrb[0].mxu0  ;;  %10142 = vmatprep.subr.bf16.mxu0 %v10921_v1  ;;  %10205 = vmatpush3.bf16.msra.mxu1 %v10939_v2 }
  0xf7   :  { %v9700_v11 = vpop.f32.mrb[0].mxu1  ;;  %v9637_v12 = vpop.f32.mrb[1].mxu0  ;;  %10206 = vmatprep.subr.bf16.mxu1 %v10940_v3 }
  0xf8   :  { %v9638_v15 = vadd.f32 %v9637_v12, %v9636_v7  ;;  %v9701_v16 = vpop.f32.mrb[1].mxu1  ;;  %v9639_v17 = vpop.f32.mrb[2].mxu0 }
  0xf9   :  { %v9702_v19 = vadd.f32 %v9701_v16, %v9700_v11  ;;  %v9703_v20 = vpop.f32.mrb[2].mxu1  ;;  %v9640_v21 = vpop.f32.mrb[3].mxu0  ;;  %10143 = vmatpush3.bf16.msra.mxu0 %v10924_v4 }
  0xfa   :  { %v9641_v22 = vadd.f32 %v9640_v21, %v9639_v17  ;;  %v9704_v23 = vpop.f32.mrb[3].mxu1  ;;  %10144 = vmatprep.subr.bf16.mxu0 %v10933_v6  ;;  %10207 = vmatpush3.bf16.msra.mxu1 %v10943_v10  ;;  %v10994_v6 = vld [vmem:[%s15272_s1 + $0x5c0] sm:$0xff]  }
  0xfb   :  { %v12820_v27 = vadd.f32 %v9702_v19, %v9638_v15  ;;  %v9705_v28 = vadd.f32 %v9704_v23, %v9703_v20  ;;  %3495 = vmatmul.mubr.bf16.gmra.mrb[108].mxu0 %v10900_v5  ;;  %10208 = vmatprep.subr.bf16.mxu1 %v10950_v14  ;;  %v10932_v5 = vld [vmem:[%s15271_s0 + $0x4e0] ss:$100 sps:$4 sm:$0xff]   ;;  %v10941_v14 = vld [vmem:[%s15271_s0 + $0x5ac] ss:$100 sps:$4 sm:$0xff]  }
  0xfc   :  { %3592 = vmatmul.mubr.bf16.gmra.mrb[108].mxu1 %v10905_v8  ;;  %3502 = vmatprep.mubr.bf16.mxu0 %v10906_v9  ;;  %v10937_v8 = vld [vmem:[%s15271_s0 + $0x4e8] ss:$100 sps:$4 sm:$0xff]  }
  0xfd   :  { %v12822_v29 = vadd.f32 %v9705_v28, %v9641_v22  ;;  %3599 = vmatprep.mubr.bf16.mxu1 %v10910_v13  ;;  %10145 = vmatpush3.bf16.msra.mxu0 %v10936_v18  ;;  %v10946_v18 = vld [vmem:[%s15271_s0 + $0x5b4] ss:$100 sps:$4 sm:$0xff]   ;;  %v10955_v28 = vld [vmem:[%s15271_s0 + $0x44] ss:$100 sps:$4 sm:$0xff]  }
  0xfe   :  { %v9642_v33 = vpop.f32.mrb[4].mxu0  ;;  %10146 = vmatprep.subr.bf16.mxu0 %v10945_v24  ;;  %10209 = vmatpush3.bf16.msra.mxu1 %v10951_v25  ;;  %v10944_v24 = vld [vmem:[%s15271_s0 + $0x5a8] ss:$100 sps:$4 sm:$0xff]  }
  0xff   :  { %v9706_v36 = vpop.f32.mrb[4].mxu1  ;;  %v9643_v37 = vpop.f32.mrb[5].mxu0  ;;  %10210 = vmatprep.subr.bf16.mxu1 %v10952_v26  ;;  %v10949_v26 = vld [vmem:[%s15271_s0 + $0x5b0] ss:$100 sps:$4 sm:$0xff]  }
 0x100   :  { %v9644_v39 = vadd.f32 %v9643_v37, %v9642_v33  ;;  %v9707_v40 = vpop.f32.mrb[5].mxu1  ;;  %v9645_v41 = vpop.f32.mrb[6].mxu0 }
 0x101   :  { %v9708_v42 = vadd.f32 %v9707_v40, %v9706_v36  ;;  %v9709_v43 = vpop.f32.mrb[6].mxu1  ;;  %v9646_v44 = vpop.f32.mrb[7].mxu0  ;;  %10147 = vmatpush3.bf16.msra.mxu0 %v10948_v31 }
 0x102   :  { %v9647_v46 = vadd.f32 %v9646_v44, %v9645_v41  ;;  %v9710_v47 = vpop.f32.mrb[7].mxu1  ;;  %10211 = vmatpush3.bf16.msra.mxu1 %v10956_v32  ;;  %10260 = vmatprep.subr.bf16.mxu0 %v10957_v35  ;;  %v10960_v35 = vld [vmem:[%s15271_s0 + $0x4c] ss:$100 sps:$4 sm:$0xff]   ;;  %v10953_v44 = vld [vmem:[%s15271_s0 + $0x40] ss:$100 sps:$4 sm:$0xff]  }
 0x103   :  { %v12845_v48 = vadd.f32 %v9708_v42, %v9644_v39  ;;  %v9711_v49 = vadd.f32 %v9710_v47, %v9709_v43  ;;  %3503 = vmatmul.mubr.bf16.gmra.mrb[112].mxu0 %v10908_v30  ;;  %10324 = vmatprep.subr.bf16.mxu1 %v10994_v6  ;;  %v10961_v47 = vld [vmem:[%s15272_s1 + $0x500] sm:$0xff]  }
 0x104   :  { %3600 = vmatmul.mubr.bf16.gmra.mrb[112].mxu1 %v10913_v34  ;;  %3510 = vmatprep.mubr.bf16.mxu0 %v10917_v38 }
 0x105   :  { %v12847_v50 = vadd.f32 %v9711_v49, %v9647_v46  ;;  %3607 = vmatprep.mubr.bf16.mxu1 %v10922_v45  ;;  %v10958_v46 = vld [vmem:[%s15271_s0 + $0x48] ss:$100 sps:$4 sm:$0xff]  }
 0x106   :  { %v9648_v51 = vpop.f32.mrb[8].mxu0 }
 0x107   :  { %v9712_v53 = vpop.f32.mrb[8].mxu1  ;;  %v9649_v54 = vpop.f32.mrb[9].mxu0 }
 0x108   :  { %v9650_v56 = vadd.f32 %v9649_v54, %v9648_v51  ;;  %v9713_v57 = vpop.f32.mrb[9].mxu1  ;;  %v9651_v58 = vpop.f32.mrb[10].mxu0 }
 0x109   :  { %v9714_v60 = vadd.f32 %v9713_v57, %v9712_v53  ;;  %v9715_v61 = vpop.f32.mrb[10].mxu1  ;;  %v9652_v62 = vpop.f32.mrb[11].mxu0 }
 0x10a   :  { %v9653_v0 = vadd.f32 %v9652_v62, %v9651_v58  ;;  %v9716_v1 = vpop.f32.mrb[11].mxu1 }
 0x10b   :  { %v12861_v2 = vadd.f32 %v9714_v60, %v9650_v56  ;;  %v9717_v3 = vadd.f32 %v9716_v1, %v9715_v61  ;;  %3511 = vmatmul.mubr.bf16.gmra.mrb[116].mxu0 %v10920_v52  ;;  %v10962_v52 = vld [vmem:[%s15271_s0 + $0x10c] ss:$100 sps:$4 sm:$0xff]   ;;  %v10966_v56 = vld [vmem:[%s15271_s0 + $0x114] ss:$100 sps:$4 sm:$0xff]   ;;  %v10995_v61 = vld [vmem:[%s15272_s1 + $0x580] sm:$0xff]  }
 0x10c   :  { %3608 = vmatmul.mubr.bf16.gmra.mrb[116].mxu1 %v10925_v55  ;;  %3518 = vmatprep.mubr.bf16.mxu0 %v10929_v59  ;;  %v10965_v60 = vld [vmem:[%s15272_s1 + $0x548] sm:$0xff]  }
 0x10d   :  { %v12863_v4 = vadd.f32 %v9717_v3, %v9653_v0  ;;  %3615 = vmatprep.mubr.bf16.mxu1 %v10934_v63  ;;  %v10996_v0 = vld [vmem:[%s15272_s1 + $0x5c8] sm:$0xff]  }
 0x10e   :  { %v9654_v7 = vpop.f32.mrb[12].mxu0 }
 0x10f   :  { %v9718_v9 = vpop.f32.mrb[12].mxu1  ;;  %v9655_v10 = vpop.f32.mrb[13].mxu0 }
 0x110   :  { %v9656_v11 = vadd.f32 %v9655_v10, %v9654_v7  ;;  %v9719_v12 = vpop.f32.mrb[13].mxu1  ;;  %v9657_v13 = vpop.f32.mrb[14].mxu0  ;;  %v10964_v7 = vld [vmem:[%s15271_s0 + $0x108] ss:$100 sps:$4 sm:$0xff]   ;;  %v10969_v10 = vld [vmem:[%s15271_s0 + $0x110] ss:$100 sps:$4 sm:$0xff]  }
 0x111   :  { %v9720_v15 = vadd.f32 %v9719_v12, %v9718_v9  ;;  %v9721_v16 = vpop.f32.mrb[14].mxu1  ;;  %v9658_v17 = vpop.f32.mrb[15].mxu0  ;;  %v10999_v12 = vld [vmem:[%s15272_s1 + $0x588] sm:$0xff]  }
 0x112   :  { %v9659_v19 = vadd.f32 %v9658_v17, %v9657_v13  ;;  %v9722_v20 = vpop.f32.mrb[15].mxu1 }
 0x113   :  { %v12880_v21 = vadd.f32 %v9720_v15, %v9656_v11  ;;  %v9723_v22 = vadd.f32 %v9722_v20, %v9721_v16  ;;  %3519 = vmatmul.mubr.bf16.gmra.mrb[120].mxu0 %v10932_v5  ;;  %v10968_v5 = vld [vmem:[%s15272_s1 + $0x508] sm:$0xff]   ;;  %v10970_v11 = vld [vmem:[%s15271_s0 + $0x1d4] ss:$100 sps:$4 sm:$0xff]   ;;  %v10974_v15 = vld [vmem:[%s15271_s0 + $0x1dc] ss:$100 sps:$4 sm:$0xff]  }
 0x114   :  { %3616 = vmatmul.mubr.bf16.gmra.mrb[120].mxu1 %v10937_v8  ;;  %3526 = vmatprep.mubr.bf16.mxu0 %v10941_v14  ;;  %v10973_v8 = vld [vmem:[%s15272_s1 + $0x550] sm:$0xff]  }
 0x115   :  { %v12882_v23 = vadd.f32 %v9723_v22, %v9659_v19  ;;  %3623 = vmatprep.mubr.bf16.mxu1 %v10946_v18  ;;  %v11006_v16 = vld [vmem:[%s15272_s1 + $0x5d0] sm:$0xff]  }
 0x116   :  { %v9660_v25 = vpop.f32.mrb[16].mxu0 }
 0x117   :  { %v9724_v30 = vpop.f32.mrb[16].mxu1  ;;  %v9661_v31 = vpop.f32.mrb[17].mxu0 }
 0x118   :  { %v9662_v32 = vadd.f32 %v9661_v31, %v9660_v25  ;;  %v9725_v33 = vpop.f32.mrb[17].mxu1  ;;  %v9663_v34 = vpop.f32.mrb[18].mxu0  ;;  %v10976_v25 = vld [vmem:[%s15272_s1 + $0x510] sm:$0xff]  }
 0x119   :  { %v9726_v36 = vadd.f32 %v9725_v33, %v9724_v30  ;;  %v9727_v37 = vpop.f32.mrb[18].mxu1  ;;  %v9664_v38 = vpop.f32.mrb[19].mxu0  ;;  %v11007_v31 = vld [vmem:[%s15272_s1 + $0x590] sm:$0xff]  }
 0x11a   :  { %v9665_v39 = vadd.f32 %v9664_v38, %v9663_v34  ;;  %v9728_v40 = vpop.f32.mrb[19].mxu1  ;;  %v11008_v34 = vld [vmem:[%s15272_s1 + $0x5d8] sm:$0xff]   ;;  %v10989_v38 = vld [vmem:[%s15272_s1 + $0x560] sm:$0xff]  }
 0x11b   :  { %v12896_v41 = vadd.f32 %v9726_v36, %v9662_v32  ;;  %v9729_v42 = vadd.f32 %v9728_v40, %v9727_v37  ;;  %3527 = vmatmul.mubr.bf16.gmra.mrb[124].mxu0 %v10944_v24  ;;  %v10972_v37 = vld [vmem:[%s15271_s0 + $0x1d0] ss:$100 sps:$4 sm:$0xff]  }
 0x11c   :  { %3624 = vmatmul.mubr.bf16.gmra.mrb[124].mxu1 %v10949_v26  ;;  %3664 = vmatprep.mubr.bf16.mxu0 %v10955_v28  ;;  %v10981_v26 = vld [vmem:[%s15272_s1 + $0x558] sm:$0xff]  }
 0x11d   :  { %v12898_v43 = vadd.f32 %v9729_v42, %v9665_v39  ;;  %3761 = vmatprep.mubr.bf16.mxu1 %v10960_v35  ;;  %v10984_v35 = vld [vmem:[%s15272_s1 + $0x518] sm:$0xff]  }
 0x11e   :  { %v9666_v45 = vpop.f32.mrb[20].mxu0  ;;  %v11011_v39 = vld [vmem:[%s15272_s1 + $0x598] sm:$0xff]  }
 0x11f   :  { %v9730_v49 = vpop.f32.mrb[20].mxu1  ;;  %v9667_v51 = vpop.f32.mrb[21].mxu0  ;;  %v10977_v42 = vld [vmem:[%s15271_s0 + $0x1d8] ss:$100 sps:$4 sm:$0xff]  }
 0x120   :  { %v9668_v53 = vadd.f32 %v9667_v51, %v9666_v45  ;;  %v9731_v54 = vpop.f32.mrb[21].mxu1  ;;  %v9669_v55 = vpop.f32.mrb[22].mxu0 }
 0x121   :  { %v9732_v57 = vadd.f32 %v9731_v54, %v9730_v49  ;;  %v9733_v58 = vpop.f32.mrb[22].mxu1  ;;  %v9670_v59 = vpop.f32.mrb[23].mxu0 }
 0x122   :  { %v9671_v62 = vadd.f32 %v9670_v59, %v9669_v55  ;;  %v9734_v63 = vpop.f32.mrb[23].mxu1 }
 0x123   :  { %v12924_v1 = vadd.f32 %v9732_v57, %v9668_v53  ;;  %v9735_v3 = vadd.f32 %v9734_v63, %v9733_v58  ;;  %3665 = vmatmul.mubr.bf16.vlgmr.msra.gmra.mrb[128].mxu0 %v10953_v44  ;;  %v11018_v44 = vld [vmem:[%s15272_s1 + $0x5e0] sm:$0xff]   ;;  %v11001_v58 = vld [vmem:[%s15272_s1 + $0x568] sm:$0xff]  }
 0x124   :  { %10261 = vmatpush3.bf16.msra.mxu0 %v10961_v47  ;;  %3762 = vmatmul.mubr.bf16.vlgmr.msra.gmra.mrb[128].mxu1 %v10958_v46  ;;  %v10992_v57 = vld [vmem:[%s15272_s1 + $0x520] sm:$0xff]  }
 0x125   :  { %v12929_v6 = vadd.f32 %v9735_v3, %v9671_v62  ;;  %3672 = vmatprep.mubr.bf16.mxu0 %v10962_v52  ;;  %10262 = vmatprep.subr.bf16.mxu0 %v10965_v60  ;;  %v10978_v52 = vld [vmem:[%s15271_s0 + $0x29c] ss:$100 sps:$4 sm:$0xff]  }
 0x126   :  { %v9672_v9 = vpop.f32.mrb[24].mxu0  ;;  %3769 = vmatprep.mubr.bf16.mxu1 %v10966_v56  ;;  %10325 = vmatpush3.bf16.msra.mxu1 %v10995_v61  ;;  %v10982_v56 = vld [vmem:[%s15271_s0 + $0x2a4] ss:$100 sps:$4 sm:$0xff]  }
 0x127   :  { %v9736_v13 = vpop.f32.mrb[24].mxu1  ;;  %v9673_v14 = vpop.f32.mrb[25].mxu0  ;;  %10326 = vmatprep.subr.bf16.mxu1 %v10996_v0  ;;  %v11019_v61 = vld [vmem:[%s15272_s1 + $0x5a0] sm:$0xff]   ;;  %v11020_v0 = vld [vmem:[%s15272_s1 + $0x5e8] sm:$0xff]  }
 0x128   :  { %v9674_v17 = vadd.f32 %v9673_v14, %v9672_v9  ;;  %v9737_v18 = vpop.f32.mrb[25].mxu1  ;;  %v9675_v19 = vpop.f32.mrb[26].mxu0  ;;  %10263 = vmatpush3.bf16.msra.mxu0 %v10968_v5  ;;  %v10980_v5 = vld [vmem:[%s15271_s0 + $0x298] ss:$100 sps:$4 sm:$0xff]  }
 0x129   :  { %v9738_v20 = vadd.f32 %v9737_v18, %v9736_v13  ;;  %v9739_v22 = vpop.f32.mrb[26].mxu1  ;;  %v9676_v24 = vpop.f32.mrb[27].mxu0  ;;  %10264 = vmatprep.subr.bf16.mxu0 %v10973_v8  ;;  %v11013_v8 = vld [vmem:[%s15272_s1 + $0x570] sm:$0xff]   ;;  %v10986_v18 = vld [vmem:[%s15271_s0 + $0x364] ss:$100 sps:$4 sm:$0xff]  }
 0x12a   :  { %v9677_v28 = vadd.f32 %v9676_v24, %v9675_v19  ;;  %v9740_v30 = vpop.f32.mrb[27].mxu1  ;;  %10327 = vmatpush3.bf16.msra.mxu1 %v10999_v12  ;;  %v11030_v12 = vld [vmem:[%s15272_s1 + $0x5f0] sm:$0xff]  }
 0x12b   :  { %v12961_v32 = vadd.f32 %v9738_v20, %v9674_v17  ;;  %v9741_v33 = vadd.f32 %v9740_v30, %v9739_v22  ;;  %3673 = vmatmul.mubr.bf16.gmra.mrb[132].mxu0 %v10964_v7  ;;  %10328 = vmatprep.subr.bf16.mxu1 %v11006_v16  ;;  %v11004_v7 = vld [vmem:[%s15272_s1 + $0x528] sm:$0xff]  }
 0x12c   :  { %3770 = vmatmul.mubr.bf16.gmra.mrb[132].mxu1 %v10969_v10  ;;  %3680 = vmatprep.mubr.bf16.mxu0 %v10970_v11  ;;  %v10985_v10 = vld [vmem:[%s15271_s0 + $0x2a0] ss:$100 sps:$4 sm:$0xff]   ;;  %v11023_v11 = vld [vmem:[%s15272_s1 + $0x5a8] sm:$0xff]  }
 0x12d   :  { %v12969_v36 = vadd.f32 %v9741_v33, %v9677_v28  ;;  %3777 = vmatprep.mubr.bf16.mxu1 %v10974_v15  ;;  %10265 = vmatpush3.bf16.msra.mxu0 %v10976_v25  ;;  %v10990_v24 = vld [vmem:[%s15271_s0 + $0x36c] ss:$100 sps:$4 sm:$0xff]  }
 0x12e   :  { %v9678_v40 = vpop.f32.mrb[28].mxu0  ;;  %10266 = vmatprep.subr.bf16.mxu0 %v10981_v26  ;;  %10329 = vmatpush3.bf16.msra.mxu1 %v11007_v31  ;;  %v11016_v25 = vld [vmem:[%s15272_s1 + $0x530] sm:$0xff]   ;;  %v11025_v26 = vld [vmem:[%s15272_s1 + $0x578] sm:$0xff]  }
 0x12f   :  { %v9742_v45 = vpop.f32.mrb[28].mxu1  ;;  %v9679_v46 = vpop.f32.mrb[29].mxu0  ;;  %10330 = vmatprep.subr.bf16.mxu1 %v11008_v34  ;;  %v11031_v33 = vld [vmem:[%s15272_s1 + $0x5b0] sm:$0xff]  }
 0x130   :  { %v9680_v47 = vadd.f32 %v9679_v46, %v9678_v40  ;;  %v9743_v49 = vpop.f32.mrb[29].mxu1  ;;  %v9681_v51 = vpop.f32.mrb[30].mxu0 }
 0x131   :  { %v9744_v53 = vadd.f32 %v9743_v49, %v9742_v45  ;;  %v9745_v54 = vpop.f32.mrb[30].mxu1  ;;  %v9682_v55 = vpop.f32.mrb[31].mxu0  ;;  %10267 = vmatpush3.bf16.msra.mxu0 %v10984_v35  ;;  %v11032_v35 = vld [vmem:[%s15272_s1 + $0x5f8] sm:$0xff]   ;;  %v13065_v45 = vld [vmem:[%s15272_s1 + $0x600] sm:$0xff]  }
 0x132   :  { %v9683_v59 = vadd.f32 %v9682_v55, %v9681_v51  ;;  %v9746_v60 = vpop.f32.mrb[31].mxu1  ;;  %10268 = vmatprep.subr.bf16.mxu0 %v10989_v38  ;;  %10331 = vmatpush3.bf16.msra.mxu1 %v11011_v39  ;;  %v11028_v39 = vld [vmem:[%s15272_s1 + $0x538] sm:$0xff]  }
 0x133   :  { %v13001_v62 = vadd.f32 %v9744_v53, %v9680_v47  ;;  %v9747_v63 = vadd.f32 %v9746_v60, %v9745_v54  ;;  %3681 = vmatmul.mubr.bf16.gmra.mrb[136].mxu0 %v10972_v37  ;;  %10332 = vmatprep.subr.bf16.mxu1 %v11018_v44  ;;  %v11036_v44 = vld [vmem:[%s15272_s1 + $0x5b8] sm:$0xff]   ;;  %v10997_v53 = vld [vmem:[%s15271_s0 + $0x42c] ss:$100 sps:$4 sm:$0xff]  }
 0x134   :  { %3778 = vmatmul.mubr.bf16.gmra.mrb[136].mxu1 %v10977_v42  ;;  %3688 = vmatprep.mubr.bf16.mxu0 %v10978_v52 }
 0x135   :  { %v13006_v3 = vadd.f32 %v9747_v63, %v9683_v59  ;;  %3785 = vmatprep.mubr.bf16.mxu1 %v10982_v56  ;;  %10269 = vmatpush3.bf16.msra.mxu0 %v10992_v57  ;;  %v11002_v57 = vld [vmem:[%s15271_s0 + $0x434] ss:$100 sps:$4 sm:$0xff]  }
 0x136   :  { %v9764_v9 = vpop.f32.mrb[32].mxu0  ;;  %10270 = vmatprep.subr.bf16.mxu0 %v11001_v58  ;;  %10333 = vmatpush3.bf16.msra.mxu1 %v11019_v61 }
 0x137   :  { %v9765_v13 = vpop.f32.mrb[33].mxu0  ;;  %v9828_v14 = vpop.f32.mrb[32].mxu1  ;;  %10334 = vmatprep.subr.bf16.mxu1 %v11020_v0 }
 0x138   :  { %v9766_v15 = vadd.f32 %v9765_v13, %v9764_v9  ;;  %v9767_v16 = vpop.f32.mrb[34].mxu0  ;;  %v9829_v17 = vpop.f32.mrb[33].mxu1  ;;  %v11009_v13 = vld [vmem:[%s15271_s0 + $0x4f4] ss:$100 sps:$4 sm:$0xff]  }
 0x139   :  { %v9768_v19 = vpop.f32.mrb[35].mxu0  ;;  %v9830_v20 = vadd.f32 %v9829_v17, %v9828_v14  ;;  %v9831_v22 = vpop.f32.mrb[34].mxu1  ;;  %10271 = vmatpush3.bf16.msra.mxu0 %v11004_v7  ;;  %v11014_v17 = vld [vmem:[%s15271_s0 + $0x4fc] ss:$100 sps:$4 sm:$0xff]  }
 0x13a   :  { %v3085_v28 = vadd.f32 %v9766_v15, %v12820_v27  ;;  %v9769_v30 = vadd.f32 %v9768_v19, %v9767_v16  ;;  %v9832_v31 = vpop.f32.mrb[35].mxu1  ;;  %10272 = vmatprep.subr.bf16.mxu0 %v11013_v8  ;;  %10335 = vmatpush3.bf16.msra.mxu1 %v11023_v11  ;;  %v10988_v27 = vld [vmem:[%s15271_s0 + $0x360] ss:$100 sps:$4 sm:$0xff]   ;;  %v11005_v8 = vld [vmem:[%s15271_s0 + $0x430] ss:$100 sps:$4 sm:$0xff]  }
 0x13b   :  { %v9833_v34 = vadd.f32 %v9832_v31, %v9831_v22  ;;  %3689 = vmatmul.mubr.bf16.gmra.mrb[140].mxu0 %v10980_v5  ;;  %10336 = vmatprep.subr.bf16.mxu1 %v11030_v12 }
 0x13c   :  { %v3088_v37 = vadd.f32 %v9769_v30, %v12822_v29  ;;  %v13046_v38 = vadd.f32 %v9830_v20, %v3085_v28  ;;  %3786 = vmatmul.mubr.bf16.gmra.mrb[140].mxu1 %v10985_v10  ;;  %3696 = vmatprep.mubr.bf16.mxu0 %v10986_v18  ;;  %v10993_v29 = vld [vmem:[%s15271_s0 + $0x368] ss:$100 sps:$4 sm:$0xff]  }
 0x13d   :  { %3793 = vmatprep.mubr.bf16.mxu1 %v10990_v24  ;;  %10273 = vmatpush3.bf16.msra.mxu0 %v11016_v25 }
 0x13e   :  { %v13054_v40 = vadd.f32 %v9833_v34, %v3088_v37  ;;  %v9770_v42 = vpop.f32.mrb[36].mxu0  ;;  %10274 = vmatprep.subr.bf16.mxu0 %v11025_v26  ;;  %10337 = vmatpush3.bf16.msra.mxu1 %v11031_v33  ;;  %v11012_v26 = vld [vmem:[%s15271_s0 + $0x4f0] ss:$100 sps:$4 sm:$0xff]   ;;  %v11021_v37 = vld [vmem:[%s15271_s0 + $0x5bc] ss:$100 sps:$4 sm:$0xff]  }
 0x13f   :  { %v9771_v46 = vpop.f32.mrb[37].mxu0  ;;  %v9834_v47 = vpop.f32.mrb[36].mxu1  ;;  %10338 = vmatprep.subr.bf16.mxu1 %v11032_v35 }
 0x140   :  { %v9772_v49 = vadd.f32 %v9771_v46, %v9770_v42  ;;  %v9773_v51 = vpop.f32.mrb[38].mxu0  ;;  %v9835_v52 = vpop.f32.mrb[37].mxu1 }
 0x141   :  { %v9774_v54 = vpop.f32.mrb[39].mxu0  ;;  %v9836_v55 = vadd.f32 %v9835_v52, %v9834_v47  ;;  %v9837_v56 = vpop.f32.mrb[38].mxu1  ;;  %10275 = vmatpush3.bf16.msra.mxu0 %v11028_v39 }
 0x142   :  { %v3093_v58 = vadd.f32 %v9772_v49, %v12845_v48  ;;  %v9775_v59 = vadd.f32 %v9774_v54, %v9773_v51  ;;  %v9838_v60 = vpop.f32.mrb[39].mxu1  ;;  %10339 = vmatpush3.bf16.msra.mxu1 %v11036_v44  ;;  %10466 = vmatprep.subr.bf16.mxu0 %v13065_v45  ;;  %v11000_v48 = vld [vmem:[%s15271_s0 + $0x428] ss:$100 sps:$4 sm:$0xff]  }
 0x143   :  { %v9839_v61 = vadd.f32 %v9838_v60, %v9837_v56  ;;  %3697 = vmatmul.mubr.bf16.gmra.mrb[144].mxu0 %v10988_v27 }
 0x144   :  { %v3096_v63 = vadd.f32 %v9775_v59, %v12847_v50  ;;  %v13076_v0 = vadd.f32 %v9836_v55, %v3093_v58  ;;  %3794 = vmatmul.mubr.bf16.gmra.mrb[144].mxu1 %v10993_v29  ;;  %3704 = vmatprep.mubr.bf16.mxu0 %v10997_v53  ;;  %v11026_v29 = vld [vmem:[%s15271_s0 + $0x5c4] ss:$100 sps:$4 sm:$0xff]   ;;  %v11024_v53 = vld [vmem:[%s15271_s0 + $0x5b8] ss:$100 sps:$4 sm:$0xff]  }
 0x145   :  { %3801 = vmatprep.mubr.bf16.mxu1 %v11002_v57  ;;  %v11040_v58 = vld [vmem:[%s15271_s0 + $0x5c] ss:$100 sps:$4 sm:$0xff]  }
 0x146   :  { %v13078_v5 = vadd.f32 %v9839_v61, %v3096_v63  ;;  %v9776_v7 = vpop.f32.mrb[40].mxu0 }
 0x147   :  { %v9777_v9 = vpop.f32.mrb[41].mxu0  ;;  %v9840_v10 = vpop.f32.mrb[40].mxu1 }
 0x148   :  { %v9778_v11 = vadd.f32 %v9777_v9, %v9776_v7  ;;  %v9779_v50 = vpop.f32.mrb[42].mxu0  ;;  %v9841_v12 = vpop.f32.mrb[41].mxu1 }
 0x149   :  { %v9780_v14 = vpop.f32.mrb[43].mxu0  ;;  %v9842_v15 = vadd.f32 %v9841_v12, %v9840_v10  ;;  %v9843_v16 = vpop.f32.mrb[42].mxu1 }
 0x14a   :  { %v3101_v18 = vadd.f32 %v9778_v11, %v12861_v2  ;;  %v9781_v19 = vadd.f32 %v9780_v14, %v9779_v50  ;;  %v9844_v20 = vpop.f32.mrb[43].mxu1  ;;  %v11017_v2 = vld [vmem:[%s15271_s0 + $0x4f8] ss:$100 sps:$4 sm:$0xff]  }
 0x14b   :  { %v9845_v22 = vadd.f32 %v9844_v20, %v9843_v16  ;;  %3705 = vmatmul.mubr.bf16.gmra.mrb[148].mxu0 %v11000_v48 }
 0x14c   :  { %v3104_v24 = vadd.f32 %v9781_v19, %v12863_v4  ;;  %v13094_v25 = vadd.f32 %v9842_v15, %v3101_v18  ;;  %3802 = vmatmul.mubr.bf16.gmra.mrb[148].mxu1 %v11005_v8  ;;  %3712 = vmatprep.mubr.bf16.mxu0 %v11009_v13  ;;  %v11033_v13 = vld [vmem:[%s15271_s0 + $0x50] ss:$100 sps:$4 sm:$0xff]   ;;  %v11044_v18 = vld [vmem:[%s15272_s1 + $0x608] sm:$0xff]  }
 0x14d   :  { %3809 = vmatprep.mubr.bf16.mxu1 %v11014_v17 }
 0x14e   :  { %v13099_v28 = vadd.f32 %v9845_v22, %v3104_v24  ;;  %v9782_v30 = vpop.f32.mrb[44].mxu0  ;;  %v11045_v24 = vld [vmem:[%s15271_s0 + $0x124] ss:$100 sps:$4 sm:$0xff]  }
 0x14f   :  { %v9783_v31 = vpop.f32.mrb[45].mxu0  ;;  %v9846_v33 = vpop.f32.mrb[44].mxu1 }
 0x150   :  { %v9784_v34 = vadd.f32 %v9783_v31, %v9782_v30  ;;  %v9785_v4 = vpop.f32.mrb[46].mxu0  ;;  %v9847_v35 = vpop.f32.mrb[45].mxu1 }
 0x151   :  { %v9786_v27 = vpop.f32.mrb[47].mxu0  ;;  %v9848_v39 = vadd.f32 %v9847_v35, %v9846_v33  ;;  %v9849_v42 = vpop.f32.mrb[46].mxu1  ;;  %v11051_v35 = vld [vmem:[%s15272_s1 + $0x610] sm:$0xff]  }
 0x152   :  { %v3109_v44 = vadd.f32 %v9784_v34, %v12880_v21  ;;  %v9787_v46 = vadd.f32 %v9786_v27, %v9785_v4  ;;  %v9850_v47 = vpop.f32.mrb[47].mxu1  ;;  %v11029_v21 = vld [vmem:[%s15271_s0 + $0x5c0] ss:$100 sps:$4 sm:$0xff]  }
 0x153   :  { %v9851_v49 = vadd.f32 %v9850_v47, %v9849_v42  ;;  %3713 = vmatmul.mubr.bf16.gmra.mrb[152].mxu0 %v11012_v26 }
 0x154   :  { %v3112_v51 = vadd.f32 %v9787_v46, %v12882_v23  ;;  %v13112_v52 = vadd.f32 %v9848_v39, %v3109_v44  ;;  %3810 = vmatmul.mubr.bf16.gmra.mrb[152].mxu1 %v11017_v2  ;;  %3720 = vmatprep.mubr.bf16.mxu0 %v11021_v37  ;;  %v11035_v23 = vld [vmem:[%s15271_s0 + $0x54] ss:$100 sps:$4 sm:$0xff]   ;;  %v11052_v46 = vld [vmem:[%s15271_s0 + $0x1ec] ss:$100 sps:$4 sm:$0xff]  }
 0x155   :  { %3817 = vmatprep.mubr.bf16.mxu1 %v11026_v29  ;;  %v11047_v29 = vld [vmem:[%s15271_s0 + $0x120] ss:$100 sps:$4 sm:$0xff]  }
 0x156   :  { %v13117_v54 = vadd.f32 %v9851_v49, %v3112_v51  ;;  %v9788_v55 = vpop.f32.mrb[48].mxu0 }
 0x157   :  { %v9789_v56 = vpop.f32.mrb[49].mxu0  ;;  %v9852_v57 = vpop.f32.mrb[48].mxu1 }
 0x158   :  { %v9790_v59 = vadd.f32 %v9789_v56, %v9788_v55  ;;  %v9791_v60 = vpop.f32.mrb[50].mxu0  ;;  %v9853_v61 = vpop.f32.mrb[49].mxu1 }
 0x159   :  { %v9792_v63 = vpop.f32.mrb[51].mxu0  ;;  %v9854_v7 = vadd.f32 %v9853_v61, %v9852_v57  ;;  %v9855_v48 = vpop.f32.mrb[50].mxu1 }
 0x15a   :  { %v3117_v8 = vadd.f32 %v9790_v59, %v12896_v41  ;;  %v9793_v9 = vadd.f32 %v9792_v63, %v9791_v60  ;;  %v9856_v10 = vpop.f32.mrb[51].mxu1  ;;  %v11038_v41 = vld [vmem:[%s15271_s0 + $0x58] ss:$100 sps:$4 sm:$0xff]   ;;  %v11065_v63 = vld [vmem:[%s15272_s1 + $0x620] sm:$0xff]  }
 0x15b   :  { %v9857_v11 = vadd.f32 %v9856_v10, %v9855_v48  ;;  %3721 = vmatmul.mubr.bf16.gmra.mrb[156].mxu0 %v11024_v53  ;;  %v11058_v53 = vld [vmem:[%s15272_s1 + $0x618] sm:$0xff]  }
 0x15c   :  { %v3120_v50 = vadd.f32 %v9793_v9, %v12898_v43  ;;  %v13130_v12 = vadd.f32 %v9854_v7, %v3117_v8  ;;  %3818 = vmatmul.mubr.bf16.gmra.mrb[156].mxu1 %v11029_v21  ;;  %3858 = vmatprep.mubr.bf16.mxu0 %v11035_v23  ;;  %v11041_v43 = vld [vmem:[%s15271_s0 + $0x11c] ss:$100 sps:$4 sm:$0xff]   ;;  %v11055_v8 = vld [vmem:[%s15271_s0 + $0x2ac] ss:$100 sps:$4 sm:$0xff]  }
 0x15d   :  { %3955 = vmatprep.mubr.bf16.mxu1 %v11040_v58  ;;  %v11050_v7 = vld [vmem:[%s15271_s0 + $0x1e0] ss:$100 sps:$4 sm:$0xff]  }
 0x15e   :  { %v13135_v14 = vadd.f32 %v9857_v11, %v3120_v50  ;;  %v9794_v15 = vpop.f32.mrb[52].mxu0  ;;  %v11059_v11 = vld [vmem:[%s15271_s0 + $0x2b4] ss:$100 sps:$4 sm:$0xff]  }
 0x15f   :  { %v9795_v16 = vpop.f32.mrb[53].mxu0  ;;  %v9858_v17 = vpop.f32.mrb[52].mxu1 }
 0x160   :  { %v9796_v19 = vadd.f32 %v9795_v16, %v9794_v15  ;;  %v9797_v20 = vpop.f32.mrb[54].mxu0  ;;  %v9859_v22 = vpop.f32.mrb[53].mxu1 }
 0x161   :  { %v9798_v26 = vpop.f32.mrb[55].mxu0  ;;  %v9860_v30 = vadd.f32 %v9859_v22, %v9858_v17  ;;  %v9861_v2 = vpop.f32.mrb[54].mxu1 }
 0x162   :  { %v3125_v31 = vadd.f32 %v9796_v19, %v12924_v1  ;;  %v9799_v33 = vadd.f32 %v9798_v26, %v9797_v20  ;;  %v9862_v34 = vpop.f32.mrb[55].mxu1  ;;  %v11043_v1 = vld [vmem:[%s15271_s0 + $0x118] ss:$100 sps:$4 sm:$0xff]  }
 0x163   :  { %v9863_v4 = vadd.f32 %v9862_v34, %v9861_v2  ;;  %3859 = vmatmul.mubr.bf16.vlgmr.msra.gmra.mrb[160].mxu0 %v11033_v13  ;;  %v11057_v2 = vld [vmem:[%s15271_s0 + $0x2a8] ss:$100 sps:$4 sm:$0xff]  }
 0x164   :  { %v3128_v37 = vadd.f32 %v9799_v33, %v12929_v6  ;;  %v13154_v27 = vadd.f32 %v9860_v30, %v3125_v31  ;;  %10467 = vmatpush3.bf16.msra.mxu0 %v13065_v45  ;;  %3956 = vmatmul.mubr.bf16.vlgmr.msra.gmra.mrb[160].mxu1 %v11038_v41  ;;  %v11048_v6 = vld [vmem:[%s15271_s0 + $0x1e4] ss:$100 sps:$4 sm:$0xff]   ;;  %v11079_v30 = vld [vmem:[%s15272_s1 + $0x630] sm:$0xff]  }
 0x165   :  { %3866 = vmatprep.mubr.bf16.mxu0 %v11041_v43  ;;  %10468 = vmatprep.subr.bf16.mxu0 %v11044_v18  ;;  %v11072_v41 = vld [vmem:[%s15272_s1 + $0x628] sm:$0xff]   ;;  %v11062_v33 = vld [vmem:[%s15271_s0 + $0x374] ss:$100 sps:$4 sm:$0xff]  }
 0x166   :  { %v13160_v39 = vadd.f32 %v9863_v4, %v3128_v37  ;;  %v9800_v42 = vpop.f32.mrb[56].mxu0  ;;  %3963 = vmatprep.mubr.bf16.mxu1 %v11045_v24 }
 0x167   :  { %v9801_v45 = vpop.f32.mrb[57].mxu0  ;;  %v9864_v44 = vpop.f32.mrb[56].mxu1 }
 0x168   :  { %v9802_v47 = vadd.f32 %v9801_v45, %v9800_v42  ;;  %v9803_v49 = vpop.f32.mrb[58].mxu0  ;;  %v9865_v51 = vpop.f32.mrb[57].mxu1  ;;  %10469 = vmatpush3.bf16.msra.mxu0 %v11044_v18 }
 0x169   :  { %v9804_v55 = vpop.f32.mrb[59].mxu0  ;;  %v9866_v21 = vadd.f32 %v9865_v51, %v9864_v44  ;;  %v9867_v23 = vpop.f32.mrb[58].mxu1  ;;  %10470 = vmatprep.subr.bf16.mxu0 %v11051_v35 }
 0x16a   :  { %v3133_v56 = vadd.f32 %v9802_v47, %v12961_v32  ;;  %v9805_v57 = vadd.f32 %v9804_v55, %v9803_v49  ;;  %v9868_v58 = vpop.f32.mrb[59].mxu1 }
 0x16b   :  { %v9869_v59 = vadd.f32 %v9868_v58, %v9867_v23  ;;  %3867 = vmatmul.mubr.bf16.gmra.mrb[164].mxu0 %v11043_v1 }
 0x16c   :  { %v3136_v60 = vadd.f32 %v9805_v57, %v12969_v36  ;;  %v13176_v61 = vadd.f32 %v9866_v21, %v3133_v56  ;;  %3964 = vmatmul.mubr.bf16.gmra.mrb[164].mxu1 %v11047_v29  ;;  %3874 = vmatprep.mubr.bf16.mxu0 %v11048_v6  ;;  %v11054_v36 = vld [vmem:[%s15271_s0 + $0x1e8] ss:$100 sps:$4 sm:$0xff]   ;;  %v11086_v29 = vld [vmem:[%s15272_s1 + $0x638] sm:$0xff]   ;;  %v11064_v21 = vld [vmem:[%s15271_s0 + $0x370] ss:$100 sps:$4 sm:$0xff]  }
 0x16d   :  { %3971 = vmatprep.mubr.bf16.mxu1 %v11052_v46  ;;  %10471 = vmatpush3.bf16.msra.mxu0 %v11051_v35  ;;  %v11066_v35 = vld [vmem:[%s15271_s0 + $0x37c] ss:$100 sps:$4 sm:$0xff]  }
 0x16e   :  { %v13184_v32 = vadd.f32 %v9869_v59, %v3136_v60  ;;  %v9806_v48 = vpop.f32.mrb[60].mxu0  ;;  %10472 = vmatprep.subr.bf16.mxu0 %v11058_v53  ;;  %v11068_v56 = vld [vmem:[%s15271_s0 + $0x378] ss:$100 sps:$4 sm:$0xff]   ;;  %v11073_v59 = vld [vmem:[%s15271_s0 + $0x444] ss:$100 sps:$4 sm:$0xff]  }
 0x16f   :  { %v9807_v9 = vpop.f32.mrb[61].mxu0  ;;  %v9870_v10 = vpop.f32.mrb[60].mxu1 }
 0x170   :  { %v9808_v50 = vadd.f32 %v9807_v9, %v9806_v48  ;;  %v9809_v13 = vpop.f32.mrb[62].mxu0  ;;  %v9871_v15 = vpop.f32.mrb[61].mxu1 }
 0x171   :  { %v9810_v16 = vpop.f32.mrb[63].mxu0  ;;  %v9872_v17 = vadd.f32 %v9871_v15, %v9870_v10  ;;  %v9873_v43 = vpop.f32.mrb[62].mxu1  ;;  %10473 = vmatpush3.bf16.msra.mxu0 %v11058_v53 }
 0x172   :  { %v3141_v18 = vadd.f32 %v9808_v50, %v13001_v62  ;;  %v9811_v19 = vadd.f32 %v9810_v16, %v9809_v13  ;;  %v9874_v20 = vpop.f32.mrb[63].mxu1  ;;  %10474 = vmatprep.subr.bf16.mxu0 %v11065_v63 }
 0x173   :  { %v9875_v22 = vadd.f32 %v9874_v20, %v9873_v43  ;;  %3875 = vmatmul.mubr.bf16.gmra.mrb[168].mxu0 %v11050_v7 }
 0x174   :  { %v3144_v24 = vadd.f32 %v9811_v19, %v13006_v3  ;;  %v13200_v26 = vadd.f32 %v9872_v17, %v3141_v18  ;;  %3972 = vmatmul.mubr.bf16.gmra.mrb[168].mxu1 %v11054_v36  ;;  %3882 = vmatprep.mubr.bf16.mxu0 %v11055_v8  ;;  %v11061_v3 = vld [vmem:[%s15271_s0 + $0x2b0] ss:$100 sps:$4 sm:$0xff]  }
 0x175   :  { %3979 = vmatprep.mubr.bf16.mxu1 %v11059_v11  ;;  %10475 = vmatpush3.bf16.msra.mxu0 %v11065_v63  ;;  %v11080_v19 = vld [vmem:[%s15271_s0 + $0x50c] ss:$100 sps:$4 sm:$0xff]  }
 0x176   :  { %v13208_v62 = vadd.f32 %v9875_v22, %v3144_v24  ;;  %v9892_v31 = vpop.f32.mrb[64].mxu0  ;;  %10476 = vmatprep.subr.bf16.mxu0 %v11072_v41 }
 0x177   :  { %v9893_v34 = vpop.f32.mrb[65].mxu0  ;;  %v9956_v4 = vpop.f32.mrb[64].mxu1 }
 0x178   :  { %v9894_v37 = vadd.f32 %v9893_v34, %v9892_v31  ;;  %v9895_v1 = vpop.f32.mrb[66].mxu0  ;;  %v9957_v42 = vpop.f32.mrb[65].mxu1 }
 0x179   :  { %v9896_v6 = vpop.f32.mrb[67].mxu0  ;;  %v9958_v45 = vadd.f32 %v9957_v42, %v9956_v4  ;;  %v9959_v44 = vpop.f32.mrb[66].mxu1  ;;  %10477 = vmatpush3.bf16.msra.mxu0 %v11072_v41  ;;  %v11071_v41 = vld [vmem:[%s15271_s0 + $0x438] ss:$100 sps:$4 sm:$0xff]  }
 0x17a   :  { %v3279_v46 = vadd.f32 %v9894_v37, %v13046_v38  ;;  %v9897_v47 = vadd.f32 %v9896_v6, %v9895_v1  ;;  %v9960_v49 = vpop.f32.mrb[67].mxu1  ;;  %10478 = vmatprep.subr.bf16.mxu0 %v11079_v30  ;;  %v11078_v1 = vld [vmem:[%s15271_s0 + $0x500] ss:$100 sps:$4 sm:$0xff]  }
 0x17b   :  { %v9961_v51 = vadd.f32 %v9960_v49, %v9959_v44  ;;  %3883 = vmatmul.mubr.bf16.gmra.mrb[172].mxu0 %v11057_v2  ;;  %v11087_v44 = vld [vmem:[%s15271_s0 + $0x5d4] ss:$100 sps:$4 sm:$0xff]  }
 0x17c   :  { %v3282_v53 = vadd.f32 %v9897_v47, %v13054_v40  ;;  %v13224_v55 = vadd.f32 %v9958_v45, %v3279_v46  ;;  %3980 = vmatmul.mubr.bf16.gmra.mrb[172].mxu1 %v11061_v3  ;;  %3890 = vmatprep.mubr.bf16.mxu0 %v11062_v33  ;;  %v11069_v40 = vld [vmem:[%s15271_s0 + $0x43c] ss:$100 sps:$4 sm:$0xff]  }
 0x17d   :  { %3987 = vmatprep.mubr.bf16.mxu1 %v11066_v35  ;;  %10479 = vmatpush3.bf16.msra.mxu0 %v11079_v30 }
 0x17e   :  { %v13229_v23 = vadd.f32 %v9961_v51, %v3282_v53  ;;  %v9898_v38 = vpop.f32.mrb[68].mxu0  ;;  %10480 = vmatprep.subr.bf16.mxu0 %v11086_v29 }
 0x17f   :  { %v9899_v57 = vpop.f32.mrb[69].mxu0  ;;  %v9962_v58 = vpop.f32.mrb[68].mxu1 }
 0x180   :  { %v9900_v60 = vadd.f32 %v9899_v57, %v9898_v38  ;;  %v9901_v63 = vpop.f32.mrb[70].mxu0  ;;  %v9963_v7 = vpop.f32.mrb[69].mxu1 }
 0x181   :  { %v9902_v48 = vpop.f32.mrb[71].mxu0  ;;  %v9964_v36 = vadd.f32 %v9963_v7, %v9962_v58  ;;  %v9965_v8 = vpop.f32.mrb[70].mxu1  ;;  %10481 = vmatpush3.bf16.msra.mxu0 %v11086_v29 }
 0x182   :  { %v3287_v9 = vadd.f32 %v9900_v60, %v13076_v0  ;;  %v9903_v10 = vadd.f32 %v9902_v48, %v9901_v63  ;;  %v9966_v11 = vpop.f32.mrb[71].mxu1  ;;  %v11075_v0 = vld [vmem:[%s15271_s0 + $0x440] ss:$100 sps:$4 sm:$0xff]   ;;  %v11085_v60 = vld [vmem:[%s15271_s0 + $0x5c8] ss:$100 sps:$4 sm:$0xff]  }
 0x183   :  { %v9967_v50 = vadd.f32 %v9966_v11, %v9965_v8  ;;  %3891 = vmatmul.mubr.bf16.gmra.mrb[176].mxu0 %v11064_v21 }
 0x184   :  { %v3290_v13 = vadd.f32 %v9903_v10, %v13078_v5  ;;  %v13242_v15 = vadd.f32 %v9964_v36, %v3287_v9  ;;  %3988 = vmatmul.mubr.bf16.gmra.mrb[176].mxu1 %v11068_v56  ;;  %3898 = vmatprep.mubr.bf16.mxu0 %v11069_v40  ;;  %v11076_v5 = vld [vmem:[%s15271_s0 + $0x504] ss:$100 sps:$4 sm:$0xff]  }
 0x185   :  { %3995 = vmatprep.mubr.bf16.mxu1 %v11073_v59 }
 0x186   :  { %v13247_v16 = vadd.f32 %v9967_v50, %v3290_v13  ;;  %v9904_v17 = vpop.f32.mrb[72].mxu0 }
 0x187   :  { %v9905_v43 = vpop.f32.mrb[73].mxu0  ;;  %v9968_v18 = vpop.f32.mrb[72].mxu1 }
 0x188   :  { %v9906_v20 = vadd.f32 %v9905_v43, %v9904_v17  ;;  %v9907_v22 = vpop.f32.mrb[74].mxu0  ;;  %v9969_v24 = vpop.f32.mrb[73].mxu1 }
 0x189   :  { %v9908_v30 = vpop.f32.mrb[75].mxu0  ;;  %v9970_v2 = vadd.f32 %v9969_v24, %v9968_v18  ;;  %v9971_v31 = vpop.f32.mrb[74].mxu1 }
 0x18a   :  { %v3295_v3 = vadd.f32 %v9906_v20, %v13094_v25  ;;  %v9909_v33 = vadd.f32 %v9908_v30, %v9907_v22  ;;  %v9972_v34 = vpop.f32.mrb[75].mxu1  ;;  %v11082_v25 = vld [vmem:[%s15271_s0 + $0x508] ss:$100 sps:$4 sm:$0xff]  }
 0x18b   :  { %v9973_v4 = vadd.f32 %v9972_v34, %v9971_v31  ;;  %3899 = vmatmul.mubr.bf16.gmra.mrb[180].mxu0 %v11071_v41 }
 0x18c   :  { %v3298_v35 = vadd.f32 %v9909_v33, %v13099_v28  ;;  %v13260_v37 = vadd.f32 %v9970_v2, %v3295_v3  ;;  %3996 = vmatmul.mubr.bf16.gmra.mrb[180].mxu1 %v11075_v0  ;;  %3906 = vmatprep.mubr.bf16.mxu0 %v11076_v5  ;;  %v11083_v28 = vld [vmem:[%s15271_s0 + $0x5cc] ss:$100 sps:$4 sm:$0xff]  }
 0x18d   :  { %4003 = vmatprep.mubr.bf16.mxu1 %v11080_v19  ;;  %v11091_v19 = vld [vmem:[%s15271_s0 + $0x128] ss:$100 sps:$4 sm:$0xff]  }
 0x18e   :  { %v13265_v42 = vadd.f32 %v9973_v4, %v3298_v35  ;;  %v9910_v29 = vpop.f32.mrb[76].mxu0 }
 0x18f   :  { %v9911_v6 = vpop.f32.mrb[77].mxu0  ;;  %v9974_v45 = vpop.f32.mrb[76].mxu1 }
 0x190   :  { %v9912_v46 = vadd.f32 %v9911_v6, %v9910_v29  ;;  %v9913_v47 = vpop.f32.mrb[78].mxu0  ;;  %v9975_v49 = vpop.f32.mrb[77].mxu1  ;;  %v11093_v6 = vld [vmem:[%s15271_s0 + $0x2b8] ss:$100 sps:$4 sm:$0xff]  }
 0x191   :  { %v9914_v51 = vpop.f32.mrb[79].mxu0  ;;  %v9976_v53 = vadd.f32 %v9975_v49, %v9974_v45  ;;  %v9977_v21 = vpop.f32.mrb[78].mxu1 }
 0x192   :  { %v3303_v38 = vadd.f32 %v9912_v46, %v13112_v52  ;;  %v9915_v56 = vadd.f32 %v9914_v51, %v9913_v47  ;;  %v9978_v40 = vpop.f32.mrb[79].mxu1  ;;  %v11089_v52 = vld [vmem:[%s15271_s0 + $0x5d0] ss:$100 sps:$4 sm:$0xff]  }
 0x193   :  { %v9979_v57 = vadd.f32 %v9978_v40, %v9977_v21  ;;  %3907 = vmatmul.mubr.bf16.gmra.mrb[184].mxu0 %v11078_v1 }
 0x194   :  { %v3306_v58 = vadd.f32 %v9915_v56, %v13117_v54  ;;  %v13278_v59 = vadd.f32 %v9976_v53, %v3303_v38  ;;  %4004 = vmatmul.mubr.bf16.gmra.mrb[184].mxu1 %v11082_v25  ;;  %3914 = vmatprep.mubr.bf16.mxu0 %v11083_v28  ;;  %v11090_v54 = vld [vmem:[%s15271_s0 + $0x60] ss:$100 sps:$4 sm:$0xff]  }
 0x195   :  { %4011 = vmatprep.mubr.bf16.mxu1 %v11087_v44 }
 0x196   :  { %v13283_v63 = vadd.f32 %v9979_v57, %v3306_v58  ;;  %v9916_v7 = vpop.f32.mrb[80].mxu0 }
 0x197   :  { %v9917_v48 = vpop.f32.mrb[81].mxu0  ;;  %v9980_v36 = vpop.f32.mrb[80].mxu1 }
 0x198   :  { %v9918_v8 = vadd.f32 %v9917_v48, %v9916_v7  ;;  %v9919_v9 = vpop.f32.mrb[82].mxu0  ;;  %v9981_v10 = vpop.f32.mrb[81].mxu1 }
 0x199   :  { %v9920_v11 = vpop.f32.mrb[83].mxu0  ;;  %v9982_v50 = vadd.f32 %v9981_v10, %v9980_v36  ;;  %v9983_v13 = vpop.f32.mrb[82].mxu1 }
 0x19a   :  { %v3311_v41 = vadd.f32 %v9918_v8, %v13130_v12  ;;  %v9921_v17 = vadd.f32 %v9920_v11, %v9919_v9  ;;  %v9984_v0 = vpop.f32.mrb[83].mxu1  ;;  %v11092_v12 = vld [vmem:[%s15271_s0 + $0x1f0] ss:$100 sps:$4 sm:$0xff]  }
 0x19b   :  { %v9985_v5 = vadd.f32 %v9984_v0, %v9983_v13  ;;  %3915 = vmatmul.mubr.bf16.gmra.mrb[188].mxu0 %v11085_v60 }
 0x19c   :  { %v3314_v43 = vadd.f32 %v9921_v17, %v13135_v14  ;;  %v13293_v18 = vadd.f32 %v9982_v50, %v3311_v41  ;;  %4012 = vmatmul.mubr.bf16.gmra.mrb[188].mxu1 %v11089_v52  ;;  %10482 = vmatprep.mubr.bf16.mxu0 %v11090_v54  ;;  %v11095_v52 = vld [vmem:[%s15271_s0 + $0x448] ss:$100 sps:$4 sm:$0xff]  }
 0x19e   :  { %v13298_v20 = vadd.f32 %v9985_v5, %v3314_v43  ;;  %v9922_v22 = vpop.f32.mrb[84].mxu0 }
 0x19f   :  { %v9923_v24 = vpop.f32.mrb[85].mxu0  ;;  %v9986_v30 = vpop.f32.mrb[84].mxu1 }
 0x1a0   :  { %v9924_v2 = vadd.f32 %v9923_v24, %v9922_v22  ;;  %v9925_v31 = vpop.f32.mrb[86].mxu0  ;;  %v9987_v14 = vpop.f32.mrb[85].mxu1  ;;  %v11097_v22 = vld [vmem:[%s15271_s0 + $0x5d8] ss:$100 sps:$4 sm:$0xff]  }
 0x1a1   :  { %v9926_v3 = vpop.f32.mrb[87].mxu0  ;;  %v9988_v33 = vadd.f32 %v9987_v14, %v9986_v30  ;;  %v9989_v34 = vpop.f32.mrb[86].mxu1 }
 0x1a2   :  { %v3319_v4 = vadd.f32 %v9924_v2, %v13154_v27  ;;  %v9927_v35 = vadd.f32 %v9926_v3, %v9925_v31  ;;  %v9990_v1 = vpop.f32.mrb[87].mxu1  ;;  %v11094_v27 = vld [vmem:[%s15271_s0 + $0x380] ss:$100 sps:$4 sm:$0xff]  }
 0x1a3   :  { %v9991_v29 = vadd.f32 %v9990_v1, %v9989_v34  ;;  %10483 = vmatmul.mubr.bf16.vlgmr.msra.gmra.mrb[192].mxu0 %v11091_v19 }
 0x1a4   :  { %v3322_v25 = vadd.f32 %v9927_v35, %v13160_v39  ;;  %v13305_v28 = vadd.f32 %v9988_v33, %v3319_v4  ;;  %10486 = vmatprep.mubr.bf16.mxu0 %v11092_v12 }
 0x1a6   :  { %v13310_v45 = vadd.f32 %v9991_v29, %v3322_v25  ;;  %v9928_v44 = vpop.f32.mrb[88].mxu0 }
 0x1a7   :  { %v9929_v46 = vpop.f32.mrb[89].mxu0  ;;  %v9992_v47 = vpop.f32.mrb[88].mxu1 }
 0x1a8   :  { %v9930_v49 = vadd.f32 %v9929_v46, %v9928_v44  ;;  %v9931_v51 = vpop.f32.mrb[90].mxu0  ;;  %v9993_v53 = vpop.f32.mrb[89].mxu1 }
 0x1a9   :  { %v9932_v39 = vpop.f32.mrb[91].mxu0  ;;  %v9994_v21 = vadd.f32 %v9993_v53, %v9992_v47  ;;  %v9995_v38 = vpop.f32.mrb[90].mxu1 }
 0x1aa   :  { %v3327_v56 = vadd.f32 %v9930_v49, %v13176_v61  ;;  %v9933_v40 = vadd.f32 %v9932_v39, %v9931_v51  ;;  %v9996_v57 = vpop.f32.mrb[91].mxu1  ;;  %v11096_v61 = vld [vmem:[%s15271_s0 + $0x510] ss:$100 sps:$4 sm:$0xff]  }
 0x1ab   :  { %v9997_v58 = vadd.f32 %v9996_v57, %v9995_v38  ;;  %10487 = vmatmul.mubr.bf16.gmra.mrb[196].mxu0 %v11093_v6 }
 0x1ac   :  { %v3330_v60 = vadd.f32 %v9933_v40, %v13184_v32  ;;  %v13317_v7 = vadd.f32 %v9994_v21, %v3327_v56  ;;  %10490 = vmatprep.mubr.bf16.mxu0 %v11094_v27 }
 0x1ae   :  { %v13322_v54 = vadd.f32 %v9997_v58, %v3330_v60  ;;  %v9934_v48 = vpop.f32.mrb[92].mxu0 }
 0x1af   :  { %v9935_v36 = vpop.f32.mrb[93].mxu0  ;;  %v9998_v8 = vpop.f32.mrb[92].mxu1 }
 0x1b0   :  { %v9936_v9 = vadd.f32 %v9935_v36, %v9934_v48  ;;  %v9937_v10 = vpop.f32.mrb[94].mxu0  ;;  %v9999_v11 = vpop.f32.mrb[93].mxu1 }
 0x1b1   :  { %v9938_v32 = vpop.f32.mrb[95].mxu0  ;;  %v10000_v50 = vadd.f32 %v9999_v11, %v9998_v8  ;;  %v10001_v13 = vpop.f32.mrb[94].mxu1 }
 0x1b2   :  { %v3335_v41 = vadd.f32 %v9936_v9, %v13200_v26  ;;  %v9939_v17 = vadd.f32 %v9938_v32, %v9937_v10  ;;  %v10002_v0 = vpop.f32.mrb[95].mxu1 }
 0x1b3   :  { %v10003_v5 = vadd.f32 %v10002_v0, %v10001_v13  ;;  %10491 = vmatmul.mubr.bf16.gmra.mrb[200].mxu0 %v11095_v52 }
 0x1b4   :  { %v3338_v43 = vadd.f32 %v9939_v17, %v13208_v62  ;;  %v13329_v19 = vadd.f32 %v10000_v50, %v3335_v41  ;;  %10494 = vmatprep.mubr.bf16.mxu0 %v11096_v61 }
 0x1b6   :  { %v13334_v12 = vadd.f32 %v10003_v5, %v3338_v43  ;;  %v10020_v24 = vpop.f32.mrb[96].mxu0 }
 0x1b7   :  { %v10021_v30 = vpop.f32.mrb[97].mxu0  ;;  %v10084_v2 = vpop.f32.mrb[96].mxu1 }
 0x1b8   :  { %v10022_v31 = vadd.f32 %v10021_v30, %v10020_v24  ;;  %v10023_v26 = vpop.f32.mrb[98].mxu0  ;;  %v10085_v14 = vpop.f32.mrb[97].mxu1 }
 0x1b9   :  { %v10024_v3 = vpop.f32.mrb[99].mxu0  ;;  %v10086_v33 = vadd.f32 %v10085_v14, %v10084_v2  ;;  %v10087_v34 = vpop.f32.mrb[98].mxu1 }
 0x1ba   :  { %v3473_v62 = vadd.f32 %v10022_v31, %v13224_v55  ;;  %v10025_v4 = vadd.f32 %v10024_v3, %v10023_v26  ;;  %v10088_v35 = vpop.f32.mrb[99].mxu1 }
 0x1bb   :  { %v10089_v1 = vadd.f32 %v10088_v35, %v10087_v34  ;;  %10495 = vmatmul.mubr.bf16.gmra.mrb[204].mxu0 %v11097_v22 }
 0x1bc   :  { %v3476_v29 = vadd.f32 %v10025_v4, %v13229_v23  ;;  %v13338_v25 = vadd.f32 %v10086_v33, %v3473_v62 }
 0x1be   :  { %v13340_v6 = vadd.f32 %v10089_v1, %v3476_v29  ;;  %v10026_v44 = vpop.f32.mrb[100].mxu0 }
 0x1bf   :  { %v10027_v27 = vpop.f32.mrb[101].mxu0  ;;  %v10090_v46 = vpop.f32.mrb[100].mxu1 }
 0x1c0   :  { %v10028_v47 = vadd.f32 %v10027_v27, %v10026_v44  ;;  %v10029_v49 = vpop.f32.mrb[102].mxu0  ;;  %v10091_v51 = vpop.f32.mrb[101].mxu1 }
 0x1c1   :  { %v10030_v53 = vpop.f32.mrb[103].mxu0  ;;  %v10092_v39 = vadd.f32 %v10091_v51, %v10090_v46  ;;  %v10093_v21 = vpop.f32.mrb[102].mxu1 }
 0x1c2   :  { %v3481_v55 = vadd.f32 %v10028_v47, %v13242_v15  ;;  %v10031_v38 = vadd.f32 %v10030_v53, %v10029_v49  ;;  %v10094_v56 = vpop.f32.mrb[103].mxu1 }
 0x1c3   :  { %v10095_v40 = vadd.f32 %v10094_v56, %v10093_v21 }
 0x1c4   :  { %v3484_v23 = vadd.f32 %v10031_v38, %v13247_v16  ;;  %v13344_v57 = vadd.f32 %v10092_v39, %v3481_v55 }
 0x1c6   :  { %v13346_v58 = vadd.f32 %v10095_v40, %v3484_v23  ;;  %v10032_v60 = vpop.f32.mrb[104].mxu0 }
 0x1c7   :  { %v10033_v52 = vpop.f32.mrb[105].mxu0  ;;  %v10096_v48 = vpop.f32.mrb[104].mxu1 }
 0x1c8   :  { %v10034_v61 = vadd.f32 %v10033_v52, %v10032_v60  ;;  %v10035_v36 = vpop.f32.mrb[106].mxu0  ;;  %v10097_v8 = vpop.f32.mrb[105].mxu1 }
 0x1c9   :  { %v10036_v9 = vpop.f32.mrb[107].mxu0  ;;  %v10098_v10 = vadd.f32 %v10097_v8, %v10096_v48  ;;  %v10099_v11 = vpop.f32.mrb[106].mxu1 }
 0x1ca   :  { %v3489_v15 = vadd.f32 %v10034_v61, %v13260_v37  ;;  %v10037_v32 = vadd.f32 %v10036_v9, %v10035_v36  ;;  %v10100_v50 = vpop.f32.mrb[107].mxu1 }
 0x1cb   :  { %v10101_v13 = vadd.f32 %v10100_v50, %v10099_v11 }
 0x1cc   :  { %v3492_v16 = vadd.f32 %v10037_v32, %v13265_v42  ;;  %v13350_v41 = vadd.f32 %v10098_v10, %v3489_v15 }
 0x1ce   :  { %v13352_v17 = vadd.f32 %v10101_v13, %v3492_v16  ;;  %v10038_v0 = vpop.f32.mrb[108].mxu0 }
 0x1cf   :  { %v10039_v5 = vpop.f32.mrb[109].mxu0  ;;  %v10102_v43 = vpop.f32.mrb[108].mxu1 }
 0x1d0   :  { %v10040_v22 = vadd.f32 %v10039_v5, %v10038_v0  ;;  %v10041_v24 = vpop.f32.mrb[110].mxu0  ;;  %v10103_v30 = vpop.f32.mrb[109].mxu1 }
 0x1d1   :  { %v10042_v2 = vpop.f32.mrb[111].mxu0  ;;  %v10104_v31 = vadd.f32 %v10103_v30, %v10102_v43  ;;  %v10105_v26 = vpop.f32.mrb[110].mxu1 }
 0x1d2   :  { %v3497_v37 = vadd.f32 %v10040_v22, %v13278_v59  ;;  %v10043_v14 = vadd.f32 %v10042_v2, %v10041_v24  ;;  %v10106_v3 = vpop.f32.mrb[111].mxu1 }
 0x1d3   :  { %v10107_v33 = vadd.f32 %v10106_v3, %v10105_v26 }
 0x1d4   :  { %v3500_v42 = vadd.f32 %v10043_v14, %v13283_v63  ;;  %v13356_v34 = vadd.f32 %v10104_v31, %v3497_v37 }
 0x1d6   :  { %v13358_v62 = vadd.f32 %v10107_v33, %v3500_v42  ;;  %v10044_v4 = vpop.f32.mrb[112].mxu0 }
 0x1d7   :  { %v10045_v35 = vpop.f32.mrb[113].mxu0  ;;  %v10108_v1 = vpop.f32.mrb[112].mxu1 }
 0x1d8   :  { %v10046_v29 = vadd.f32 %v10045_v35, %v10044_v4  ;;  %v10047_v44 = vpop.f32.mrb[114].mxu0  ;;  %v10109_v27 = vpop.f32.mrb[113].mxu1 }
 0x1d9   :  { %v10048_v46 = vpop.f32.mrb[115].mxu0  ;;  %v10110_v47 = vadd.f32 %v10109_v27, %v10108_v1  ;;  %v10111_v49 = vpop.f32.mrb[114].mxu1 }
 0x1da   :  { %v3505_v59 = vadd.f32 %v10046_v29, %v13293_v18  ;;  %v10049_v51 = vadd.f32 %v10048_v46, %v10047_v44  ;;  %v10112_v53 = vpop.f32.mrb[115].mxu1 }
 0x1db   :  { %v10113_v39 = vadd.f32 %v10112_v53, %v10111_v49  ;;  %v11098_v49 = vld [vmem:[%s15274_s3] ss:$16 sps:$4 sm:$0xff]  }
 0x1dc   :  { %v3508_v63 = vadd.f32 %v10049_v51, %v13298_v20  ;;  %v13362_v21 = vadd.f32 %v10110_v47, %v3505_v59  ;;  %v11101_v59 = vld [vmem:[%s15274_s3 + $0x8] ss:$16 sps:$4 sm:$0xff]  }
 0x1de   :  { %v13364_v55 = vadd.f32 %v10113_v39, %v3508_v63  ;;  %v10050_v38 = vpop.f32.mrb[116].mxu0  ;;  %v11109_v63 = vld [vmem:[%s15274_s3 + $0x2c] ss:$16 sps:$4 sm:$0xff]  }
 0x1df   :  { %v10051_v56 = vpop.f32.mrb[117].mxu0  ;;  %v10114_v40 = vpop.f32.mrb[116].mxu1 }
 0x1e0   :  { %v10052_v23 = vadd.f32 %v10051_v56, %v10050_v38  ;;  %v10053_v60 = vpop.f32.mrb[118].mxu0  ;;  %v10115_v52 = vpop.f32.mrb[117].mxu1 }
 0x1e1   :  { %v10054_v48 = vpop.f32.mrb[119].mxu0  ;;  %v10116_v61 = vadd.f32 %v10115_v52, %v10114_v40  ;;  %v10117_v36 = vpop.f32.mrb[118].mxu1  ;;  %v11104_v40 = vld [vmem:[%s15274_s3 + $0x20] ss:$16 sps:$4 sm:$0xff]  }
 0x1e2   :  { %v3513_v18 = vadd.f32 %v10052_v23, %v13305_v28  ;;  %v10055_v8 = vadd.f32 %v10054_v48, %v10053_v60  ;;  %v10118_v9 = vpop.f32.mrb[119].mxu1 }
 0x1e3   :  { %v10119_v10 = vadd.f32 %v10118_v9, %v10117_v36  ;;  %v11112_v9 = vld [vmem:[%s15274_s3 + $0x44] ss:$16 sps:$4 sm:$0xff]  }
 0x1e4   :  { %v3516_v20 = vadd.f32 %v10055_v8, %v13310_v45  ;;  %v13368_v11 = vadd.f32 %v10116_v61, %v3513_v18 }
 0x1e6   :  { %v13370_v15 = vadd.f32 %v10119_v10, %v3516_v20  ;;  %v10056_v32 = vpop.f32.mrb[120].mxu0  ;;  %v11115_v10 = vld [vmem:[%s15274_s3 + $0x4c] ss:$16 sps:$4 sm:$0xff]  }
 0x1e7   :  { %v10057_v50 = vpop.f32.mrb[121].mxu0  ;;  %v10120_v13 = vpop.f32.mrb[120].mxu1 }
 0x1e8   :  { %v10058_v16 = vadd.f32 %v10057_v50, %v10056_v32  ;;  %v10059_v0 = vpop.f32.mrb[122].mxu0  ;;  %v10121_v5 = vpop.f32.mrb[121].mxu1 }
 0x1e9   :  { %v10060_v43 = vpop.f32.mrb[123].mxu0  ;;  %v10122_v22 = vadd.f32 %v10121_v5, %v10120_v13  ;;  %v10123_v24 = vpop.f32.mrb[122].mxu1  ;;  %v11110_v13 = vld [vmem:[%s15274_s3 + $0x40] ss:$16 sps:$4 sm:$0xff]  }
 0x1ea   :  { %v3521_v28 = vadd.f32 %v10058_v16, %v13317_v7  ;;  %v10061_v30 = vadd.f32 %v10060_v43, %v10059_v0  ;;  %v10124_v2 = vpop.f32.mrb[123].mxu1  ;;  %v11100_v7 = vld [vmem:[%s15274_s3 + $0x4] ss:$16 sps:$4 sm:$0xff]   ;;  %v11113_v16 = vld [vmem:[%s15274_s3 + $0x48] ss:$16 sps:$4 sm:$0xff]  }
 0x1eb   :  { %v10125_v31 = vadd.f32 %v10124_v2, %v10123_v24  ;;  %7408 = vmatprep.subr.bf16.mxu1 %v11100_v7 }
 0x1ec   :  { %v3524_v45 = vadd.f32 %v10061_v30, %v13322_v54  ;;  %v13374_v26 = vadd.f32 %v10122_v22, %v3521_v28  ;;  %v11103_v54 = vld [vmem:[%s15274_s3 + $0xc] ss:$16 sps:$4 sm:$0xff]   ;;  %7409 = vmatpush1.bf16.msra.mxu1 %v11098_v49  ;;  %v11116_v30 = vld [vmem:[%s15274_s3 + $0x60] ss:$16 sps:$4 sm:$0xff]  }
 0x1ed   :  { %7736 = vmatprep.subr.bf16.mxu0 %v11103_v54  ;;  %v11121_v22 = vld [vmem:[%s15274_s3 + $0x6c] ss:$16 sps:$4 sm:$0xff]   ;;  %v11122_v54 = vld [vmem:[%s15274_s3 + $0x80] ss:$16 sps:$4 sm:$0xff]  }
 0x1ee   :  { %v13376_v37 = vadd.f32 %v10125_v31, %v3524_v45  ;;  %v10062_v14 = vpop.f32.mrb[124].mxu0  ;;  %7737 = vmatpush1.bf16.msra.mxu0 %v11101_v59  ;;  %v11133_v59 = vld [vmem:[%s15274_s3 + $0xac] ss:$16 sps:$4 sm:$0xff]  }
 0x1ef   :  { %v10063_v3 = vpop.f32.mrb[125].mxu0  ;;  %v10126_v33 = vpop.f32.mrb[124].mxu1  ;;  %7738 = vmatprep.subr.bf16.mxu0 %v11109_v63 }
 0x1f0   :  { %v10064_v42 = vadd.f32 %v10063_v3, %v10062_v14  ;;  %v10065_v4 = vpop.f32.mrb[126].mxu0  ;;  %v10127_v35 = vpop.f32.mrb[125].mxu1 }
 0x1f1   :  { %v10066_v1 = vpop.f32.mrb[127].mxu0  ;;  %v10128_v29 = vadd.f32 %v10127_v35, %v10126_v33  ;;  %v10129_v44 = vpop.f32.mrb[126].mxu1  ;;  %v11124_v35 = vld [vmem:[%s15274_s3 + $0x84] ss:$16 sps:$4 sm:$0xff]  }
 0x1f2   :  { %v3529_v27 = vadd.f32 %v10064_v42, %v13329_v19  ;;  %v10067_v46 = vadd.f32 %v10066_v1, %v10065_v4  ;;  %v10130_v47 = vpop.f32.mrb[127].mxu1  ;;  %v11106_v19 = vld [vmem:[%s15274_s3 + $0x24] ss:$16 sps:$4 sm:$0xff]   ;;  %v11127_v1 = vld [vmem:[%s15274_s3 + $0x8c] ss:$16 sps:$4 sm:$0xff]  }
 0x1f3   :  { %v10131_v51 = vadd.f32 %v10130_v47, %v10129_v44  ;;  %7410 = vmatprep.subr.bf16.mxu1 %v11106_v19  ;;  %v11128_v19 = vld [vmem:[%s15274_s3 + $0xa0] ss:$16 sps:$4 sm:$0xff]  }
 0x1f4   :  { %v3532_v53 = vadd.f32 %v10067_v46, %v13334_v12  ;;  %v13392_v39 = vadd.f32 %v10128_v29, %v3529_v27  ;;  %v11107_v12 = vld [vmem:[%s15274_s3 + $0x28] ss:$16 sps:$4 sm:$0xff]   ;;  %7411 = vmatpush1.bf16.msra.mxu1 %v11104_v40 }
 0x1f5   :  { %7739 = vmatpush1.bf16.msra.mxu0 %v11107_v12  ;;  %7412 = vmatprep.subr.bf16.mxu1 %v11112_v9  ;;  %v11125_v27 = vld [vmem:[%s15274_s3 + $0x88] ss:$16 sps:$4 sm:$0xff]  }
 0x1f6   :  { %v13400_v38 = vadd.f32 %v10131_v51, %v3532_v53  ;;  %v10148_v56 = vpop.f32.mrb[128].mxu0  ;;  %7740 = vmatprep.subr.bf16.mxu0 %v11115_v10  ;;  %v11134_v10 = vld [vmem:[%s15274_s3 + $0xc0] ss:$16 sps:$4 sm:$0xff]  }
 0x1f7   :  { %v10149_v23 = vpop.f32.mrb[129].mxu0  ;;  %v10212_v60 = vpop.f32.mrb[128].mxu1 }
 0x1f8   :  { %v10150_v52 = vadd.f32 %v10149_v23, %v10148_v56  ;;  %v10151_v48 = vpop.f32.mrb[130].mxu0  ;;  %v10213_v61 = vpop.f32.mrb[129].mxu1  ;;  %7413 = vmatpush1.bf16.msra.mxu1 %v11110_v13 }
 0x1f9   :  { %v10152_v36 = vpop.f32.mrb[131].mxu0  ;;  %v10214_v18 = vadd.f32 %v10213_v61, %v10212_v60  ;;  %v10215_v8 = vpop.f32.mrb[130].mxu1  ;;  %7741 = vmatpush1.bf16.msra.mxu0 %v11113_v16  ;;  %v11136_v61 = vld [vmem:[%s15274_s3 + $0xc4] ss:$16 sps:$4 sm:$0xff]   ;;  %v11145_v16 = vld [vmem:[%s15274_s3 + $0xec] ss:$16 sps:$4 sm:$0xff]  }
 0x1fa   :  { %v3667_v20 = vadd.f32 %v10150_v52, %v13338_v25  ;;  %v10153_v32 = vadd.f32 %v10152_v36, %v10151_v48  ;;  %v10216_v50 = vpop.f32.mrb[131].mxu1  ;;  %v11118_v25 = vld [vmem:[%s15274_s3 + $0x64] ss:$16 sps:$4 sm:$0xff]   ;;  %7742 = vmatprep.subr.bf16.mxu0 %v11121_v22  ;;  %v11139_v36 = vld [vmem:[%s15274_s3 + $0xcc] ss:$16 sps:$4 sm:$0xff]  }
 0x1fb   :  { %v10217_v0 = vadd.f32 %v10216_v50, %v10215_v8  ;;  %7414 = vmatprep.subr.bf16.mxu1 %v11118_v25  ;;  %v11140_v25 = vld [vmem:[%s15274_s3 + $0xe0] ss:$16 sps:$4 sm:$0xff]  }
 0x1fc   :  { %v3670_v5 = vadd.f32 %v10153_v32, %v13340_v6  ;;  %v13422_v43 = vadd.f32 %v10214_v18, %v3667_v20  ;;  %v11119_v6 = vld [vmem:[%s15274_s3 + $0x68] ss:$16 sps:$4 sm:$0xff]   ;;  %7415 = vmatpush1.bf16.msra.mxu1 %v11116_v30 }
 0x1fd   :  { %7743 = vmatpush1.bf16.msra.mxu0 %v11119_v6  ;;  %7416 = vmatprep.subr.bf16.mxu1 %v11124_v35  ;;  %v11137_v20 = vld [vmem:[%s15274_s3 + $0xc8] ss:$16 sps:$4 sm:$0xff]   ;;  %v11151_v35 = vld [vmem:[%s15274_s3 + $0x10c] ss:$16 sps:$4 sm:$0xff]  }
 0x1fe   :  { %v13430_v24 = vadd.f32 %v10217_v0, %v3670_v5  ;;  %v10154_v28 = vpop.f32.mrb[132].mxu0  ;;  %7744 = vmatprep.subr.bf16.mxu0 %v11127_v1 }
 0x1ff   :  { %v10155_v2 = vpop.f32.mrb[133].mxu0  ;;  %v10218_v31 = vpop.f32.mrb[132].mxu1 }
 0x200   :  { %v10156_v45 = vadd.f32 %v10155_v2, %v10154_v28  ;;  %v10157_v14 = vpop.f32.mrb[134].mxu0  ;;  %v10219_v3 = vpop.f32.mrb[133].mxu1  ;;  %7417 = vmatpush1.bf16.msra.mxu1 %v11122_v54 }
 0x201   :  { %v10158_v33 = vpop.f32.mrb[135].mxu0  ;;  %v10220_v42 = vadd.f32 %v10219_v3, %v10218_v31  ;;  %v10221_v4 = vpop.f32.mrb[134].mxu1  ;;  %7745 = vmatpush1.bf16.msra.mxu0 %v11125_v27 }
 0x202   :  { %v3675_v29 = vadd.f32 %v10156_v45, %v13344_v57  ;;  %v10159_v44 = vadd.f32 %v10158_v33, %v10157_v14  ;;  %v10222_v7 = vpop.f32.mrb[135].mxu1  ;;  %v11130_v57 = vld [vmem:[%s15274_s3 + $0xa4] ss:$16 sps:$4 sm:$0xff]   ;;  %7746 = vmatprep.subr.bf16.mxu0 %v11133_v59 }
 0x203   :  { %v10223_v46 = vadd.f32 %v10222_v7, %v10221_v4  ;;  %7418 = vmatprep.subr.bf16.mxu1 %v11130_v57  ;;  %v11148_v4 = vld [vmem:[%s15274_s3 + $0x104] ss:$16 sps:$4 sm:$0xff]  }
 0x204   :  { %v3678_v47 = vadd.f32 %v10159_v44, %v13346_v58  ;;  %v13452_v49 = vadd.f32 %v10220_v42, %v3675_v29  ;;  %v11131_v58 = vld [vmem:[%s15274_s3 + $0xa8] ss:$16 sps:$4 sm:$0xff]   ;;  %7419 = vmatpush1.bf16.msra.mxu1 %v11128_v19  ;;  %v11146_v29 = vld [vmem:[%s15274_s3 + $0x100] ss:$16 sps:$4 sm:$0xff]  }
 0x205   :  { %7747 = vmatpush1.bf16.msra.mxu0 %v11131_v58  ;;  %7420 = vmatprep.subr.bf16.mxu1 %v11136_v61  ;;  %v11149_v44 = vld [vmem:[%s15274_s3 + $0x108] ss:$16 sps:$4 sm:$0xff]   ;;  %v11163_v61 = vld [vmem:[%s15274_s3 + $0x14c] ss:$16 sps:$4 sm:$0xff]  }
 0x206   :  { %v13460_v51 = vadd.f32 %v10223_v46, %v3678_v47  ;;  %v10160_v53 = vpop.f32.mrb[136].mxu0  ;;  %7748 = vmatprep.subr.bf16.mxu0 %v11139_v36  ;;  %v11154_v46 = vld [vmem:[%s15274_s3 + $0x124] ss:$16 sps:$4 sm:$0xff]   ;;  %v11157_v47 = vld [vmem:[%s15274_s3 + $0x12c] ss:$16 sps:$4 sm:$0xff]  }
 0x207   :  { %v10161_v63 = vpop.f32.mrb[137].mxu0  ;;  %v10224_v56 = vpop.f32.mrb[136].mxu1 }
 0x208   :  { %v10162_v40 = vadd.f32 %v10161_v63, %v10160_v53  ;;  %v10163_v12 = vpop.f32.mrb[138].mxu0  ;;  %v10225_v23 = vpop.f32.mrb[137].mxu1  ;;  %7421 = vmatpush1.bf16.msra.mxu1 %v11134_v10  ;;  %v11155_v53 = vld [vmem:[%s15274_s3 + $0x128] ss:$16 sps:$4 sm:$0xff]  }
 0x209   :  { %v10164_v60 = vpop.f32.mrb[139].mxu0  ;;  %v10226_v52 = vadd.f32 %v10225_v23, %v10224_v56  ;;  %v10227_v48 = vpop.f32.mrb[138].mxu1  ;;  %7749 = vmatpush1.bf16.msra.mxu0 %v11137_v20 }
 0x20a   :  { %v3683_v18 = vadd.f32 %v10162_v40, %v13350_v41  ;;  %v10165_v8 = vadd.f32 %v10164_v60, %v10163_v12  ;;  %v10228_v9 = vpop.f32.mrb[139].mxu1  ;;  %v11142_v41 = vld [vmem:[%s15274_s3 + $0xe4] ss:$16 sps:$4 sm:$0xff]   ;;  %7750 = vmatprep.subr.bf16.mxu0 %v11145_v16 }
 0x20b   :  { %v10229_v32 = vadd.f32 %v10228_v9, %v10227_v48  ;;  %7422 = vmatprep.subr.bf16.mxu1 %v11142_v41  ;;  %v11160_v48 = vld [vmem:[%s15274_s3 + $0x144] ss:$16 sps:$4 sm:$0xff]  }
 0x20c   :  { %v3686_v50 = vadd.f32 %v10165_v8, %v13352_v17  ;;  %v13482_v13 = vadd.f32 %v10226_v52, %v3683_v18  ;;  %v11143_v17 = vld [vmem:[%s15274_s3 + $0xe8] ss:$16 sps:$4 sm:$0xff]   ;;  %7423 = vmatpush1.bf16.msra.mxu1 %v11140_v25  ;;  %v11158_v18 = vld [vmem:[%s15274_s3 + $0x140] ss:$16 sps:$4 sm:$0xff]  }
 0x20d   :  { %7751 = vmatpush1.bf16.msra.mxu0 %v11143_v17  ;;  %7424 = vmatprep.subr.bf16.mxu1 %v11148_v4  ;;  %v11161_v8 = vld [vmem:[%s15274_s3 + $0x148] ss:$16 sps:$4 sm:$0xff]  }
 0x20e   :  { %v13490_v0 = vadd.f32 %v10229_v32, %v3686_v50  ;;  %v10166_v5 = vpop.f32.mrb[140].mxu0  ;;  %7752 = vmatprep.subr.bf16.mxu0 %v11151_v35  ;;  %v11166_v32 = vld [vmem:[%s15274_s3 + $0x164] ss:$16 sps:$4 sm:$0xff]   ;;  %v11169_v50 = vld [vmem:[%s15274_s3 + $0x16c] ss:$16 sps:$4 sm:$0xff]  }
 0x20f   :  { %v10167_v22 = vpop.f32.mrb[141].mxu0  ;;  %v10230_v28 = vpop.f32.mrb[140].mxu1  ;;  %v11173_v4 = vld [vmem:[%s15274_s3 + $0x188] ss:$16 sps:$4 sm:$0xff]  }
 0x210   :  { %v10168_v30 = vadd.f32 %v10167_v22, %v10166_v5  ;;  %v10169_v6 = vpop.f32.mrb[142].mxu0  ;;  %v10231_v2 = vpop.f32.mrb[141].mxu1  ;;  %7425 = vmatpush1.bf16.msra.mxu1 %v11146_v29  ;;  %v11167_v5 = vld [vmem:[%s15274_s3 + $0x168] ss:$16 sps:$4 sm:$0xff]  }
 0x211   :  { %v10170_v31 = vpop.f32.mrb[143].mxu0  ;;  %v10232_v45 = vadd.f32 %v10231_v2, %v10230_v28  ;;  %v10233_v14 = vpop.f32.mrb[142].mxu1  ;;  %7753 = vmatpush1.bf16.msra.mxu0 %v11149_v44  ;;  %7426 = vmatprep.subr.bf16.mxu1 %v11154_v46  ;;  %v11176_v44 = vld [vmem:[%s15274_s3 + $0x1a0] ss:$16 sps:$4 sm:$0xff]  }
 0x212   :  { %v3691_v3 = vadd.f32 %v10168_v30, %v13356_v34  ;;  %v10171_v33 = vadd.f32 %v10170_v31, %v10169_v6  ;;  %v10234_v42 = vpop.f32.mrb[143].mxu1  ;;  %7754 = vmatprep.subr.bf16.mxu0 %v11157_v47  ;;  %v11181_v47 = vld [vmem:[%s15274_s3 + $0x1ac] ss:$16 sps:$4 sm:$0xff]  }
 0x213   :  { %v10235_v1 = vadd.f32 %v10234_v42, %v10233_v14  ;;  %v11172_v14 = vld [vmem:[%s15274_s3 + $0x184] ss:$16 sps:$4 sm:$0xff]   ;;  %v11170_v42 = vld [vmem:[%s15274_s3 + $0x180] ss:$16 sps:$4 sm:$0xff]  }
 0x214   :  { %v3694_v34 = vadd.f32 %v10171_v33, %v13358_v62  ;;  %v13512_v7 = vadd.f32 %v10232_v45, %v3691_v3  ;;  %v11152_v62 = vld [vmem:[%s15274_s3 + $0x120] ss:$16 sps:$4 sm:$0xff]   ;;  %v11175_v3 = vld [vmem:[%s15274_s3 + $0x18c] ss:$16 sps:$4 sm:$0xff]  }
 0x215   :  { %7427 = vmatpush1.bf16.msra.mxu1 %v11152_v62  ;;  %7755 = vmatpush1.bf16.msra.mxu0 %v11155_v53  ;;  %v11184_v53 = vld [vmem:[%s15274_s3 + $0x1c4] ss:$16 sps:$4 sm:$0xff]  }
 0x216   :  { %v13514_v54 = vadd.f32 %v10235_v1, %v3694_v34  ;;  %v10172_v27 = vpop.f32.mrb[144].mxu0  ;;  %7428 = vmatprep.subr.bf16.mxu1 %v11160_v48  ;;  %7756 = vmatprep.subr.bf16.mxu0 %v11163_v61  ;;  %v11178_v34 = vld [vmem:[%s15274_s3 + $0x1a4] ss:$16 sps:$4 sm:$0xff]  }
 0x217   :  { %v10173_v57 = vpop.f32.mrb[145].mxu0  ;;  %v10236_v59 = vpop.f32.mrb[144].mxu1  ;;  %v11190_v48 = vld [vmem:[%s15274_s3 + $0x1e4] ss:$16 sps:$4 sm:$0xff]  }
 0x218   :  { %v10174_v19 = vadd.f32 %v10173_v57, %v10172_v27  ;;  %v10175_v58 = vpop.f32.mrb[146].mxu0  ;;  %v10237_v63 = vpop.f32.mrb[145].mxu1 }
 0x219   :  { %v10176_v56 = vpop.f32.mrb[147].mxu0  ;;  %v10238_v40 = vadd.f32 %v10237_v63, %v10236_v59  ;;  %v10239_v12 = vpop.f32.mrb[146].mxu1  ;;  %7429 = vmatpush1.bf16.msra.mxu1 %v11158_v18  ;;  %7757 = vmatpush1.bf16.msra.mxu0 %v11161_v8 }
 0x21a   :  { %v3699_v23 = vadd.f32 %v10174_v19, %v13362_v21  ;;  %v10177_v60 = vadd.f32 %v10176_v56, %v10175_v58  ;;  %v10240_v52 = vpop.f32.mrb[147].mxu1  ;;  %7430 = vmatprep.subr.bf16.mxu1 %v11166_v32  ;;  %7758 = vmatprep.subr.bf16.mxu0 %v11169_v50  ;;  %v11182_v56 = vld [vmem:[%s15274_s3 + $0x1c0] ss:$16 sps:$4 sm:$0xff]  }
 0x21b   :  { %v10241_v36 = vadd.f32 %v10240_v52, %v10239_v12  ;;  %v11185_v52 = vld [vmem:[%s15274_s3 + $0x1c8] ss:$16 sps:$4 sm:$0xff]  }
 0x21c   :  { %v3702_v21 = vadd.f32 %v10177_v60, %v13364_v55  ;;  %v13542_v9 = vadd.f32 %v10238_v40, %v3699_v23  ;;  %v11164_v55 = vld [vmem:[%s15274_s3 + $0x160] ss:$16 sps:$4 sm:$0xff]   ;;  %v11187_v40 = vld [vmem:[%s15274_s3 + $0x1cc] ss:$16 sps:$4 sm:$0xff]  }
 0x21d   :  { %7431 = vmatpush1.bf16.msra.mxu1 %v11164_v55  ;;  %7759 = vmatpush1.bf16.msra.mxu0 %v11167_v5 }
 0x21e   :  { %v13544_v10 = vadd.f32 %v10241_v36, %v3702_v21  ;;  %v10178_v20 = vpop.f32.mrb[148].mxu0  ;;  %7432 = vmatprep.subr.bf16.mxu1 %v11172_v14  ;;  %7760 = vmatprep.subr.bf16.mxu0 %v11175_v3  ;;  %v11188_v36 = vld [vmem:[%s15274_s3 + $0x1e0] ss:$16 sps:$4 sm:$0xff]   ;;  %v11191_v21 = vld [vmem:[%s15274_s3 + $0x1e8] ss:$16 sps:$4 sm:$0xff]  }
 0x21f   :  { %v10179_v41 = vpop.f32.mrb[149].mxu0  ;;  %v10242_v16 = vpop.f32.mrb[148].mxu1 }
 0x220   :  { %v10180_v25 = vadd.f32 %v10179_v41, %v10178_v20  ;;  %v10181_v17 = vpop.f32.mrb[150].mxu0  ;;  %v10243_v22 = vpop.f32.mrb[149].mxu1 }
 0x221   :  { %v10182_v28 = vpop.f32.mrb[151].mxu0  ;;  %v10244_v30 = vadd.f32 %v10243_v22, %v10242_v16  ;;  %v10245_v6 = vpop.f32.mrb[150].mxu1  ;;  %7433 = vmatpush1.bf16.msra.mxu1 %v11170_v42  ;;  %7761 = vmatpush1.bf16.msra.mxu0 %v11173_v4 }
 0x222   :  { %v3707_v2 = vadd.f32 %v10180_v25, %v13368_v11  ;;  %v10183_v31 = vadd.f32 %v10182_v28, %v10181_v17  ;;  %v10246_v45 = vpop.f32.mrb[151].mxu1  ;;  %7434 = vmatprep.subr.bf16.mxu1 %v11178_v34  ;;  %7762 = vmatprep.subr.bf16.mxu0 %v11181_v47 }
 0x223   :  { %v10247_v33 = vadd.f32 %v10246_v45, %v10245_v6  ;;  %v11196_v6 = vld [vmem:[%s15274_s3 + $0x204] ss:$16 sps:$4 sm:$0xff]  }
 0x224   :  { %v3710_v11 = vadd.f32 %v10183_v31, %v13370_v15  ;;  %v13572_v35 = vadd.f32 %v10244_v30, %v3707_v2  ;;  %v11179_v15 = vld [vmem:[%s15274_s3 + $0x1a8] ss:$16 sps:$4 sm:$0xff]   ;;  %v11199_v2 = vld [vmem:[%s15274_s3 + $0x20c] ss:$16 sps:$4 sm:$0xff]  }
 0x225   :  { %7435 = vmatpush1.bf16.msra.mxu1 %v11176_v44  ;;  %7763 = vmatpush1.bf16.msra.mxu0 %v11179_v15 }
 0x226   :  { %v13574_v1 = vadd.f32 %v10247_v33, %v3710_v11  ;;  %v10184_v29 = vpop.f32.mrb[152].mxu0  ;;  %7436 = vmatprep.subr.bf16.mxu1 %v11184_v53  ;;  %7764 = vmatprep.subr.bf16.mxu0 %v11187_v40 }
 0x227   :  { %v10185_v27 = vpop.f32.mrb[153].mxu0  ;;  %v10248_v46 = vpop.f32.mrb[152].mxu1 }
 0x228   :  { %v10186_v57 = vadd.f32 %v10185_v27, %v10184_v29  ;;  %v10187_v59 = vpop.f32.mrb[154].mxu0  ;;  %v10249_v62 = vpop.f32.mrb[153].mxu1 }
 0x229   :  { %v10188_v19 = vpop.f32.mrb[155].mxu0  ;;  %v10250_v58 = vadd.f32 %v10249_v62, %v10248_v46  ;;  %v10251_v63 = vpop.f32.mrb[154].mxu1  ;;  %7437 = vmatpush1.bf16.msra.mxu1 %v11182_v56  ;;  %7765 = vmatpush1.bf16.msra.mxu0 %v11185_v52 }
 0x22a   :  { %v3715_v12 = vadd.f32 %v10186_v57, %v13374_v26  ;;  %v10189_v23 = vadd.f32 %v10188_v19, %v10187_v59  ;;  %v10252_v60 = vpop.f32.mrb[155].mxu1  ;;  %v11193_v26 = vld [vmem:[%s15274_s3 + $0x1ec] ss:$16 sps:$4 sm:$0xff]   ;;  %7438 = vmatprep.subr.bf16.mxu1 %v11190_v48 }
 0x22b   :  { %v10253_v61 = vadd.f32 %v10252_v60, %v10251_v63  ;;  %7766 = vmatprep.subr.bf16.mxu0 %v11193_v26 }
 0x22c   :  { %v3718_v18 = vadd.f32 %v10189_v23, %v13376_v37  ;;  %v13611_v8 = vadd.f32 %v10250_v58, %v3715_v12 }
 0x22d   :  { %7439 = vmatpush1.bf16.msra.mxu1 %v11188_v36  ;;  %7767 = vmatpush1.bf16.msra.mxu0 %v11191_v21 }
 0x22e   :  { %v13616_v20 = vadd.f32 %v10253_v61, %v3718_v18  ;;  %v10190_v32 = vpop.f32.mrb[156].mxu0  ;;  %7449 = vmatprep.subr.bf16.mxu1 %v11196_v6  ;;  %7777 = vmatprep.subr.bf16.mxu0 %v11199_v2 }
 0x22f   :  { %v10191_v50 = vpop.f32.mrb[157].mxu0  ;;  %v10254_v41 = vpop.f32.mrb[156].mxu1 }
 0x230   :  { %v10192_v16 = vadd.f32 %v10191_v50, %v10190_v32  ;;  %v10193_v55 = vpop.f32.mrb[158].mxu0  ;;  %v10255_v5 = vpop.f32.mrb[157].mxu1 }
 0x231   :  { %v10194_v25 = vpop.f32.mrb[159].mxu0  ;;  %v10256_v37 = vadd.f32 %v10255_v5, %v10254_v41  ;;  %v10257_v17 = vpop.f32.mrb[158].mxu1 }
 0x232   :  { %v3723_v22 = vadd.f32 %v10192_v16, %v13392_v39  ;;  %v10195_v28 = vadd.f32 %v10194_v25, %v10193_v55  ;;  %v10258_v30 = vpop.f32.mrb[159].mxu1 }
 0x233   :  { %v10259_v31 = vadd.f32 %v10258_v30, %v10257_v17 }
 0x234   :  { %v3726_v45 = vadd.f32 %v10195_v28, %v13400_v38  ;;  %v13626_v14 = vadd.f32 %v10256_v37, %v3723_v22 }
 0x236   :  { %v13628_v3 = vadd.f32 %v10259_v31, %v3726_v45  ;;  %v10276_v39 = vpop.f32.mrb[160].mxu0 }
 0x237   :  { %v10277_v33 = vpop.f32.mrb[161].mxu0  ;;  %v10340_v42 = vpop.f32.mrb[160].mxu1 }
 0x238   :  { %v10278_v4 = vadd.f32 %v10277_v33, %v10276_v39  ;;  %v10279_v11 = vpop.f32.mrb[162].mxu0  ;;  %v10341_v29 = vpop.f32.mrb[161].mxu1 }
 0x239   :  { %v10280_v44 = vpop.f32.mrb[163].mxu0  ;;  %v10342_v34 = vadd.f32 %v10341_v29, %v10340_v42  ;;  %v10343_v27 = vpop.f32.mrb[162].mxu1 }
 0x23a   :  { %v3861_v46 = vadd.f32 %v10278_v4, %v13422_v43  ;;  %v10281_v15 = vadd.f32 %v10280_v44, %v10279_v11  ;;  %v10344_v47 = vpop.f32.mrb[163].mxu1 }
 0x23b   :  { %v10345_v38 = vadd.f32 %v10344_v47, %v10343_v27 }
 0x23c   :  { %v3864_v57 = vadd.f32 %v10281_v15, %v13430_v24  ;;  %v13632_v59 = vadd.f32 %v10342_v34, %v3861_v46 }
 0x23e   :  { %v10282_v62 = vpop.f32.mrb[164].mxu0  ;;  %v13634_v53 = vadd.f32 %v10345_v38, %v3864_v57 }
 0x23f   :  { %v10283_v19 = vpop.f32.mrb[165].mxu0  ;;  %v10346_v58 = vpop.f32.mrb[164].mxu1 }
 0x240   :  { %v10284_v63 = vadd.f32 %v10283_v19, %v10282_v62  ;;  %v10285_v56 = vpop.f32.mrb[166].mxu0  ;;  %v10347_v40 = vpop.f32.mrb[165].mxu1 }
 0x241   :  { %v10286_v12 = vpop.f32.mrb[167].mxu0  ;;  %v10348_v23 = vadd.f32 %v10347_v40, %v10346_v58  ;;  %v10349_v60 = vpop.f32.mrb[166].mxu1 }
 0x242   :  { %v3869_v43 = vadd.f32 %v10284_v63, %v13452_v49  ;;  %v10287_v52 = vadd.f32 %v10286_v12, %v10285_v56  ;;  %v10350_v48 = vpop.f32.mrb[167].mxu1 }
 0x243   :  { %v10351_v61 = vadd.f32 %v10350_v48, %v10349_v60 }
 0x244   :  { %v3872_v24 = vadd.f32 %v10287_v52, %v13460_v51  ;;  %v13638_v36 = vadd.f32 %v10348_v23, %v3869_v43 }
 0x246   :  { %v10288_v26 = vpop.f32.mrb[168].mxu0  ;;  %v13640_v18 = vadd.f32 %v10351_v61, %v3872_v24 }
 0x247   :  { %v10289_v21 = vpop.f32.mrb[169].mxu0  ;;  %v10352_v32 = vpop.f32.mrb[168].mxu1 }
 0x248   :  { %v10290_v50 = vadd.f32 %v10289_v21, %v10288_v26  ;;  %v10291_v41 = vpop.f32.mrb[170].mxu0  ;;  %v10353_v16 = vpop.f32.mrb[169].mxu1 }
 0x249   :  { %v10292_v55 = vpop.f32.mrb[171].mxu0  ;;  %v10354_v5 = vadd.f32 %v10353_v16, %v10352_v32  ;;  %v10355_v25 = vpop.f32.mrb[170].mxu1 }
 0x24a   :  { %v3877_v49 = vadd.f32 %v10290_v50, %v13482_v13  ;;  %v10293_v37 = vadd.f32 %v10292_v55, %v10291_v41  ;;  %v10356_v17 = vpop.f32.mrb[171].mxu1 }
 0x24b   :  { %v10357_v22 = vadd.f32 %v10356_v17, %v10355_v25 }
 0x24c   :  { %v3880_v51 = vadd.f32 %v10293_v37, %v13490_v0  ;;  %v13644_v28 = vadd.f32 %v10354_v5, %v3877_v49 }
 0x24e   :  { %v10294_v30 = vpop.f32.mrb[172].mxu0  ;;  %v13646_v6 = vadd.f32 %v10357_v22, %v3880_v51 }
 0x24f   :  { %v10295_v2 = vpop.f32.mrb[173].mxu0  ;;  %v10358_v31 = vpop.f32.mrb[172].mxu1 }
 0x250   :  { %v10296_v45 = vadd.f32 %v10295_v2, %v10294_v30  ;;  %v10297_v39 = vpop.f32.mrb[174].mxu0  ;;  %v10359_v33 = vpop.f32.mrb[173].mxu1 }
 0x251   :  { %v10298_v42 = vpop.f32.mrb[175].mxu0  ;;  %v10360_v4 = vadd.f32 %v10359_v33, %v10358_v31  ;;  %v10361_v11 = vpop.f32.mrb[174].mxu1 }
 0x252   :  { %v3885_v13 = vadd.f32 %v10296_v45, %v13512_v7  ;;  %v10299_v29 = vadd.f32 %v10298_v42, %v10297_v39  ;;  %v10362_v44 = vpop.f32.mrb[175].mxu1 }
 0x253   :  { %v10363_v34 = vadd.f32 %v10362_v44, %v10361_v11 }
 0x254   :  { %v3888_v0 = vadd.f32 %v10299_v29, %v13514_v54  ;;  %v13650_v27 = vadd.f32 %v10360_v4, %v3885_v13 }
 0x255   :  { %16 = vsyncpa [#allocation5], 0  ;;  %vm11942_vm0 = vmmov 0   ;;  %s11943_s18 = smov [#allocation4]  }
 0x256   :  { %v10300_v46 = vpop.f32.mrb[176].mxu0  ;;  %v13652_v15 = vadd.f32 %v10363_v34, %v3888_v0 }
 0x257   :  { %v10301_v47 = vpop.f32.mrb[177].mxu0  ;;  %v10364_v38 = vpop.f32.mrb[176].mxu1 }
 0x258   :  { %v10302_v57 = vadd.f32 %v10301_v47, %v10300_v46  ;;  %v10303_v62 = vpop.f32.mrb[178].mxu0  ;;  %v10365_v19 = vpop.f32.mrb[177].mxu1 }
 0x259   :  { %v10304_v58 = vpop.f32.mrb[179].mxu0  ;;  %v10366_v63 = vadd.f32 %v10365_v19, %v10364_v38  ;;  %v10367_v56 = vpop.f32.mrb[178].mxu1 }
 0x25a   :  { %v3893_v7 = vadd.f32 %v10302_v57, %v13542_v9  ;;  %v10305_v40 = vadd.f32 %v10304_v58, %v10303_v62  ;;  %v10368_v12 = vpop.f32.mrb[179].mxu1 }
 0x25b   :  { %v10369_v23 = vadd.f32 %v10368_v12, %v10367_v56 }
 0x25c   :  { %v3896_v54 = vadd.f32 %v10305_v40, %v13544_v10  ;;  %v13656_v60 = vadd.f32 %v10366_v63, %v3893_v7 }
 0x25e   :  { %v10306_v43 = vpop.f32.mrb[180].mxu0  ;;  %v13658_v52 = vadd.f32 %v10369_v23, %v3896_v54 }
 0x25f   :  { %v10307_v48 = vpop.f32.mrb[181].mxu0  ;;  %v10370_v61 = vpop.f32.mrb[180].mxu1 }
 0x260   :  { %v10308_v24 = vadd.f32 %v10307_v48, %v10306_v43  ;;  %v10309_v26 = vpop.f32.mrb[182].mxu0  ;;  %v10371_v21 = vpop.f32.mrb[181].mxu1 }
 0x261   :  { %v10310_v32 = vpop.f32.mrb[183].mxu0  ;;  %v10372_v50 = vadd.f32 %v10371_v21, %v10370_v61  ;;  %v10373_v41 = vpop.f32.mrb[182].mxu1 }
 0x262   :  { %v3901_v9 = vadd.f32 %v10308_v24, %v13572_v35  ;;  %v10311_v16 = vadd.f32 %v10310_v32, %v10309_v26  ;;  %v10374_v55 = vpop.f32.mrb[183].mxu1 }
 0x263   :  { %v10375_v5 = vadd.f32 %v10374_v55, %v10373_v41 }
 0x264   :  { %v3904_v10 = vadd.f32 %v10311_v16, %v13574_v1  ;;  %v3998_v25 = vadd.f32 %v10372_v50, %v3901_v9 }
 0x266   :  { %v10312_v49 = vpop.f32.mrb[184].mxu0  ;;  %v4001_v37 = vadd.f32 %v10375_v5, %v3904_v10 }
 0x267   :  { %v10313_v17 = vpop.f32.mrb[185].mxu0  ;;  %v10376_v22 = vpop.f32.mrb[184].mxu1 }
 0x268   :  { %v10314_v51 = vadd.f32 %v10313_v17, %v10312_v49  ;;  %v10315_v30 = vpop.f32.mrb[186].mxu0  ;;  %v10377_v2 = vpop.f32.mrb[185].mxu1 }
 0x269   :  { %v10316_v31 = vpop.f32.mrb[187].mxu0  ;;  %v10378_v45 = vadd.f32 %v10377_v2, %v10376_v22  ;;  %v10379_v39 = vpop.f32.mrb[186].mxu1 }
 0x26a   :  { %v3909_v33 = vadd.f32 %v10314_v51, %v13611_v8  ;;  %v10317_v42 = vadd.f32 %v10316_v31, %v10315_v30  ;;  %v10380_v35 = vpop.f32.mrb[187].mxu1 }
 0x26b   :  { %v10381_v4 = vadd.f32 %v10380_v35, %v10379_v39 }
 0x26c   :  { %v3912_v11 = vadd.f32 %v10317_v42, %v13616_v20  ;;  %v4006_v13 = vadd.f32 %v10378_v45, %v3909_v33 }
 0x26e   :  { %v10318_v1 = vpop.f32.mrb[188].mxu0  ;;  %v4009_v29 = vadd.f32 %v10381_v4, %v3912_v11 }
 0x26f   :  { %v10319_v44 = vpop.f32.mrb[189].mxu0  ;;  %v10382_v34 = vpop.f32.mrb[188].mxu1 }
 0x270   :  { %v10320_v0 = vadd.f32 %v10319_v44, %v10318_v1  ;;  %v10321_v46 = vpop.f32.mrb[190].mxu0  ;;  %v10383_v47 = vpop.f32.mrb[189].mxu1 }
 0x271   :  { %v10322_v38 = vpop.f32.mrb[191].mxu0  ;;  %v10384_v57 = vadd.f32 %v10383_v47, %v10382_v34  ;;  %v10385_v62 = vpop.f32.mrb[190].mxu1 }
 0x272   :  { %v3917_v19 = vadd.f32 %v10320_v0, %v13626_v14  ;;  %v10323_v58 = vadd.f32 %v10322_v38, %v10321_v46  ;;  %v10386_v8 = vpop.f32.mrb[191].mxu1 }
 0x273   :  { %v10387_v63 = vadd.f32 %v10386_v8, %v10385_v62 }
 0x274   :  { %v3920_v56 = vadd.f32 %v10323_v58, %v13628_v3  ;;  %v4014_v7 = vadd.f32 %v10384_v57, %v3917_v19 }
 0x276   :  { %v10484_v20 = vpop.f32.mrb[192].mxu0  ;;  %v4017_v40 = vadd.f32 %v10387_v63, %v3920_v56 }
 0x277   :  { %v4063_v12 = vadd.f32 %v10484_v20, %v13638_v36  ;;  %v4054_v23 = vpop.f32.mrb[193].mxu0 }
 0x278   :  { %v4055_v54 = vadd.f32 %v4054_v23, %v13632_v59  ;;  %v10485_v43 = vpop.f32.mrb[194].mxu0 }
 0x279   :  { %v4066_v48 = vadd.f32 %v10485_v43, %v13640_v18  ;;  %v4057_v61 = vpop.f32.mrb[195].mxu0  ;;  %v4712_v43 = vlaneseq }
 0x27a   :  { %v4058_v24 = vadd.f32 %v4057_v61, %v13634_v53 }
 0x27e   :  { %v10488_v14 = vpop.f32.mrb[196].mxu0 }
 0x27f   :  { %v4079_v26 = vadd.f32 %v10488_v14, %v13650_v27  ;;  %v4070_v21 = vpop.f32.mrb[197].mxu0 }
 0x280   :  { %v4071_v3 = vadd.f32 %v4070_v21, %v13644_v28  ;;  %v10489_v32 = vpop.f32.mrb[198].mxu0 }
 0x281   :  { %v4119_v50 = vmax.f32 %v4063_v12, %v4079_v26  ;;  %v4082_v41 = vadd.f32 %v10489_v32, %v13652_v15  ;;  %v4073_v36 = vpop.f32.mrb[199].mxu0 }
 0x282   :  { %v4117_v9 = vmax.f32 %v4055_v54, %v4071_v3  ;;  %v4074_v59 = vadd.f32 %v4073_v36, %v13646_v6  ;;  %v9056_v6 = vld [vmem:[%s15273_s2] ss:$0 sm:$0xff]  ;;  %v11940_v3 = vmov 1966171168  }
 0x283   :  { %v4120_v16 = vmax.f32 %v4066_v48, %v4082_v41  ;;  %v4736_v32 = vunpack.c.l.s4 %v11940_v3  ;;  %v11239_v3 = vld [vmem:[%s15274_s3 + $0x2e8] ss:$16 sps:$4 sm:$0xff]  }
 0x284   :  { %v4118_v55 = vmax.f32 %v4058_v24, %v4074_v59 }
 0x286   :  { %v10492_v18 = vpop.f32.mrb[200].mxu0 }
 0x287   :  { %v4095_v5 = vadd.f32 %v10492_v18, %v3998_v25  ;;  %v4086_v10 = vpop.f32.mrb[201].mxu0 }
 0x288   :  { %v4087_v53 = vadd.f32 %v4086_v10, %v13656_v60  ;;  %v10493_v49 = vpop.f32.mrb[202].mxu0 }
 0x289   :  { %v4123_v27 = vmax.f32 %v4119_v50, %v4095_v5  ;;  %v4098_v17 = vadd.f32 %v10493_v49, %v4001_v37  ;;  %v4089_v22 = vpop.f32.mrb[203].mxu0  ;;  %v13679_v49 = vshrl.u32 %v4712_v43, 7  ;;  %v11232_v43 = vld [vmem:[%s15274_s3 + $0x2c4] ss:$16 sps:$4 sm:$0xff]  }
 0x28a   :  { %v4121_v28 = vmax.f32 %v4117_v9, %v4087_v53  ;;  %v4090_v51 = vadd.f32 %v4089_v22, %v13658_v52 }
 0x28b   :  { %v4124_v30 = vmax.f32 %v4120_v16, %v4098_v17 }
 0x28c   :  { %v4122_v15 = vmax.f32 %v4118_v55, %v4090_v51 }
 0x28e   :  { %v10496_v2 = vpop.f32.mrb[204].mxu0 }
 0x28f   :  { %v4111_v31 = vadd.f32 %v10496_v2, %v4014_v7  ;;  %v4102_v45 = vpop.f32.mrb[205].mxu0 }
 0x290   :  { %v4103_v25 = vadd.f32 %v4102_v45, %v4006_v13  ;;  %v10497_v39 = vpop.f32.mrb[206].mxu0 }
 0x291   :  { %v4127_v33 = vmax.f32 %v4123_v27, %v4111_v31  ;;  %v4114_v60 = vadd.f32 %v10497_v39, %v4017_v40  ;;  %v4105_v42 = vpop.f32.mrb[207].mxu0  ;;  %v4737_v27 = vunpack.c.0.s8 %v4736_v32  ;;  %v11244_v32 = vld [vmem:[%s15274_s3 + $0x304] ss:$16 sps:$4 sm:$0xff]  }
 0x292   :  { %v4125_v35 = vmax.f32 %v4121_v28, %v4103_v25  ;;  %v4106_v37 = vadd.f32 %v4105_v42, %v4009_v29  ;;  %v11194_v42 = vld [vmem:[%s15274_s3 + $0x200] ss:$16 sps:$4 sm:$0xff]  }
 0x293   :  { %v4138_v4 = vadd.f32 %v9056_v6, %v4127_v33  ;;  %v4128_v11 = vmax.f32 %v4124_v30, %v4114_v60  ;;  %v13682_v17 = vsub.s32 %v4737_v27, %v13679_v49  ;;  %v11262_v27 = vld [vmem:[%s15274_s3 + $0x364] ss:$16 sps:$4 sm:$0xff]  }
 0x294   :  { %v4136_v1 = vadd.f32 %v9056_v6, %v4125_v35  ;;  %v4126_v52 = vmax.f32 %v4122_v15, %v4106_v37  ;;  %v11197_v35 = vld [vmem:[%s15274_s3 + $0x208] ss:$16 sps:$4 sm:$0xff]  }
 0x295   :  { %v4142_v44 = vmax.f32 %v4138_v4, 0.0  ;;  %v4139_v34 = vadd.f32 %v9056_v6, %v4128_v11 }
 0x296   :  { %v4140_v0 = vmax.f32 %v4136_v1, 0.0  ;;  %v4137_v46 = vadd.f32 %v9056_v6, %v4126_v52 }
 0x297   :  { %4146 = vst [vmem:[#allocation2 + $0x10] sm:$0xff] %v4142_v44  ;;  %v4143_v47 = vmax.f32 %v4139_v34, 0.0  ;;  %v11202_v44 = vld [vmem:[%s15274_s3 + $0x224] ss:$16 sps:$4 sm:$0xff]   ;;  %v11205_v34 = vld [vmem:[%s15274_s3 + $0x22c] ss:$16 sps:$4 sm:$0xff]  }
 0x298   :  { %4144 = vst [vmem:[#allocation2] sm:$0xff] %v4140_v0  ;;  %v4141_v38 = vmax.f32 %v4137_v46, 0.0  ;;  %v11200_v46 = vld [vmem:[%s15274_s3 + $0x220] ss:$16 sps:$4 sm:$0xff]  }
 0x299   :  { %4147 = vst [vmem:[#allocation2 + $0x18] sm:$0xff] %v4143_v47  ;;  %v11203_v47 = vld [vmem:[%s15274_s3 + $0x228] ss:$16 sps:$4 sm:$0xff]  }
 0x29a   :  { %4145 = vst [vmem:[#allocation2 + $0x8] sm:$0xff] %v4141_v38  ;;  %v11208_v38 = vld [vmem:[%s15274_s3 + $0x244] ss:$16 sps:$4 sm:$0xff]  }
 0x29e   :  { %v4172_v13 = vld [vmem:[#allocation2 + $0x10] sm:$0x3]  ;;  %v4175_v57 = vld [vmem:[#allocation2 + $0x12] sm:$0x3]  ;;  %v4178_v62 = vld [vmem:[#allocation2 + $0x14] sm:$0x3] }
 0x29f   :  { %v4173_v19 = vpack.c.bf16 %v4172_v13, %v4172_v13  ;;  %v4176_v58 = vpack.c.bf16 %v4175_v57, %v4175_v57  ;;  %v4179_v29 = vpack.c.bf16 %v4178_v62, %v4178_v62  ;;  %v4181_v8 = vld [vmem:[#allocation2 + $0x16] sm:$0x3]  ;;  %v4148_v63 = vld [vmem:[#allocation2] sm:$0x3]  ;;  %v4151_v56 = vld [vmem:[#allocation2 + $0x2] sm:$0x3] }
 0x2a0   :  { %v4182_v7 = vpack.c.bf16 %v4181_v8, %v4181_v8  ;;  %v4149_v20 = vpack.c.bf16 %v4148_v63, %v4148_v63  ;;  %v4152_v40 = vpack.c.bf16 %v4151_v56, %v4151_v56  ;;  %v4154_v12 = vld [vmem:[#allocation2 + $0x4] sm:$0x3]  ;;  %v4157_v23 = vld [vmem:[#allocation2 + $0x6] sm:$0x3]  ;;  %v4184_v54 = vld [vmem:[#allocation2 + $0x18] sm:$0x3] }
 0x2a1   :  { %4174 = vst [vmem:[#allocation3 + $0x8] sm:$0x1] %v4173_v19  ;;  %4177 = vst [vmem:[#allocation3 + $0x9] sm:$0x1] %v4176_v58  ;;  %v4155_v48 = vpack.c.bf16 %v4154_v12, %v4154_v12  ;;  %v4158_v61 = vpack.c.bf16 %v4157_v23, %v4157_v23  ;;  %v4185_v24 = vpack.c.bf16 %v4184_v54, %v4184_v54  ;;  %v4187_v14 = vld [vmem:[#allocation2 + $0x1a] sm:$0x3] }
 0x2a2   :  { %4180 = vst [vmem:[#allocation3 + $0xa] sm:$0x1] %v4179_v29  ;;  %v4190_v26 = vld [vmem:[#allocation2 + $0x1c] sm:$0x3]  ;;  %v4193_v21 = vld [vmem:[#allocation2 + $0x1e] sm:$0x3]  ;;  %v4188_v50 = vpack.c.bf16 %v4187_v14, %v4187_v14 }
 0x2a3   :  { %4183 = vst [vmem:[#allocation3 + $0xb] sm:$0x1] %v4182_v7  ;;  %4150 = vst [vmem:[#allocation3] sm:$0x1] %v4149_v20  ;;  %v4191_v41 = vpack.c.bf16 %v4190_v26, %v4190_v26  ;;  %v4194_v36 = vpack.c.bf16 %v4193_v21, %v4193_v21  ;;  %v4160_v9 = vld [vmem:[#allocation2 + $0x8] sm:$0x3] }
 0x2a4   :  { %4153 = vst [vmem:[#allocation3 + $0x1] sm:$0x1] %v4152_v40  ;;  %v4163_v59 = vld [vmem:[#allocation2 + $0xa] sm:$0x3]  ;;  %v4166_v16 = vld [vmem:[#allocation2 + $0xc] sm:$0x3]  ;;  %v4161_v55 = vpack.c.bf16 %v4160_v9, %v4160_v9 }
 0x2a5   :  { %4156 = vst [vmem:[#allocation3 + $0x2] sm:$0x1] %v4155_v48  ;;  %4159 = vst [vmem:[#allocation3 + $0x3] sm:$0x1] %v4158_v61  ;;  %v4164_v18 = vpack.c.bf16 %v4163_v59, %v4163_v59  ;;  %v4167_v5 = vpack.c.bf16 %v4166_v16, %v4166_v16  ;;  %v4169_v10 = vld [vmem:[#allocation2 + $0xe] sm:$0x3] }
 0x2a6   :  { %4186 = vst [vmem:[#allocation3 + $0xc] sm:$0x1] %v4185_v24  ;;  %4189 = vst [vmem:[#allocation3 + $0xd] sm:$0x1] %v4188_v50  ;;  %v4170_v53 = vpack.c.bf16 %v4169_v10, %v4169_v10  ;;  %v11211_v13 = vld [vmem:[%s15274_s3 + $0x24c] ss:$16 sps:$4 sm:$0xff]  }
 0x2a7   :  { %4192 = vst [vmem:[#allocation3 + $0xe] sm:$0x1] %v4191_v41  ;;  %4195 = vst [vmem:[#allocation3 + $0xf] sm:$0x1] %v4194_v36  ;;  %v11206_v57 = vld [vmem:[%s15274_s3 + $0x240] ss:$16 sps:$4 sm:$0xff]  }
 0x2a8   :  { %4162 = vst [vmem:[#allocation3 + $0x4] sm:$0x1] %v4161_v55  ;;  %4165 = vst [vmem:[#allocation3 + $0x5] sm:$0x1] %v4164_v18  ;;  %v11209_v62 = vld [vmem:[%s15274_s3 + $0x248] ss:$16 sps:$4 sm:$0xff]  }
 0x2a9   :  { %4168 = vst [vmem:[#allocation3 + $0x6] sm:$0x1] %v4167_v5  ;;  %4171 = vst [vmem:[#allocation3 + $0x7] sm:$0x1] %v4170_v53  ;;  %v11214_v19 = vld [vmem:[%s15274_s3 + $0x264] ss:$16 sps:$4 sm:$0xff]  }
 0x2aa   :  { %v11217_v58 = vld [vmem:[%s15274_s3 + $0x26c] ss:$16 sps:$4 sm:$0xff]   ;;  %v11212_v29 = vld [vmem:[%s15274_s3 + $0x260] ss:$16 sps:$4 sm:$0xff]   ;;  %v11215_v8 = vld [vmem:[%s15274_s3 + $0x268] ss:$16 sps:$4 sm:$0xff]  }
 0x2ab   :  { %v11220_v63 = vld [vmem:[%s15274_s3 + $0x284] ss:$16 sps:$4 sm:$0xff]   ;;  %v11223_v56 = vld [vmem:[%s15274_s3 + $0x28c] ss:$16 sps:$4 sm:$0xff]   ;;  %v11218_v7 = vld [vmem:[%s15274_s3 + $0x280] ss:$16 sps:$4 sm:$0xff]  }
 0x2ac   :  { %v11221_v20 = vld [vmem:[%s15274_s3 + $0x288] ss:$16 sps:$4 sm:$0xff]   ;;  %v11226_v40 = vld [vmem:[%s15274_s3 + $0x2a4] ss:$16 sps:$4 sm:$0xff]   ;;  %v11229_v12 = vld [vmem:[%s15274_s3 + $0x2ac] ss:$16 sps:$4 sm:$0xff]  }
 0x2ad   :  { %v11224_v23 = vld [vmem:[%s15274_s3 + $0x2a0] ss:$16 sps:$4 sm:$0xff]   ;;  %v11227_v54 = vld [vmem:[%s15274_s3 + $0x2a8] ss:$16 sps:$4 sm:$0xff]   ;;  %v11235_v48 = vld [vmem:[%s15274_s3 + $0x2cc] ss:$16 sps:$4 sm:$0xff]  }
 0x2ae   :  { %v4197_v22 = vld [vmem:[#allocation3 + $0x8] sm:$0xff]  ;;  %v11230_v61 = vld [vmem:[%s15274_s3 + $0x2c0] ss:$16 sps:$4 sm:$0xff]   ;;  %v11238_v14 = vld [vmem:[%s15274_s3 + $0x2e4] ss:$16 sps:$4 sm:$0xff]  }
 0x2af   :  { %v13685_v51 = vrot.slane %v4197_v22, %v13682_v17  ;;  %v4783_v30 = vcombine.high %v4197_v22, %v4197_v22  ;;  %v11233_v24 = vld [vmem:[%s15274_s3 + $0x2c8] ss:$16 sps:$4 sm:$0xff]   ;;  %v11241_v26 = vld [vmem:[%s15274_s3 + $0x2ec] ss:$16 sps:$4 sm:$0xff]   ;;  %v11236_v21 = vld [vmem:[%s15274_s3 + $0x2e0] ss:$16 sps:$4 sm:$0xff]  }
 0x2b0   :  { %v4196_v28 = vld [vmem:[#allocation3] sm:$0xff]  ;;  %v11247_v50 = vld [vmem:[%s15274_s3 + $0x30c] ss:$16 sps:$4 sm:$0xff]   ;;  %v11245_v36 = vld [vmem:[%s15274_s3 + $0x308] ss:$16 sps:$4 sm:$0xff]  }
 0x2b1   :  { %v4741_v15 = vrot.slane %v4196_v28, %v13682_v17  ;;  %v4734_v2 = vcombine.high %v4196_v28, %v4196_v28  ;;  %v13690_v31 = vrot.slane %v13685_v51, %v13682_v17  ;;  %v4797_v45 = vrot.slane %v4783_v30, %v13682_v17  ;;  %v11242_v41 = vld [vmem:[%s15274_s3 + $0x300] ss:$16 sps:$4 sm:$0xff]   ;;  %v11250_v9 = vld [vmem:[%s15274_s3 + $0x324] ss:$16 sps:$4 sm:$0xff]   ;;  %v11253_v59 = vld [vmem:[%s15274_s3 + $0x32c] ss:$16 sps:$4 sm:$0xff]  }
 0x2b2   :  { %v11248_v16 = vld [vmem:[%s15274_s3 + $0x320] ss:$16 sps:$4 sm:$0xff]   ;;  %v11251_v55 = vld [vmem:[%s15274_s3 + $0x328] ss:$16 sps:$4 sm:$0xff]   ;;  %v11256_v18 = vld [vmem:[%s15274_s3 + $0x344] ss:$16 sps:$4 sm:$0xff]  }
 0x2b3   :  { %v4749_v6 = vcombine.high %v4741_v15, %v4741_v15  ;;  %v4748_v25 = vrot.slane %v4734_v2, %v13682_v17  ;;  %v4799_v39 = vcombine.high %v4797_v45, %v4797_v45  ;;  %v13695_v33 = vrot.slane %v4797_v45, %v13682_v17  ;;  %v11259_v5 = vld [vmem:[%s15274_s3 + $0x34c] ss:$16 sps:$4 sm:$0xff]   ;;  %v11254_v10 = vld [vmem:[%s15274_s3 + $0x340] ss:$16 sps:$4 sm:$0xff]   ;;  %v11257_v53 = vld [vmem:[%s15274_s3 + $0x348] ss:$16 sps:$4 sm:$0xff]  }
 0x2b4   :  { %v13708_v11 = vrot.slane %v4741_v15, %v13682_v17  ;;  %v11265_v22 = vld [vmem:[%s15274_s3 + $0x36c] ss:$16 sps:$4 sm:$0xff]   ;;  %v11260_v28 = vld [vmem:[%s15274_s3 + $0x360] ss:$16 sps:$4 sm:$0xff]   ;;  %v11263_v30 = vld [vmem:[%s15274_s3 + $0x368] ss:$16 sps:$4 sm:$0xff]  }
 0x2b5   :  { %v4771_v60 = vrot.slane %v4749_v6, %v13682_v17  ;;  %v4750_v37 = vcombine.high %v4748_v25, %v4748_v25  ;;  %v13705_v4 = vrot.slane %v4748_v25, %v13682_v17  ;;  %v13711_v1 = vrot.slane %v4799_v39, %v13682_v17  ;;  %v11268_v15 = vld [vmem:[%s15274_s3 + $0x384] ss:$16 sps:$4 sm:$0xff]   ;;  %v11271_v2 = vld [vmem:[%s15274_s3 + $0x38c] ss:$16 sps:$4 sm:$0xff]   ;;  %v11266_v45 = vld [vmem:[%s15274_s3 + $0x380] ss:$16 sps:$4 sm:$0xff]  }
 0x2b6   :  { %v11269_v6 = vld [vmem:[%s15274_s3 + $0x388] ss:$16 sps:$4 sm:$0xff]   ;;  %v11274_v25 = vld [vmem:[%s15274_s3 + $0x3a4] ss:$16 sps:$4 sm:$0xff]   ;;  %v11277_v39 = vld [vmem:[%s15274_s3 + $0x3ac] ss:$16 sps:$4 sm:$0xff]  }
 0x2b7   :  { %7440 = vmatprep.mubr.bf16.mxu1 %v4771_v60  ;;  %7768 = vmatprep.mubr.bf16.mxu0 %v4771_v60  ;;  %v4781_v52 = vcombine.high %v4771_v60, %v4771_v60  ;;  %v13720_v0 = vrot.slane %v4750_v37, %v13682_v17  ;;  %v11272_v60 = vld [vmem:[%s15274_s3 + $0x3a0] ss:$16 sps:$4 sm:$0xff]   ;;  %v11283_v37 = vld [vmem:[%s15274_s3 + $0x3cc] ss:$16 sps:$4 sm:$0xff]  }
 0x2b8   :  { %7441 = vmatmul.mubr.bf16.vlgmr.msra.gmra.mrb[192].mxu1 %v13708_v11  ;;  %7769 = vmatmul.mubr.bf16.vlgmr.msra.gmra.mrb[208].mxu0 %v13708_v11 }
 0x2b9   :  { %7450 = vmatpush1.bf16.msra.mxu1 %v11194_v42  ;;  %7778 = vmatpush1.bf16.msra.mxu0 %v11197_v35  ;;  %v11275_v42 = vld [vmem:[%s15274_s3 + $0x3a8] ss:$16 sps:$4 sm:$0xff]   ;;  %v11280_v35 = vld [vmem:[%s15274_s3 + $0x3c4] ss:$16 sps:$4 sm:$0xff]  }
 0x2ba   :  { %7481 = vmatprep.mubr.bf16.mxu1 %v4781_v52  ;;  %7809 = vmatprep.mubr.bf16.mxu0 %v4781_v52  ;;  %v11278_v52 = vld [vmem:[%s15274_s3 + $0x3c0] ss:$16 sps:$4 sm:$0xff]  }
 0x2bb   :  { %7451 = vmatprep.subr.bf16.mxu1 %v11202_v44  ;;  %7779 = vmatprep.subr.bf16.mxu0 %v11205_v34  ;;  %v11281_v44 = vld [vmem:[%s15274_s3 + $0x3c8] ss:$16 sps:$4 sm:$0xff]   ;;  %v11286_v34 = vld [vmem:[%s15274_s3 + $0x3e4] ss:$16 sps:$4 sm:$0xff]  }
 0x2bd   :  { %7452 = vmatpush1.bf16.msra.mxu1 %v11200_v46  ;;  %7780 = vmatpush1.bf16.msra.mxu0 %v11203_v47  ;;  %v11289_v46 = vld [vmem:[%s15274_s3 + $0x3ec] ss:$16 sps:$4 sm:$0xff]   ;;  %v11284_v47 = vld [vmem:[%s15274_s3 + $0x3e0] ss:$16 sps:$4 sm:$0xff]  }
 0x2be   :  { %7453 = vmatprep.subr.bf16.mxu1 %v11208_v38  ;;  %7781 = vmatprep.subr.bf16.mxu0 %v11211_v13  ;;  %v11287_v38 = vld [vmem:[%s15274_s3 + $0x3e8] ss:$16 sps:$4 sm:$0xff]   ;;  %v11292_v13 = vld [vmem:[%s15274_s3 + $0x404] ss:$16 sps:$4 sm:$0xff]  }
 0x2c1   :  { %7454 = vmatpush1.bf16.msra.mxu1 %v11206_v57  ;;  %7782 = vmatpush1.bf16.msra.mxu0 %v11209_v62  ;;  %v11295_v57 = vld [vmem:[%s15274_s3 + $0x40c] ss:$16 sps:$4 sm:$0xff]   ;;  %v11290_v62 = vld [vmem:[%s15274_s3 + $0x400] ss:$16 sps:$4 sm:$0xff]  }
 0x2c2   :  { %7455 = vmatprep.subr.bf16.mxu1 %v11214_v19  ;;  %7783 = vmatprep.subr.bf16.mxu0 %v11217_v58  ;;  %v4779_v19 = vcombine.high %v13708_v11, %v13708_v11  ;;  %v11293_v58 = vld [vmem:[%s15274_s3 + $0x408] ss:$16 sps:$4 sm:$0xff]   ;;  %v11297_v11 = vld [vmem:[%s15274_s3 + $0x420] ss:$16 sps:$4 sm:$0xff]  }
 0x2c5   :  { %7456 = vmatpush1.bf16.msra.mxu1 %v11212_v29  ;;  %7784 = vmatpush1.bf16.msra.mxu0 %v11215_v8  ;;  %v11299_v29 = vld [vmem:[%s15274_s3 + $0x424] ss:$16 sps:$4 sm:$0xff]   ;;  %v11302_v8 = vld [vmem:[%s15274_s3 + $0x42c] ss:$16 sps:$4 sm:$0xff]  }
 0x2c6   :  { %7457 = vmatprep.subr.bf16.mxu1 %v11220_v63  ;;  %7785 = vmatprep.subr.bf16.mxu0 %v11223_v56  ;;  %v11300_v63 = vld [vmem:[%s15274_s3 + $0x428] ss:$16 sps:$4 sm:$0xff]   ;;  %v11305_v56 = vld [vmem:[%s15274_s3 + $0x444] ss:$16 sps:$4 sm:$0xff]  }
 0x2c9   :  { %7458 = vmatpush1.bf16.msra.mxu1 %v11218_v7  ;;  %7786 = vmatpush1.bf16.msra.mxu0 %v11221_v20  ;;  %v11308_v7 = vld [vmem:[%s15274_s3 + $0x44c] ss:$16 sps:$4 sm:$0xff]   ;;  %v11303_v20 = vld [vmem:[%s15274_s3 + $0x440] ss:$16 sps:$4 sm:$0xff]  }
 0x2ca   :  { %7459 = vmatprep.subr.bf16.mxu1 %v11226_v40  ;;  %7787 = vmatprep.subr.bf16.mxu0 %v11229_v12  ;;  %v11306_v40 = vld [vmem:[%s15274_s3 + $0x448] ss:$16 sps:$4 sm:$0xff]   ;;  %v11311_v12 = vld [vmem:[%s15274_s3 + $0x464] ss:$16 sps:$4 sm:$0xff]  }
 0x2cd   :  { %7460 = vmatpush1.bf16.msra.mxu1 %v11224_v23  ;;  %7788 = vmatpush1.bf16.msra.mxu0 %v11227_v54  ;;  %v11314_v23 = vld [vmem:[%s15274_s3 + $0x46c] ss:$16 sps:$4 sm:$0xff]   ;;  %v11309_v54 = vld [vmem:[%s15274_s3 + $0x460] ss:$16 sps:$4 sm:$0xff]  }
 0x2ce   :  { %7461 = vmatprep.subr.bf16.mxu1 %v11232_v43  ;;  %7789 = vmatprep.subr.bf16.mxu0 %v11235_v48  ;;  %v11312_v43 = vld [vmem:[%s15274_s3 + $0x468] ss:$16 sps:$4 sm:$0xff]   ;;  %v11317_v48 = vld [vmem:[%s15274_s3 + $0x484] ss:$16 sps:$4 sm:$0xff]  }
 0x2d1   :  { %7462 = vmatpush1.bf16.msra.mxu1 %v11230_v61  ;;  %7790 = vmatpush1.bf16.msra.mxu0 %v11233_v24  ;;  %v11320_v61 = vld [vmem:[%s15274_s3 + $0x48c] ss:$16 sps:$4 sm:$0xff]   ;;  %v11315_v24 = vld [vmem:[%s15274_s3 + $0x480] ss:$16 sps:$4 sm:$0xff]  }
 0x2d2   :  { %7463 = vmatprep.subr.bf16.mxu1 %v11238_v14  ;;  %7791 = vmatprep.subr.bf16.mxu0 %v11241_v26  ;;  %v11318_v14 = vld [vmem:[%s15274_s3 + $0x488] ss:$16 sps:$4 sm:$0xff]   ;;  %v11323_v26 = vld [vmem:[%s15274_s3 + $0x4a4] ss:$16 sps:$4 sm:$0xff]  }
 0x2d5   :  { %7464 = vmatpush1.bf16.msra.mxu1 %v11236_v21  ;;  %7792 = vmatpush1.bf16.msra.mxu0 %v11239_v3  ;;  %v11326_v21 = vld [vmem:[%s15274_s3 + $0x4ac] ss:$16 sps:$4 sm:$0xff]   ;;  %v11321_v3 = vld [vmem:[%s15274_s3 + $0x4a0] ss:$16 sps:$4 sm:$0xff]  }
 0x2d6   :  { %7465 = vmatprep.subr.bf16.mxu1 %v11244_v32  ;;  %7793 = vmatprep.subr.bf16.mxu0 %v11247_v50  ;;  %v11324_v32 = vld [vmem:[%s15274_s3 + $0x4a8] ss:$16 sps:$4 sm:$0xff]   ;;  %v11329_v50 = vld [vmem:[%s15274_s3 + $0x4c4] ss:$16 sps:$4 sm:$0xff]  }
 0x2d9   :  { %7466 = vmatpush1.bf16.msra.mxu1 %v11242_v41  ;;  %7794 = vmatpush1.bf16.msra.mxu0 %v11245_v36  ;;  %v11332_v41 = vld [vmem:[%s15274_s3 + $0x4cc] ss:$16 sps:$4 sm:$0xff]   ;;  %v11327_v36 = vld [vmem:[%s15274_s3 + $0x4c0] ss:$16 sps:$4 sm:$0xff]  }
 0x2da   :  { %7467 = vmatprep.subr.bf16.mxu1 %v11250_v9  ;;  %7795 = vmatprep.subr.bf16.mxu0 %v11253_v59  ;;  %v11330_v9 = vld [vmem:[%s15274_s3 + $0x4c8] ss:$16 sps:$4 sm:$0xff]   ;;  %v11335_v59 = vld [vmem:[%s15274_s3 + $0x4e4] ss:$16 sps:$4 sm:$0xff]  }
 0x2dd   :  { %7468 = vmatpush1.bf16.msra.mxu1 %v11248_v16  ;;  %7796 = vmatpush1.bf16.msra.mxu0 %v11251_v55  ;;  %v11338_v16 = vld [vmem:[%s15274_s3 + $0x4ec] ss:$16 sps:$4 sm:$0xff]   ;;  %v11333_v55 = vld [vmem:[%s15274_s3 + $0x4e0] ss:$16 sps:$4 sm:$0xff]  }
 0x2de   :  { %7469 = vmatprep.subr.bf16.mxu1 %v11256_v18  ;;  %7797 = vmatprep.subr.bf16.mxu0 %v11259_v5  ;;  %v11336_v18 = vld [vmem:[%s15274_s3 + $0x4e8] ss:$16 sps:$4 sm:$0xff]   ;;  %v11341_v5 = vld [vmem:[%s15274_s3 + $0x504] ss:$16 sps:$4 sm:$0xff]  }
 0x2e1   :  { %7470 = vmatpush1.bf16.msra.mxu1 %v11254_v10  ;;  %7798 = vmatpush1.bf16.msra.mxu0 %v11257_v53  ;;  %v11344_v10 = vld [vmem:[%s15274_s3 + $0x50c] ss:$16 sps:$4 sm:$0xff]   ;;  %v11339_v53 = vld [vmem:[%s15274_s3 + $0x500] ss:$16 sps:$4 sm:$0xff]  }
 0x2e2   :  { %7471 = vmatprep.subr.bf16.mxu1 %v11262_v27  ;;  %7799 = vmatprep.subr.bf16.mxu0 %v11265_v22  ;;  %v11342_v27 = vld [vmem:[%s15274_s3 + $0x508] ss:$16 sps:$4 sm:$0xff]   ;;  %v11347_v22 = vld [vmem:[%s15274_s3 + $0x524] ss:$16 sps:$4 sm:$0xff]  }
 0x2e5   :  { %7472 = vmatpush1.bf16.msra.mxu1 %v11260_v28  ;;  %7800 = vmatpush1.bf16.msra.mxu0 %v11263_v30  ;;  %v11350_v28 = vld [vmem:[%s15274_s3 + $0x52c] ss:$16 sps:$4 sm:$0xff]   ;;  %v11345_v30 = vld [vmem:[%s15274_s3 + $0x520] ss:$16 sps:$4 sm:$0xff]  }
 0x2e6   :  { %7473 = vmatprep.subr.bf16.mxu1 %v11268_v15  ;;  %7801 = vmatprep.subr.bf16.mxu0 %v11271_v2  ;;  %v11348_v15 = vld [vmem:[%s15274_s3 + $0x528] ss:$16 sps:$4 sm:$0xff]   ;;  %v11353_v2 = vld [vmem:[%s15274_s3 + $0x544] ss:$16 sps:$4 sm:$0xff]  }
 0x2e9   :  { %7474 = vmatpush1.bf16.msra.mxu1 %v11266_v45  ;;  %7802 = vmatpush1.bf16.msra.mxu0 %v11269_v6  ;;  %v11356_v45 = vld [vmem:[%s15274_s3 + $0x54c] ss:$16 sps:$4 sm:$0xff]   ;;  %v11351_v6 = vld [vmem:[%s15274_s3 + $0x540] ss:$16 sps:$4 sm:$0xff]  }
 0x2ea   :  { %7475 = vmatprep.subr.bf16.mxu1 %v11274_v25  ;;  %7803 = vmatprep.subr.bf16.mxu0 %v11277_v39  ;;  %v11354_v25 = vld [vmem:[%s15274_s3 + $0x548] ss:$16 sps:$4 sm:$0xff]   ;;  %v11359_v39 = vld [vmem:[%s15274_s3 + $0x564] ss:$16 sps:$4 sm:$0xff]  }
 0x2ed   :  { %7476 = vmatpush1.bf16.msra.mxu1 %v11272_v60  ;;  %7804 = vmatpush1.bf16.msra.mxu0 %v11275_v42  ;;  %v11362_v60 = vld [vmem:[%s15274_s3 + $0x56c] ss:$16 sps:$4 sm:$0xff]   ;;  %v11357_v42 = vld [vmem:[%s15274_s3 + $0x560] ss:$16 sps:$4 sm:$0xff]  }
 0x2ee   :  { %7477 = vmatprep.subr.bf16.mxu1 %v11280_v35  ;;  %7805 = vmatprep.subr.bf16.mxu0 %v11283_v37  ;;  %v11360_v35 = vld [vmem:[%s15274_s3 + $0x568] ss:$16 sps:$4 sm:$0xff]   ;;  %v11365_v37 = vld [vmem:[%s15274_s3 + $0x584] ss:$16 sps:$4 sm:$0xff]  }
 0x2f1   :  { %7478 = vmatpush1.bf16.msra.mxu1 %v11278_v52  ;;  %7806 = vmatpush1.bf16.msra.mxu0 %v11281_v44  ;;  %v11368_v52 = vld [vmem:[%s15274_s3 + $0x58c] ss:$16 sps:$4 sm:$0xff]   ;;  %v11363_v44 = vld [vmem:[%s15274_s3 + $0x580] ss:$16 sps:$4 sm:$0xff]  }
 0x2f2   :  { %7479 = vmatprep.subr.bf16.mxu1 %v11286_v34  ;;  %7807 = vmatprep.subr.bf16.mxu0 %v11289_v46  ;;  %v11366_v34 = vld [vmem:[%s15274_s3 + $0x588] ss:$16 sps:$4 sm:$0xff]   ;;  %v11371_v46 = vld [vmem:[%s15274_s3 + $0x5a4] ss:$16 sps:$4 sm:$0xff]  }
 0x2f5   :  { %7480 = vmatpush1.bf16.msra.mxu1 %v11284_v47  ;;  %7808 = vmatpush1.bf16.msra.mxu0 %v11287_v38  ;;  %v11374_v47 = vld [vmem:[%s15274_s3 + $0x5ac] ss:$16 sps:$4 sm:$0xff]   ;;  %v11369_v38 = vld [vmem:[%s15274_s3 + $0x5a0] ss:$16 sps:$4 sm:$0xff]  }
 0x2f6   :  { %7490 = vmatprep.subr.bf16.mxu1 %v11292_v13  ;;  %7818 = vmatprep.subr.bf16.mxu0 %v11295_v57  ;;  %v11372_v13 = vld [vmem:[%s15274_s3 + $0x5a8] ss:$16 sps:$4 sm:$0xff]   ;;  %v11377_v57 = vld [vmem:[%s15274_s3 + $0x5c4] ss:$16 sps:$4 sm:$0xff]  }
 0x2f8   :  { %7482 = vmatmul.mubr.bf16.vlgmr.msra.gmra.mrb[192].mxu1 %v4779_v19  ;;  %7810 = vmatmul.mubr.bf16.vlgmr.msra.gmra.mrb[208].mxu0 %v4779_v19  ;;  %v11375_v19 = vld [vmem:[%s15274_s3 + $0x5c0] ss:$16 sps:$4 sm:$0xff]  }
 0x2f9   :  { %7491 = vmatpush1.bf16.msra.mxu1 %v11290_v62  ;;  %7522 = vmatprep.mubr.bf16.mxu1 %v13720_v0  ;;  %v11380_v62 = vld [vmem:[%s15274_s3 + $0x5cc] ss:$16 sps:$4 sm:$0xff]  }
 0x2fa   :  { %7819 = vmatpush1.bf16.msra.mxu0 %v11293_v58  ;;  %7850 = vmatprep.mubr.bf16.mxu0 %v13720_v0  ;;  %v11378_v58 = vld [vmem:[%s15274_s3 + $0x5c8] ss:$16 sps:$4 sm:$0xff]  }
 0x2fb   :  { %7492 = vmatprep.subr.bf16.mxu1 %v11299_v29  ;;  %7820 = vmatprep.subr.bf16.mxu0 %v11302_v8  ;;  %v11383_v29 = vld [vmem:[%s15274_s3 + $0x5e4] ss:$16 sps:$4 sm:$0xff]   ;;  %v11386_v8 = vld [vmem:[%s15274_s3 + $0x5ec] ss:$16 sps:$4 sm:$0xff]  }
 0x2fd   :  { %7493 = vmatpush1.bf16.msra.mxu1 %v11297_v11  ;;  %v11381_v11 = vld [vmem:[%s15274_s3 + $0x5e0] ss:$16 sps:$4 sm:$0xff]  }
 0x2fe   :  { %7821 = vmatpush1.bf16.msra.mxu0 %v11300_v63  ;;  %7494 = vmatprep.subr.bf16.mxu1 %v11305_v56  ;;  %v11384_v63 = vld [vmem:[%s15274_s3 + $0x5e8] ss:$16 sps:$4 sm:$0xff]   ;;  %v11389_v56 = vld [vmem:[%s15274_s3 + $0x604] ss:$16 sps:$4 sm:$0xff]  }
 0x2ff   :  { %7822 = vmatprep.subr.bf16.mxu0 %v11308_v7  ;;  %v11392_v7 = vld [vmem:[%s15274_s3 + $0x60c] ss:$16 sps:$4 sm:$0xff]  }
 0x301   :  { %7495 = vmatpush1.bf16.msra.mxu1 %v11303_v20  ;;  %v11387_v20 = vld [vmem:[%s15274_s3 + $0x600] ss:$16 sps:$4 sm:$0xff]  }
 0x302   :  { %7823 = vmatpush1.bf16.msra.mxu0 %v11306_v40  ;;  %7496 = vmatprep.subr.bf16.mxu1 %v11311_v12  ;;  %v11390_v40 = vld [vmem:[%s15274_s3 + $0x608] ss:$16 sps:$4 sm:$0xff]   ;;  %v11395_v12 = vld [vmem:[%s15274_s3 + $0x624] ss:$16 sps:$4 sm:$0xff]  }
 0x303   :  { %7824 = vmatprep.subr.bf16.mxu0 %v11314_v23  ;;  %v4782_v23 = vcombine.high %v13720_v0, %v13720_v0  ;;  %v11401_v0 = vld [vmem:[%s15274_s3 + $0x644] ss:$16 sps:$4 sm:$0xff]  }
 0x305   :  { %7497 = vmatpush1.bf16.msra.mxu1 %v11309_v54  ;;  %v11398_v54 = vld [vmem:[%s15274_s3 + $0x62c] ss:$16 sps:$4 sm:$0xff]  }
 0x306   :  { %7825 = vmatpush1.bf16.msra.mxu0 %v11312_v43  ;;  %7498 = vmatprep.subr.bf16.mxu1 %v11317_v48  ;;  %v11393_v43 = vld [vmem:[%s15274_s3 + $0x620] ss:$16 sps:$4 sm:$0xff]   ;;  %v11396_v48 = vld [vmem:[%s15274_s3 + $0x628] ss:$16 sps:$4 sm:$0xff]  }
 0x307   :  { %7826 = vmatprep.subr.bf16.mxu0 %v11320_v61  ;;  %v11404_v61 = vld [vmem:[%s15274_s3 + $0x64c] ss:$16 sps:$4 sm:$0xff]  }
 0x309   :  { %7499 = vmatpush1.bf16.msra.mxu1 %v11315_v24  ;;  %v11399_v24 = vld [vmem:[%s15274_s3 + $0x640] ss:$16 sps:$4 sm:$0xff]  }
 0x30a   :  { %7827 = vmatpush1.bf16.msra.mxu0 %v11318_v14  ;;  %7500 = vmatprep.subr.bf16.mxu1 %v11323_v26  ;;  %v11402_v14 = vld [vmem:[%s15274_s3 + $0x648] ss:$16 sps:$4 sm:$0xff]   ;;  %v11407_v26 = vld [vmem:[%s15274_s3 + $0x664] ss:$16 sps:$4 sm:$0xff]  }
 0x30b   :  { %7828 = vmatprep.subr.bf16.mxu0 %v11326_v21  ;;  %v11410_v21 = vld [vmem:[%s15274_s3 + $0x66c] ss:$16 sps:$4 sm:$0xff]  }
 0x30d   :  { %7501 = vmatpush1.bf16.msra.mxu1 %v11321_v3  ;;  %v11405_v3 = vld [vmem:[%s15274_s3 + $0x660] ss:$16 sps:$4 sm:$0xff]  }
 0x30e   :  { %7829 = vmatpush1.bf16.msra.mxu0 %v11324_v32  ;;  %7502 = vmatprep.subr.bf16.mxu1 %v11329_v50  ;;  %v11408_v32 = vld [vmem:[%s15274_s3 + $0x668] ss:$16 sps:$4 sm:$0xff]   ;;  %v11413_v50 = vld [vmem:[%s15274_s3 + $0x684] ss:$16 sps:$4 sm:$0xff]  }
 0x30f   :  { %7830 = vmatprep.subr.bf16.mxu0 %v11332_v41  ;;  %v11416_v41 = vld [vmem:[%s15274_s3 + $0x68c] ss:$16 sps:$4 sm:$0xff]  }
 0x311   :  { %7503 = vmatpush1.bf16.msra.mxu1 %v11327_v36  ;;  %v11411_v36 = vld [vmem:[%s15274_s3 + $0x680] ss:$16 sps:$4 sm:$0xff]  }
 0x312   :  { %7831 = vmatpush1.bf16.msra.mxu0 %v11330_v9  ;;  %7504 = vmatprep.subr.bf16.mxu1 %v11335_v59  ;;  %v11414_v9 = vld [vmem:[%s15274_s3 + $0x688] ss:$16 sps:$4 sm:$0xff]   ;;  %v11419_v59 = vld [vmem:[%s15274_s3 + $0x6a4] ss:$16 sps:$4 sm:$0xff]  }
 0x313   :  { %7832 = vmatprep.subr.bf16.mxu0 %v11338_v16  ;;  %v11422_v16 = vld [vmem:[%s15274_s3 + $0x6ac] ss:$16 sps:$4 sm:$0xff]  }
 0x315   :  { %7505 = vmatpush1.bf16.msra.mxu1 %v11333_v55  ;;  %v11417_v55 = vld [vmem:[%s15274_s3 + $0x6a0] ss:$16 sps:$4 sm:$0xff]  }
 0x316   :  { %7833 = vmatpush1.bf16.msra.mxu0 %v11336_v18  ;;  %7506 = vmatprep.subr.bf16.mxu1 %v11341_v5  ;;  %v11420_v18 = vld [vmem:[%s15274_s3 + $0x6a8] ss:$16 sps:$4 sm:$0xff]   ;;  %v11425_v5 = vld [vmem:[%s15274_s3 + $0x6c4] ss:$16 sps:$4 sm:$0xff]  }
 0x317   :  { %7834 = vmatprep.subr.bf16.mxu0 %v11344_v10  ;;  %v11428_v10 = vld [vmem:[%s15274_s3 + $0x6cc] ss:$16 sps:$4 sm:$0xff]  }
 0x319   :  { %7507 = vmatpush1.bf16.msra.mxu1 %v11339_v53  ;;  %v11423_v53 = vld [vmem:[%s15274_s3 + $0x6c0] ss:$16 sps:$4 sm:$0xff]  }
 0x31a   :  { %7835 = vmatpush1.bf16.msra.mxu0 %v11342_v27  ;;  %7508 = vmatprep.subr.bf16.mxu1 %v11347_v22  ;;  %v11426_v27 = vld [vmem:[%s15274_s3 + $0x6c8] ss:$16 sps:$4 sm:$0xff]   ;;  %v11431_v22 = vld [vmem:[%s15274_s3 + $0x6e4] ss:$16 sps:$4 sm:$0xff]  }
 0x31b   :  { %7836 = vmatprep.subr.bf16.mxu0 %v11350_v28  ;;  %v11434_v28 = vld [vmem:[%s15274_s3 + $0x6ec] ss:$16 sps:$4 sm:$0xff]  }
 0x31d   :  { %7509 = vmatpush1.bf16.msra.mxu1 %v11345_v30  ;;  %v11429_v30 = vld [vmem:[%s15274_s3 + $0x6e0] ss:$16 sps:$4 sm:$0xff]  }
 0x31e   :  { %7837 = vmatpush1.bf16.msra.mxu0 %v11348_v15  ;;  %7510 = vmatprep.subr.bf16.mxu1 %v11353_v2  ;;  %v11432_v15 = vld [vmem:[%s15274_s3 + $0x6e8] ss:$16 sps:$4 sm:$0xff]   ;;  %v11437_v2 = vld [vmem:[%s15274_s3 + $0x704] ss:$16 sps:$4 sm:$0xff]  }
 0x31f   :  { %7838 = vmatprep.subr.bf16.mxu0 %v11356_v45  ;;  %v11440_v45 = vld [vmem:[%s15274_s3 + $0x70c] ss:$16 sps:$4 sm:$0xff]  }
 0x321   :  { %7511 = vmatpush1.bf16.msra.mxu1 %v11351_v6  ;;  %v11435_v6 = vld [vmem:[%s15274_s3 + $0x700] ss:$16 sps:$4 sm:$0xff]  }
 0x322   :  { %7839 = vmatpush1.bf16.msra.mxu0 %v11354_v25  ;;  %7512 = vmatprep.subr.bf16.mxu1 %v11359_v39  ;;  %v11438_v25 = vld [vmem:[%s15274_s3 + $0x708] ss:$16 sps:$4 sm:$0xff]   ;;  %v11443_v39 = vld [vmem:[%s15274_s3 + $0x724] ss:$16 sps:$4 sm:$0xff]  }
 0x323   :  { %7840 = vmatprep.subr.bf16.mxu0 %v11362_v60  ;;  %v11446_v60 = vld [vmem:[%s15274_s3 + $0x72c] ss:$16 sps:$4 sm:$0xff]  }
 0x325   :  { %7513 = vmatpush1.bf16.msra.mxu1 %v11357_v42  ;;  %v11441_v42 = vld [vmem:[%s15274_s3 + $0x720] ss:$16 sps:$4 sm:$0xff]  }
 0x326   :  { %7841 = vmatpush1.bf16.msra.mxu0 %v11360_v35  ;;  %7514 = vmatprep.subr.bf16.mxu1 %v11365_v37  ;;  %v11444_v35 = vld [vmem:[%s15274_s3 + $0x728] ss:$16 sps:$4 sm:$0xff]   ;;  %v11449_v37 = vld [vmem:[%s15274_s3 + $0x744] ss:$16 sps:$4 sm:$0xff]  }
 0x327   :  { %7842 = vmatprep.subr.bf16.mxu0 %v11368_v52  ;;  %v11452_v52 = vld [vmem:[%s15274_s3 + $0x74c] ss:$16 sps:$4 sm:$0xff]  }
 0x329   :  { %7515 = vmatpush1.bf16.msra.mxu1 %v11363_v44  ;;  %v11447_v44 = vld [vmem:[%s15274_s3 + $0x740] ss:$16 sps:$4 sm:$0xff]  }
 0x32a   :  { %7843 = vmatpush1.bf16.msra.mxu0 %v11366_v34  ;;  %7516 = vmatprep.subr.bf16.mxu1 %v11371_v46  ;;  %v11450_v34 = vld [vmem:[%s15274_s3 + $0x748] ss:$16 sps:$4 sm:$0xff]   ;;  %v11455_v46 = vld [vmem:[%s15274_s3 + $0x764] ss:$16 sps:$4 sm:$0xff]  }
 0x32b   :  { %7844 = vmatprep.subr.bf16.mxu0 %v11374_v47  ;;  %v11458_v47 = vld [vmem:[%s15274_s3 + $0x76c] ss:$16 sps:$4 sm:$0xff]  }
 0x32d   :  { %7517 = vmatpush1.bf16.msra.mxu1 %v11369_v38  ;;  %v11453_v38 = vld [vmem:[%s15274_s3 + $0x760] ss:$16 sps:$4 sm:$0xff]  }
 0x32e   :  { %7845 = vmatpush1.bf16.msra.mxu0 %v11372_v13  ;;  %7518 = vmatprep.subr.bf16.mxu1 %v11377_v57  ;;  %v11456_v13 = vld [vmem:[%s15274_s3 + $0x768] ss:$16 sps:$4 sm:$0xff]   ;;  %v11461_v57 = vld [vmem:[%s15274_s3 + $0x784] ss:$16 sps:$4 sm:$0xff]  }
 0x32f   :  { %7846 = vmatprep.subr.bf16.mxu0 %v11380_v62  ;;  %v11464_v62 = vld [vmem:[%s15274_s3 + $0x78c] ss:$16 sps:$4 sm:$0xff]  }
 0x331   :  { %7519 = vmatpush1.bf16.msra.mxu1 %v11375_v19  ;;  %v11459_v19 = vld [vmem:[%s15274_s3 + $0x780] ss:$16 sps:$4 sm:$0xff]  }
 0x332   :  { %7847 = vmatpush1.bf16.msra.mxu0 %v11378_v58  ;;  %7520 = vmatprep.subr.bf16.mxu1 %v11383_v29  ;;  %v11462_v58 = vld [vmem:[%s15274_s3 + $0x788] ss:$16 sps:$4 sm:$0xff]   ;;  %v11467_v29 = vld [vmem:[%s15274_s3 + $0x7a4] ss:$16 sps:$4 sm:$0xff]  }
 0x333   :  { %7848 = vmatprep.subr.bf16.mxu0 %v11386_v8  ;;  %v11470_v8 = vld [vmem:[%s15274_s3 + $0x7ac] ss:$16 sps:$4 sm:$0xff]  }
 0x335   :  { %7521 = vmatpush1.bf16.msra.mxu1 %v11381_v11  ;;  %v11465_v11 = vld [vmem:[%s15274_s3 + $0x7a0] ss:$16 sps:$4 sm:$0xff]  }
 0x336   :  { %7849 = vmatpush1.bf16.msra.mxu0 %v11384_v63  ;;  %7531 = vmatprep.subr.bf16.mxu1 %v11389_v56  ;;  %v11468_v63 = vld [vmem:[%s15274_s3 + $0x7a8] ss:$16 sps:$4 sm:$0xff]   ;;  %v11473_v56 = vld [vmem:[%s15274_s3 + $0x7c4] ss:$16 sps:$4 sm:$0xff]  }
 0x337   :  { %7859 = vmatprep.subr.bf16.mxu0 %v11392_v7  ;;  %v11476_v7 = vld [vmem:[%s15274_s3 + $0x7cc] ss:$16 sps:$4 sm:$0xff]  }
 0x338   :  { %7523 = vmatmul.mubr.bf16.vlgmr.msra.gmra.mrb[192].mxu1 %v13705_v4 }
 0x339   :  { %7851 = vmatmul.mubr.bf16.vlgmr.msra.gmra.mrb[208].mxu0 %v13705_v4  ;;  %7532 = vmatpush1.bf16.msra.mxu1 %v11387_v20  ;;  %v11471_v20 = vld [vmem:[%s15274_s3 + $0x7c0] ss:$16 sps:$4 sm:$0xff]  }
 0x33a   :  { %7563 = vmatprep.mubr.bf16.mxu1 %v4782_v23  ;;  %7860 = vmatpush1.bf16.msra.mxu0 %v11390_v40  ;;  %v11474_v40 = vld [vmem:[%s15274_s3 + $0x7c8] ss:$16 sps:$4 sm:$0xff]  }
 0x33b   :  { %7891 = vmatprep.mubr.bf16.mxu0 %v4782_v23  ;;  %7533 = vmatprep.subr.bf16.mxu1 %v11395_v12  ;;  %v11479_v12 = vld [vmem:[%s15274_s3 + $0x7e4] ss:$16 sps:$4 sm:$0xff]   ;;  %v11482_v23 = vld [vmem:[%s15274_s3 + $0x7ec] ss:$16 sps:$4 sm:$0xff]  }
 0x33c   :  { %7861 = vmatprep.subr.bf16.mxu0 %v11398_v54  ;;  %v11477_v54 = vld [vmem:[%s15274_s3 + $0x7e0] ss:$16 sps:$4 sm:$0xff]  }
 0x33d   :  { %7534 = vmatpush1.bf16.msra.mxu1 %v11393_v43  ;;  %v11480_v43 = vld [vmem:[%s15274_s3 + $0x7e8] ss:$16 sps:$4 sm:$0xff]  }
 0x33e   :  { %7862 = vmatpush1.bf16.msra.mxu0 %v11396_v48  ;;  %7535 = vmatprep.subr.bf16.mxu1 %v11401_v0  ;;  %v11485_v48 = vld [vmem:[%s15274_s3 + $0x804] ss:$16 sps:$4 sm:$0xff]   ;;  %v11488_v0 = vld [vmem:[%s15274_s3 + $0x80c] ss:$16 sps:$4 sm:$0xff]  }
 0x33f   :  { %7863 = vmatprep.subr.bf16.mxu0 %v11404_v61  ;;  %v4798_v61 = vcombine.high %v13685_v51, %v13685_v51 }
 0x341   :  { %7536 = vmatpush1.bf16.msra.mxu1 %v11399_v24  ;;  %v11483_v24 = vld [vmem:[%s15274_s3 + $0x800] ss:$16 sps:$4 sm:$0xff]   ;;  %v14310_v51 = vrot.slane %v4798_v61, %v13682_v17  ;;  %v11497_v17 = vld [vmem:[%s15274_s3 + $0x844] ss:$16 sps:$4 sm:$0xff]   ;;  %v11570_v61 = vld [vmem:[%s15274_s3 + $0x9c8] ss:$16 sps:$4 sm:$0xff]  }
 0x342   :  { %7864 = vmatpush1.bf16.msra.mxu0 %v11402_v14  ;;  %7537 = vmatprep.subr.bf16.mxu1 %v11407_v26  ;;  %v4780_v14 = vcombine.high %v13705_v4, %v13705_v4  ;;  %v11486_v26 = vld [vmem:[%s15274_s3 + $0x808] ss:$16 sps:$4 sm:$0xff]   ;;  %v11489_v4 = vld [vmem:[%s15274_s3 + $0x820] ss:$16 sps:$4 sm:$0xff]  }
 0x343   :  { %7865 = vmatprep.subr.bf16.mxu0 %v11410_v21  ;;  %v11491_v21 = vld [vmem:[%s15274_s3 + $0x824] ss:$16 sps:$4 sm:$0xff]  }
 0x345   :  { %7538 = vmatpush1.bf16.msra.mxu1 %v11405_v3  ;;  %v11494_v3 = vld [vmem:[%s15274_s3 + $0x82c] ss:$16 sps:$4 sm:$0xff]  }
 0x346   :  { %7866 = vmatpush1.bf16.msra.mxu0 %v11408_v32  ;;  %7539 = vmatprep.subr.bf16.mxu1 %v11413_v50  ;;  %v11492_v32 = vld [vmem:[%s15274_s3 + $0x828] ss:$16 sps:$4 sm:$0xff]   ;;  %v11500_v50 = vld [vmem:[%s15274_s3 + $0x84c] ss:$16 sps:$4 sm:$0xff]  }
 0x347   :  { %7867 = vmatprep.subr.bf16.mxu0 %v11416_v41  ;;  %v11495_v41 = vld [vmem:[%s15274_s3 + $0x840] ss:$16 sps:$4 sm:$0xff]  }
 0x349   :  { %7540 = vmatpush1.bf16.msra.mxu1 %v11411_v36  ;;  %v11498_v36 = vld [vmem:[%s15274_s3 + $0x848] ss:$16 sps:$4 sm:$0xff]  }
 0x34a   :  { %7868 = vmatpush1.bf16.msra.mxu0 %v11414_v9  ;;  %7541 = vmatprep.subr.bf16.mxu1 %v11419_v59  ;;  %v11503_v9 = vld [vmem:[%s15274_s3 + $0x864] ss:$16 sps:$4 sm:$0xff]   ;;  %v11506_v59 = vld [vmem:[%s15274_s3 + $0x86c] ss:$16 sps:$4 sm:$0xff]  }
 0x34b   :  { %7869 = vmatprep.subr.bf16.mxu0 %v11422_v16  ;;  %v11501_v16 = vld [vmem:[%s15274_s3 + $0x860] ss:$16 sps:$4 sm:$0xff]  }
 0x34d   :  { %7542 = vmatpush1.bf16.msra.mxu1 %v11417_v55  ;;  %v11504_v55 = vld [vmem:[%s15274_s3 + $0x868] ss:$16 sps:$4 sm:$0xff]  }
 0x34e   :  { %7870 = vmatpush1.bf16.msra.mxu0 %v11420_v18  ;;  %7543 = vmatprep.subr.bf16.mxu1 %v11425_v5  ;;  %v11509_v18 = vld [vmem:[%s15274_s3 + $0x884] ss:$16 sps:$4 sm:$0xff]   ;;  %v11512_v5 = vld [vmem:[%s15274_s3 + $0x88c] ss:$16 sps:$4 sm:$0xff]  }
 0x34f   :  { %7871 = vmatprep.subr.bf16.mxu0 %v11428_v10  ;;  %v11507_v10 = vld [vmem:[%s15274_s3 + $0x880] ss:$16 sps:$4 sm:$0xff]  }
 0x351   :  { %7544 = vmatpush1.bf16.msra.mxu1 %v11423_v53  ;;  %v11510_v53 = vld [vmem:[%s15274_s3 + $0x888] ss:$16 sps:$4 sm:$0xff]  }
 0x352   :  { %7872 = vmatpush1.bf16.msra.mxu0 %v11426_v27  ;;  %7545 = vmatprep.subr.bf16.mxu1 %v11431_v22  ;;  %v11515_v27 = vld [vmem:[%s15274_s3 + $0x8a4] ss:$16 sps:$4 sm:$0xff]   ;;  %v11518_v22 = vld [vmem:[%s15274_s3 + $0x8ac] ss:$16 sps:$4 sm:$0xff]  }
 0x353   :  { %7873 = vmatprep.subr.bf16.mxu0 %v11434_v28  ;;  %v11513_v28 = vld [vmem:[%s15274_s3 + $0x8a0] ss:$16 sps:$4 sm:$0xff]  }
 0x355   :  { %7546 = vmatpush1.bf16.msra.mxu1 %v11429_v30  ;;  %v11516_v30 = vld [vmem:[%s15274_s3 + $0x8a8] ss:$16 sps:$4 sm:$0xff]  }
 0x356   :  { %7874 = vmatpush1.bf16.msra.mxu0 %v11432_v15  ;;  %7547 = vmatprep.subr.bf16.mxu1 %v11437_v2  ;;  %v11521_v15 = vld [vmem:[%s15274_s3 + $0x8c4] ss:$16 sps:$4 sm:$0xff]   ;;  %v11524_v2 = vld [vmem:[%s15274_s3 + $0x8cc] ss:$16 sps:$4 sm:$0xff]  }
 0x357   :  { %7875 = vmatprep.subr.bf16.mxu0 %v11440_v45  ;;  %v11519_v45 = vld [vmem:[%s15274_s3 + $0x8c0] ss:$16 sps:$4 sm:$0xff]  }
 0x359   :  { %7548 = vmatpush1.bf16.msra.mxu1 %v11435_v6  ;;  %v11522_v6 = vld [vmem:[%s15274_s3 + $0x8c8] ss:$16 sps:$4 sm:$0xff]  }
 0x35a   :  { %7876 = vmatpush1.bf16.msra.mxu0 %v11438_v25  ;;  %7549 = vmatprep.subr.bf16.mxu1 %v11443_v39  ;;  %v11527_v25 = vld [vmem:[%s15274_s3 + $0x8e4] ss:$16 sps:$4 sm:$0xff]   ;;  %v11530_v39 = vld [vmem:[%s15274_s3 + $0x8ec] ss:$16 sps:$4 sm:$0xff]  }
 0x35b   :  { %7877 = vmatprep.subr.bf16.mxu0 %v11446_v60  ;;  %v11525_v60 = vld [vmem:[%s15274_s3 + $0x8e0] ss:$16 sps:$4 sm:$0xff]  }
 0x35d   :  { %7550 = vmatpush1.bf16.msra.mxu1 %v11441_v42  ;;  %v11528_v42 = vld [vmem:[%s15274_s3 + $0x8e8] ss:$16 sps:$4 sm:$0xff]  }
 0x35e   :  { %7878 = vmatpush1.bf16.msra.mxu0 %v11444_v35  ;;  %7551 = vmatprep.subr.bf16.mxu1 %v11449_v37  ;;  %v11533_v35 = vld [vmem:[%s15274_s3 + $0x904] ss:$16 sps:$4 sm:$0xff]   ;;  %v11536_v37 = vld [vmem:[%s15274_s3 + $0x90c] ss:$16 sps:$4 sm:$0xff]  }
 0x35f   :  { %7879 = vmatprep.subr.bf16.mxu0 %v11452_v52  ;;  %v11531_v52 = vld [vmem:[%s15274_s3 + $0x900] ss:$16 sps:$4 sm:$0xff]  }
 0x361   :  { %7552 = vmatpush1.bf16.msra.mxu1 %v11447_v44  ;;  %v11534_v44 = vld [vmem:[%s15274_s3 + $0x908] ss:$16 sps:$4 sm:$0xff]  }
 0x362   :  { %7880 = vmatpush1.bf16.msra.mxu0 %v11450_v34  ;;  %7553 = vmatprep.subr.bf16.mxu1 %v11455_v46  ;;  %v11539_v34 = vld [vmem:[%s15274_s3 + $0x924] ss:$16 sps:$4 sm:$0xff]   ;;  %v11542_v46 = vld [vmem:[%s15274_s3 + $0x92c] ss:$16 sps:$4 sm:$0xff]  }
 0x363   :  { %7881 = vmatprep.subr.bf16.mxu0 %v11458_v47  ;;  %v11537_v47 = vld [vmem:[%s15274_s3 + $0x920] ss:$16 sps:$4 sm:$0xff]  }
 0x365   :  { %7554 = vmatpush1.bf16.msra.mxu1 %v11453_v38  ;;  %v11540_v38 = vld [vmem:[%s15274_s3 + $0x928] ss:$16 sps:$4 sm:$0xff]  }
 0x366   :  { %7882 = vmatpush1.bf16.msra.mxu0 %v11456_v13  ;;  %7555 = vmatprep.subr.bf16.mxu1 %v11461_v57  ;;  %v11545_v13 = vld [vmem:[%s15274_s3 + $0x944] ss:$16 sps:$4 sm:$0xff]   ;;  %v11548_v57 = vld [vmem:[%s15274_s3 + $0x94c] ss:$16 sps:$4 sm:$0xff]  }
 0x367   :  { %7883 = vmatprep.subr.bf16.mxu0 %v11464_v62  ;;  %v11543_v62 = vld [vmem:[%s15274_s3 + $0x940] ss:$16 sps:$4 sm:$0xff]  }
 0x369   :  { %7556 = vmatpush1.bf16.msra.mxu1 %v11459_v19  ;;  %v11546_v19 = vld [vmem:[%s15274_s3 + $0x948] ss:$16 sps:$4 sm:$0xff]  }
 0x36a   :  { %7884 = vmatpush1.bf16.msra.mxu0 %v11462_v58  ;;  %7557 = vmatprep.subr.bf16.mxu1 %v11467_v29  ;;  %v11551_v58 = vld [vmem:[%s15274_s3 + $0x964] ss:$16 sps:$4 sm:$0xff]   ;;  %v11554_v29 = vld [vmem:[%s15274_s3 + $0x96c] ss:$16 sps:$4 sm:$0xff]  }
 0x36b   :  { %7885 = vmatprep.subr.bf16.mxu0 %v11470_v8  ;;  %v11549_v8 = vld [vmem:[%s15274_s3 + $0x960] ss:$16 sps:$4 sm:$0xff]  }
 0x36d   :  { %7558 = vmatpush1.bf16.msra.mxu1 %v11465_v11  ;;  %v11552_v11 = vld [vmem:[%s15274_s3 + $0x968] ss:$16 sps:$4 sm:$0xff]  }
 0x36e   :  { %7886 = vmatpush1.bf16.msra.mxu0 %v11468_v63  ;;  %7559 = vmatprep.subr.bf16.mxu1 %v11473_v56  ;;  %v11557_v63 = vld [vmem:[%s15274_s3 + $0x984] ss:$16 sps:$4 sm:$0xff]   ;;  %v11560_v56 = vld [vmem:[%s15274_s3 + $0x98c] ss:$16 sps:$4 sm:$0xff]  }
 0x36f   :  { %7887 = vmatprep.subr.bf16.mxu0 %v11476_v7  ;;  %v11555_v7 = vld [vmem:[%s15274_s3 + $0x980] ss:$16 sps:$4 sm:$0xff]  }
 0x371   :  { %7560 = vmatpush1.bf16.msra.mxu1 %v11471_v20  ;;  %v11558_v20 = vld [vmem:[%s15274_s3 + $0x988] ss:$16 sps:$4 sm:$0xff]  }
 0x372   :  { %7888 = vmatpush1.bf16.msra.mxu0 %v11474_v40  ;;  %7561 = vmatprep.subr.bf16.mxu1 %v11479_v12  ;;  %v11563_v40 = vld [vmem:[%s15274_s3 + $0x9a4] ss:$16 sps:$4 sm:$0xff]   ;;  %v11566_v12 = vld [vmem:[%s15274_s3 + $0x9ac] ss:$16 sps:$4 sm:$0xff]  }
 0x373   :  { %7889 = vmatprep.subr.bf16.mxu0 %v11482_v23  ;;  %v11561_v23 = vld [vmem:[%s15274_s3 + $0x9a0] ss:$16 sps:$4 sm:$0xff]  }
 0x375   :  { %7562 = vmatpush1.bf16.msra.mxu1 %v11477_v54  ;;  %v11564_v54 = vld [vmem:[%s15274_s3 + $0x9a8] ss:$16 sps:$4 sm:$0xff]  }
 0x376   :  { %7890 = vmatpush1.bf16.msra.mxu0 %v11480_v43  ;;  %7572 = vmatprep.subr.bf16.mxu1 %v11485_v48  ;;  %v11569_v43 = vld [vmem:[%s15274_s3 + $0x9c4] ss:$16 sps:$4 sm:$0xff]   ;;  %v11572_v48 = vld [vmem:[%s15274_s3 + $0x9cc] ss:$16 sps:$4 sm:$0xff]  }
 0x377   :  { %7900 = vmatprep.subr.bf16.mxu0 %v11488_v0  ;;  %v11567_v0 = vld [vmem:[%s15274_s3 + $0x9c0] ss:$16 sps:$4 sm:$0xff]  }
 0x378   :  { %7564 = vmatmul.mubr.bf16.vlgmr.msra.gmra.mrb[192].mxu1 %v4780_v14 }
 0x379   :  { %7892 = vmatmul.mubr.bf16.vlgmr.msra.gmra.mrb[208].mxu0 %v4780_v14  ;;  %7573 = vmatpush1.bf16.msra.mxu1 %v11483_v24  ;;  %v11575_v24 = vld [vmem:[%s15274_s3 + $0x9e4] ss:$16 sps:$4 sm:$0xff]   ;;  %v11578_v14 = vld [vmem:[%s15274_s3 + $0x9ec] ss:$16 sps:$4 sm:$0xff]  }
 0x37a   :  { %7604 = vmatprep.mubr.bf16.mxu1 %v14310_v51  ;;  %7901 = vmatpush1.bf16.msra.mxu0 %v11486_v26  ;;  %v11573_v26 = vld [vmem:[%s15274_s3 + $0x9e0] ss:$16 sps:$4 sm:$0xff]  }
 0x37b   :  { %7932 = vmatprep.mubr.bf16.mxu0 %v14310_v51  ;;  %7574 = vmatprep.subr.bf16.mxu1 %v11491_v21  ;;  %v11576_v21 = vld [vmem:[%s15274_s3 + $0x9e8] ss:$16 sps:$4 sm:$0xff]  }
 0x37c   :  { %7902 = vmatprep.subr.bf16.mxu0 %v11494_v3  ;;  %v11581_v3 = vld [vmem:[%s15274_s3 + $0xa04] ss:$16 sps:$4 sm:$0xff]  }
 0x37d   :  { %7575 = vmatpush1.bf16.msra.mxu1 %v11489_v4  ;;  %v11584_v4 = vld [vmem:[%s15274_s3 + $0xa0c] ss:$16 sps:$4 sm:$0xff]  }
 0x37e   :  { %7903 = vmatpush1.bf16.msra.mxu0 %v11492_v32  ;;  %7576 = vmatprep.subr.bf16.mxu1 %v11497_v17  ;;  %v11579_v32 = vld [vmem:[%s15274_s3 + $0xa00] ss:$16 sps:$4 sm:$0xff]   ;;  %v11582_v17 = vld [vmem:[%s15274_s3 + $0xa08] ss:$16 sps:$4 sm:$0xff]  }
 0x37f   :  { %7904 = vmatprep.subr.bf16.mxu0 %v11500_v50  ;;  %v11587_v50 = vld [vmem:[%s15274_s3 + $0xa24] ss:$16 sps:$4 sm:$0xff]  }
 0x381   :  { %7577 = vmatpush1.bf16.msra.mxu1 %v11495_v41  ;;  %v4830_v41 = vcombine.high %v14310_v51, %v14310_v51  ;;  %v11593_v51 = vld [vmem:[%s15274_s3 + $0xa44] ss:$16 sps:$4 sm:$0xff]  }
 0x382   :  { %7905 = vmatpush1.bf16.msra.mxu0 %v11498_v36  ;;  %7578 = vmatprep.subr.bf16.mxu1 %v11503_v9  ;;  %v11590_v36 = vld [vmem:[%s15274_s3 + $0xa2c] ss:$16 sps:$4 sm:$0xff]   ;;  %v11585_v9 = vld [vmem:[%s15274_s3 + $0xa20] ss:$16 sps:$4 sm:$0xff]  }
 0x383   :  { %7906 = vmatprep.subr.bf16.mxu0 %v11506_v59  ;;  %v11588_v59 = vld [vmem:[%s15274_s3 + $0xa28] ss:$16 sps:$4 sm:$0xff]  }
 0x385   :  { %7579 = vmatpush1.bf16.msra.mxu1 %v11501_v16  ;;  %v11596_v16 = vld [vmem:[%s15274_s3 + $0xa4c] ss:$16 sps:$4 sm:$0xff]  }
 0x386   :  { %7907 = vmatpush1.bf16.msra.mxu0 %v11504_v55  ;;  %7580 = vmatprep.subr.bf16.mxu1 %v11509_v18  ;;  %v11591_v55 = vld [vmem:[%s15274_s3 + $0xa40] ss:$16 sps:$4 sm:$0xff]   ;;  %v11594_v18 = vld [vmem:[%s15274_s3 + $0xa48] ss:$16 sps:$4 sm:$0xff]  }
 0x387   :  { %7908 = vmatprep.subr.bf16.mxu0 %v11512_v5  ;;  %v11599_v5 = vld [vmem:[%s15274_s3 + $0xa64] ss:$16 sps:$4 sm:$0xff]  }
 0x389   :  { %7581 = vmatpush1.bf16.msra.mxu1 %v11507_v10  ;;  %v11602_v10 = vld [vmem:[%s15274_s3 + $0xa6c] ss:$16 sps:$4 sm:$0xff]  }
 0x38a   :  { %7909 = vmatpush1.bf16.msra.mxu0 %v11510_v53  ;;  %7582 = vmatprep.subr.bf16.mxu1 %v11515_v27  ;;  %v11597_v53 = vld [vmem:[%s15274_s3 + $0xa60] ss:$16 sps:$4 sm:$0xff]   ;;  %v11600_v27 = vld [vmem:[%s15274_s3 + $0xa68] ss:$16 sps:$4 sm:$0xff]  }
 0x38b   :  { %7910 = vmatprep.subr.bf16.mxu0 %v11518_v22  ;;  %v11605_v22 = vld [vmem:[%s15274_s3 + $0xa84] ss:$16 sps:$4 sm:$0xff]  }
 0x38d   :  { %7583 = vmatpush1.bf16.msra.mxu1 %v11513_v28  ;;  %v11608_v28 = vld [vmem:[%s15274_s3 + $0xa8c] ss:$16 sps:$4 sm:$0xff]  }
 0x38e   :  { %7911 = vmatpush1.bf16.msra.mxu0 %v11516_v30  ;;  %7584 = vmatprep.subr.bf16.mxu1 %v11521_v15  ;;  %v11603_v30 = vld [vmem:[%s15274_s3 + $0xa80] ss:$16 sps:$4 sm:$0xff]   ;;  %v11606_v15 = vld [vmem:[%s15274_s3 + $0xa88] ss:$16 sps:$4 sm:$0xff]  }
 0x38f   :  { %7912 = vmatprep.subr.bf16.mxu0 %v11524_v2  ;;  %v11611_v2 = vld [vmem:[%s15274_s3 + $0xaa4] ss:$16 sps:$4 sm:$0xff]  }
 0x391   :  { %7585 = vmatpush1.bf16.msra.mxu1 %v11519_v45  ;;  %v11614_v45 = vld [vmem:[%s15274_s3 + $0xaac] ss:$16 sps:$4 sm:$0xff]  }
 0x392   :  { %7913 = vmatpush1.bf16.msra.mxu0 %v11522_v6  ;;  %7586 = vmatprep.subr.bf16.mxu1 %v11527_v25  ;;  %v11609_v6 = vld [vmem:[%s15274_s3 + $0xaa0] ss:$16 sps:$4 sm:$0xff]   ;;  %v11612_v25 = vld [vmem:[%s15274_s3 + $0xaa8] ss:$16 sps:$4 sm:$0xff]  }
 0x393   :  { %7914 = vmatprep.subr.bf16.mxu0 %v11530_v39  ;;  %v11617_v39 = vld [vmem:[%s15274_s3 + $0xac4] ss:$16 sps:$4 sm:$0xff]  }
 0x395   :  { %7587 = vmatpush1.bf16.msra.mxu1 %v11525_v60  ;;  %v11620_v60 = vld [vmem:[%s15274_s3 + $0xacc] ss:$16 sps:$4 sm:$0xff]  }
 0x396   :  { %7915 = vmatpush1.bf16.msra.mxu0 %v11528_v42  ;;  %7588 = vmatprep.subr.bf16.mxu1 %v11533_v35  ;;  %v11615_v42 = vld [vmem:[%s15274_s3 + $0xac0] ss:$16 sps:$4 sm:$0xff]   ;;  %v11618_v35 = vld [vmem:[%s15274_s3 + $0xac8] ss:$16 sps:$4 sm:$0xff]  }
 0x397   :  { %7916 = vmatprep.subr.bf16.mxu0 %v11536_v37  ;;  %v11623_v37 = vld [vmem:[%s15274_s3 + $0xae4] ss:$16 sps:$4 sm:$0xff]  }
 0x399   :  { %7589 = vmatpush1.bf16.msra.mxu1 %v11531_v52  ;;  %v11626_v52 = vld [vmem:[%s15274_s3 + $0xaec] ss:$16 sps:$4 sm:$0xff]  }
 0x39a   :  { %7917 = vmatpush1.bf16.msra.mxu0 %v11534_v44  ;;  %7590 = vmatprep.subr.bf16.mxu1 %v11539_v34  ;;  %v11621_v44 = vld [vmem:[%s15274_s3 + $0xae0] ss:$16 sps:$4 sm:$0xff]   ;;  %v11624_v34 = vld [vmem:[%s15274_s3 + $0xae8] ss:$16 sps:$4 sm:$0xff]  }
 0x39b   :  { %7918 = vmatprep.subr.bf16.mxu0 %v11542_v46  ;;  %v11629_v46 = vld [vmem:[%s15274_s3 + $0xb04] ss:$16 sps:$4 sm:$0xff]  }
 0x39d   :  { %7591 = vmatpush1.bf16.msra.mxu1 %v11537_v47  ;;  %v11632_v47 = vld [vmem:[%s15274_s3 + $0xb0c] ss:$16 sps:$4 sm:$0xff]  }
 0x39e   :  { %7919 = vmatpush1.bf16.msra.mxu0 %v11540_v38  ;;  %7592 = vmatprep.subr.bf16.mxu1 %v11545_v13  ;;  %v11627_v38 = vld [vmem:[%s15274_s3 + $0xb00] ss:$16 sps:$4 sm:$0xff]   ;;  %v11630_v13 = vld [vmem:[%s15274_s3 + $0xb08] ss:$16 sps:$4 sm:$0xff]  }
 0x39f   :  { %7920 = vmatprep.subr.bf16.mxu0 %v11548_v57  ;;  %v11635_v57 = vld [vmem:[%s15274_s3 + $0xb24] ss:$16 sps:$4 sm:$0xff]  }
 0x3a1   :  { %7593 = vmatpush1.bf16.msra.mxu1 %v11543_v62  ;;  %v11638_v62 = vld [vmem:[%s15274_s3 + $0xb2c] ss:$16 sps:$4 sm:$0xff]  }
 0x3a2   :  { %7921 = vmatpush1.bf16.msra.mxu0 %v11546_v19  ;;  %7594 = vmatprep.subr.bf16.mxu1 %v11551_v58  ;;  %v11633_v19 = vld [vmem:[%s15274_s3 + $0xb20] ss:$16 sps:$4 sm:$0xff]   ;;  %v11636_v58 = vld [vmem:[%s15274_s3 + $0xb28] ss:$16 sps:$4 sm:$0xff]  }
 0x3a3   :  { %7922 = vmatprep.subr.bf16.mxu0 %v11554_v29  ;;  %v11641_v29 = vld [vmem:[%s15274_s3 + $0xb44] ss:$16 sps:$4 sm:$0xff]  }
 0x3a5   :  { %7595 = vmatpush1.bf16.msra.mxu1 %v11549_v8  ;;  %v11644_v8 = vld [vmem:[%s15274_s3 + $0xb4c] ss:$16 sps:$4 sm:$0xff]  }
 0x3a6   :  { %7923 = vmatpush1.bf16.msra.mxu0 %v11552_v11  ;;  %7596 = vmatprep.subr.bf16.mxu1 %v11557_v63  ;;  %v11639_v11 = vld [vmem:[%s15274_s3 + $0xb40] ss:$16 sps:$4 sm:$0xff]   ;;  %v11642_v63 = vld [vmem:[%s15274_s3 + $0xb48] ss:$16 sps:$4 sm:$0xff]  }
 0x3a7   :  { %7924 = vmatprep.subr.bf16.mxu0 %v11560_v56  ;;  %v11647_v56 = vld [vmem:[%s15274_s3 + $0xb64] ss:$16 sps:$4 sm:$0xff]  }
 0x3a9   :  { %7597 = vmatpush1.bf16.msra.mxu1 %v11555_v7  ;;  %v11650_v7 = vld [vmem:[%s15274_s3 + $0xb6c] ss:$16 sps:$4 sm:$0xff]  }
 0x3aa   :  { %7925 = vmatpush1.bf16.msra.mxu0 %v11558_v20  ;;  %7598 = vmatprep.subr.bf16.mxu1 %v11563_v40  ;;  %v11645_v20 = vld [vmem:[%s15274_s3 + $0xb60] ss:$16 sps:$4 sm:$0xff]   ;;  %v11648_v40 = vld [vmem:[%s15274_s3 + $0xb68] ss:$16 sps:$4 sm:$0xff]  }
 0x3ab   :  { %7926 = vmatprep.subr.bf16.mxu0 %v11566_v12  ;;  %v11653_v12 = vld [vmem:[%s15274_s3 + $0xb84] ss:$16 sps:$4 sm:$0xff]  }
 0x3ad   :  { %7599 = vmatpush1.bf16.msra.mxu1 %v11561_v23  ;;  %v11656_v23 = vld [vmem:[%s15274_s3 + $0xb8c] ss:$16 sps:$4 sm:$0xff]  }
 0x3ae   :  { %7927 = vmatpush1.bf16.msra.mxu0 %v11564_v54  ;;  %7600 = vmatprep.subr.bf16.mxu1 %v11569_v43  ;;  %v11651_v54 = vld [vmem:[%s15274_s3 + $0xb80] ss:$16 sps:$4 sm:$0xff]   ;;  %v11654_v43 = vld [vmem:[%s15274_s3 + $0xb88] ss:$16 sps:$4 sm:$0xff]  }
 0x3af   :  { %7928 = vmatprep.subr.bf16.mxu0 %v11572_v48  ;;  %v11659_v48 = vld [vmem:[%s15274_s3 + $0xba4] ss:$16 sps:$4 sm:$0xff]  }
 0x3b1   :  { %7601 = vmatpush1.bf16.msra.mxu1 %v11567_v0  ;;  %v11662_v0 = vld [vmem:[%s15274_s3 + $0xbac] ss:$16 sps:$4 sm:$0xff]  }
 0x3b2   :  { %7929 = vmatpush1.bf16.msra.mxu0 %v11570_v61  ;;  %7602 = vmatprep.subr.bf16.mxu1 %v11575_v24  ;;  %v11657_v61 = vld [vmem:[%s15274_s3 + $0xba0] ss:$16 sps:$4 sm:$0xff]   ;;  %v11660_v24 = vld [vmem:[%s15274_s3 + $0xba8] ss:$16 sps:$4 sm:$0xff]  }
 0x3b3   :  { %7930 = vmatprep.subr.bf16.mxu0 %v11578_v14  ;;  %v11665_v14 = vld [vmem:[%s15274_s3 + $0xbc4] ss:$16 sps:$4 sm:$0xff]  }
 0x3b5   :  { %7603 = vmatpush1.bf16.msra.mxu1 %v11573_v26  ;;  %v11668_v26 = vld [vmem:[%s15274_s3 + $0xbcc] ss:$16 sps:$4 sm:$0xff]  }
 0x3b6   :  { %7931 = vmatpush1.bf16.msra.mxu0 %v11576_v21  ;;  %7613 = vmatprep.subr.bf16.mxu1 %v11581_v3  ;;  %v11663_v21 = vld [vmem:[%s15274_s3 + $0xbc0] ss:$16 sps:$4 sm:$0xff]   ;;  %v11666_v3 = vld [vmem:[%s15274_s3 + $0xbc8] ss:$16 sps:$4 sm:$0xff]  }
 0x3b7   :  { %7941 = vmatprep.subr.bf16.mxu0 %v11584_v4  ;;  %v11671_v4 = vld [vmem:[%s15274_s3 + $0xbe4] ss:$16 sps:$4 sm:$0xff]  }
 0x3b8   :  { %7605 = vmatmul.mubr.bf16.vlgmr.msra.gmra.mrb[192].mxu1 %v13690_v31 }
 0x3b9   :  { %7933 = vmatmul.mubr.bf16.vlgmr.msra.gmra.mrb[208].mxu0 %v13690_v31  ;;  %7614 = vmatpush1.bf16.msra.mxu1 %v11579_v32  ;;  %v11674_v32 = vld [vmem:[%s15274_s3 + $0xbec] ss:$16 sps:$4 sm:$0xff]  }
 0x3ba   :  { %7645 = vmatprep.mubr.bf16.mxu1 %v4830_v41  ;;  %7942 = vmatpush1.bf16.msra.mxu0 %v11582_v17  ;;  %v11669_v17 = vld [vmem:[%s15274_s3 + $0xbe0] ss:$16 sps:$4 sm:$0xff]  }
 0x3bb   :  { %7973 = vmatprep.mubr.bf16.mxu0 %v4830_v41  ;;  %7615 = vmatprep.subr.bf16.mxu1 %v11587_v50  ;;  %v11672_v50 = vld [vmem:[%s15274_s3 + $0xbe8] ss:$16 sps:$4 sm:$0xff]   ;;  %v11677_v41 = vld [vmem:[%s15274_s3 + $0xc04] ss:$16 sps:$4 sm:$0xff]  }
 0x3bc   :  { %7943 = vmatprep.subr.bf16.mxu0 %v11590_v36  ;;  %v11680_v36 = vld [vmem:[%s15274_s3 + $0xc0c] ss:$16 sps:$4 sm:$0xff]  }
 0x3bd   :  { %7616 = vmatpush1.bf16.msra.mxu1 %v11585_v9  ;;  %v11675_v9 = vld [vmem:[%s15274_s3 + $0xc00] ss:$16 sps:$4 sm:$0xff]  }
 0x3be   :  { %7944 = vmatpush1.bf16.msra.mxu0 %v11588_v59  ;;  %7617 = vmatprep.subr.bf16.mxu1 %v11593_v51  ;;  %v4828_v59 = vcombine.high %v13690_v31, %v13690_v31  ;;  %v11678_v51 = vld [vmem:[%s15274_s3 + $0xc08] ss:$16 sps:$4 sm:$0xff]   ;;  %v11682_v31 = vld [vmem:[%s15274_s3 + $0xc20] ss:$16 sps:$4 sm:$0xff]  }
 0x3bf   :  { %7945 = vmatprep.subr.bf16.mxu0 %v11596_v16  ;;  %v11684_v16 = vld [vmem:[%s15274_s3 + $0xc24] ss:$16 sps:$4 sm:$0xff]  }
 0x3c1   :  { %7618 = vmatpush1.bf16.msra.mxu1 %v11591_v55  ;;  %v11687_v55 = vld [vmem:[%s15274_s3 + $0xc2c] ss:$16 sps:$4 sm:$0xff]  }
 0x3c2   :  { %7946 = vmatpush1.bf16.msra.mxu0 %v11594_v18  ;;  %7619 = vmatprep.subr.bf16.mxu1 %v11599_v5  ;;  %v11685_v18 = vld [vmem:[%s15274_s3 + $0xc28] ss:$16 sps:$4 sm:$0xff]   ;;  %v11690_v5 = vld [vmem:[%s15274_s3 + $0xc44] ss:$16 sps:$4 sm:$0xff]  }
 0x3c3   :  { %7947 = vmatprep.subr.bf16.mxu0 %v11602_v10  ;;  %v11693_v10 = vld [vmem:[%s15274_s3 + $0xc4c] ss:$16 sps:$4 sm:$0xff]  }
 0x3c5   :  { %7620 = vmatpush1.bf16.msra.mxu1 %v11597_v53  ;;  %v11688_v53 = vld [vmem:[%s15274_s3 + $0xc40] ss:$16 sps:$4 sm:$0xff]  }
 0x3c6   :  { %7948 = vmatpush1.bf16.msra.mxu0 %v11600_v27  ;;  %7621 = vmatprep.subr.bf16.mxu1 %v11605_v22  ;;  %v11691_v27 = vld [vmem:[%s15274_s3 + $0xc48] ss:$16 sps:$4 sm:$0xff]   ;;  %v11696_v22 = vld [vmem:[%s15274_s3 + $0xc64] ss:$16 sps:$4 sm:$0xff]  }
 0x3c7   :  { %7949 = vmatprep.subr.bf16.mxu0 %v11608_v28  ;;  %v11699_v28 = vld [vmem:[%s15274_s3 + $0xc6c] ss:$16 sps:$4 sm:$0xff]  }
 0x3c9   :  { %7622 = vmatpush1.bf16.msra.mxu1 %v11603_v30  ;;  %v11694_v30 = vld [vmem:[%s15274_s3 + $0xc60] ss:$16 sps:$4 sm:$0xff]  }
 0x3ca   :  { %7950 = vmatpush1.bf16.msra.mxu0 %v11606_v15  ;;  %7623 = vmatprep.subr.bf16.mxu1 %v11611_v2  ;;  %v11697_v15 = vld [vmem:[%s15274_s3 + $0xc68] ss:$16 sps:$4 sm:$0xff]   ;;  %v11702_v2 = vld [vmem:[%s15274_s3 + $0xc84] ss:$16 sps:$4 sm:$0xff]  }
 0x3cb   :  { %7951 = vmatprep.subr.bf16.mxu0 %v11614_v45  ;;  %v11705_v45 = vld [vmem:[%s15274_s3 + $0xc8c] ss:$16 sps:$4 sm:$0xff]  }
 0x3cd   :  { %7624 = vmatpush1.bf16.msra.mxu1 %v11609_v6  ;;  %v11700_v6 = vld [vmem:[%s15274_s3 + $0xc80] ss:$16 sps:$4 sm:$0xff]  }
 0x3ce   :  { %7952 = vmatpush1.bf16.msra.mxu0 %v11612_v25  ;;  %7625 = vmatprep.subr.bf16.mxu1 %v11617_v39  ;;  %v11703_v25 = vld [vmem:[%s15274_s3 + $0xc88] ss:$16 sps:$4 sm:$0xff]   ;;  %v11708_v39 = vld [vmem:[%s15274_s3 + $0xca4] ss:$16 sps:$4 sm:$0xff]  }
 0x3cf   :  { %7953 = vmatprep.subr.bf16.mxu0 %v11620_v60  ;;  %v11711_v60 = vld [vmem:[%s15274_s3 + $0xcac] ss:$16 sps:$4 sm:$0xff]  }
 0x3d1   :  { %7626 = vmatpush1.bf16.msra.mxu1 %v11615_v42  ;;  %v11706_v42 = vld [vmem:[%s15274_s3 + $0xca0] ss:$16 sps:$4 sm:$0xff]  }
 0x3d2   :  { %7954 = vmatpush1.bf16.msra.mxu0 %v11618_v35  ;;  %7627 = vmatprep.subr.bf16.mxu1 %v11623_v37  ;;  %v11709_v35 = vld [vmem:[%s15274_s3 + $0xca8] ss:$16 sps:$4 sm:$0xff]   ;;  %v11714_v37 = vld [vmem:[%s15274_s3 + $0xcc4] ss:$16 sps:$4 sm:$0xff]  }
 0x3d3   :  { %7955 = vmatprep.subr.bf16.mxu0 %v11626_v52  ;;  %v11717_v52 = vld [vmem:[%s15274_s3 + $0xccc] ss:$16 sps:$4 sm:$0xff]  }
 0x3d5   :  { %7628 = vmatpush1.bf16.msra.mxu1 %v11621_v44  ;;  %v11712_v44 = vld [vmem:[%s15274_s3 + $0xcc0] ss:$16 sps:$4 sm:$0xff]  }
 0x3d6   :  { %7956 = vmatpush1.bf16.msra.mxu0 %v11624_v34  ;;  %7629 = vmatprep.subr.bf16.mxu1 %v11629_v46  ;;  %v11715_v34 = vld [vmem:[%s15274_s3 + $0xcc8] ss:$16 sps:$4 sm:$0xff]   ;;  %v11720_v46 = vld [vmem:[%s15274_s3 + $0xce4] ss:$16 sps:$4 sm:$0xff]  }
 0x3d7   :  { %7957 = vmatprep.subr.bf16.mxu0 %v11632_v47  ;;  %v11723_v47 = vld [vmem:[%s15274_s3 + $0xcec] ss:$16 sps:$4 sm:$0xff]  }
 0x3d9   :  { %7630 = vmatpush1.bf16.msra.mxu1 %v11627_v38  ;;  %v11718_v38 = vld [vmem:[%s15274_s3 + $0xce0] ss:$16 sps:$4 sm:$0xff]  }
 0x3da   :  { %7958 = vmatpush1.bf16.msra.mxu0 %v11630_v13  ;;  %7631 = vmatprep.subr.bf16.mxu1 %v11635_v57  ;;  %v11721_v13 = vld [vmem:[%s15274_s3 + $0xce8] ss:$16 sps:$4 sm:$0xff]   ;;  %v11726_v57 = vld [vmem:[%s15274_s3 + $0xd04] ss:$16 sps:$4 sm:$0xff]  }
 0x3db   :  { %7959 = vmatprep.subr.bf16.mxu0 %v11638_v62  ;;  %v11729_v62 = vld [vmem:[%s15274_s3 + $0xd0c] ss:$16 sps:$4 sm:$0xff]  }
 0x3dd   :  { %7632 = vmatpush1.bf16.msra.mxu1 %v11633_v19  ;;  %v11724_v19 = vld [vmem:[%s15274_s3 + $0xd00] ss:$16 sps:$4 sm:$0xff]  }
 0x3de   :  { %7960 = vmatpush1.bf16.msra.mxu0 %v11636_v58  ;;  %7633 = vmatprep.subr.bf16.mxu1 %v11641_v29  ;;  %v11727_v58 = vld [vmem:[%s15274_s3 + $0xd08] ss:$16 sps:$4 sm:$0xff]   ;;  %v11732_v29 = vld [vmem:[%s15274_s3 + $0xd24] ss:$16 sps:$4 sm:$0xff]  }
 0x3df   :  { %7961 = vmatprep.subr.bf16.mxu0 %v11644_v8  ;;  %v11735_v8 = vld [vmem:[%s15274_s3 + $0xd2c] ss:$16 sps:$4 sm:$0xff]  }
 0x3e1   :  { %7634 = vmatpush1.bf16.msra.mxu1 %v11639_v11  ;;  %v11730_v11 = vld [vmem:[%s15274_s3 + $0xd20] ss:$16 sps:$4 sm:$0xff]  }
 0x3e2   :  { %7962 = vmatpush1.bf16.msra.mxu0 %v11642_v63  ;;  %7635 = vmatprep.subr.bf16.mxu1 %v11647_v56  ;;  %v11733_v63 = vld [vmem:[%s15274_s3 + $0xd28] ss:$16 sps:$4 sm:$0xff]   ;;  %v11738_v56 = vld [vmem:[%s15274_s3 + $0xd44] ss:$16 sps:$4 sm:$0xff]  }
 0x3e3   :  { %7963 = vmatprep.subr.bf16.mxu0 %v11650_v7  ;;  %v11741_v7 = vld [vmem:[%s15274_s3 + $0xd4c] ss:$16 sps:$4 sm:$0xff]  }
 0x3e5   :  { %7636 = vmatpush1.bf16.msra.mxu1 %v11645_v20  ;;  %v11736_v20 = vld [vmem:[%s15274_s3 + $0xd40] ss:$16 sps:$4 sm:$0xff]  }
 0x3e6   :  { %7964 = vmatpush1.bf16.msra.mxu0 %v11648_v40  ;;  %7637 = vmatprep.subr.bf16.mxu1 %v11653_v12  ;;  %v11739_v40 = vld [vmem:[%s15274_s3 + $0xd48] ss:$16 sps:$4 sm:$0xff]   ;;  %v11744_v12 = vld [vmem:[%s15274_s3 + $0xd64] ss:$16 sps:$4 sm:$0xff]  }
 0x3e7   :  { %7965 = vmatprep.subr.bf16.mxu0 %v11656_v23  ;;  %v11747_v23 = vld [vmem:[%s15274_s3 + $0xd6c] ss:$16 sps:$4 sm:$0xff]  }
 0x3e9   :  { %7638 = vmatpush1.bf16.msra.mxu1 %v11651_v54  ;;  %v11742_v54 = vld [vmem:[%s15274_s3 + $0xd60] ss:$16 sps:$4 sm:$0xff]  }
 0x3ea   :  { %7966 = vmatpush1.bf16.msra.mxu0 %v11654_v43  ;;  %7639 = vmatprep.subr.bf16.mxu1 %v11659_v48  ;;  %v11745_v43 = vld [vmem:[%s15274_s3 + $0xd68] ss:$16 sps:$4 sm:$0xff]   ;;  %v11750_v48 = vld [vmem:[%s15274_s3 + $0xd84] ss:$16 sps:$4 sm:$0xff]  }
 0x3eb   :  { %7967 = vmatprep.subr.bf16.mxu0 %v11662_v0  ;;  %v11753_v0 = vld [vmem:[%s15274_s3 + $0xd8c] ss:$16 sps:$4 sm:$0xff]  }
 0x3ed   :  { %7640 = vmatpush1.bf16.msra.mxu1 %v11657_v61  ;;  %v11748_v61 = vld [vmem:[%s15274_s3 + $0xd80] ss:$16 sps:$4 sm:$0xff]  }
 0x3ee   :  { %7968 = vmatpush1.bf16.msra.mxu0 %v11660_v24  ;;  %7641 = vmatprep.subr.bf16.mxu1 %v11665_v14  ;;  %v11751_v24 = vld [vmem:[%s15274_s3 + $0xd88] ss:$16 sps:$4 sm:$0xff]   ;;  %v11756_v14 = vld [vmem:[%s15274_s3 + $0xda4] ss:$16 sps:$4 sm:$0xff]  }
 0x3ef   :  { %7969 = vmatprep.subr.bf16.mxu0 %v11668_v26  ;;  %v11759_v26 = vld [vmem:[%s15274_s3 + $0xdac] ss:$16 sps:$4 sm:$0xff]  }
 0x3f1   :  { %7642 = vmatpush1.bf16.msra.mxu1 %v11663_v21  ;;  %v11754_v21 = vld [vmem:[%s15274_s3 + $0xda0] ss:$16 sps:$4 sm:$0xff]  }
 0x3f2   :  { %7970 = vmatpush1.bf16.msra.mxu0 %v11666_v3  ;;  %7643 = vmatprep.subr.bf16.mxu1 %v11671_v4  ;;  %v11757_v3 = vld [vmem:[%s15274_s3 + $0xda8] ss:$16 sps:$4 sm:$0xff]   ;;  %v11762_v4 = vld [vmem:[%s15274_s3 + $0xdc4] ss:$16 sps:$4 sm:$0xff]  }
 0x3f3   :  { %7971 = vmatprep.subr.bf16.mxu0 %v11674_v32  ;;  %v11765_v32 = vld [vmem:[%s15274_s3 + $0xdcc] ss:$16 sps:$4 sm:$0xff]  }
 0x3f5   :  { %7644 = vmatpush1.bf16.msra.mxu1 %v11669_v17  ;;  %v11760_v17 = vld [vmem:[%s15274_s3 + $0xdc0] ss:$16 sps:$4 sm:$0xff]  }
 0x3f6   :  { %7972 = vmatpush1.bf16.msra.mxu0 %v11672_v50  ;;  %7654 = vmatprep.subr.bf16.mxu1 %v11677_v41  ;;  %v11763_v50 = vld [vmem:[%s15274_s3 + $0xdc8] ss:$16 sps:$4 sm:$0xff]   ;;  %v11768_v41 = vld [vmem:[%s15274_s3 + $0xde4] ss:$16 sps:$4 sm:$0xff]  }
 0x3f7   :  { %7982 = vmatprep.subr.bf16.mxu0 %v11680_v36  ;;  %v11771_v36 = vld [vmem:[%s15274_s3 + $0xdec] ss:$16 sps:$4 sm:$0xff]  }
 0x3f8   :  { %7646 = vmatmul.mubr.bf16.vlgmr.msra.gmra.mrb[192].mxu1 %v4828_v59 }
 0x3f9   :  { %7974 = vmatmul.mubr.bf16.vlgmr.msra.gmra.mrb[208].mxu0 %v4828_v59  ;;  %7655 = vmatpush1.bf16.msra.mxu1 %v11675_v9  ;;  %v11766_v9 = vld [vmem:[%s15274_s3 + $0xde0] ss:$16 sps:$4 sm:$0xff]   ;;  %v11769_v59 = vld [vmem:[%s15274_s3 + $0xde8] ss:$16 sps:$4 sm:$0xff]  }
 0x3fa   :  { %7686 = vmatprep.mubr.bf16.mxu1 %v13711_v1  ;;  %7983 = vmatpush1.bf16.msra.mxu0 %v11678_v51  ;;  %v11774_v51 = vld [vmem:[%s15274_s3 + $0xe04] ss:$16 sps:$4 sm:$0xff]  }
 0x3fb   :  { %8014 = vmatprep.mubr.bf16.mxu0 %v13711_v1  ;;  %7656 = vmatprep.subr.bf16.mxu1 %v11684_v16  ;;  %v11777_v16 = vld [vmem:[%s15274_s3 + $0xe0c] ss:$16 sps:$4 sm:$0xff]  }
 0x3fc   :  { %7984 = vmatprep.subr.bf16.mxu0 %v11687_v55  ;;  %v11772_v55 = vld [vmem:[%s15274_s3 + $0xe00] ss:$16 sps:$4 sm:$0xff]  }
 0x3fd   :  { %7657 = vmatpush1.bf16.msra.mxu1 %v11682_v31  ;;  %v11775_v31 = vld [vmem:[%s15274_s3 + $0xe08] ss:$16 sps:$4 sm:$0xff]  }
 0x3fe   :  { %7985 = vmatpush1.bf16.msra.mxu0 %v11685_v18  ;;  %7658 = vmatprep.subr.bf16.mxu1 %v11690_v5  ;;  %v11780_v18 = vld [vmem:[%s15274_s3 + $0xe24] ss:$16 sps:$4 sm:$0xff]   ;;  %v4831_v5 = vcombine.high %v13711_v1, %v13711_v1 }
 0x3ff   :  { %7986 = vmatprep.subr.bf16.mxu0 %v11693_v10  ;;  %v11783_v10 = vld [vmem:[%s15274_s3 + $0xe2c] ss:$16 sps:$4 sm:$0xff]   ;;  %v11786_v1 = vld [vmem:[%s15274_s3 + $0xe44] ss:$16 sps:$4 sm:$0xff]  }
 0x401   :  { %7659 = vmatpush1.bf16.msra.mxu1 %v11688_v53  ;;  %v11778_v53 = vld [vmem:[%s15274_s3 + $0xe20] ss:$16 sps:$4 sm:$0xff]  }
 0x402   :  { %7987 = vmatpush1.bf16.msra.mxu0 %v11691_v27  ;;  %7660 = vmatprep.subr.bf16.mxu1 %v11696_v22  ;;  %v11781_v27 = vld [vmem:[%s15274_s3 + $0xe28] ss:$16 sps:$4 sm:$0xff]   ;;  %v11789_v22 = vld [vmem:[%s15274_s3 + $0xe4c] ss:$16 sps:$4 sm:$0xff]  }
 0x403   :  { %7988 = vmatprep.subr.bf16.mxu0 %v11699_v28  ;;  %v11784_v28 = vld [vmem:[%s15274_s3 + $0xe40] ss:$16 sps:$4 sm:$0xff]  }
 0x405   :  { %7661 = vmatpush1.bf16.msra.mxu1 %v11694_v30  ;;  %v11787_v30 = vld [vmem:[%s15274_s3 + $0xe48] ss:$16 sps:$4 sm:$0xff]  }
 0x406   :  { %7989 = vmatpush1.bf16.msra.mxu0 %v11697_v15  ;;  %7662 = vmatprep.subr.bf16.mxu1 %v11702_v2  ;;  %v11792_v15 = vld [vmem:[%s15274_s3 + $0xe64] ss:$16 sps:$4 sm:$0xff]   ;;  %v11795_v2 = vld [vmem:[%s15274_s3 + $0xe6c] ss:$16 sps:$4 sm:$0xff]  }
 0x407   :  { %7990 = vmatprep.subr.bf16.mxu0 %v11705_v45  ;;  %v11790_v45 = vld [vmem:[%s15274_s3 + $0xe60] ss:$16 sps:$4 sm:$0xff]  }
 0x409   :  { %7663 = vmatpush1.bf16.msra.mxu1 %v11700_v6  ;;  %v11793_v6 = vld [vmem:[%s15274_s3 + $0xe68] ss:$16 sps:$4 sm:$0xff]  }
 0x40a   :  { %7991 = vmatpush1.bf16.msra.mxu0 %v11703_v25  ;;  %7664 = vmatprep.subr.bf16.mxu1 %v11708_v39  ;;  %v11798_v25 = vld [vmem:[%s15274_s3 + $0xe84] ss:$16 sps:$4 sm:$0xff]   ;;  %v11801_v39 = vld [vmem:[%s15274_s3 + $0xe8c] ss:$16 sps:$4 sm:$0xff]  }
 0x40b   :  { %7992 = vmatprep.subr.bf16.mxu0 %v11711_v60  ;;  %v11796_v60 = vld [vmem:[%s15274_s3 + $0xe80] ss:$16 sps:$4 sm:$0xff]  }
 0x40d   :  { %7665 = vmatpush1.bf16.msra.mxu1 %v11706_v42  ;;  %v11799_v42 = vld [vmem:[%s15274_s3 + $0xe88] ss:$16 sps:$4 sm:$0xff]  }
 0x40e   :  { %7993 = vmatpush1.bf16.msra.mxu0 %v11709_v35  ;;  %7666 = vmatprep.subr.bf16.mxu1 %v11714_v37  ;;  %v11804_v35 = vld [vmem:[%s15274_s3 + $0xea4] ss:$16 sps:$4 sm:$0xff]   ;;  %v11807_v37 = vld [vmem:[%s15274_s3 + $0xeac] ss:$16 sps:$4 sm:$0xff]  }
 0x40f   :  { %7994 = vmatprep.subr.bf16.mxu0 %v11717_v52  ;;  %v11802_v52 = vld [vmem:[%s15274_s3 + $0xea0] ss:$16 sps:$4 sm:$0xff]  }
 0x411   :  { %7667 = vmatpush1.bf16.msra.mxu1 %v11712_v44  ;;  %v11805_v44 = vld [vmem:[%s15274_s3 + $0xea8] ss:$16 sps:$4 sm:$0xff]  }
 0x412   :  { %7995 = vmatpush1.bf16.msra.mxu0 %v11715_v34  ;;  %7668 = vmatprep.subr.bf16.mxu1 %v11720_v46  ;;  %v11810_v34 = vld [vmem:[%s15274_s3 + $0xec4] ss:$16 sps:$4 sm:$0xff]   ;;  %v11813_v46 = vld [vmem:[%s15274_s3 + $0xecc] ss:$16 sps:$4 sm:$0xff]  }
 0x413   :  { %7996 = vmatprep.subr.bf16.mxu0 %v11723_v47  ;;  %v11808_v47 = vld [vmem:[%s15274_s3 + $0xec0] ss:$16 sps:$4 sm:$0xff]  }
 0x415   :  { %7669 = vmatpush1.bf16.msra.mxu1 %v11718_v38  ;;  %v11811_v38 = vld [vmem:[%s15274_s3 + $0xec8] ss:$16 sps:$4 sm:$0xff]  }
 0x416   :  { %7997 = vmatpush1.bf16.msra.mxu0 %v11721_v13  ;;  %7670 = vmatprep.subr.bf16.mxu1 %v11726_v57  ;;  %v11816_v13 = vld [vmem:[%s15274_s3 + $0xee4] ss:$16 sps:$4 sm:$0xff]   ;;  %v11819_v57 = vld [vmem:[%s15274_s3 + $0xeec] ss:$16 sps:$4 sm:$0xff]  }
 0x417   :  { %7998 = vmatprep.subr.bf16.mxu0 %v11729_v62  ;;  %v11814_v62 = vld [vmem:[%s15274_s3 + $0xee0] ss:$16 sps:$4 sm:$0xff]  }
 0x419   :  { %7671 = vmatpush1.bf16.msra.mxu1 %v11724_v19  ;;  %v11817_v19 = vld [vmem:[%s15274_s3 + $0xee8] ss:$16 sps:$4 sm:$0xff]  }
 0x41a   :  { %7999 = vmatpush1.bf16.msra.mxu0 %v11727_v58  ;;  %7672 = vmatprep.subr.bf16.mxu1 %v11732_v29  ;;  %v11822_v58 = vld [vmem:[%s15274_s3 + $0xf04] ss:$16 sps:$4 sm:$0xff]   ;;  %v11825_v29 = vld [vmem:[%s15274_s3 + $0xf0c] ss:$16 sps:$4 sm:$0xff]  }
 0x41b   :  { %8000 = vmatprep.subr.bf16.mxu0 %v11735_v8  ;;  %v11820_v8 = vld [vmem:[%s15274_s3 + $0xf00] ss:$16 sps:$4 sm:$0xff]  }
 0x41d   :  { %7673 = vmatpush1.bf16.msra.mxu1 %v11730_v11  ;;  %v11823_v11 = vld [vmem:[%s15274_s3 + $0xf08] ss:$16 sps:$4 sm:$0xff]  }
 0x41e   :  { %8001 = vmatpush1.bf16.msra.mxu0 %v11733_v63  ;;  %7674 = vmatprep.subr.bf16.mxu1 %v11738_v56  ;;  %v11828_v63 = vld [vmem:[%s15274_s3 + $0xf24] ss:$16 sps:$4 sm:$0xff]   ;;  %v11831_v56 = vld [vmem:[%s15274_s3 + $0xf2c] ss:$16 sps:$4 sm:$0xff]  }
 0x41f   :  { %8002 = vmatprep.subr.bf16.mxu0 %v11741_v7  ;;  %v11826_v7 = vld [vmem:[%s15274_s3 + $0xf20] ss:$16 sps:$4 sm:$0xff]  }
 0x421   :  { %7675 = vmatpush1.bf16.msra.mxu1 %v11736_v20  ;;  %v11829_v20 = vld [vmem:[%s15274_s3 + $0xf28] ss:$16 sps:$4 sm:$0xff]  }
 0x422   :  { %8003 = vmatpush1.bf16.msra.mxu0 %v11739_v40  ;;  %7676 = vmatprep.subr.bf16.mxu1 %v11744_v12  ;;  %v11834_v40 = vld [vmem:[%s15274_s3 + $0xf44] ss:$16 sps:$4 sm:$0xff]   ;;  %v11837_v12 = vld [vmem:[%s15274_s3 + $0xf4c] ss:$16 sps:$4 sm:$0xff]  }
 0x423   :  { %8004 = vmatprep.subr.bf16.mxu0 %v11747_v23  ;;  %v11832_v23 = vld [vmem:[%s15274_s3 + $0xf40] ss:$16 sps:$4 sm:$0xff]  }
 0x425   :  { %7677 = vmatpush1.bf16.msra.mxu1 %v11742_v54  ;;  %v11835_v54 = vld [vmem:[%s15274_s3 + $0xf48] ss:$16 sps:$4 sm:$0xff]  }
 0x426   :  { %8005 = vmatpush1.bf16.msra.mxu0 %v11745_v43  ;;  %7678 = vmatprep.subr.bf16.mxu1 %v11750_v48  ;;  %v11840_v43 = vld [vmem:[%s15274_s3 + $0xf64] ss:$16 sps:$4 sm:$0xff]   ;;  %v11843_v48 = vld [vmem:[%s15274_s3 + $0xf6c] ss:$16 sps:$4 sm:$0xff]  }
 0x427   :  { %8006 = vmatprep.subr.bf16.mxu0 %v11753_v0  ;;  %v11838_v0 = vld [vmem:[%s15274_s3 + $0xf60] ss:$16 sps:$4 sm:$0xff]  }
 0x429   :  { %7679 = vmatpush1.bf16.msra.mxu1 %v11748_v61  ;;  %v11841_v61 = vld [vmem:[%s15274_s3 + $0xf68] ss:$16 sps:$4 sm:$0xff]  }
 0x42a   :  { %8007 = vmatpush1.bf16.msra.mxu0 %v11751_v24  ;;  %7680 = vmatprep.subr.bf16.mxu1 %v11756_v14  ;;  %v11846_v24 = vld [vmem:[%s15274_s3 + $0xf84] ss:$16 sps:$4 sm:$0xff]   ;;  %v11849_v14 = vld [vmem:[%s15274_s3 + $0xf8c] ss:$16 sps:$4 sm:$0xff]  }
 0x42b   :  { %8008 = vmatprep.subr.bf16.mxu0 %v11759_v26  ;;  %v11844_v26 = vld [vmem:[%s15274_s3 + $0xf80] ss:$16 sps:$4 sm:$0xff]  }
 0x42d   :  { %7681 = vmatpush1.bf16.msra.mxu1 %v11754_v21  ;;  %v11847_v21 = vld [vmem:[%s15274_s3 + $0xf88] ss:$16 sps:$4 sm:$0xff]  }
 0x42e   :  { %8009 = vmatpush1.bf16.msra.mxu0 %v11757_v3  ;;  %7682 = vmatprep.subr.bf16.mxu1 %v11762_v4  ;;  %v11852_v3 = vld [vmem:[%s15274_s3 + $0xfa4] ss:$16 sps:$4 sm:$0xff]   ;;  %v11855_v4 = vld [vmem:[%s15274_s3 + $0xfac] ss:$16 sps:$4 sm:$0xff]  }
 0x42f   :  { %8010 = vmatprep.subr.bf16.mxu0 %v11765_v32  ;;  %v11850_v32 = vld [vmem:[%s15274_s3 + $0xfa0] ss:$16 sps:$4 sm:$0xff]  }
 0x431   :  { %7683 = vmatpush1.bf16.msra.mxu1 %v11760_v17  ;;  %v11853_v17 = vld [vmem:[%s15274_s3 + $0xfa8] ss:$16 sps:$4 sm:$0xff]  }
 0x432   :  { %8011 = vmatpush1.bf16.msra.mxu0 %v11763_v50  ;;  %7684 = vmatprep.subr.bf16.mxu1 %v11768_v41  ;;  %v11858_v50 = vld [vmem:[%s15274_s3 + $0xfc4] ss:$16 sps:$4 sm:$0xff]   ;;  %v11861_v41 = vld [vmem:[%s15274_s3 + $0xfcc] ss:$16 sps:$4 sm:$0xff]  }
 0x433   :  { %8012 = vmatprep.subr.bf16.mxu0 %v11771_v36  ;;  %v11856_v36 = vld [vmem:[%s15274_s3 + $0xfc0] ss:$16 sps:$4 sm:$0xff]  }
 0x435   :  { %7685 = vmatpush1.bf16.msra.mxu1 %v11766_v9  ;;  %v11859_v9 = vld [vmem:[%s15274_s3 + $0xfc8] ss:$16 sps:$4 sm:$0xff]  }
 0x436   :  { %8013 = vmatpush1.bf16.msra.mxu0 %v11769_v59  ;;  %7695 = vmatprep.subr.bf16.mxu1 %v11774_v51  ;;  %v11864_v59 = vld [vmem:[%s15274_s3 + $0xfe4] ss:$16 sps:$4 sm:$0xff]   ;;  %v11867_v51 = vld [vmem:[%s15274_s3 + $0xfec] ss:$16 sps:$4 sm:$0xff]  }
 0x437   :  { %8023 = vmatprep.subr.bf16.mxu0 %v11777_v16  ;;  %v11862_v16 = vld [vmem:[%s15274_s3 + $0xfe0] ss:$16 sps:$4 sm:$0xff]  }
 0x438   :  { %7687 = vmatmul.mubr.bf16.vlgmr.msra.gmra.mrb[192].mxu1 %v13695_v33 }
 0x439   :  { %8015 = vmatmul.mubr.bf16.vlgmr.msra.gmra.mrb[208].mxu0 %v13695_v33  ;;  %7696 = vmatpush1.bf16.msra.mxu1 %v11772_v55  ;;  %v11865_v55 = vld [vmem:[%s15274_s3 + $0xfe8] ss:$16 sps:$4 sm:$0xff]   ;;  %s8648_s3 = sshll.u32 %s11943_s18, 4  ;;  %s8649_s3 = int_to_ptr.vmem [resolvable:$true] %s8648_s3 }
 0x43a   :  { %7727 = vmatprep.mubr.bf16.mxu1 %v4831_v5  ;;  %8024 = vmatpush1.bf16.msra.mxu0 %v11775_v31  ;;  %v11868_v31 = vld [vmem:[%s15276_s5 + $0x40] sm:$0xff]   ;;  %p11921_p1 = scmp.lt.s32.totalorder %s8649_s3, %s8649_s3 }
 0x43b   :  { %8055 = vmatprep.mubr.bf16.mxu0 %v4831_v5  ;;  %7697 = vmatprep.subr.bf16.mxu1 %v11780_v18  ;;  %v11869_v18 = vld [vmem:[%s15276_s5] sm:$0xff]   ;;  %v4829_v5 = vcombine.high %v13695_v33, %v13695_v33  ;;  %v11873_v33 = vld [vmem:[%s15276_s5 + $0x10] sm:$0xff]  }
 0x43c   :  { %8025 = vmatprep.subr.bf16.mxu0 %v11783_v10  ;;  %v11870_v10 = vld [vmem:[%s15276_s5 + $0x48] sm:$0xff]  }
 0x43d   :  { %7698 = vmatpush1.bf16.msra.mxu1 %v11778_v53  ;;  %v11871_v53 = vld [vmem:[%s15276_s5 + $0x8] sm:$0xff]  }
 0x43e   :  { %8026 = vmatpush1.bf16.msra.mxu0 %v11781_v27  ;;  %7699 = vmatprep.subr.bf16.mxu1 %v11786_v1  ;;  %v11872_v27 = vld [vmem:[%s15276_s5 + $0x50] sm:$0xff]   ;;  %v11874_v1 = vld [vmem:[%s15276_s5 + $0x58] sm:$0xff]  }
 0x43f   :  { %8027 = vmatprep.subr.bf16.mxu0 %v11789_v22  ;;  %v11875_v22 = vld [vmem:[%s15276_s5 + $0x18] sm:$0xff]  }
 0x441   :  { %7700 = vmatpush1.bf16.msra.mxu1 %v11784_v28  ;;  %v11876_v28 = vld [vmem:[%s15276_s5 + $0x60] sm:$0xff]  }
 0x442   :  { %8028 = vmatpush1.bf16.msra.mxu0 %v11787_v30  ;;  %7701 = vmatprep.subr.bf16.mxu1 %v11792_v15  ;;  %v11877_v30 = vld [vmem:[%s15276_s5 + $0x20] sm:$0xff]   ;;  %v11878_v15 = vld [vmem:[%s15276_s5 + $0x68] sm:$0xff]  }
 0x443   :  { %8029 = vmatprep.subr.bf16.mxu0 %v11795_v2  ;;  %v11879_v2 = vld [vmem:[%s15276_s5 + $0x28] sm:$0xff]  }
 0x445   :  { %7702 = vmatpush1.bf16.msra.mxu1 %v11790_v45  ;;  %v11880_v45 = vld [vmem:[%s15276_s5 + $0x70] sm:$0xff]  }
 0x446   :  { %8030 = vmatpush1.bf16.msra.mxu0 %v11793_v6  ;;  %7703 = vmatprep.subr.bf16.mxu1 %v11798_v25  ;;  %v11881_v6 = vld [vmem:[%s15276_s5 + $0x30] sm:$0xff]   ;;  %v11882_v25 = vld [vmem:[%s15276_s5 + $0x78] sm:$0xff]  }
 0x447   :  { %8031 = vmatprep.subr.bf16.mxu0 %v11801_v39  ;;  %v11883_v39 = vld [vmem:[%s15276_s5 + $0x38] sm:$0xff]  }
 0x449   :  { %7704 = vmatpush1.bf16.msra.mxu1 %v11796_v60  ;;  %v11884_v60 = vld [vmem:[%s15276_s5 + $0xc0] sm:$0xff]  }
 0x44a   :  { %8032 = vmatpush1.bf16.msra.mxu0 %v11799_v42  ;;  %7705 = vmatprep.subr.bf16.mxu1 %v11804_v35  ;;  %v4714_v42 = vsub.s32 0, %v13679_v49  ;;  %v4710_v35 = vld [vmem:[%s15275_s4] sm:$0xf] }
 0x44b   :  { %8033 = vmatprep.subr.bf16.mxu0 %v11807_v37  ;;  %v4718_v37 = vsub.s32 1, %v13679_v49 }
 0x44d   :  { %7706 = vmatpush1.bf16.msra.mxu1 %v11802_v52  ;;  %v4726_v52 = vsub.s32 3, %v13679_v49 }
 0x44e   :  { %8034 = vmatpush1.bf16.msra.mxu0 %v11805_v44  ;;  %7707 = vmatprep.subr.bf16.mxu1 %v11810_v34  ;;  %v4715_v44 = vrot.slane %v4710_v35, %v4714_v42  ;;  %v4719_v34 = vrot.slane %v4710_v35, %v4718_v37  ;;  %v9569_v42 = vld [vmem:[%s15277_s6] ss:$0 sm:$0xff] }
 0x44f   :  { %8035 = vmatprep.subr.bf16.mxu0 %v11813_v46  ;;  %v4727_v46 = vrot.slane %v4710_v35, %v4726_v52 }
 0x451   :  { %7708 = vmatpush1.bf16.msra.mxu1 %v11808_v47 }
 0x452   :  { %8036 = vmatpush1.bf16.msra.mxu0 %v11811_v38  ;;  %7709 = vmatprep.subr.bf16.mxu1 %v11816_v13 }
 0x453   :  { %8037 = vmatprep.subr.bf16.mxu0 %v11819_v57 }
 0x455   :  { %7710 = vmatpush1.bf16.msra.mxu1 %v11814_v62 }
 0x456   :  { %8038 = vmatpush1.bf16.msra.mxu0 %v11817_v19  ;;  %7711 = vmatprep.subr.bf16.mxu1 %v11822_v58 }
 0x457   :  { %8039 = vmatprep.subr.bf16.mxu0 %v11825_v29 }
 0x459   :  { %7712 = vmatpush1.bf16.msra.mxu1 %v11820_v8 }
 0x45a   :  { %8040 = vmatpush1.bf16.msra.mxu0 %v11823_v11  ;;  %7713 = vmatprep.subr.bf16.mxu1 %v11828_v63 }
 0x45b   :  { %8041 = vmatprep.subr.bf16.mxu0 %v11831_v56 }
 0x45d   :  { %7714 = vmatpush1.bf16.msra.mxu1 %v11826_v7 }
 0x45e   :  { %8042 = vmatpush1.bf16.msra.mxu0 %v11829_v20  ;;  %7715 = vmatprep.subr.bf16.mxu1 %v11834_v40 }
 0x45f   :  { %8043 = vmatprep.subr.bf16.mxu0 %v11837_v12  ;;  %v11885_v12 = vld [vmem:[%s15276_s5 + $0x80] sm:$0xff]  }
 0x461   :  { %7716 = vmatpush1.bf16.msra.mxu1 %v11832_v23 }
 0x462   :  { %8044 = vmatpush1.bf16.msra.mxu0 %v11835_v54  ;;  %7717 = vmatprep.subr.bf16.mxu1 %v11840_v43  ;;  %v11886_v54 = vld [vmem:[%s15276_s5 + $0xc8] sm:$0xff]  }
 0x463   :  { %8045 = vmatprep.subr.bf16.mxu0 %v11843_v48  ;;  %v11887_v48 = vld [vmem:[%s15276_s5 + $0x88] sm:$0xff]  }
 0x465   :  { %7718 = vmatpush1.bf16.msra.mxu1 %v11838_v0  ;;  %v11888_v0 = vld [vmem:[%s15276_s5 + $0xd0] sm:$0xff]  }
 0x466   :  { %8046 = vmatpush1.bf16.msra.mxu0 %v11841_v61  ;;  %7719 = vmatprep.subr.bf16.mxu1 %v11846_v24  ;;  %v11889_v61 = vld [vmem:[%s15276_s5 + $0x90] sm:$0xff]   ;;  %v11890_v24 = vld [vmem:[%s15276_s5 + $0xd8] sm:$0xff]  }
 0x467   :  { %8047 = vmatprep.subr.bf16.mxu0 %v11849_v14  ;;  %v11891_v14 = vld [vmem:[%s15276_s5 + $0x98] sm:$0xff]  }
 0x469   :  { %7720 = vmatpush1.bf16.msra.mxu1 %v11844_v26  ;;  %v11892_v26 = vld [vmem:[%s15276_s5 + $0xe0] sm:$0xff]  }
 0x46a   :  { %8048 = vmatpush1.bf16.msra.mxu0 %v11847_v21  ;;  %7721 = vmatprep.subr.bf16.mxu1 %v11852_v3  ;;  %v11893_v21 = vld [vmem:[%s15276_s5 + $0xa0] sm:$0xff]   ;;  %v4722_v3 = vsub.s32 2, %v13679_v49  ;;  %v11897_v49 = vld [vmem:[%s15276_s5 + $0xb0] sm:$0xff]  }
 0x46b   :  { %8049 = vmatprep.subr.bf16.mxu0 %v11855_v4  ;;  %v11894_v4 = vld [vmem:[%s15276_s5 + $0xe8] sm:$0xff]  }
 0x46d   :  { %7722 = vmatpush1.bf16.msra.mxu1 %v11850_v32  ;;  %v11895_v32 = vld [vmem:[%s15276_s5 + $0xa8] sm:$0xff]  }
 0x46e   :  { %8050 = vmatpush1.bf16.msra.mxu0 %v11853_v17  ;;  %7723 = vmatprep.subr.bf16.mxu1 %v11858_v50  ;;  %v4723_v17 = vrot.slane %v4710_v35, %v4722_v3  ;;  %v11896_v50 = vld [vmem:[%s15276_s5 + $0xf0] sm:$0xff]  }
 0x46f   :  { %8051 = vmatprep.subr.bf16.mxu0 %v11861_v41 }
 0x471   :  { %7724 = vmatpush1.bf16.msra.mxu1 %v11856_v36  ;;  %v11898_v36 = vld [vmem:[%s15276_s5 + $0xf8] sm:$0xff]  }
 0x472   :  { %8052 = vmatpush1.bf16.msra.mxu0 %v11859_v9  ;;  %7725 = vmatprep.subr.bf16.mxu1 %v11864_v59  ;;  %v11899_v9 = vld [vmem:[%s15276_s5 + $0xb8] sm:$0xff]  }
 0x473   :  { %8053 = vmatprep.subr.bf16.mxu0 %v11867_v51 }
 0x475   :  { %7726 = vmatpush1.bf16.msra.mxu1 %v11862_v16  ;;  %v11900_v16 = vld [vmem:[%s15278_s7] sm:$0xff]  }
 0x476   :  { %8054 = vmatpush1.bf16.msra.mxu0 %v11865_v55  ;;  %10404 = vmatprep.subr.bf16.mxu1 %v11868_v31  ;;  %v11941_v55 = vmov 0.0   ;;  %v11901_v31 = vld [vmem:[%s15278_s7 + $0x8] sm:$0xff]  }
 0x477   :  { %10498 = vmatprep.subr.bf16.mxu0 %v11941_v55 }
 0x478   :  { %7728 = vmatmul.mubr.bf16.vlgmr.msra.gmra.mrb[192].mxu1 %v4829_v5 }
 0x479   :  { %8056 = vmatmul.mubr.bf16.vlgmr.msra.gmra.mrb[208].mxu0 %v4829_v5  ;;  %10405 = vmatpush3.bf16.msra.mxu1 %v11869_v18  ;;  %v11902_v18 = vld [vmem:[%s15278_s7 + $0x10] sm:$0xff]   ;;  %v11903_v5 = vld [vmem:[%s15278_s7 + $0x18] sm:$0xff]  }
 0x47a   :  { %10406 = vmatprep.subr.bf16.mxu1 %v11870_v10  ;;  %10499 = vmatpush3.bf16.msra.mxu0 %v11900_v16  ;;  %v11904_v10 = vld [vmem:[%s15278_s7 + $0x20] sm:$0xff]  }
 0x47b   :  { %10500 = vmatprep.subr.bf16.mxu0 %v11941_v55  ;;  %10514 = vmatprep.mubr.msk.bf16.mxu0 %vm11942_vm0, %v11941_v55 }
 0x47d   :  { %10407 = vmatpush3.bf16.msra.mxu1 %v11871_v53  ;;  %v11905_v53 = vld [vmem:[%s15278_s7 + $0x28] sm:$0xff]  }
 0x47e   :  { %10408 = vmatprep.subr.bf16.mxu1 %v11872_v27  ;;  %10501 = vmatpush3.bf16.msra.mxu0 %v11901_v31  ;;  %v11906_v27 = vld [vmem:[%s15278_s7 + $0x30] sm:$0xff]  }
 0x47f   :  { %10502 = vmatprep.subr.bf16.mxu0 %v11941_v55 }
 0x481   :  { %10409 = vmatpush3.bf16.msra.mxu1 %v11873_v33  ;;  %v11907_v33 = vld [vmem:[%s15278_s7 + $0x38] sm:$0xff]  }
 0x482   :  { %10410 = vmatprep.subr.bf16.mxu1 %v11874_v1  ;;  %10503 = vmatpush3.bf16.msra.mxu0 %v11902_v18  ;;  %v11908_v1 = vld [vmem:[%s15280_s9] sm:$0xff]  }
 0x483   :  { %10504 = vmatprep.subr.bf16.mxu0 %v11941_v55 }
 0x485   :  { %10411 = vmatpush3.bf16.msra.mxu1 %v11875_v22  ;;  %v11909_v22 = vld [vmem:[%s15280_s9 + $0x8] sm:$0xff]  }
 0x486   :  { %10412 = vmatprep.subr.bf16.mxu1 %v11876_v28  ;;  %10505 = vmatpush3.bf16.msra.mxu0 %v11903_v5  ;;  %v11910_v28 = vld [vmem:[%s15280_s9 + $0x10] sm:$0xff]  }
 0x487   :  { %10506 = vmatprep.subr.bf16.mxu0 %v11941_v55 }
 0x489   :  { %10413 = vmatpush3.bf16.msra.mxu1 %v11877_v30  ;;  %v11911_v30 = vld [vmem:[%s15280_s9 + $0x18] sm:$0xff]  }
 0x48a   :  { %10414 = vmatprep.subr.bf16.mxu1 %v11878_v15  ;;  %10507 = vmatpush3.bf16.msra.mxu0 %v11904_v10  ;;  %v11912_v15 = vld [vmem:[%s15280_s9 + $0x20] sm:$0xff]  }
 0x48b   :  { %10508 = vmatprep.subr.bf16.mxu0 %v11941_v55 }
 0x48d   :  { %10415 = vmatpush3.bf16.msra.mxu1 %v11879_v2  ;;  %v11913_v2 = vld [vmem:[%s15280_s9 + $0x28] sm:$0xff]  }
 0x48e   :  { %10416 = vmatprep.subr.bf16.mxu1 %v11880_v45  ;;  %10509 = vmatpush3.bf16.msra.mxu0 %v11905_v53 }
 0x48f   :  { %10510 = vmatprep.subr.bf16.mxu0 %v11941_v55 }
 0x491   :  { %10417 = vmatpush3.bf16.msra.mxu1 %v11881_v6 }
 0x492   :  { %10418 = vmatprep.subr.bf16.mxu1 %v11882_v25  ;;  %10511 = vmatpush3.bf16.msra.mxu0 %v11906_v27 }
 0x493   :  { %10512 = vmatprep.subr.bf16.mxu0 %v11941_v55 }
 0x495   :  { %10419 = vmatpush3.bf16.msra.mxu1 %v11883_v39 }
 0x496   :  { %10426 = vmatprep.subr.bf16.mxu1 %v11884_v60  ;;  %10513 = vmatpush3.bf16.msra.mxu0 %v11907_v33 }
 0x54b   :  { %v7729_v47 = vpop.f32.mrb[192].mxu1 }
 0x54c   :  { %v10538_v38 = vadd.f32 %v7729_v47, %v4715_v44  ;;  %v8057_v13 = vpop.f32.mrb[208].mxu0  ;;  %v7731_v57 = vpop.f32.mrb[193].mxu1 }
 0x54d   :  { %v10539_v62 = vadd.f32 %v7731_v57, %v4719_v34  ;;  %v8059_v19 = vpop.f32.mrb[209].mxu0  ;;  %v7733_v58 = vpop.f32.mrb[194].mxu1  ;;  %v10540_v41 = vadd.f32 %v8057_v13, %v4723_v17  ;;  %v11914_v57 = vld [vmem:[%s15280_s9 + $0x30] sm:$0xff]  }
 0x54e   :  { %v8064_v29 = vmax.f32 %v10538_v38, 0.0  ;;  %v10541_v8 = vadd.f32 %v8059_v19, %v4727_v46  ;;  %v8061_v11 = vpop.f32.mrb[210].mxu0  ;;  %v7734_v63 = vpop.f32.mrb[195].mxu1  ;;  %v9602_v19 = vld [vmem:[%s15279_s8] ss:$0 sm:$0xff]  ;;  %s11916_s8 = scalar_lea.vmem %s8649_s3, 32 }
 0x54f   :  { %v8065_v56 = vmax.f32 %v10539_v62, 0.0  ;;  %v8062_v7 = vpop.f32.mrb[211].mxu0  ;;  %v8066_v59 = vmax.f32 %v10540_v41, 0.0  ;;  %v11915_v62 = vld [vmem:[%s15280_s9 + $0x38] sm:$0xff]   ;;  %p11917_p0 = scmp.ne.s32.totalorder %s8649_s3, %s11916_s8  ;;  %p11922_p2 = scmp.lt.s32.totalorder %s11916_s8, %s11916_s8 }
 0x550   :  { %v8067_v20 = vmax.f32 %v10541_v8, 0.0  ;;  %v8068_v23 = vpack.c.bf16 %v8064_v29, %v8064_v29 }
 0x551   :  { %v8069_v40 = vpack.c.bf16 %v8065_v56, %v8065_v56  ;;  %v8070_v51 = vpack.c.bf16 %v8066_v59, %v8066_v59  ;;  %p11923_p3 = por %p11922_p2, %p11921_p1 }
 0x552   :  { %v8071_v43 = vpack.c.bf16 %v8067_v20, %v8067_v20  ;;  %v9611_v20 = vld [vmem:[%s15281_s10] ss:$0 sm:$0xff] }
 0x553   :  { %8367 = vmatprep.mubr.bf16.mxu1 %v8069_v40  ;;  %p11924_p4 = pnand %p11923_p3, %p11917_p0 }
 0x554   :  { %8368 = vmatmul.mubr.bf16.vlgmr.msra.gmra.mrb[196].mxu1 %v8068_v23 }
 0x555   :  { %10427 = vmatpush3.bf16.msra.mxu1 %v11885_v12  ;;  %8407 = vmatprep.mubr.bf16.mxu1 %v8071_v43 }
 0x556   :  { %10428 = vmatprep.subr.bf16.mxu1 %v11886_v54 }
 0x559   :  { %10429 = vmatpush3.bf16.msra.mxu1 %v11887_v48 }
 0x55a   :  { %10430 = vmatprep.subr.bf16.mxu1 %v11888_v0 }
 0x55d   :  { %10431 = vmatpush3.bf16.msra.mxu1 %v11889_v61 }
 0x55e   :  { %10432 = vmatprep.subr.bf16.mxu1 %v11890_v24 }
 0x561   :  { %10433 = vmatpush3.bf16.msra.mxu1 %v11891_v14 }
 0x562   :  { %10434 = vmatprep.subr.bf16.mxu1 %v11892_v26 }
 0x565   :  { %10435 = vmatpush3.bf16.msra.mxu1 %v11893_v21 }
 0x566   :  { %10436 = vmatprep.subr.bf16.mxu1 %v11894_v4 }
 0x569   :  { %10437 = vmatpush3.bf16.msra.mxu1 %v11895_v32 }
 0x56a   :  { %10438 = vmatprep.subr.bf16.mxu1 %v11896_v50 }
 0x56d   :  { %10439 = vmatpush3.bf16.msra.mxu1 %v11897_v49 }
 0x56e   :  { %10440 = vmatprep.subr.bf16.mxu1 %v11898_v36 }
 0x571   :  { %10441 = vmatpush3.bf16.msra.mxu1 %v11899_v9 }
 0x572   :  { %10518 = vmatprep.subr.bf16.mxu1 %v11941_v55 }
 0x574   :  { %8408 = vmatmul.mubr.bf16.vlgmr.msra.gmra.mrb[200].mxu1 %v8070_v51 }
 0x575   :  { %10534 = vmatprep.mubr.msk.bf16.mxu1 %vm11942_vm0, %v11941_v55  ;;  %10519 = vmatpush3.bf16.msra.mxu1 %v11908_v1 }
 0x576   :  { %10520 = vmatprep.subr.bf16.mxu1 %v11941_v55 }
 0x579   :  { %10521 = vmatpush3.bf16.msra.mxu1 %v11909_v22 }
 0x57a   :  { %10522 = vmatprep.subr.bf16.mxu1 %v11941_v55 }
 0x57d   :  { %10523 = vmatpush3.bf16.msra.mxu1 %v11910_v28 }
 0x57e   :  { %10524 = vmatprep.subr.bf16.mxu1 %v11941_v55 }
 0x581   :  { %10525 = vmatpush3.bf16.msra.mxu1 %v11911_v30 }
 0x582   :  { %10526 = vmatprep.subr.bf16.mxu1 %v11941_v55 }
 0x585   :  { %10527 = vmatpush3.bf16.msra.mxu1 %v11912_v15 }
 0x586   :  { %10528 = vmatprep.subr.bf16.mxu1 %v11941_v55 }
 0x589   :  { %10529 = vmatpush3.bf16.msra.mxu1 %v11913_v2 }
 0x58a   :  { %10530 = vmatprep.subr.bf16.mxu1 %v11941_v55 }
 0x58d   :  { %10531 = vmatpush3.bf16.msra.mxu1 %v11914_v57 }
 0x58e   :  { %10532 = vmatprep.subr.bf16.mxu1 %v11941_v55 }
 0x591   :  { %10533 = vmatpush3.bf16.msra.mxu1 %v11915_v62 }
 0x627   :  { %v10420_v45 = vpop.f32.mrb[196].mxu1 }
 0x628   :  { %v10421_v6 = vpop.f32.mrb[197].mxu1 }
 0x629   :  { %v10422_v25 = vadd.f32 %v10421_v6, %v10420_v45  ;;  %v10423_v39 = vpop.f32.mrb[198].mxu1 }
 0x62a   :  { %v10424_v60 = vpop.f32.mrb[199].mxu1 }
 0x62b   :  { %v8370_v52 = vadd.f32 %v10422_v25, %v9569_v42 }
 0x647   :  { %v10442_v35 = vpop.f32.mrb[200].mxu1 }
 0x648   :  { %v10443_v37 = vpop.f32.mrb[201].mxu1 }
 0x649   :  { %v10444_v44 = vadd.f32 %v10443_v37, %v10442_v35  ;;  %v10445_v34 = vpop.f32.mrb[202].mxu1 }
 0x64a   :  { %v10446_v46 = vpop.f32.mrb[203].mxu1 }
 0x64b   :  { %v8410_v47 = vadd.f32 %v10444_v44, %v8370_v52 }
 0x64d   :  { %v8415_v38 = vmax.f32 %v8410_v47, 0.0 }
 0x64f   :  { %v8416_v13 = vpack.c.bf16 %v8415_v38, %v8415_v38 }
 0x651   :  { %10515 = vmatmul.mubr.bf16.vlgmr.msra.gmra.mrb[212].mxu0 %v8416_v13 }
 0x724   :  { %v8522_v58 = vpop.f32.mrb[212].mxu0 }
 0x725   :  { %v8523_v29 = vadd.f32 %v9602_v19, %v8522_v58  ;;  %v10516_v8 = vpop.f32.mrb[213].mxu0 }
 0x726   :  { %v8525_v11 = vpop.f32.mrb[214].mxu0 }
 0x727   :  { %v8528_v63 = vmax.f32 %v8523_v29, 0.0  ;;  %v10517_v56 = vpop.f32.mrb[215].mxu0 }
 0x729   :  { %v8529_v7 = vpack.c.bf16 %v8528_v63, %v8528_v63 }
 0x72b   :  { %10535 = vmatmul.mubr.bf16.vlgmr.msra.gmra.mrb[204].mxu1 %v8529_v7 }
 0x7fe   :  { %v8635_v40 = vpop.f32.mrb[204].mxu1 }
 0x7ff   :  { %v8636_v12 = vadd.f32 %v9611_v20, %v8635_v40  ;;  %v10536_v23 = vpop.f32.mrb[205].mxu1 }
 0x800   :  { %v8638_v54 = vpop.f32.mrb[206].mxu1 }
 0x801   :  { %8641 = vst [vmem:[#allocation4] sm:$0x3] %v8636_v12  ;;  %v10537_v43 = vpop.f32.mrb[207].mxu1 }
 0x802   :  { %11927 = shalt.err (!%p11924_p4)
}
 0x803   :  { %s11928_s10 = scalar_lea.hbm %s15282_s11, 32 }
 0x804   :  { %p11929_p5 = scmp.ne.s32.totalorder %s15282_s11, %s11928_s10  ;;  %p11932_p6 = scmp.lt.u32.totalorder %s11928_s10, %s15282_s11 }
 0x806   :  { %p11934_p7 = pnand %p11932_p6, %p11929_p5 }
 0x808   :  { %11937 = shalt.err (!%p11934_p7)
}
 0x809   :  { %8651 = dma.vmem_to_hbm [thread:$0]  %s8649_s3, 32, %s15282_s11, [#allocation5]  }
 0x80a   :  { %11938 = dma.done.wait [#allocation5], 32  }
 0x80b   :  { %11939 = vsyncadd [#allocation5], 4294967264 }
 0x80c   :  { %8655 = vsyncpa [#allocation5], 1 }

</bundles_post_ra>
